<compile_context>
chip_gen: v7x
topology: tpu7x:2x2x1
jax: 0.10.0
libtpu: 0.0.40
codegen_flags: <defaults>
</compile_context>

<pallas_src>
import functools
import numpy as np

import jax
import jax.numpy as jnp
from jax.experimental import pallas as pl
from jax.experimental.pallas import tpu as pltpu

LEAKY_SLOPE = 0.01          # torch.nn.LeakyReLU default
KSIZE = 5                   # Encoder uses kernel_size=5 everywhere
DILS = (1, 2, 4, 8)         # conv dilation = 2**i for blocks 1..4


def _leaky(x):
    return jnp.where(x >= 0, x, LEAKY_SLOPE * x)


def _encoder_dims(L, in_channels, out_channels):
    """Per-block (input length, left pad, (cin, cmid, cout))."""
    chans = ((in_channels, 64, 64), (64, 128, 128), (128, 256, 256),
             (256, out_channels, out_channels))
    lens, cur = [], L
    for _ in range(4):
        lens.append(cur)
        cur = cur // 2                                   # nn.MaxPool1d(2) floors
    pads = tuple(2 * (KSIZE - 1) * d for d in DILS)       # == (K-1)*2**(dil+1)
    return tuple(lens), pads, chans


# ---------------------------------------------------------------------------
# Fused encoder kernel (one grid step == one batch sample, all in VMEM)
# ---------------------------------------------------------------------------
def make_fused_encoder_kernel(L, in_channels, out_channels):
    lens, pads, chans = _encoder_dims(L, in_channels, out_channels)
    K = KSIZE

    def kernel(x_ref, *args):
        wrefs = args[:24]            # 4 blocks x (w1, b1, w2, b2, ws, bs)
        o_ref = args[24]
        xp_refs = args[25:29]        # per-block padded inputs (VMEM scratch)

        def conv_from_ref(src_ref, w_ref, b_ref, d, l_out, cin):
            # Causal dilated conv: K tap windows read straight from the padded ref
            # at static sublane offsets k*d; contraction over channels on the MXU.
            acc = None
            for k in range(K):
                xk = src_ref[pl.ds(k * d, l_out), :]        # (l_out, cin)
                wk = w_ref[k]                               # (cin, cout)
                term = xk * wk if cin == 1 else jnp.dot(
                    xk, wk, preferred_element_type=jnp.float32)
                acc = term if acc is None else acc + term
            return acc + b_ref[...]

        def conv_from_val(h, w_ref, b_ref, d, l_out):
            acc = None
            for k in range(K):
                xk = jax.lax.slice_in_dim(h, k * d, k * d + l_out, axis=0)
                term = jnp.dot(xk, w_ref[k], preferred_element_type=jnp.float32)
                acc = term if acc is None else acc + term
            return acc + b_ref[...]

        def maxpool2(h, l_in):
            # MaxPool1d(2): pairwise max over time (sublanes).  Even/odd row
            # compaction via tiny in-register 0/1 selection matmuls built from a
            # single iota difference — no HBM matrices, contraction over time only.
            n = l_in // 2
            row = jax.lax.broadcasted_iota(jnp.int32, (n, l_in), 0)
            col = jax.lax.broadcasted_iota(jnp.int32, (n, l_in), 1)
            diff = col - 2 * row
            sel_e = (diff == 0).astype(jnp.float32)
            sel_o = (diff == 1).astype(jnp.float32)
            even = jnp.dot(sel_e, h, preferred_element_type=jnp.float32)
            odd = jnp.dot(sel_o, h, preferred_element_type=jnp.float32)
            return jnp.maximum(even, odd)

        # Stage block-1 input: causal left pad done directly in VMEM scratch.
        xp_refs[0][0:pads[0], :] = jnp.zeros((pads[0], in_channels), jnp.float32)
        xp_refs[0][pads[0]:, :] = x_ref[...].astype(jnp.float32)

        for i in range(4):
            cin, cmid, cout = chans[i]
            d, li, pad = DILS[i], lens[i], pads[i]
            l1 = li + (K - 1) * d                           # length after conv1
            w1, b1, w2, b2, ws, bs = wrefs[6 * i:6 * i + 6]
            xp = xp_refs[i]

            h1 = _leaky(conv_from_ref(xp, w1, b1, d, l1, cin))      # (l1, cmid)
            h2 = _leaky(conv_from_val(h1, w2, b2, d, li))           # (li, cout)
            x_in = xp[pl.ds(pad, li), :]                            # un-padded input
            skip = (x_in * ws[...] if cin == 1 else
                    jnp.dot(x_in, ws[...], preferred_element_type=jnp.float32))
            blk = h2 + skip + bs[...]                               # (li, cout)

            if i < 3:
                pooled = maxpool2(blk, li)                          # (li//2, cout)
                npad = pads[i + 1]
                nxt = xp_refs[i + 1]
                nxt[0:npad, :] = jnp.zeros((npad, cout), jnp.float32)
                nxt[npad:, :] = pooled
            else:
                # AdaptiveMaxPool1d(1) + squeeze(2): max over time (sublanes).
                o_ref[...] = jnp.max(blk, axis=0, keepdims=True).astype(o_ref.dtype)

    return kernel


def _const_index_map(ndim):
    zeros = (0,) * ndim
    return lambda b: zeros


def encoder_forward(x, packed_params, *, in_channels, out_channels):
    """x: (B, S) with S = in_channels * L  ->  (B, out_channels)."""
    B, S = x.shape
    L = S // in_channels
    lens, pads, chans = _encoder_dims(L, in_channels, out_channels)

    # (B, S) -> (B, in_channels, L) -> (B, L, in_channels): time on sublanes,
    # channels on lanes inside the kernel.
    xl = x.astype(jnp.float32).reshape(B, in_channels, L).transpose(0, 2, 1)

    flat_w = [w for blk in packed_params for w in blk]              # 24 arrays
    in_specs = [pl.BlockSpec((None, L, in_channels), lambda b: (b, 0, 0))]
    in_specs += [pl.BlockSpec(tuple(w.shape), _const_index_map(w.ndim))
                 for w in flat_w]

    scratch = [pltpu.VMEM((lens[i] + pads[i], chans[i][0]), jnp.float32)
               for i in range(4)]

    out3 = pl.pallas_call(
        make_fused_encoder_kernel(L, in_channels, out_channels),
        out_shape=jax.ShapeDtypeStruct((B, 1, out_channels), jnp.float32),
        grid=(B,),
        in_specs=in_specs,
        out_specs=pl.BlockSpec((None, 1, out_channels), lambda b: (b, 0, 0)),
        scratch_shapes=scratch,
        compiler_params=pltpu.CompilerParams(
            dimension_semantics=("parallel",)),    # v7x: shard batch over 2 TCs
    )(xl, *flat_w)
    return out3[:, 0, :]


# ---------------------------------------------------------------------------
# Parameters: PyTorch-layout init + one-time repack into kernel layout
# ---------------------------------------------------------------------------
def _init_conv(key, cout, cin, k):
    bound = 1.0 / np.sqrt(cin * k)          # PyTorch Conv1d default init range
    kw, kb = jax.random.split(key)
    w = jax.random.uniform(kw, (cout, cin, k), jnp.float32, -bound, bound)
    b = jax.random.uniform(kb, (cout,), jnp.float32, -bound, bound)
    return w, b


def init_encoder_params(key, in_channels, out_channels):
    # weight_norm is a reparametrization only; at init g*v/||v|| == v, so plain conv
    # weights are forward-equivalent.  Trained weights must be pre-folded.
    specs = [(in_channels, 64, 64, 5), (64, 128, 128, 5),
             (128, 256, 256, 5), (256, out_channels, out_channels, 5)]
    params = []
    for (cin, cmid, cout, k) in specs:
        key, k1, k2, k3 = jax.random.split(key, 4)
        w1, b1 = _init_conv(k1, cmid, cin, k)
        w2, b2 = _init_conv(k2, cout, cmid, k)
        ws, bs = _init_conv(k3, cout, cin, 1)
        params.append((w1, b1, w2, b2, ws, bs))
    return params


def pack_params_for_kernel(params):
    """Hoisted weight repacking: PyTorch (Cout, Cin, K) -> kernel (K, Cin, Cout)."""
    packed = []
    for (w1, b1, w2, b2, ws, bs) in params:
        packed.append((
            jnp.transpose(w1, (2, 1, 0)),           # (K, Cin, Cmid)
            b1[None, :],                            # (1, Cmid)
            jnp.transpose(w2, (2, 1, 0)),           # (K, Cmid, Cout)
            b2[None, :],                            # (1, Cout)
            jnp.transpose(ws[:, :, 0], (1, 0)),     # (Cin, Cout)
            bs[None, :],                            # (1, Cout)
        ))
    return packed


# ---------------------------------------------------------------------------
# Pure-JAX reference (validation only)
# ---------------------------------------------------------------------------
def _ref_conv1d(x, w, b, d):
    out = jax.lax.conv_general_dilated(
        x, w, window_strides=(1,), padding="VALID",
        rhs_dilation=(d,), dimension_numbers=("NCH", "OIH", "NCH"))
    return out + b[None, :, None]


def _ref_block(x, params, kernel_size, dil_exp):
    w1, b1, w2, b2, ws, bs = params
    K, d = kernel_size, 2 ** dil_exp
    pad = (K - 1) * 2 ** (dil_exp + 1)
    xp = jnp.pad(x, ((0, 0), (0, 0), (pad, 0)))
    h = _leaky(_ref_conv1d(xp, w1, b1, d))
    h = _leaky(_ref_conv1d(h, w2, b2, d))
    return h + _ref_conv1d(x, ws, bs, 1)


def _ref_encoder(x, params, in_channels):
    B = x.shape[0]
    h = x.astype(jnp.float32).reshape(B, in_channels, -1)
    for i, dil_exp in enumerate((0, 1, 2, 3)):
        h = _ref_block(h, params[i], 5, dil_exp)
        if i < 3:
            Bh, Ch, Lh = h.shape
            h = jnp.max(h[:, :, :(Lh // 2) * 2].reshape(Bh, Ch, Lh // 2, 2), axis=-1)
    return jnp.max(h, axis=-1)


if __name__ == "__main__":
    in_channels, out_channels = 1, 32
    B, L = 2, 64                                   # L shrinks 64 -> 32 -> 16 -> 8
    key = jax.random.PRNGKey(0)
    kx, kp = jax.random.split(key)
    x = jax.random.normal(kx, (B, in_channels * L), jnp.float32)
    params = init_encoder_params(kp, in_channels, out_channels)
    packed = pack_params_for_kernel(params)        # one-time repack (hoisted)

    fwd = jax.jit(functools.partial(encoder_forward,
                                    in_channels=in_channels,
                                    out_channels=out_channels))
    out = jax.block_until_ready(fwd(x, packed))
    assert out.shape == (B, out_channels), out.shape

    ref = jax.block_until_ready(_ref_encoder(x, params, in_channels))
    # Tolerance note: f32 matmuls run as reduced-precision MXU passes at default
    # precision in both the kernel and the XLA reference (different accumulation
    # orders), so bit-tight agreement is not expected.  Structural bugs (tap
    # offsets, padding, pooling, layout) produce O(1) errors, far outside this.
    np.testing.assert_allclose(np.asarray(out), np.asarray(ref), rtol=2e-2, atol=2e-2)
    print("KERNEL_OK")
</pallas_src>

<mosaic_0001>
module attributes {stable_mosaic.version = 11 : i64} {
  func.func @kernel(%arg0: i32, %arg1: memref<1x64x1xf32, #tpu.memory_space<vmem>>, %arg2: memref<5x1x64xf32, #tpu.memory_space<vmem>>, %arg3: memref<1x64xf32, #tpu.memory_space<vmem>>, %arg4: memref<5x64x64xf32, #tpu.memory_space<vmem>>, %arg5: memref<1x64xf32, #tpu.memory_space<vmem>>, %arg6: memref<1x64xf32, #tpu.memory_space<vmem>>, %arg7: memref<1x64xf32, #tpu.memory_space<vmem>>, %arg8: memref<5x64x128xf32, #tpu.memory_space<vmem>>, %arg9: memref<1x128xf32, #tpu.memory_space<vmem>>, %arg10: memref<5x128x128xf32, #tpu.memory_space<vmem>>, %arg11: memref<1x128xf32, #tpu.memory_space<vmem>>, %arg12: memref<64x128xf32, #tpu.memory_space<vmem>>, %arg13: memref<1x128xf32, #tpu.memory_space<vmem>>, %arg14: memref<5x128x256xf32, #tpu.memory_space<vmem>>, %arg15: memref<1x256xf32, #tpu.memory_space<vmem>>, %arg16: memref<5x256x256xf32, #tpu.memory_space<vmem>>, %arg17: memref<1x256xf32, #tpu.memory_space<vmem>>, %arg18: memref<128x256xf32, #tpu.memory_space<vmem>>, %arg19: memref<1x256xf32, #tpu.memory_space<vmem>>, %arg20: memref<5x256x32xf32, #tpu.memory_space<vmem>>, %arg21: memref<1x32xf32, #tpu.memory_space<vmem>>, %arg22: memref<5x32x32xf32, #tpu.memory_space<vmem>>, %arg23: memref<1x32xf32, #tpu.memory_space<vmem>>, %arg24: memref<256x32xf32, #tpu.memory_space<vmem>>, %arg25: memref<1x32xf32, #tpu.memory_space<vmem>>, %arg26: memref<1x1x32xf32, #tpu.memory_space<vmem>>, %arg27: memref<72x1xf32, #tpu.memory_space<vmem>>, %arg28: memref<48x64xf32, #tpu.memory_space<vmem>>, %arg29: memref<48x128xf32, #tpu.memory_space<vmem>>, %arg30: memref<72x256xf32, #tpu.memory_space<vmem>>) attributes {dimension_semantics = [#tpu.dimension_semantics<parallel>], iteration_bounds = array<i64: 2>, scalar_prefetch = 0 : i64, scratch_operands = 4 : i64, tpu.core_type = #tpu.core_type<tc>, window_params = [{transform_indices = @transform_0, window_bounds = array<i64: 1, 64, 1>}, {pipeline_mode = #tpu.pipeline_mode<synchronous>, transform_indices = @transform_1, window_bounds = array<i64: 5, 1, 64>}, {pipeline_mode = #tpu.pipeline_mode<synchronous>, transform_indices = @transform_2, window_bounds = array<i64: 1, 64>}, {pipeline_mode = #tpu.pipeline_mode<synchronous>, transform_indices = @transform_3, window_bounds = array<i64: 5, 64, 64>}, {pipeline_mode = #tpu.pipeline_mode<synchronous>, transform_indices = @transform_4, window_bounds = array<i64: 1, 64>}, {pipeline_mode = #tpu.pipeline_mode<synchronous>, transform_indices = @transform_5, window_bounds = array<i64: 1, 64>}, {pipeline_mode = #tpu.pipeline_mode<synchronous>, transform_indices = @transform_6, window_bounds = array<i64: 1, 64>}, {pipeline_mode = #tpu.pipeline_mode<synchronous>, transform_indices = @transform_7, window_bounds = array<i64: 5, 64, 128>}, {pipeline_mode = #tpu.pipeline_mode<synchronous>, transform_indices = @transform_8, window_bounds = array<i64: 1, 128>}, {pipeline_mode = #tpu.pipeline_mode<synchronous>, transform_indices = @transform_9, window_bounds = array<i64: 5, 128, 128>}, {pipeline_mode = #tpu.pipeline_mode<synchronous>, transform_indices = @transform_10, window_bounds = array<i64: 1, 128>}, {pipeline_mode = #tpu.pipeline_mode<synchronous>, transform_indices = @transform_11, window_bounds = array<i64: 64, 128>}, {pipeline_mode = #tpu.pipeline_mode<synchronous>, transform_indices = @transform_12, window_bounds = array<i64: 1, 128>}, {pipeline_mode = #tpu.pipeline_mode<synchronous>, transform_indices = @transform_13, window_bounds = array<i64: 5, 128, 256>}, {pipeline_mode = #tpu.pipeline_mode<synchronous>, transform_indices = @transform_14, window_bounds = array<i64: 1, 256>}, {pipeline_mode = #tpu.pipeline_mode<synchronous>, transform_indices = @transform_15, window_bounds = array<i64: 5, 256, 256>}, {pipeline_mode = #tpu.pipeline_mode<synchronous>, transform_indices = @transform_16, window_bounds = array<i64: 1, 256>}, {pipeline_mode = #tpu.pipeline_mode<synchronous>, transform_indices = @transform_17, window_bounds = array<i64: 128, 256>}, {pipeline_mode = #tpu.pipeline_mode<synchronous>, transform_indices = @transform_18, window_bounds = array<i64: 1, 256>}, {pipeline_mode = #tpu.pipeline_mode<synchronous>, transform_indices = @transform_19, window_bounds = array<i64: 5, 256, 32>}, {pipeline_mode = #tpu.pipeline_mode<synchronous>, transform_indices = @transform_20, window_bounds = array<i64: 1, 32>}, {pipeline_mode = #tpu.pipeline_mode<synchronous>, transform_indices = @transform_21, window_bounds = array<i64: 5, 32, 32>}, {pipeline_mode = #tpu.pipeline_mode<synchronous>, transform_indices = @transform_22, window_bounds = array<i64: 1, 32>}, {pipeline_mode = #tpu.pipeline_mode<synchronous>, transform_indices = @transform_23, window_bounds = array<i64: 256, 32>}, {pipeline_mode = #tpu.pipeline_mode<synchronous>, transform_indices = @transform_24, window_bounds = array<i64: 1, 32>}, {transform_indices = @transform_25, window_bounds = array<i64: 1, 1, 32>}]} {
    %cst = arith.constant 0.000000e+00 : f32
    %0 = vector.broadcast %cst : f32 to vector<8x1xf32>
    %c0 = arith.constant 0 : index
    %c0_0 = arith.constant 0 : index
    %1 = vector.load %arg27[%c0, %c0_0] : memref<72x1xf32, #tpu.memory_space<vmem>>, vector<8x1xf32>
    tpu.vector_store %arg27[%c0, %c0_0], %0 {strides = array<i32>} : memref<72x1xf32, #tpu.memory_space<vmem>>, vector<8x1xf32>,
    %c0_1 = arith.constant 0 : index
    %c0_2 = arith.constant 0 : index
    %c0_3 = arith.constant 0 : index
    %2 = vector.load %arg1[%c0_1, %c0_2, %c0_3] : memref<1x64x1xf32, #tpu.memory_space<vmem>>, vector<1x64x1xf32>
    %3 = vector.shape_cast %2 : vector<1x64x1xf32> to vector<64x1xf32>
    %c8 = arith.constant 8 : index
    %c0_4 = arith.constant 0 : index
    %4 = vector.load %arg27[%c8, %c0_4] : memref<72x1xf32, #tpu.memory_space<vmem>>, vector<64x1xf32>
    tpu.vector_store %arg27[%c8, %c0_4], %3 {strides = array<i32>} : memref<72x1xf32, #tpu.memory_space<vmem>>, vector<64x1xf32>,
    %c0_5 = arith.constant 0 : index
    %c0_6 = arith.constant 0 : index
    %5 = vector.load %arg27[%c0_5, %c0_6] : memref<72x1xf32, #tpu.memory_space<vmem>>, vector<68x1xf32>
    %c0_7 = arith.constant 0 : index
    %c0_8 = arith.constant 0 : index
    %c0_9 = arith.constant 0 : index
    %6 = vector.load %arg2[%c0_7, %c0_8, %c0_9] : memref<5x1x64xf32, #tpu.memory_space<vmem>>, vector<1x1x64xf32>
    %7 = vector.shape_cast %6 : vector<1x1x64xf32> to vector<1x64xf32>
    %8 = vector.broadcast %5 : vector<68x1xf32> to vector<68x64xf32>
    %9 = vector.broadcast %7 : vector<1x64xf32> to vector<68x64xf32>
    %10 = arith.mulf %8, %9 : vector<68x64xf32>
    %c1 = arith.constant 1 : index
    %c0_10 = arith.constant 0 : index
    %11 = vector.load %arg27[%c1, %c0_10] : memref<72x1xf32, #tpu.memory_space<vmem>>, vector<68x1xf32>
    %c1_11 = arith.constant 1 : index
    %c0_12 = arith.constant 0 : index
    %c0_13 = arith.constant 0 : index
    %12 = vector.load %arg2[%c1_11, %c0_12, %c0_13] : memref<5x1x64xf32, #tpu.memory_space<vmem>>, vector<1x1x64xf32>
    %13 = vector.shape_cast %12 : vector<1x1x64xf32> to vector<1x64xf32>
    %14 = vector.broadcast %11 : vector<68x1xf32> to vector<68x64xf32>
    %15 = vector.broadcast %13 : vector<1x64xf32> to vector<68x64xf32>
    %16 = arith.mulf %14, %15 : vector<68x64xf32>
    %17 = arith.addf %10, %16 : vector<68x64xf32>
    %c2 = arith.constant 2 : index
    %c0_14 = arith.constant 0 : index
    %18 = vector.load %arg27[%c2, %c0_14] : memref<72x1xf32, #tpu.memory_space<vmem>>, vector<68x1xf32>
    %c2_15 = arith.constant 2 : index
    %c0_16 = arith.constant 0 : index
    %c0_17 = arith.constant 0 : index
    %19 = vector.load %arg2[%c2_15, %c0_16, %c0_17] : memref<5x1x64xf32, #tpu.memory_space<vmem>>, vector<1x1x64xf32>
    %20 = vector.shape_cast %19 : vector<1x1x64xf32> to vector<1x64xf32>
    %21 = vector.broadcast %18 : vector<68x1xf32> to vector<68x64xf32>
    %22 = vector.broadcast %20 : vector<1x64xf32> to vector<68x64xf32>
    %23 = arith.mulf %21, %22 : vector<68x64xf32>
    %24 = arith.addf %17, %23 : vector<68x64xf32>
    %c3 = arith.constant 3 : index
    %c0_18 = arith.constant 0 : index
    %25 = vector.load %arg27[%c3, %c0_18] : memref<72x1xf32, #tpu.memory_space<vmem>>, vector<68x1xf32>
    %c3_19 = arith.constant 3 : index
    %c0_20 = arith.constant 0 : index
    %c0_21 = arith.constant 0 : index
    %26 = vector.load %arg2[%c3_19, %c0_20, %c0_21] : memref<5x1x64xf32, #tpu.memory_space<vmem>>, vector<1x1x64xf32>
    %27 = vector.shape_cast %26 : vector<1x1x64xf32> to vector<1x64xf32>
    %28 = vector.broadcast %25 : vector<68x1xf32> to vector<68x64xf32>
    %29 = vector.broadcast %27 : vector<1x64xf32> to vector<68x64xf32>
    %30 = arith.mulf %28, %29 : vector<68x64xf32>
    %31 = arith.addf %24, %30 : vector<68x64xf32>
    %c4 = arith.constant 4 : index
    %c0_22 = arith.constant 0 : index
    %32 = vector.load %arg27[%c4, %c0_22] : memref<72x1xf32, #tpu.memory_space<vmem>>, vector<68x1xf32>
    %c4_23 = arith.constant 4 : index
    %c0_24 = arith.constant 0 : index
    %c0_25 = arith.constant 0 : index
    %33 = vector.load %arg2[%c4_23, %c0_24, %c0_25] : memref<5x1x64xf32, #tpu.memory_space<vmem>>, vector<1x1x64xf32>
    %34 = vector.shape_cast %33 : vector<1x1x64xf32> to vector<1x64xf32>
    %35 = vector.broadcast %32 : vector<68x1xf32> to vector<68x64xf32>
    %36 = vector.broadcast %34 : vector<1x64xf32> to vector<68x64xf32>
    %37 = arith.mulf %35, %36 : vector<68x64xf32>
    %38 = arith.addf %31, %37 : vector<68x64xf32>
    %c0_26 = arith.constant 0 : index
    %c0_27 = arith.constant 0 : index
    %39 = vector.load %arg3[%c0_26, %c0_27] : memref<1x64xf32, #tpu.memory_space<vmem>>, vector<1x64xf32>
    %40 = vector.broadcast %39 : vector<1x64xf32> to vector<68x64xf32>
    %41 = arith.addf %38, %40 : vector<68x64xf32>
    %cst_28 = arith.constant 0.000000e+00 : f32
    %42 = vector.broadcast %cst_28 : f32 to vector<68x64xf32>
    %43 = arith.cmpf oge, %41, %42 : vector<68x64xf32>
    %cst_29 = arith.constant 0.00999999977 : f32
    %44 = vector.broadcast %cst_29 : f32 to vector<68x64xf32>
    %45 = arith.mulf %44, %41 : vector<68x64xf32>
    %46 = arith.select %43, %41, %45 : vector<68x64xi1>, vector<68x64xf32>
    %47 = vector.extract_strided_slice %46 {offsets = [0, 0], sizes = [64, 64], strides = [1, 1]} : vector<68x64xf32> to vector<64x64xf32>
    %c0_30 = arith.constant 0 : index
    %c0_31 = arith.constant 0 : index
    %c0_32 = arith.constant 0 : index
    %48 = vector.load %arg4[%c0_30, %c0_31, %c0_32] : memref<5x64x64xf32, #tpu.memory_space<vmem>>, vector<1x64x64xf32>
    %49 = vector.shape_cast %48 : vector<1x64x64xf32> to vector<64x64xf32>
    %cst_33 = arith.constant dense<0.000000e+00> : vector<64x64xf32>
    %50 = tpu.matmul %47, %49, %cst_33 {dimension_numbers = #tpu.dot_dimension_numbers<[1], [0], [0], [1], [0, 0, 1, 1], [], []>} : vector<64x64xf32>, vector<64x64xf32>, vector<64x64xf32> -> vector<64x64xf32>
    %51 = vector.extract_strided_slice %46 {offsets = [1, 0], sizes = [64, 64], strides = [1, 1]} : vector<68x64xf32> to vector<64x64xf32>
    %c1_34 = arith.constant 1 : index
    %c0_35 = arith.constant 0 : index
    %c0_36 = arith.constant 0 : index
    %52 = vector.load %arg4[%c1_34, %c0_35, %c0_36] : memref<5x64x64xf32, #tpu.memory_space<vmem>>, vector<1x64x64xf32>
    %53 = vector.shape_cast %52 : vector<1x64x64xf32> to vector<64x64xf32>
    %cst_37 = arith.constant dense<0.000000e+00> : vector<64x64xf32>
    %54 = tpu.matmul %51, %53, %cst_37 {dimension_numbers = #tpu.dot_dimension_numbers<[1], [0], [0], [1], [0, 0, 1, 1], [], []>} : vector<64x64xf32>, vector<64x64xf32>, vector<64x64xf32> -> vector<64x64xf32>
    %55 = arith.addf %50, %54 : vector<64x64xf32>
    %56 = vector.extract_strided_slice %46 {offsets = [2, 0], sizes = [64, 64], strides = [1, 1]} : vector<68x64xf32> to vector<64x64xf32>
    %c2_38 = arith.constant 2 : index
    %c0_39 = arith.constant 0 : index
    %c0_40 = arith.constant 0 : index
    %57 = vector.load %arg4[%c2_38, %c0_39, %c0_40] : memref<5x64x64xf32, #tpu.memory_space<vmem>>, vector<1x64x64xf32>
    %58 = vector.shape_cast %57 : vector<1x64x64xf32> to vector<64x64xf32>
    %cst_41 = arith.constant dense<0.000000e+00> : vector<64x64xf32>
    %59 = tpu.matmul %56, %58, %cst_41 {dimension_numbers = #tpu.dot_dimension_numbers<[1], [0], [0], [1], [0, 0, 1, 1], [], []>} : vector<64x64xf32>, vector<64x64xf32>, vector<64x64xf32> -> vector<64x64xf32>
    %60 = arith.addf %55, %59 : vector<64x64xf32>
    %61 = vector.extract_strided_slice %46 {offsets = [3, 0], sizes = [64, 64], strides = [1, 1]} : vector<68x64xf32> to vector<64x64xf32>
    %c3_42 = arith.constant 3 : index
    %c0_43 = arith.constant 0 : index
    %c0_44 = arith.constant 0 : index
    %62 = vector.load %arg4[%c3_42, %c0_43, %c0_44] : memref<5x64x64xf32, #tpu.memory_space<vmem>>, vector<1x64x64xf32>
    %63 = vector.shape_cast %62 : vector<1x64x64xf32> to vector<64x64xf32>
    %cst_45 = arith.constant dense<0.000000e+00> : vector<64x64xf32>
    %64 = tpu.matmul %61, %63, %cst_45 {dimension_numbers = #tpu.dot_dimension_numbers<[1], [0], [0], [1], [0, 0, 1, 1], [], []>} : vector<64x64xf32>, vector<64x64xf32>, vector<64x64xf32> -> vector<64x64xf32>
    %65 = arith.addf %60, %64 : vector<64x64xf32>
    %66 = vector.extract_strided_slice %46 {offsets = [4, 0], sizes = [64, 64], strides = [1, 1]} : vector<68x64xf32> to vector<64x64xf32>
    %c4_46 = arith.constant 4 : index
    %c0_47 = arith.constant 0 : index
    %c0_48 = arith.constant 0 : index
    %67 = vector.load %arg4[%c4_46, %c0_47, %c0_48] : memref<5x64x64xf32, #tpu.memory_space<vmem>>, vector<1x64x64xf32>
    %68 = vector.shape_cast %67 : vector<1x64x64xf32> to vector<64x64xf32>
    %cst_49 = arith.constant dense<0.000000e+00> : vector<64x64xf32>
    %69 = tpu.matmul %66, %68, %cst_49 {dimension_numbers = #tpu.dot_dimension_numbers<[1], [0], [0], [1], [0, 0, 1, 1], [], []>} : vector<64x64xf32>, vector<64x64xf32>, vector<64x64xf32> -> vector<64x64xf32>
    %70 = arith.addf %65, %69 : vector<64x64xf32>
    %c0_50 = arith.constant 0 : index
    %c0_51 = arith.constant 0 : index
    %71 = vector.load %arg5[%c0_50, %c0_51] : memref<1x64xf32, #tpu.memory_space<vmem>>, vector<1x64xf32>
    %72 = vector.broadcast %71 : vector<1x64xf32> to vector<64x64xf32>
    %73 = arith.addf %70, %72 : vector<64x64xf32>
    %cst_52 = arith.constant 0.000000e+00 : f32
    %74 = vector.broadcast %cst_52 : f32 to vector<64x64xf32>
    %75 = arith.cmpf oge, %73, %74 : vector<64x64xf32>
    %cst_53 = arith.constant 0.00999999977 : f32
    %76 = vector.broadcast %cst_53 : f32 to vector<64x64xf32>
    %77 = arith.mulf %76, %73 : vector<64x64xf32>
    %78 = arith.select %75, %73, %77 : vector<64x64xi1>, vector<64x64xf32>
    %c8_54 = arith.constant 8 : index
    %c0_55 = arith.constant 0 : index
    %79 = vector.load %arg27[%c8_54, %c0_55] : memref<72x1xf32, #tpu.memory_space<vmem>>, vector<64x1xf32>
    %c0_56 = arith.constant 0 : index
    %c0_57 = arith.constant 0 : index
    %80 = vector.load %arg6[%c0_56, %c0_57] : memref<1x64xf32, #tpu.memory_space<vmem>>, vector<1x64xf32>
    %81 = vector.broadcast %79 : vector<64x1xf32> to vector<64x64xf32>
    %82 = vector.broadcast %80 : vector<1x64xf32> to vector<64x64xf32>
    %83 = arith.mulf %81, %82 : vector<64x64xf32>
    %84 = arith.addf %78, %83 : vector<64x64xf32>
    %c0_58 = arith.constant 0 : index
    %c0_59 = arith.constant 0 : index
    %85 = vector.load %arg7[%c0_58, %c0_59] : memref<1x64xf32, #tpu.memory_space<vmem>>, vector<1x64xf32>
    %86 = vector.broadcast %85 : vector<1x64xf32> to vector<64x64xf32>
    %87 = arith.addf %84, %86 : vector<64x64xf32>
    %88 = tpu.iota {dimensions = array<i32: 0>} : vector<32x64xi32>
    %89 = tpu.iota {dimensions = array<i32: 1>} : vector<32x64xi32>
    %c2_i32 = arith.constant 2 : i32
    %90 = vector.broadcast %c2_i32 : i32 to vector<32x64xi32>
    %91 = arith.muli %90, %88 : vector<32x64xi32>
    %92 = arith.subi %89, %91 : vector<32x64xi32>
    %c0_i32 = arith.constant 0 : i32
    %93 = vector.broadcast %c0_i32 : i32 to vector<32x64xi32>
    %94 = arith.cmpi eq, %92, %93 : vector<32x64xi32>
    %95 = arith.extui %94 : vector<32x64xi1> to vector<32x64xi32>
    %96 = arith.sitofp %95 : vector<32x64xi32> to vector<32x64xf32>
    %c1_i32 = arith.constant 1 : i32
    %97 = vector.broadcast %c1_i32 : i32 to vector<32x64xi32>
    %98 = arith.cmpi eq, %92, %97 : vector<32x64xi32>
    %99 = arith.extui %98 : vector<32x64xi1> to vector<32x64xi32>
    %100 = arith.sitofp %99 : vector<32x64xi32> to vector<32x64xf32>
    %cst_60 = arith.constant dense<0.000000e+00> : vector<32x64xf32>
    %101 = tpu.matmul %96, %87, %cst_60 {dimension_numbers = #tpu.dot_dimension_numbers<[1], [0], [0], [1], [0, 0, 1, 1], [], []>} : vector<32x64xf32>, vector<64x64xf32>, vector<32x64xf32> -> vector<32x64xf32>
    %cst_61 = arith.constant dense<0.000000e+00> : vector<32x64xf32>
    %102 = tpu.matmul %100, %87, %cst_61 {dimension_numbers = #tpu.dot_dimension_numbers<[1], [0], [0], [1], [0, 0, 1, 1], [], []>} : vector<32x64xf32>, vector<64x64xf32>, vector<32x64xf32> -> vector<32x64xf32>
    %103 = arith.maximumf %101, %102 : vector<32x64xf32>
    %cst_62 = arith.constant 0.000000e+00 : f32
    %104 = vector.broadcast %cst_62 : f32 to vector<16x64xf32>
    %c0_63 = arith.constant 0 : index
    %c0_64 = arith.constant 0 : index
    %105 = vector.load %arg28[%c0_63, %c0_64] : memref<48x64xf32, #tpu.memory_space<vmem>>, vector<16x64xf32>
    tpu.vector_store %arg28[%c0_63, %c0_64], %104 {strides = array<i32>} : memref<48x64xf32, #tpu.memory_space<vmem>>, vector<16x64xf32>,
    %c16 = arith.constant 16 : index
    %c0_65 = arith.constant 0 : index
    %106 = vector.load %arg28[%c16, %c0_65] : memref<48x64xf32, #tpu.memory_space<vmem>>, vector<32x64xf32>
    tpu.vector_store %arg28[%c16, %c0_65], %103 {strides = array<i32>} : memref<48x64xf32, #tpu.memory_space<vmem>>, vector<32x64xf32>,
    %c0_66 = arith.constant 0 : index
    %c0_67 = arith.constant 0 : index
    %107 = vector.load %arg28[%c0_66, %c0_67] : memref<48x64xf32, #tpu.memory_space<vmem>>, vector<40x64xf32>
    %c0_68 = arith.constant 0 : index
    %c0_69 = arith.constant 0 : index
    %c0_70 = arith.constant 0 : index
    %108 = vector.load %arg8[%c0_68, %c0_69, %c0_70] : memref<5x64x128xf32, #tpu.memory_space<vmem>>, vector<1x64x128xf32>
    %109 = vector.shape_cast %108 : vector<1x64x128xf32> to vector<64x128xf32>
    %cst_71 = arith.constant dense<0.000000e+00> : vector<40x128xf32>
    %110 = tpu.matmul %107, %109, %cst_71 {dimension_numbers = #tpu.dot_dimension_numbers<[1], [0], [0], [1], [0, 0, 1, 1], [], []>} : vector<40x64xf32>, vector<64x128xf32>, vector<40x128xf32> -> vector<40x128xf32>
    %c2_72 = arith.constant 2 : index
    %c0_73 = arith.constant 0 : index
    %111 = vector.load %arg28[%c2_72, %c0_73] : memref<48x64xf32, #tpu.memory_space<vmem>>, vector<40x64xf32>
    %c1_74 = arith.constant 1 : index
    %c0_75 = arith.constant 0 : index
    %c0_76 = arith.constant 0 : index
    %112 = vector.load %arg8[%c1_74, %c0_75, %c0_76] : memref<5x64x128xf32, #tpu.memory_space<vmem>>, vector<1x64x128xf32>
    %113 = vector.shape_cast %112 : vector<1x64x128xf32> to vector<64x128xf32>
    %cst_77 = arith.constant dense<0.000000e+00> : vector<40x128xf32>
    %114 = tpu.matmul %111, %113, %cst_77 {dimension_numbers = #tpu.dot_dimension_numbers<[1], [0], [0], [1], [0, 0, 1, 1], [], []>} : vector<40x64xf32>, vector<64x128xf32>, vector<40x128xf32> -> vector<40x128xf32>
    %115 = arith.addf %110, %114 : vector<40x128xf32>
    %c4_78 = arith.constant 4 : index
    %c0_79 = arith.constant 0 : index
    %116 = vector.load %arg28[%c4_78, %c0_79] : memref<48x64xf32, #tpu.memory_space<vmem>>, vector<40x64xf32>
    %c2_80 = arith.constant 2 : index
    %c0_81 = arith.constant 0 : index
    %c0_82 = arith.constant 0 : index
    %117 = vector.load %arg8[%c2_80, %c0_81, %c0_82] : memref<5x64x128xf32, #tpu.memory_space<vmem>>, vector<1x64x128xf32>
    %118 = vector.shape_cast %117 : vector<1x64x128xf32> to vector<64x128xf32>
    %cst_83 = arith.constant dense<0.000000e+00> : vector<40x128xf32>
    %119 = tpu.matmul %116, %118, %cst_83 {dimension_numbers = #tpu.dot_dimension_numbers<[1], [0], [0], [1], [0, 0, 1, 1], [], []>} : vector<40x64xf32>, vector<64x128xf32>, vector<40x128xf32> -> vector<40x128xf32>
    %120 = arith.addf %115, %119 : vector<40x128xf32>
    %c6 = arith.constant 6 : index
    %c0_84 = arith.constant 0 : index
    %121 = vector.load %arg28[%c6, %c0_84] : memref<48x64xf32, #tpu.memory_space<vmem>>, vector<40x64xf32>
    %c3_85 = arith.constant 3 : index
    %c0_86 = arith.constant 0 : index
    %c0_87 = arith.constant 0 : index
    %122 = vector.load %arg8[%c3_85, %c0_86, %c0_87] : memref<5x64x128xf32, #tpu.memory_space<vmem>>, vector<1x64x128xf32>
    %123 = vector.shape_cast %122 : vector<1x64x128xf32> to vector<64x128xf32>
    %cst_88 = arith.constant dense<0.000000e+00> : vector<40x128xf32>
    %124 = tpu.matmul %121, %123, %cst_88 {dimension_numbers = #tpu.dot_dimension_numbers<[1], [0], [0], [1], [0, 0, 1, 1], [], []>} : vector<40x64xf32>, vector<64x128xf32>, vector<40x128xf32> -> vector<40x128xf32>
    %125 = arith.addf %120, %124 : vector<40x128xf32>
    %c8_89 = arith.constant 8 : index
    %c0_90 = arith.constant 0 : index
    %126 = vector.load %arg28[%c8_89, %c0_90] : memref<48x64xf32, #tpu.memory_space<vmem>>, vector<40x64xf32>
    %c4_91 = arith.constant 4 : index
    %c0_92 = arith.constant 0 : index
    %c0_93 = arith.constant 0 : index
    %127 = vector.load %arg8[%c4_91, %c0_92, %c0_93] : memref<5x64x128xf32, #tpu.memory_space<vmem>>, vector<1x64x128xf32>
    %128 = vector.shape_cast %127 : vector<1x64x128xf32> to vector<64x128xf32>
    %cst_94 = arith.constant dense<0.000000e+00> : vector<40x128xf32>
    %129 = tpu.matmul %126, %128, %cst_94 {dimension_numbers = #tpu.dot_dimension_numbers<[1], [0], [0], [1], [0, 0, 1, 1], [], []>} : vector<40x64xf32>, vector<64x128xf32>, vector<40x128xf32> -> vector<40x128xf32>
    %130 = arith.addf %125, %129 : vector<40x128xf32>
    %c0_95 = arith.constant 0 : index
    %c0_96 = arith.constant 0 : index
    %131 = vector.load %arg9[%c0_95, %c0_96] : memref<1x128xf32, #tpu.memory_space<vmem>>, vector<1x128xf32>
    %132 = vector.broadcast %131 : vector<1x128xf32> to vector<40x128xf32>
    %133 = arith.addf %130, %132 : vector<40x128xf32>
    %cst_97 = arith.constant 0.000000e+00 : f32
    %134 = vector.broadcast %cst_97 : f32 to vector<40x128xf32>
    %135 = arith.cmpf oge, %133, %134 : vector<40x128xf32>
    %cst_98 = arith.constant 0.00999999977 : f32
    %136 = vector.broadcast %cst_98 : f32 to vector<40x128xf32>
    %137 = arith.mulf %136, %133 : vector<40x128xf32>
    %138 = arith.select %135, %133, %137 : vector<40x128xi1>, vector<40x128xf32>
    %139 = vector.extract_strided_slice %138 {offsets = [0, 0], sizes = [32, 128], strides = [1, 1]} : vector<40x128xf32> to vector<32x128xf32>
    %c0_99 = arith.constant 0 : index
    %c0_100 = arith.constant 0 : index
    %c0_101 = arith.constant 0 : index
    %140 = vector.load %arg10[%c0_99, %c0_100, %c0_101] : memref<5x128x128xf32, #tpu.memory_space<vmem>>, vector<1x128x128xf32>
    %141 = vector.shape_cast %140 : vector<1x128x128xf32> to vector<128x128xf32>
    %cst_102 = arith.constant dense<0.000000e+00> : vector<32x128xf32>
    %142 = tpu.matmul %139, %141, %cst_102 {dimension_numbers = #tpu.dot_dimension_numbers<[1], [0], [0], [1], [0, 0, 1, 1], [], []>} : vector<32x128xf32>, vector<128x128xf32>, vector<32x128xf32> -> vector<32x128xf32>
    %143 = vector.extract_strided_slice %138 {offsets = [2, 0], sizes = [32, 128], strides = [1, 1]} : vector<40x128xf32> to vector<32x128xf32>
    %c1_103 = arith.constant 1 : index
    %c0_104 = arith.constant 0 : index
    %c0_105 = arith.constant 0 : index
    %144 = vector.load %arg10[%c1_103, %c0_104, %c0_105] : memref<5x128x128xf32, #tpu.memory_space<vmem>>, vector<1x128x128xf32>
    %145 = vector.shape_cast %144 : vector<1x128x128xf32> to vector<128x128xf32>
    %cst_106 = arith.constant dense<0.000000e+00> : vector<32x128xf32>
    %146 = tpu.matmul %143, %145, %cst_106 {dimension_numbers = #tpu.dot_dimension_numbers<[1], [0], [0], [1], [0, 0, 1, 1], [], []>} : vector<32x128xf32>, vector<128x128xf32>, vector<32x128xf32> -> vector<32x128xf32>
    %147 = arith.addf %142, %146 : vector<32x128xf32>
    %148 = vector.extract_strided_slice %138 {offsets = [4, 0], sizes = [32, 128], strides = [1, 1]} : vector<40x128xf32> to vector<32x128xf32>
    %c2_107 = arith.constant 2 : index
    %c0_108 = arith.constant 0 : index
    %c0_109 = arith.constant 0 : index
    %149 = vector.load %arg10[%c2_107, %c0_108, %c0_109] : memref<5x128x128xf32, #tpu.memory_space<vmem>>, vector<1x128x128xf32>
    %150 = vector.shape_cast %149 : vector<1x128x128xf32> to vector<128x128xf32>
    %cst_110 = arith.constant dense<0.000000e+00> : vector<32x128xf32>
    %151 = tpu.matmul %148, %150, %cst_110 {dimension_numbers = #tpu.dot_dimension_numbers<[1], [0], [0], [1], [0, 0, 1, 1], [], []>} : vector<32x128xf32>, vector<128x128xf32>, vector<32x128xf32> -> vector<32x128xf32>
    %152 = arith.addf %147, %151 : vector<32x128xf32>
    %153 = vector.extract_strided_slice %138 {offsets = [6, 0], sizes = [32, 128], strides = [1, 1]} : vector<40x128xf32> to vector<32x128xf32>
    %c3_111 = arith.constant 3 : index
    %c0_112 = arith.constant 0 : index
    %c0_113 = arith.constant 0 : index
    %154 = vector.load %arg10[%c3_111, %c0_112, %c0_113] : memref<5x128x128xf32, #tpu.memory_space<vmem>>, vector<1x128x128xf32>
    %155 = vector.shape_cast %154 : vector<1x128x128xf32> to vector<128x128xf32>
    %cst_114 = arith.constant dense<0.000000e+00> : vector<32x128xf32>
    %156 = tpu.matmul %153, %155, %cst_114 {dimension_numbers = #tpu.dot_dimension_numbers<[1], [0], [0], [1], [0, 0, 1, 1], [], []>} : vector<32x128xf32>, vector<128x128xf32>, vector<32x128xf32> -> vector<32x128xf32>
    %157 = arith.addf %152, %156 : vector<32x128xf32>
    %158 = vector.extract_strided_slice %138 {offsets = [8, 0], sizes = [32, 128], strides = [1, 1]} : vector<40x128xf32> to vector<32x128xf32>
    %c4_115 = arith.constant 4 : index
    %c0_116 = arith.constant 0 : index
    %c0_117 = arith.constant 0 : index
    %159 = vector.load %arg10[%c4_115, %c0_116, %c0_117] : memref<5x128x128xf32, #tpu.memory_space<vmem>>, vector<1x128x128xf32>
    %160 = vector.shape_cast %159 : vector<1x128x128xf32> to vector<128x128xf32>
    %cst_118 = arith.constant dense<0.000000e+00> : vector<32x128xf32>
    %161 = tpu.matmul %158, %160, %cst_118 {dimension_numbers = #tpu.dot_dimension_numbers<[1], [0], [0], [1], [0, 0, 1, 1], [], []>} : vector<32x128xf32>, vector<128x128xf32>, vector<32x128xf32> -> vector<32x128xf32>
    %162 = arith.addf %157, %161 : vector<32x128xf32>
    %c0_119 = arith.constant 0 : index
    %c0_120 = arith.constant 0 : index
    %163 = vector.load %arg11[%c0_119, %c0_120] : memref<1x128xf32, #tpu.memory_space<vmem>>, vector<1x128xf32>
    %164 = vector.broadcast %163 : vector<1x128xf32> to vector<32x128xf32>
    %165 = arith.addf %162, %164 : vector<32x128xf32>
    %cst_121 = arith.constant 0.000000e+00 : f32
    %166 = vector.broadcast %cst_121 : f32 to vector<32x128xf32>
    %167 = arith.cmpf oge, %165, %166 : vector<32x128xf32>
    %cst_122 = arith.constant 0.00999999977 : f32
    %168 = vector.broadcast %cst_122 : f32 to vector<32x128xf32>
    %169 = arith.mulf %168, %165 : vector<32x128xf32>
    %170 = arith.select %167, %165, %169 : vector<32x128xi1>, vector<32x128xf32>
    %c16_123 = arith.constant 16 : index
    %c0_124 = arith.constant 0 : index
    %171 = vector.load %arg28[%c16_123, %c0_124] : memref<48x64xf32, #tpu.memory_space<vmem>>, vector<32x64xf32>
    %c0_125 = arith.constant 0 : index
    %c0_126 = arith.constant 0 : index
    %172 = vector.load %arg12[%c0_125, %c0_126] : memref<64x128xf32, #tpu.memory_space<vmem>>, vector<64x128xf32>
    %cst_127 = arith.constant dense<0.000000e+00> : vector<32x128xf32>
    %173 = tpu.matmul %171, %172, %cst_127 {dimension_numbers = #tpu.dot_dimension_numbers<[1], [0], [0], [1], [0, 0, 1, 1], [], []>} : vector<32x64xf32>, vector<64x128xf32>, vector<32x128xf32> -> vector<32x128xf32>
    %174 = arith.addf %170, %173 : vector<32x128xf32>
    %c0_128 = arith.constant 0 : index
    %c0_129 = arith.constant 0 : index
    %175 = vector.load %arg13[%c0_128, %c0_129] : memref<1x128xf32, #tpu.memory_space<vmem>>, vector<1x128xf32>
    %176 = vector.broadcast %175 : vector<1x128xf32> to vector<32x128xf32>
    %177 = arith.addf %174, %176 : vector<32x128xf32>
    %178 = tpu.iota {dimensions = array<i32: 0>} : vector<16x32xi32>
    %179 = tpu.iota {dimensions = array<i32: 1>} : vector<16x32xi32>
    %c2_i32_130 = arith.constant 2 : i32
    %180 = vector.broadcast %c2_i32_130 : i32 to vector<16x32xi32>
    %181 = arith.muli %180, %178 : vector<16x32xi32>
    %182 = arith.subi %179, %181 : vector<16x32xi32>
    %c0_i32_131 = arith.constant 0 : i32
    %183 = vector.broadcast %c0_i32_131 : i32 to vector<16x32xi32>
    %184 = arith.cmpi eq, %182, %183 : vector<16x32xi32>
    %185 = arith.extui %184 : vector<16x32xi1> to vector<16x32xi32>
    %186 = arith.sitofp %185 : vector<16x32xi32> to vector<16x32xf32>
    %c1_i32_132 = arith.constant 1 : i32
    %187 = vector.broadcast %c1_i32_132 : i32 to vector<16x32xi32>
    %188 = arith.cmpi eq, %182, %187 : vector<16x32xi32>
    %189 = arith.extui %188 : vector<16x32xi1> to vector<16x32xi32>
    %190 = arith.sitofp %189 : vector<16x32xi32> to vector<16x32xf32>
    %cst_133 = arith.constant dense<0.000000e+00> : vector<16x128xf32>
    %191 = tpu.matmul %186, %177, %cst_133 {dimension_numbers = #tpu.dot_dimension_numbers<[1], [0], [0], [1], [0, 0, 1, 1], [], []>} : vector<16x32xf32>, vector<32x128xf32>, vector<16x128xf32> -> vector<16x128xf32>
    %cst_134 = arith.constant dense<0.000000e+00> : vector<16x128xf32>
    %192 = tpu.matmul %190, %177, %cst_134 {dimension_numbers = #tpu.dot_dimension_numbers<[1], [0], [0], [1], [0, 0, 1, 1], [], []>} : vector<16x32xf32>, vector<32x128xf32>, vector<16x128xf32> -> vector<16x128xf32>
    %193 = arith.maximumf %191, %192 : vector<16x128xf32>
    %cst_135 = arith.constant 0.000000e+00 : f32
    %194 = vector.broadcast %cst_135 : f32 to vector<32x128xf32>
    %c0_136 = arith.constant 0 : index
    %c0_137 = arith.constant 0 : index
    %195 = vector.load %arg29[%c0_136, %c0_137] : memref<48x128xf32, #tpu.memory_space<vmem>>, vector<32x128xf32>
    tpu.vector_store %arg29[%c0_136, %c0_137], %194 {strides = array<i32>} : memref<48x128xf32, #tpu.memory_space<vmem>>, vector<32x128xf32>,
    %c32 = arith.constant 32 : index
    %c0_138 = arith.constant 0 : index
    %196 = vector.load %arg29[%c32, %c0_138] : memref<48x128xf32, #tpu.memory_space<vmem>>, vector<16x128xf32>
    tpu.vector_store %arg29[%c32, %c0_138], %193 {strides = array<i32>} : memref<48x128xf32, #tpu.memory_space<vmem>>, vector<16x128xf32>,
    %c0_139 = arith.constant 0 : index
    %c0_140 = arith.constant 0 : index
    %197 = vector.load %arg29[%c0_139, %c0_140] : memref<48x128xf32, #tpu.memory_space<vmem>>, vector<32x128xf32>
    %c0_141 = arith.constant 0 : index
    %c0_142 = arith.constant 0 : index
    %c0_143 = arith.constant 0 : index
    %198 = vector.load %arg14[%c0_141, %c0_142, %c0_143] : memref<5x128x256xf32, #tpu.memory_space<vmem>>, vector<1x128x256xf32>
    %199 = vector.shape_cast %198 : vector<1x128x256xf32> to vector<128x256xf32>
    %cst_144 = arith.constant dense<0.000000e+00> : vector<32x256xf32>
    %200 = tpu.matmul %197, %199, %cst_144 {dimension_numbers = #tpu.dot_dimension_numbers<[1], [0], [0], [1], [0, 0, 1, 1], [], []>} : vector<32x128xf32>, vector<128x256xf32>, vector<32x256xf32> -> vector<32x256xf32>
    %c4_145 = arith.constant 4 : index
    %c0_146 = arith.constant 0 : index
    %201 = vector.load %arg29[%c4_145, %c0_146] : memref<48x128xf32, #tpu.memory_space<vmem>>, vector<32x128xf32>
    %c1_147 = arith.constant 1 : index
    %c0_148 = arith.constant 0 : index
    %c0_149 = arith.constant 0 : index
    %202 = vector.load %arg14[%c1_147, %c0_148, %c0_149] : memref<5x128x256xf32, #tpu.memory_space<vmem>>, vector<1x128x256xf32>
    %203 = vector.shape_cast %202 : vector<1x128x256xf32> to vector<128x256xf32>
    %cst_150 = arith.constant dense<0.000000e+00> : vector<32x256xf32>
    %204 = tpu.matmul %201, %203, %cst_150 {dimension_numbers = #tpu.dot_dimension_numbers<[1], [0], [0], [1], [0, 0, 1, 1], [], []>} : vector<32x128xf32>, vector<128x256xf32>, vector<32x256xf32> -> vector<32x256xf32>
    %205 = arith.addf %200, %204 : vector<32x256xf32>
    %c8_151 = arith.constant 8 : index
    %c0_152 = arith.constant 0 : index
    %206 = vector.load %arg29[%c8_151, %c0_152] : memref<48x128xf32, #tpu.memory_space<vmem>>, vector<32x128xf32>
    %c2_153 = arith.constant 2 : index
    %c0_154 = arith.constant 0 : index
    %c0_155 = arith.constant 0 : index
    %207 = vector.load %arg14[%c2_153, %c0_154, %c0_155] : memref<5x128x256xf32, #tpu.memory_space<vmem>>, vector<1x128x256xf32>
    %208 = vector.shape_cast %207 : vector<1x128x256xf32> to vector<128x256xf32>
    %cst_156 = arith.constant dense<0.000000e+00> : vector<32x256xf32>
    %209 = tpu.matmul %206, %208, %cst_156 {dimension_numbers = #tpu.dot_dimension_numbers<[1], [0], [0], [1], [0, 0, 1, 1], [], []>} : vector<32x128xf32>, vector<128x256xf32>, vector<32x256xf32> -> vector<32x256xf32>
    %210 = arith.addf %205, %209 : vector<32x256xf32>
    %c12 = arith.constant 12 : index
    %c0_157 = arith.constant 0 : index
    %211 = vector.load %arg29[%c12, %c0_157] : memref<48x128xf32, #tpu.memory_space<vmem>>, vector<32x128xf32>
    %c3_158 = arith.constant 3 : index
    %c0_159 = arith.constant 0 : index
    %c0_160 = arith.constant 0 : index
    %212 = vector.load %arg14[%c3_158, %c0_159, %c0_160] : memref<5x128x256xf32, #tpu.memory_space<vmem>>, vector<1x128x256xf32>
    %213 = vector.shape_cast %212 : vector<1x128x256xf32> to vector<128x256xf32>
    %cst_161 = arith.constant dense<0.000000e+00> : vector<32x256xf32>
    %214 = tpu.matmul %211, %213, %cst_161 {dimension_numbers = #tpu.dot_dimension_numbers<[1], [0], [0], [1], [0, 0, 1, 1], [], []>} : vector<32x128xf32>, vector<128x256xf32>, vector<32x256xf32> -> vector<32x256xf32>
    %215 = arith.addf %210, %214 : vector<32x256xf32>
    %c16_162 = arith.constant 16 : index
    %c0_163 = arith.constant 0 : index
    %216 = vector.load %arg29[%c16_162, %c0_163] : memref<48x128xf32, #tpu.memory_space<vmem>>, vector<32x128xf32>
    %c4_164 = arith.constant 4 : index
    %c0_165 = arith.constant 0 : index
    %c0_166 = arith.constant 0 : index
    %217 = vector.load %arg14[%c4_164, %c0_165, %c0_166] : memref<5x128x256xf32, #tpu.memory_space<vmem>>, vector<1x128x256xf32>
    %218 = vector.shape_cast %217 : vector<1x128x256xf32> to vector<128x256xf32>
    %cst_167 = arith.constant dense<0.000000e+00> : vector<32x256xf32>
    %219 = tpu.matmul %216, %218, %cst_167 {dimension_numbers = #tpu.dot_dimension_numbers<[1], [0], [0], [1], [0, 0, 1, 1], [], []>} : vector<32x128xf32>, vector<128x256xf32>, vector<32x256xf32> -> vector<32x256xf32>
    %220 = arith.addf %215, %219 : vector<32x256xf32>
    %c0_168 = arith.constant 0 : index
    %c0_169 = arith.constant 0 : index
    %221 = vector.load %arg15[%c0_168, %c0_169] : memref<1x256xf32, #tpu.memory_space<vmem>>, vector<1x256xf32>
    %222 = vector.broadcast %221 : vector<1x256xf32> to vector<32x256xf32>
    %223 = arith.addf %220, %222 : vector<32x256xf32>
    %cst_170 = arith.constant 0.000000e+00 : f32
    %224 = vector.broadcast %cst_170 : f32 to vector<32x256xf32>
    %225 = arith.cmpf oge, %223, %224 : vector<32x256xf32>
    %cst_171 = arith.constant 0.00999999977 : f32
    %226 = vector.broadcast %cst_171 : f32 to vector<32x256xf32>
    %227 = arith.mulf %226, %223 : vector<32x256xf32>
    %228 = arith.select %225, %223, %227 : vector<32x256xi1>, vector<32x256xf32>
    %229 = vector.extract_strided_slice %228 {offsets = [0, 0], sizes = [16, 256], strides = [1, 1]} : vector<32x256xf32> to vector<16x256xf32>
    %c0_172 = arith.constant 0 : index
    %c0_173 = arith.constant 0 : index
    %c0_174 = arith.constant 0 : index
    %230 = vector.load %arg16[%c0_172, %c0_173, %c0_174] : memref<5x256x256xf32, #tpu.memory_space<vmem>>, vector<1x256x256xf32>
    %231 = vector.shape_cast %230 : vector<1x256x256xf32> to vector<256x256xf32>
    %cst_175 = arith.constant dense<0.000000e+00> : vector<16x256xf32>
    %232 = tpu.matmul %229, %231, %cst_175 {dimension_numbers = #tpu.dot_dimension_numbers<[1], [0], [0], [1], [0, 0, 1, 1], [], []>} : vector<16x256xf32>, vector<256x256xf32>, vector<16x256xf32> -> vector<16x256xf32>
    %233 = vector.extract_strided_slice %228 {offsets = [4, 0], sizes = [16, 256], strides = [1, 1]} : vector<32x256xf32> to vector<16x256xf32>
    %c1_176 = arith.constant 1 : index
    %c0_177 = arith.constant 0 : index
    %c0_178 = arith.constant 0 : index
    %234 = vector.load %arg16[%c1_176, %c0_177, %c0_178] : memref<5x256x256xf32, #tpu.memory_space<vmem>>, vector<1x256x256xf32>
    %235 = vector.shape_cast %234 : vector<1x256x256xf32> to vector<256x256xf32>
    %cst_179 = arith.constant dense<0.000000e+00> : vector<16x256xf32>
    %236 = tpu.matmul %233, %235, %cst_179 {dimension_numbers = #tpu.dot_dimension_numbers<[1], [0], [0], [1], [0, 0, 1, 1], [], []>} : vector<16x256xf32>, vector<256x256xf32>, vector<16x256xf32> -> vector<16x256xf32>
    %237 = arith.addf %232, %236 : vector<16x256xf32>
    %238 = vector.extract_strided_slice %228 {offsets = [8, 0], sizes = [16, 256], strides = [1, 1]} : vector<32x256xf32> to vector<16x256xf32>
    %c2_180 = arith.constant 2 : index
    %c0_181 = arith.constant 0 : index
    %c0_182 = arith.constant 0 : index
    %239 = vector.load %arg16[%c2_180, %c0_181, %c0_182] : memref<5x256x256xf32, #tpu.memory_space<vmem>>, vector<1x256x256xf32>
    %240 = vector.shape_cast %239 : vector<1x256x256xf32> to vector<256x256xf32>
    %cst_183 = arith.constant dense<0.000000e+00> : vector<16x256xf32>
    %241 = tpu.matmul %238, %240, %cst_183 {dimension_numbers = #tpu.dot_dimension_numbers<[1], [0], [0], [1], [0, 0, 1, 1], [], []>} : vector<16x256xf32>, vector<256x256xf32>, vector<16x256xf32> -> vector<16x256xf32>
    %242 = arith.addf %237, %241 : vector<16x256xf32>
    %243 = vector.extract_strided_slice %228 {offsets = [12, 0], sizes = [16, 256], strides = [1, 1]} : vector<32x256xf32> to vector<16x256xf32>
    %c3_184 = arith.constant 3 : index
    %c0_185 = arith.constant 0 : index
    %c0_186 = arith.constant 0 : index
    %244 = vector.load %arg16[%c3_184, %c0_185, %c0_186] : memref<5x256x256xf32, #tpu.memory_space<vmem>>, vector<1x256x256xf32>
    %245 = vector.shape_cast %244 : vector<1x256x256xf32> to vector<256x256xf32>
    %cst_187 = arith.constant dense<0.000000e+00> : vector<16x256xf32>
    %246 = tpu.matmul %243, %245, %cst_187 {dimension_numbers = #tpu.dot_dimension_numbers<[1], [0], [0], [1], [0, 0, 1, 1], [], []>} : vector<16x256xf32>, vector<256x256xf32>, vector<16x256xf32> -> vector<16x256xf32>
    %247 = arith.addf %242, %246 : vector<16x256xf32>
    %248 = vector.extract_strided_slice %228 {offsets = [16, 0], sizes = [16, 256], strides = [1, 1]} : vector<32x256xf32> to vector<16x256xf32>
    %c4_188 = arith.constant 4 : index
    %c0_189 = arith.constant 0 : index
    %c0_190 = arith.constant 0 : index
    %249 = vector.load %arg16[%c4_188, %c0_189, %c0_190] : memref<5x256x256xf32, #tpu.memory_space<vmem>>, vector<1x256x256xf32>
    %250 = vector.shape_cast %249 : vector<1x256x256xf32> to vector<256x256xf32>
    %cst_191 = arith.constant dense<0.000000e+00> : vector<16x256xf32>
    %251 = tpu.matmul %248, %250, %cst_191 {dimension_numbers = #tpu.dot_dimension_numbers<[1], [0], [0], [1], [0, 0, 1, 1], [], []>} : vector<16x256xf32>, vector<256x256xf32>, vector<16x256xf32> -> vector<16x256xf32>
    %252 = arith.addf %247, %251 : vector<16x256xf32>
    %c0_192 = arith.constant 0 : index
    %c0_193 = arith.constant 0 : index
    %253 = vector.load %arg17[%c0_192, %c0_193] : memref<1x256xf32, #tpu.memory_space<vmem>>, vector<1x256xf32>
    %254 = vector.broadcast %253 : vector<1x256xf32> to vector<16x256xf32>
    %255 = arith.addf %252, %254 : vector<16x256xf32>
    %cst_194 = arith.constant 0.000000e+00 : f32
    %256 = vector.broadcast %cst_194 : f32 to vector<16x256xf32>
    %257 = arith.cmpf oge, %255, %256 : vector<16x256xf32>
    %cst_195 = arith.constant 0.00999999977 : f32
    %258 = vector.broadcast %cst_195 : f32 to vector<16x256xf32>
    %259 = arith.mulf %258, %255 : vector<16x256xf32>
    %260 = arith.select %257, %255, %259 : vector<16x256xi1>, vector<16x256xf32>
    %c32_196 = arith.constant 32 : index
    %c0_197 = arith.constant 0 : index
    %261 = vector.load %arg29[%c32_196, %c0_197] : memref<48x128xf32, #tpu.memory_space<vmem>>, vector<16x128xf32>
    %c0_198 = arith.constant 0 : index
    %c0_199 = arith.constant 0 : index
    %262 = vector.load %arg18[%c0_198, %c0_199] : memref<128x256xf32, #tpu.memory_space<vmem>>, vector<128x256xf32>
    %cst_200 = arith.constant dense<0.000000e+00> : vector<16x256xf32>
    %263 = tpu.matmul %261, %262, %cst_200 {dimension_numbers = #tpu.dot_dimension_numbers<[1], [0], [0], [1], [0, 0, 1, 1], [], []>} : vector<16x128xf32>, vector<128x256xf32>, vector<16x256xf32> -> vector<16x256xf32>
    %264 = arith.addf %260, %263 : vector<16x256xf32>
    %c0_201 = arith.constant 0 : index
    %c0_202 = arith.constant 0 : index
    %265 = vector.load %arg19[%c0_201, %c0_202] : memref<1x256xf32, #tpu.memory_space<vmem>>, vector<1x256xf32>
    %266 = vector.broadcast %265 : vector<1x256xf32> to vector<16x256xf32>
    %267 = arith.addf %264, %266 : vector<16x256xf32>
    %268 = tpu.iota {dimensions = array<i32: 0>} : vector<8x16xi32>
    %269 = tpu.iota {dimensions = array<i32: 1>} : vector<8x16xi32>
    %c2_i32_203 = arith.constant 2 : i32
    %270 = vector.broadcast %c2_i32_203 : i32 to vector<8x16xi32>
    %271 = arith.muli %270, %268 : vector<8x16xi32>
    %272 = arith.subi %269, %271 : vector<8x16xi32>
    %c0_i32_204 = arith.constant 0 : i32
    %273 = vector.broadcast %c0_i32_204 : i32 to vector<8x16xi32>
    %274 = arith.cmpi eq, %272, %273 : vector<8x16xi32>
    %275 = arith.extui %274 : vector<8x16xi1> to vector<8x16xi32>
    %276 = arith.sitofp %275 : vector<8x16xi32> to vector<8x16xf32>
    %c1_i32_205 = arith.constant 1 : i32
    %277 = vector.broadcast %c1_i32_205 : i32 to vector<8x16xi32>
    %278 = arith.cmpi eq, %272, %277 : vector<8x16xi32>
    %279 = arith.extui %278 : vector<8x16xi1> to vector<8x16xi32>
    %280 = arith.sitofp %279 : vector<8x16xi32> to vector<8x16xf32>
    %cst_206 = arith.constant dense<0.000000e+00> : vector<8x256xf32>
    %281 = tpu.matmul %276, %267, %cst_206 {dimension_numbers = #tpu.dot_dimension_numbers<[1], [0], [0], [1], [0, 0, 1, 1], [], []>} : vector<8x16xf32>, vector<16x256xf32>, vector<8x256xf32> -> vector<8x256xf32>
    %cst_207 = arith.constant dense<0.000000e+00> : vector<8x256xf32>
    %282 = tpu.matmul %280, %267, %cst_207 {dimension_numbers = #tpu.dot_dimension_numbers<[1], [0], [0], [1], [0, 0, 1, 1], [], []>} : vector<8x16xf32>, vector<16x256xf32>, vector<8x256xf32> -> vector<8x256xf32>
    %283 = arith.maximumf %281, %282 : vector<8x256xf32>
    %cst_208 = arith.constant 0.000000e+00 : f32
    %284 = vector.broadcast %cst_208 : f32 to vector<64x256xf32>
    %c0_209 = arith.constant 0 : index
    %c0_210 = arith.constant 0 : index
    %285 = vector.load %arg30[%c0_209, %c0_210] : memref<72x256xf32, #tpu.memory_space<vmem>>, vector<64x256xf32>
    tpu.vector_store %arg30[%c0_209, %c0_210], %284 {strides = array<i32>} : memref<72x256xf32, #tpu.memory_space<vmem>>, vector<64x256xf32>,
    %c64 = arith.constant 64 : index
    %c0_211 = arith.constant 0 : index
    %286 = vector.load %arg30[%c64, %c0_211] : memref<72x256xf32, #tpu.memory_space<vmem>>, vector<8x256xf32>
    tpu.vector_store %arg30[%c64, %c0_211], %283 {strides = array<i32>} : memref<72x256xf32, #tpu.memory_space<vmem>>, vector<8x256xf32>,
    %c0_212 = arith.constant 0 : index
    %c0_213 = arith.constant 0 : index
    %287 = vector.load %arg30[%c0_212, %c0_213] : memref<72x256xf32, #tpu.memory_space<vmem>>, vector<40x256xf32>
    %c0_214 = arith.constant 0 : index
    %c0_215 = arith.constant 0 : index
    %c0_216 = arith.constant 0 : index
    %288 = vector.load %arg20[%c0_214, %c0_215, %c0_216] : memref<5x256x32xf32, #tpu.memory_space<vmem>>, vector<1x256x32xf32>
    %289 = vector.shape_cast %288 : vector<1x256x32xf32> to vector<256x32xf32>
    %cst_217 = arith.constant dense<0.000000e+00> : vector<40x32xf32>
    %290 = tpu.matmul %287, %289, %cst_217 {dimension_numbers = #tpu.dot_dimension_numbers<[1], [0], [0], [1], [0, 0, 1, 1], [], []>} : vector<40x256xf32>, vector<256x32xf32>, vector<40x32xf32> -> vector<40x32xf32>
    %c8_218 = arith.constant 8 : index
    %c0_219 = arith.constant 0 : index
    %291 = vector.load %arg30[%c8_218, %c0_219] : memref<72x256xf32, #tpu.memory_space<vmem>>, vector<40x256xf32>
    %c1_220 = arith.constant 1 : index
    %c0_221 = arith.constant 0 : index
    %c0_222 = arith.constant 0 : index
    %292 = vector.load %arg20[%c1_220, %c0_221, %c0_222] : memref<5x256x32xf32, #tpu.memory_space<vmem>>, vector<1x256x32xf32>
    %293 = vector.shape_cast %292 : vector<1x256x32xf32> to vector<256x32xf32>
    %cst_223 = arith.constant dense<0.000000e+00> : vector<40x32xf32>
    %294 = tpu.matmul %291, %293, %cst_223 {dimension_numbers = #tpu.dot_dimension_numbers<[1], [0], [0], [1], [0, 0, 1, 1], [], []>} : vector<40x256xf32>, vector<256x32xf32>, vector<40x32xf32> -> vector<40x32xf32>
    %295 = arith.addf %290, %294 : vector<40x32xf32>
    %c16_224 = arith.constant 16 : index
    %c0_225 = arith.constant 0 : index
    %296 = vector.load %arg30[%c16_224, %c0_225] : memref<72x256xf32, #tpu.memory_space<vmem>>, vector<40x256xf32>
    %c2_226 = arith.constant 2 : index
    %c0_227 = arith.constant 0 : index
    %c0_228 = arith.constant 0 : index
    %297 = vector.load %arg20[%c2_226, %c0_227, %c0_228] : memref<5x256x32xf32, #tpu.memory_space<vmem>>, vector<1x256x32xf32>
    %298 = vector.shape_cast %297 : vector<1x256x32xf32> to vector<256x32xf32>
    %cst_229 = arith.constant dense<0.000000e+00> : vector<40x32xf32>
    %299 = tpu.matmul %296, %298, %cst_229 {dimension_numbers = #tpu.dot_dimension_numbers<[1], [0], [0], [1], [0, 0, 1, 1], [], []>} : vector<40x256xf32>, vector<256x32xf32>, vector<40x32xf32> -> vector<40x32xf32>
    %300 = arith.addf %295, %299 : vector<40x32xf32>
    %c24 = arith.constant 24 : index
    %c0_230 = arith.constant 0 : index
    %301 = vector.load %arg30[%c24, %c0_230] : memref<72x256xf32, #tpu.memory_space<vmem>>, vector<40x256xf32>
    %c3_231 = arith.constant 3 : index
    %c0_232 = arith.constant 0 : index
    %c0_233 = arith.constant 0 : index
    %302 = vector.load %arg20[%c3_231, %c0_232, %c0_233] : memref<5x256x32xf32, #tpu.memory_space<vmem>>, vector<1x256x32xf32>
    %303 = vector.shape_cast %302 : vector<1x256x32xf32> to vector<256x32xf32>
    %cst_234 = arith.constant dense<0.000000e+00> : vector<40x32xf32>
    %304 = tpu.matmul %301, %303, %cst_234 {dimension_numbers = #tpu.dot_dimension_numbers<[1], [0], [0], [1], [0, 0, 1, 1], [], []>} : vector<40x256xf32>, vector<256x32xf32>, vector<40x32xf32> -> vector<40x32xf32>
    %305 = arith.addf %300, %304 : vector<40x32xf32>
    %c32_235 = arith.constant 32 : index
    %c0_236 = arith.constant 0 : index
    %306 = vector.load %arg30[%c32_235, %c0_236] : memref<72x256xf32, #tpu.memory_space<vmem>>, vector<40x256xf32>
    %c4_237 = arith.constant 4 : index
    %c0_238 = arith.constant 0 : index
    %c0_239 = arith.constant 0 : index
    %307 = vector.load %arg20[%c4_237, %c0_238, %c0_239] : memref<5x256x32xf32, #tpu.memory_space<vmem>>, vector<1x256x32xf32>
    %308 = vector.shape_cast %307 : vector<1x256x32xf32> to vector<256x32xf32>
    %cst_240 = arith.constant dense<0.000000e+00> : vector<40x32xf32>
    %309 = tpu.matmul %306, %308, %cst_240 {dimension_numbers = #tpu.dot_dimension_numbers<[1], [0], [0], [1], [0, 0, 1, 1], [], []>} : vector<40x256xf32>, vector<256x32xf32>, vector<40x32xf32> -> vector<40x32xf32>
    %310 = arith.addf %305, %309 : vector<40x32xf32>
    %c0_241 = arith.constant 0 : index
    %c0_242 = arith.constant 0 : index
    %311 = vector.load %arg21[%c0_241, %c0_242] : memref<1x32xf32, #tpu.memory_space<vmem>>, vector<1x32xf32>
    %312 = vector.broadcast %311 : vector<1x32xf32> to vector<40x32xf32>
    %313 = arith.addf %310, %312 : vector<40x32xf32>
    %cst_243 = arith.constant 0.000000e+00 : f32
    %314 = vector.broadcast %cst_243 : f32 to vector<40x32xf32>
    %315 = arith.cmpf oge, %313, %314 : vector<40x32xf32>
    %cst_244 = arith.constant 0.00999999977 : f32
    %316 = vector.broadcast %cst_244 : f32 to vector<40x32xf32>
    %317 = arith.mulf %316, %313 : vector<40x32xf32>
    %318 = arith.select %315, %313, %317 : vector<40x32xi1>, vector<40x32xf32>
    %319 = vector.extract_strided_slice %318 {offsets = [0, 0], sizes = [8, 32], strides = [1, 1]} : vector<40x32xf32> to vector<8x32xf32>
    %c0_245 = arith.constant 0 : index
    %c0_246 = arith.constant 0 : index
    %c0_247 = arith.constant 0 : index
    %320 = vector.load %arg22[%c0_245, %c0_246, %c0_247] : memref<5x32x32xf32, #tpu.memory_space<vmem>>, vector<1x32x32xf32>
    %321 = vector.shape_cast %320 : vector<1x32x32xf32> to vector<32x32xf32>
    %cst_248 = arith.constant dense<0.000000e+00> : vector<8x32xf32>
    %322 = tpu.matmul %319, %321, %cst_248 {dimension_numbers = #tpu.dot_dimension_numbers<[1], [0], [0], [1], [0, 0, 1, 1], [], []>} : vector<8x32xf32>, vector<32x32xf32>, vector<8x32xf32> -> vector<8x32xf32>
    %323 = vector.extract_strided_slice %318 {offsets = [8, 0], sizes = [8, 32], strides = [1, 1]} : vector<40x32xf32> to vector<8x32xf32>
    %c1_249 = arith.constant 1 : index
    %c0_250 = arith.constant 0 : index
    %c0_251 = arith.constant 0 : index
    %324 = vector.load %arg22[%c1_249, %c0_250, %c0_251] : memref<5x32x32xf32, #tpu.memory_space<vmem>>, vector<1x32x32xf32>
    %325 = vector.shape_cast %324 : vector<1x32x32xf32> to vector<32x32xf32>
    %cst_252 = arith.constant dense<0.000000e+00> : vector<8x32xf32>
    %326 = tpu.matmul %323, %325, %cst_252 {dimension_numbers = #tpu.dot_dimension_numbers<[1], [0], [0], [1], [0, 0, 1, 1], [], []>} : vector<8x32xf32>, vector<32x32xf32>, vector<8x32xf32> -> vector<8x32xf32>
    %327 = arith.addf %322, %326 : vector<8x32xf32>
    %328 = vector.extract_strided_slice %318 {offsets = [16, 0], sizes = [8, 32], strides = [1, 1]} : vector<40x32xf32> to vector<8x32xf32>
    %c2_253 = arith.constant 2 : index
    %c0_254 = arith.constant 0 : index
    %c0_255 = arith.constant 0 : index
    %329 = vector.load %arg22[%c2_253, %c0_254, %c0_255] : memref<5x32x32xf32, #tpu.memory_space<vmem>>, vector<1x32x32xf32>
    %330 = vector.shape_cast %329 : vector<1x32x32xf32> to vector<32x32xf32>
    %cst_256 = arith.constant dense<0.000000e+00> : vector<8x32xf32>
    %331 = tpu.matmul %328, %330, %cst_256 {dimension_numbers = #tpu.dot_dimension_numbers<[1], [0], [0], [1], [0, 0, 1, 1], [], []>} : vector<8x32xf32>, vector<32x32xf32>, vector<8x32xf32> -> vector<8x32xf32>
    %332 = arith.addf %327, %331 : vector<8x32xf32>
    %333 = vector.extract_strided_slice %318 {offsets = [24, 0], sizes = [8, 32], strides = [1, 1]} : vector<40x32xf32> to vector<8x32xf32>
    %c3_257 = arith.constant 3 : index
    %c0_258 = arith.constant 0 : index
    %c0_259 = arith.constant 0 : index
    %334 = vector.load %arg22[%c3_257, %c0_258, %c0_259] : memref<5x32x32xf32, #tpu.memory_space<vmem>>, vector<1x32x32xf32>
    %335 = vector.shape_cast %334 : vector<1x32x32xf32> to vector<32x32xf32>
    %cst_260 = arith.constant dense<0.000000e+00> : vector<8x32xf32>
    %336 = tpu.matmul %333, %335, %cst_260 {dimension_numbers = #tpu.dot_dimension_numbers<[1], [0], [0], [1], [0, 0, 1, 1], [], []>} : vector<8x32xf32>, vector<32x32xf32>, vector<8x32xf32> -> vector<8x32xf32>
    %337 = arith.addf %332, %336 : vector<8x32xf32>
    %338 = vector.extract_strided_slice %318 {offsets = [32, 0], sizes = [8, 32], strides = [1, 1]} : vector<40x32xf32> to vector<8x32xf32>
    %c4_261 = arith.constant 4 : index
    %c0_262 = arith.constant 0 : index
    %c0_263 = arith.constant 0 : index
    %339 = vector.load %arg22[%c4_261, %c0_262, %c0_263] : memref<5x32x32xf32, #tpu.memory_space<vmem>>, vector<1x32x32xf32>
    %340 = vector.shape_cast %339 : vector<1x32x32xf32> to vector<32x32xf32>
    %cst_264 = arith.constant dense<0.000000e+00> : vector<8x32xf32>
    %341 = tpu.matmul %338, %340, %cst_264 {dimension_numbers = #tpu.dot_dimension_numbers<[1], [0], [0], [1], [0, 0, 1, 1], [], []>} : vector<8x32xf32>, vector<32x32xf32>, vector<8x32xf32> -> vector<8x32xf32>
    %342 = arith.addf %337, %341 : vector<8x32xf32>
    %c0_265 = arith.constant 0 : index
    %c0_266 = arith.constant 0 : index
    %343 = vector.load %arg23[%c0_265, %c0_266] : memref<1x32xf32, #tpu.memory_space<vmem>>, vector<1x32xf32>
    %344 = vector.broadcast %343 : vector<1x32xf32> to vector<8x32xf32>
    %345 = arith.addf %342, %344 : vector<8x32xf32>
    %cst_267 = arith.constant 0.000000e+00 : f32
    %346 = vector.broadcast %cst_267 : f32 to vector<8x32xf32>
    %347 = arith.cmpf oge, %345, %346 : vector<8x32xf32>
    %cst_268 = arith.constant 0.00999999977 : f32
    %348 = vector.broadcast %cst_268 : f32 to vector<8x32xf32>
    %349 = arith.mulf %348, %345 : vector<8x32xf32>
    %350 = arith.select %347, %345, %349 : vector<8x32xi1>, vector<8x32xf32>
    %c64_269 = arith.constant 64 : index
    %c0_270 = arith.constant 0 : index
    %351 = vector.load %arg30[%c64_269, %c0_270] : memref<72x256xf32, #tpu.memory_space<vmem>>, vector<8x256xf32>
    %c0_271 = arith.constant 0 : index
    %c0_272 = arith.constant 0 : index
    %352 = vector.load %arg24[%c0_271, %c0_272] : memref<256x32xf32, #tpu.memory_space<vmem>>, vector<256x32xf32>
    %cst_273 = arith.constant dense<0.000000e+00> : vector<8x32xf32>
    %353 = tpu.matmul %351, %352, %cst_273 {dimension_numbers = #tpu.dot_dimension_numbers<[1], [0], [0], [1], [0, 0, 1, 1], [], []>} : vector<8x256xf32>, vector<256x32xf32>, vector<8x32xf32> -> vector<8x32xf32>
    %354 = arith.addf %350, %353 : vector<8x32xf32>
    %c0_274 = arith.constant 0 : index
    %c0_275 = arith.constant 0 : index
    %355 = vector.load %arg25[%c0_274, %c0_275] : memref<1x32xf32, #tpu.memory_space<vmem>>, vector<1x32xf32>
    %356 = vector.broadcast %355 : vector<1x32xf32> to vector<8x32xf32>
    %357 = arith.addf %354, %356 : vector<8x32xf32>
    %cst_276 = arith.constant dense<0xFF800000> : vector<32xf32>
    %358 = vector.multi_reduction <maximumf>, %357, %cst_276 [0] : vector<8x32xf32> to vector<32xf32>
    %359 = vector.shape_cast %358 : vector<32xf32> to vector<1x32xf32>
    %c0_277 = arith.constant 0 : index
    %c0_278 = arith.constant 0 : index
    %c0_279 = arith.constant 0 : index
    %360 = vector.load %arg26[%c0_277, %c0_278, %c0_279] : memref<1x1x32xf32, #tpu.memory_space<vmem>>, vector<1x1x32xf32>
    %361 = vector.shape_cast %360 : vector<1x1x32xf32> to vector<1x32xf32>
    %362 = vector.shape_cast %359 : vector<1x32xf32> to vector<1x1x32xf32>
    tpu.vector_store %arg26[%c0_277, %c0_278, %c0_279], %362 {strides = array<i32>} : memref<1x1x32xf32, #tpu.memory_space<vmem>>, vector<1x1x32xf32>,
    return
  }
  func.func @transform_0(%arg0: i32) -> (i32, i32, i32) {
    %c0_i32 = arith.constant 0 : i32
    %c0_i32_0 = arith.constant 0 : i32
    %c0_i32_1 = arith.constant 0 : i32
    return %arg0, %c0_i32, %c0_i32_0 : i32, i32, i32
  }
  func.func @transform_1(%arg0: i32) -> (i32, i32, i32) {
    %c0_i32 = arith.constant 0 : i32
    %c0_i32_0 = arith.constant 0 : i32
    %c0_i32_1 = arith.constant 0 : i32
    %c0_i32_2 = arith.constant 0 : i32
    return %c0_i32, %c0_i32_0, %c0_i32_1 : i32, i32, i32
  }
  func.func @transform_2(%arg0: i32) -> (i32, i32) {
    %c0_i32 = arith.constant 0 : i32
    %c0_i32_0 = arith.constant 0 : i32
    %c0_i32_1 = arith.constant 0 : i32
    return %c0_i32, %c0_i32_0 : i32, i32
  }
  func.func @transform_3(%arg0: i32) -> (i32, i32, i32) {
    %c0_i32 = arith.constant 0 : i32
    %c0_i32_0 = arith.constant 0 : i32
    %c0_i32_1 = arith.constant 0 : i32
    %c0_i32_2 = arith.constant 0 : i32
    return %c0_i32, %c0_i32_0, %c0_i32_1 : i32, i32, i32
  }
  func.func @transform_4(%arg0: i32) -> (i32, i32) {
    %c0_i32 = arith.constant 0 : i32
    %c0_i32_0 = arith.constant 0 : i32
    %c0_i32_1 = arith.constant 0 : i32
    return %c0_i32, %c0_i32_0 : i32, i32
  }
  func.func @transform_5(%arg0: i32) -> (i32, i32) {
    %c0_i32 = arith.constant 0 : i32
    %c0_i32_0 = arith.constant 0 : i32
    %c0_i32_1 = arith.constant 0 : i32
    return %c0_i32, %c0_i32_0 : i32, i32
  }
  func.func @transform_6(%arg0: i32) -> (i32, i32) {
    %c0_i32 = arith.constant 0 : i32
    %c0_i32_0 = arith.constant 0 : i32
    %c0_i32_1 = arith.constant 0 : i32
    return %c0_i32, %c0_i32_0 : i32, i32
  }
  func.func @transform_7(%arg0: i32) -> (i32, i32, i32) {
    %c0_i32 = arith.constant 0 : i32
    %c0_i32_0 = arith.constant 0 : i32
    %c0_i32_1 = arith.constant 0 : i32
    %c0_i32_2 = arith.constant 0 : i32
    return %c0_i32, %c0_i32_0, %c0_i32_1 : i32, i32, i32
  }
  func.func @transform_8(%arg0: i32) -> (i32, i32) {
    %c0_i32 = arith.constant 0 : i32
    %c0_i32_0 = arith.constant 0 : i32
    %c0_i32_1 = arith.constant 0 : i32
    return %c0_i32, %c0_i32_0 : i32, i32
  }
  func.func @transform_9(%arg0: i32) -> (i32, i32, i32) {
    %c0_i32 = arith.constant 0 : i32
    %c0_i32_0 = arith.constant 0 : i32
    %c0_i32_1 = arith.constant 0 : i32
    %c0_i32_2 = arith.constant 0 : i32
    return %c0_i32, %c0_i32_0, %c0_i32_1 : i32, i32, i32
  }
  func.func @transform_10(%arg0: i32) -> (i32, i32) {
    %c0_i32 = arith.constant 0 : i32
    %c0_i32_0 = arith.constant 0 : i32
    %c0_i32_1 = arith.constant 0 : i32
    return %c0_i32, %c0_i32_0 : i32, i32
  }
  func.func @transform_11(%arg0: i32) -> (i32, i32) {
    %c0_i32 = arith.constant 0 : i32
    %c0_i32_0 = arith.constant 0 : i32
    %c0_i32_1 = arith.constant 0 : i32
    return %c0_i32, %c0_i32_0 : i32, i32
  }
  func.func @transform_12(%arg0: i32) -> (i32, i32) {
    %c0_i32 = arith.constant 0 : i32
    %c0_i32_0 = arith.constant 0 : i32
    %c0_i32_1 = arith.constant 0 : i32
    return %c0_i32, %c0_i32_0 : i32, i32
  }
  func.func @transform_13(%arg0: i32) -> (i32, i32, i32) {
    %c0_i32 = arith.constant 0 : i32
    %c0_i32_0 = arith.constant 0 : i32
    %c0_i32_1 = arith.constant 0 : i32
    %c0_i32_2 = arith.constant 0 : i32
    return %c0_i32, %c0_i32_0, %c0_i32_1 : i32, i32, i32
  }
  func.func @transform_14(%arg0: i32) -> (i32, i32) {
    %c0_i32 = arith.constant 0 : i32
    %c0_i32_0 = arith.constant 0 : i32
    %c0_i32_1 = arith.constant 0 : i32
    return %c0_i32, %c0_i32_0 : i32, i32
  }
  func.func @transform_15(%arg0: i32) -> (i32, i32, i32) {
    %c0_i32 = arith.constant 0 : i32
    %c0_i32_0 = arith.constant 0 : i32
    %c0_i32_1 = arith.constant 0 : i32
    %c0_i32_2 = arith.constant 0 : i32
    return %c0_i32, %c0_i32_0, %c0_i32_1 : i32, i32, i32
  }
  func.func @transform_16(%arg0: i32) -> (i32, i32) {
    %c0_i32 = arith.constant 0 : i32
    %c0_i32_0 = arith.constant 0 : i32
    %c0_i32_1 = arith.constant 0 : i32
    return %c0_i32, %c0_i32_0 : i32, i32
  }
  func.func @transform_17(%arg0: i32) -> (i32, i32) {
    %c0_i32 = arith.constant 0 : i32
    %c0_i32_0 = arith.constant 0 : i32
    %c0_i32_1 = arith.constant 0 : i32
    return %c0_i32, %c0_i32_0 : i32, i32
  }
  func.func @transform_18(%arg0: i32) -> (i32, i32) {
    %c0_i32 = arith.constant 0 : i32
    %c0_i32_0 = arith.constant 0 : i32
    %c0_i32_1 = arith.constant 0 : i32
    return %c0_i32, %c0_i32_0 : i32, i32
  }
  func.func @transform_19(%arg0: i32) -> (i32, i32, i32) {
    %c0_i32 = arith.constant 0 : i32
    %c0_i32_0 = arith.constant 0 : i32
    %c0_i32_1 = arith.constant 0 : i32
    %c0_i32_2 = arith.constant 0 : i32
    return %c0_i32, %c0_i32_0, %c0_i32_1 : i32, i32, i32
  }
  func.func @transform_20(%arg0: i32) -> (i32, i32) {
    %c0_i32 = arith.constant 0 : i32
    %c0_i32_0 = arith.constant 0 : i32
    %c0_i32_1 = arith.constant 0 : i32
    return %c0_i32, %c0_i32_0 : i32, i32
  }
  func.func @transform_21(%arg0: i32) -> (i32, i32, i32) {
    %c0_i32 = arith.constant 0 : i32
    %c0_i32_0 = arith.constant 0 : i32
    %c0_i32_1 = arith.constant 0 : i32
    %c0_i32_2 = arith.constant 0 : i32
    return %c0_i32, %c0_i32_0, %c0_i32_1 : i32, i32, i32
  }
  func.func @transform_22(%arg0: i32) -> (i32, i32) {
    %c0_i32 = arith.constant 0 : i32
    %c0_i32_0 = arith.constant 0 : i32
    %c0_i32_1 = arith.constant 0 : i32
    return %c0_i32, %c0_i32_0 : i32, i32
  }
  func.func @transform_23(%arg0: i32) -> (i32, i32) {
    %c0_i32 = arith.constant 0 : i32
    %c0_i32_0 = arith.constant 0 : i32
    %c0_i32_1 = arith.constant 0 : i32
    return %c0_i32, %c0_i32_0 : i32, i32
  }
  func.func @transform_24(%arg0: i32) -> (i32, i32) {
    %c0_i32 = arith.constant 0 : i32
    %c0_i32_0 = arith.constant 0 : i32
    %c0_i32_1 = arith.constant 0 : i32
    return %c0_i32, %c0_i32_0 : i32, i32
  }
  func.func @transform_25(%arg0: i32) -> (i32, i32, i32) {
    %c0_i32 = arith.constant 0 : i32
    %c0_i32_0 = arith.constant 0 : i32
    %c0_i32_1 = arith.constant 0 : i32
    return %arg0, %c0_i32, %c0_i32_0 : i32, i32, i32
  }
}

</mosaic_0001>

<bundles_post_ra>
// kernel: encoder_forward.1
= control target key start
LH: loop header
LB: loop body
LE: loop exit
PB: predicated region body
PF: predicated region fallthrough
CT: control target
= control target key end

     0   :  { %s13787_s0 = inlined_call_operand.vmem [shape: f32[2,64,1], index: 0, kind: input, shape index: {}]   ;;  %s13788_s1 = inlined_call_operand.hbm [shape: f32[5,1,64], index: 1, kind: input, shape index: {}]   ;;  %s13789_s2 = inlined_call_operand.hbm [shape: f32[1,64], index: 2, kind: input, shape index: {}]   ;;  %s13790_s3 = inlined_call_operand.hbm [shape: f32[5,64,64], index: 3, kind: input, shape index: {}]   ;;  %s13791_s4 = inlined_call_operand.hbm [shape: f32[1,64], index: 4, kind: input, shape index: {}]   ;;  %s13792_s5 = inlined_call_operand.hbm [shape: f32[1,64], index: 5, kind: input, shape index: {}]   ;;  %s13793_s6 = inlined_call_operand.hbm [shape: f32[1,64], index: 6, kind: input, shape index: {}]   ;;  %s13794_s7 = inlined_call_operand.hbm [shape: f32[5,64,128], index: 7, kind: input, shape index: {}]   ;;  %s13795_s8 = inlined_call_operand.hbm [shape: f32[1,128], index: 8, kind: input, shape index: {}]   ;;  %s13796_s9 = inlined_call_operand.hbm [shape: f32[5,128,128], index: 9, kind: input, shape index: {}]   ;;  %s13797_s10 = inlined_call_operand.hbm [shape: f32[1,128], index: 10, kind: input, shape index: {}]   ;;  %s13798_s11 = inlined_call_operand.hbm [shape: f32[64,128], index: 11, kind: input, shape index: {}]   ;;  %s13799_s12 = inlined_call_operand.hbm [shape: f32[1,128], index: 12, kind: input, shape index: {}]   ;;  %s13800_s13 = inlined_call_operand.vmem [shape: f32[5,128,256], index: 13, kind: input, shape index: {}]   ;;  %s13801_s14 = inlined_call_operand.hbm [shape: f32[1,256], index: 14, kind: input, shape index: {}]   ;;  %s13802_s15 = inlined_call_operand.hbm [shape: f32[5,256,256], index: 15, kind: input, shape index: {}]   ;;  %s13803_s16 = inlined_call_operand.hbm [shape: f32[1,256], index: 16, kind: input, shape index: {}]   ;;  %s13804_s17 = inlined_call_operand.hbm [shape: f32[128,256], index: 17, kind: input, shape index: {}]   ;;  %s13805_s18 = inlined_call_operand.hbm [shape: f32[1,256], index: 18, kind: input, shape index: {}]   ;;  %s13806_s19 = inlined_call_operand.vmem [shape: f32[5,256,32], index: 19, kind: input, shape index: {}]   ;;  %s13807_s20 = inlined_call_operand.hbm [shape: f32[1,32], index: 20, kind: input, shape index: {}]   ;;  %s13808_s21 = inlined_call_operand.hbm [shape: f32[5,32,32], index: 21, kind: input, shape index: {}]   ;;  %s13809_s22 = inlined_call_operand.hbm [shape: f32[1,32], index: 22, kind: input, shape index: {}]   ;;  %s13810_s23 = inlined_call_operand.vmem [shape: f32[256,32], index: 23, kind: input, shape index: {}]   ;;  %s13811_s24 = inlined_call_operand.hbm [shape: f32[1,32], index: 24, kind: input, shape index: {}]   ;;  %s13812_s25 = inlined_call_operand.hbm [shape: f32[2,1,32], index: 25, kind: output, shape index: {}]  }
   0x1   :  { %13843 = sst [smem:[#allocation60_spill]] %s13787_s0 }
   0x2   :  { %13844 = sst [smem:[#allocation61_spill]] %s13788_s1 }
   0x3   :  { %13845 = sst [smem:[#allocation62_spill]] %s13789_s2 }
   0x4   :  { %13846 = sst [smem:[#allocation63_spill]] %s13790_s3 }
   0x5   :  { %13847 = sst [smem:[#allocation64_spill]] %s13791_s4 }
   0x6   :  { %13848 = sst [smem:[#allocation65_spill]] %s13792_s5 }
   0x7   :  { %13849 = sst [smem:[#allocation66_spill]] %s13793_s6 }
   0x8   :  { %13850 = sst [smem:[#allocation67_spill]] %s13794_s7 }
   0x9   :  { %13851 = sst [smem:[#allocation68_spill]] %s13795_s8 }
   0xa   :  { %13852 = sst [smem:[#allocation69_spill]] %s13796_s9 }
   0xb   :  { %13853 = sst [smem:[#allocation70_spill]] %s13797_s10 }
   0xc   :  { %13854 = sst [smem:[#allocation71_spill]] %s13799_s12 }
   0xd   :  { %13855 = sst [smem:[#allocation72_spill]] %s13800_s13 }
   0xe   :  { %13856 = sst [smem:[#allocation73_spill]] %s13802_s15 }
   0xf   :  { %13857 = sst [smem:[#allocation74_spill]] %s13804_s17 }
  0x10   :  { %13858 = sst [smem:[#allocation75_spill]] %s13806_s19 }
  0x11   :  { %13859 = sst [smem:[#allocation76_spill]] %s13807_s20 }
  0x12   :  { %13860 = sst [smem:[#allocation77_spill]] %s13810_s23 }
  0x13   :  { %13861 = sst [smem:[#allocation78_spill]] %s13812_s25 }
  0x14   :  { %30 = vsyncpa [#allocation7], 0 }
  0x15   :  { %31 = vsyncpa [#allocation10], 0 }
  0x16   :  { %32 = vsyncpa [#allocation13], 0 }
  0x17   :  { %33 = vsyncpa [#allocation16], 0 }
  0x18   :  { %34 = vsyncpa [#allocation19], 0 }
  0x19   :  { %35 = vsyncpa [#allocation22], 0 }
  0x1a   :  { %36 = vsyncpa [#allocation25], 0 }
  0x1b   :  { %37 = vsyncpa [#allocation28], 0 }
  0x1c   :  { %38 = vsyncpa [#allocation31], 0 }
  0x1d   :  { %39 = vsyncpa [#allocation34], 0 }
  0x1e   :  { %40 = vsyncpa [#allocation37], 0 }
  0x1f   :  { %41 = vsyncpa [#allocation8], 0 }
  0x20   :  { %43 = vsyncpa [#allocation8 + $0x1], 0  ;;  %s11336_s29 = smov 0   ;;  %s11338_s2 = smov 0  }
  0x21   :  { %s11340_s6 = smov 0   ;;  %s11342_s30 = smov 0  }
  0x22 LB: > { %13862 = sst [smem:[#allocation52_spill]] %s11161_s29  ;;  %s11357_s7 = sadd.s32 4294967295, %s11173_s30   ;;  %s11173_s30 = sphi %s11342_s30, %s13928_s30   ;;  %s11169_s6 = sphi %s11340_s6, %s13931_s6   ;;  %s11165_s2 = sphi %s11338_s2, %s13930_s2   ;;  %s11161_s29 = sphi %s11336_s29, %s13929_s29  }
  0x23   : > { %13863 = sst [smem:[#allocation53_spill]] %s11165_s2  ;;  %s7376_s3 = sadd.s32 4294967294, %s11173_s30  }
  0x24   : > { %13864 = sst [smem:[#allocation54_spill]] %s11169_s6  ;;  %s11361_s26 = sadd.s32 1, %s11173_s30  }
  0x25   : > { %13865 = sst [smem:[#allocation55_spill]] %s11173_s30  ;;  %s586_s1 = sadd.s32 1, %s11169_s6 }
  0x26   : > { %13866 = sst [smem:[#allocation56_spill]] %s11361_s26  ;;  %s583_s8 = ssub.s32 %s11173_s30, %s11361_s26 }
  0x27   : > { %p596_p0 = scmp.ne.s32.totalorder %s11169_s6, %s11165_s2  ;;  %p584_p1 = scmp.eq.s32.totalorder %s583_s8, 0 }
  0x28   : > { %p597_p2 = scmp.eq.s32.totalorder %s11357_s7, 1  ;;  %p602_p3 = scmp.ne.s32.totalorder %s11165_s2, %s11161_s29 }
  0x29   : > { %p603_p4 = scmp.eq.s32.totalorder %s7376_s3, 1  ;;  %p7377_p7 = scmp.ge.s32.totalorder %s11173_s30, 1 }
  0x2a   : > { %s11372_s27 = scalar_select %p584_p1, %s11169_s6, %s586_s1  }
  0x2b   : > { %p11374_p5 = por %p597_p2, %p596_p0  ;;  %p11378_p6 = por %p603_p4, %p602_p3 }
  0x2c   : > { %13867 = sst [smem:[#allocation57_spill]] %s11372_s27  ;;  %p610_p8 = scmp.lt.s32.totalorder %s11173_s30, 3 }
  0x2d   : > { %s13868_s4 = scalar_select %p11374_p5, 1, 0 }
  0x2e   : > { %s13870_s28 = scalar_select %p11378_p6, 1, 0 }
  0x2f   : > { %13869 = sst [smem:[#allocation58_spill]] %s13868_s4  ;;  %p13831_p9 = scmp.eq.s32.totalorder %s11357_s7, 0 }
  0x30   : > { %13871 = sst [smem:[#allocation59_spill]] %s13870_s28  ;;  %p11385_p10 = pnand %p7377_p7, %p610_p8 }
  0x31   : > { %s11175_s5 = smov [#allocation9]   ;;  %s11176_s3 = smov [#allocation12]  }
  0x32   : > { %s13872_s9 = scalar_select %p11385_p10, 1, 0 }
  0x33   : > { %s636_s0 = sshll.u32 %s11175_s5, 4  ;;  %p10299_p11 = pneg %p11385_p10  ;;  %s637_s0 = int_to_ptr.vmem [resolvable:$true] %s636_s0 }
  0x34   : > { %s660_s1 = sshll.u32 %s11176_s3, 4  ;;  %s11177_s27 = smov [#allocation15]   ;;  %s11397_s1 = int_to_ptr.vmem [resolvable:$true] %s660_s1 }
  0x35   : > { %p11393_p12 = pnand %p13831_p9, %p10299_p11  ;;  %s682_s6 = sshll.u32 %s11177_s27, 4  ;;  %s11399_s6 = int_to_ptr.vmem [resolvable:$true] %s682_s6 }
  0x36   : > { %s13874_s5 = sld [smem:[#allocation62_spill]] }
  0x37   : > { %p11409_p0 = pneg %p11393_p12 }
  0x3c   : > { %s10479_s29 = scalar_lea.hbm %s13874_s5, 16 }
  0x3d   : > { %p10480_p13 = scmp.ne.s32.totalorder %s13874_s5, %s10479_s29  ;;  %p10486_p3 = scmp.lt.u32.totalorder %s10479_s29, %s13874_s5 }
  0x3f   : > { %p10482_p1 = pnand %p11409_p0, %p10480_p13 }
  0x41   : > { %p10483_p2 = pneg %p10482_p1 }
  0x43   : > { %p10488_p4 = pnand %p10486_p3, %p10483_p2 }
  0x45   : > { %10491 = shalt.err (!%p10488_p4)
}
  0x46   : > { %s10492_s26 = scalar_lea.vmem %s637_s0, 16  ;;  %s10499_s25 = scalar_lea.vmem %s637_s0, 32 }
  0x47   : > { %p10493_p7 = scmp.ne.s32.totalorder %s637_s0, %s10492_s26  ;;  %p10500_p9 = scmp.lt.s32.totalorder %s637_s0, %s637_s0 }
  0x48   : > { %p10501_p6 = scmp.lt.s32.totalorder %s10499_s25, %s10492_s26 }
  0x49   : > { %p10495_p8 = pnand %p10493_p7, %p11409_p0 }
  0x4a   : > { %p10502_p5 = por %p10501_p6, %p10500_p9 }
  0x4b   : > { %p10496_p11 = pneg %p10495_p8 }
  0x4d   : > { %p10503_p10 = pnand %p10502_p5, %p10496_p11 }
  0x4f   : > { %10506 = shalt.err (!%p10503_p10)
}
  0x50   : > { %10305 = dma.hbm_to_vmem [thread:$0]  (!%p11393_p12), %s13874_s5, 16, %s637_s0, [#allocation10]  }
  0x51   : > { %s13876_s27 = sld [smem:[#allocation64_spill]] }
  0x57   : > { %s10507_s2 = scalar_lea.hbm %s13876_s27, 16 }
  0x58   : > { %p10508_p13 = scmp.ne.s32.totalorder %s13876_s27, %s10507_s2  ;;  %p10514_p5 = scmp.lt.u32.totalorder %s10507_s2, %s13876_s27 }
  0x5a   : > { %p10510_p1 = pnand %p10508_p13, %p11409_p0 }
  0x5c   : > { %p10511_p6 = pneg %p10510_p1 }
  0x5e   : > { %p10516_p9 = pnand %p10514_p5, %p10511_p6 }
  0x60   : > { %10519 = shalt.err (!%p10516_p9)
}
  0x61   : > { %s10520_s0 = scalar_lea.vmem %s11397_s1, 16  ;;  %s10527_s19 = scalar_lea.vmem %s11397_s1, 32 }
  0x62   : > { %p10521_p10 = scmp.ne.s32.totalorder %s11397_s1, %s10520_s0  ;;  %p10528_p4 = scmp.lt.s32.totalorder %s11397_s1, %s11397_s1 }
  0x63   : > { %p10529_p7 = scmp.lt.s32.totalorder %s10527_s19, %s10520_s0 }
  0x64   : > { %p10523_p2 = pnand %p10521_p10, %p11409_p0 }
  0x65   : > { %p10530_p8 = por %p10529_p7, %p10528_p4 }
  0x66   : > { %p10524_p3 = pneg %p10523_p2 }
  0x68   : > { %p10531_p11 = pnand %p10530_p8, %p10524_p3 }
  0x6a   : > { %10534 = shalt.err (!%p10531_p11)
}
  0x6b   : > { %10311 = dma.hbm_to_vmem [thread:$0]  (!%p11393_p12), %s13876_s27, 16, %s11397_s1, [#allocation13]  }
  0x6c   : > { %s13877_s29 = sld [smem:[#allocation66_spill]] }
  0x72   : > { %s13878_s4 = smov %s13877_s29  ;;  %s10535_s26 = scalar_lea.hbm %s13877_s29, 16 }
  0x73   : > { %p10536_p13 = scmp.ne.s32.totalorder %s13878_s4, %s10535_s26  ;;  %p10542_p5 = scmp.lt.u32.totalorder %s10535_s26, %s13878_s4 }
  0x75   : > { %p10538_p1 = pnand %p10536_p13, %p11409_p0 }
  0x77   : > { %p10539_p6 = pneg %p10538_p1 }
  0x79   : > { %p10544_p9 = pnand %p10542_p5, %p10539_p6 }
  0x7b   : > { %10547 = shalt.err (!%p10544_p9)
}
  0x7c   : > { %s10548_s1 = scalar_lea.vmem %s11399_s6, 16  ;;  %s10555_s5 = scalar_lea.vmem %s11399_s6, 32 }
  0x7d   : > { %p10549_p10 = scmp.ne.s32.totalorder %s11399_s6, %s10548_s1  ;;  %p10556_p4 = scmp.lt.s32.totalorder %s11399_s6, %s11399_s6 }
  0x7e   : > { %p10557_p7 = scmp.lt.s32.totalorder %s10555_s5, %s10548_s1 }
  0x7f   : > { %p10551_p2 = pnand %p10549_p10, %p11409_p0 }
  0x80   : > { %p10558_p8 = por %p10557_p7, %p10556_p4 }
  0x81   : > { %p10552_p3 = pneg %p10551_p2 }
  0x83   : > { %p10559_p11 = pnand %p10558_p8, %p10552_p3 }
  0x85   : > { %10562 = shalt.err (!%p10559_p11)
}
  0x86   : > { %10317 = dma.hbm_to_vmem [thread:$0]  (!%p11393_p12), %s13878_s4, 16, %s11399_s6, [#allocation16]  }
  0x87   : > { %s11178_s30 = smov [#allocation18]   ;;  %s11179_s29 = smov [#allocation21]  }
  0x88   : > { %s706_s28 = sshll.u32 %s11178_s30, 4  ;;  %s730_s26 = sshll.u32 %s11179_s29, 4  ;;  %s707_s28 = int_to_ptr.vmem [resolvable:$true] %s706_s28  ;;  %s731_s26 = int_to_ptr.vmem [resolvable:$true] %s730_s26 }
  0x89   : > { %s13879_s19 = sld [smem:[#allocation68_spill]] }
  0x8f   : > { %s10563_s1 = scalar_lea.hbm %s13879_s19, 16 }
  0x90   : > { %p10564_p13 = scmp.ne.s32.totalorder %s13879_s19, %s10563_s1  ;;  %p10570_p5 = scmp.lt.u32.totalorder %s10563_s1, %s13879_s19 }
  0x92   : > { %p10566_p1 = pnand %p10564_p13, %p11409_p0 }
  0x94   : > { %p10567_p6 = pneg %p10566_p1 }
  0x96   : > { %p10572_p9 = pnand %p10570_p5, %p10567_p6 }
  0x98   : > { %10575 = shalt.err (!%p10572_p9)
}
  0x99   : > { %s10576_s6 = scalar_lea.vmem %s707_s28, 16  ;;  %s10583_s2 = scalar_lea.vmem %s707_s28, 32 }
  0x9a   : > { %p10577_p10 = scmp.ne.s32.totalorder %s707_s28, %s10576_s6  ;;  %p10584_p4 = scmp.lt.s32.totalorder %s707_s28, %s707_s28 }
  0x9b   : > { %p10585_p7 = scmp.lt.s32.totalorder %s10583_s2, %s10576_s6 }
  0x9c   : > { %p10579_p2 = pnand %p10577_p10, %p11409_p0 }
  0x9d   : > { %p10586_p8 = por %p10585_p7, %p10584_p4 }
  0x9e   : > { %p10580_p3 = pneg %p10579_p2 }
  0xa0   : > { %p10587_p11 = pnand %p10586_p8, %p10580_p3 }
  0xa2   : > { %10590 = shalt.err (!%p10587_p11)
}
  0xa3   : > { %10323 = dma.hbm_to_vmem [thread:$0]  (!%p11393_p12), %s13879_s19, 16, %s707_s28, [#allocation19]  }
  0xa4   : > { %s13880_s10 = sld [smem:[#allocation70_spill]] }
  0xaa   : > { %s10591_s25 = scalar_lea.hbm %s13880_s10, 16 }
  0xab   : > { %p10592_p13 = scmp.ne.s32.totalorder %s13880_s10, %s10591_s25  ;;  %p10598_p5 = scmp.lt.u32.totalorder %s10591_s25, %s13880_s10 }
  0xad   : > { %p10594_p1 = pnand %p10592_p13, %p11409_p0 }
  0xaf   : > { %p10595_p6 = pneg %p10594_p1 }
  0xb1   : > { %p10600_p9 = pnand %p10598_p5, %p10595_p6 }
  0xb3   : > { %10603 = shalt.err (!%p10600_p9)
}
  0xb4   : > { %s10604_s6 = scalar_lea.vmem %s731_s26, 16  ;;  %s10611_s28 = scalar_lea.vmem %s731_s26, 32 }
  0xb5   : > { %p10605_p10 = scmp.ne.s32.totalorder %s731_s26, %s10604_s6  ;;  %p10612_p4 = scmp.lt.s32.totalorder %s731_s26, %s731_s26 }
  0xb6   : > { %p10613_p7 = scmp.lt.s32.totalorder %s10611_s28, %s10604_s6 }
  0xb7   : > { %p10607_p2 = pnand %p10605_p10, %p11409_p0 }
  0xb8   : > { %p10614_p8 = por %p10613_p7, %p10612_p4 }
  0xb9   : > { %p10608_p3 = pneg %p10607_p2 }
  0xbb   : > { %p10615_p11 = pnand %p10614_p8, %p10608_p3 }
  0xbd   : > { %10618 = shalt.err (!%p10615_p11)
}
  0xbe   : > { %10329 = dma.hbm_to_vmem [thread:$0]  (!%p11393_p12), %s13880_s10, 16, %s731_s26, [#allocation22]  }
  0xbf   : > { %s11180_s30 = smov [#allocation24]   ;;  %s13881_s12 = sld [smem:[#allocation71_spill]] }
  0xc0   : > { %s754_s13 = sshll.u32 %s11180_s30, 4  ;;  %s755_s13 = int_to_ptr.vmem [resolvable:$true] %s754_s13 }
  0xc5   : > { %s10619_s0 = scalar_lea.hbm %s13881_s12, 16 }
  0xc6   : > { %p10620_p13 = scmp.ne.s32.totalorder %s13881_s12, %s10619_s0  ;;  %p10626_p5 = scmp.lt.u32.totalorder %s10619_s0, %s13881_s12 }
  0xc8   : > { %p10622_p1 = pnand %p10620_p13, %p11409_p0 }
  0xca   : > { %p10623_p6 = pneg %p10622_p1 }
  0xcc   : > { %p10628_p9 = pnand %p10626_p5, %p10623_p6 }
  0xce   : > { %10631 = shalt.err (!%p10628_p9)
}
  0xcf   : > { %s10632_s26 = scalar_lea.vmem %s755_s13, 16  ;;  %s10639_s28 = scalar_lea.vmem %s755_s13, 32 }
  0xd0   : > { %p10633_p10 = scmp.ne.s32.totalorder %s755_s13, %s10632_s26  ;;  %p10640_p4 = scmp.lt.s32.totalorder %s755_s13, %s755_s13 }
  0xd1   : > { %p10641_p7 = scmp.lt.s32.totalorder %s10639_s28, %s10632_s26 }
  0xd2   : > { %p10635_p2 = pnand %p10633_p10, %p11409_p0 }
  0xd3   : > { %p10642_p8 = por %p10641_p7, %p10640_p4 }
  0xd4   : > { %p10636_p3 = pneg %p10635_p2 }
  0xd6   : > { %p10643_p11 = pnand %p10642_p8, %p10636_p3 }
  0xd8   : > { %10646 = shalt.err (!%p10643_p11)
}
  0xd9   : > { %10335 = dma.hbm_to_vmem [thread:$0]  (!%p11393_p12), %s13881_s12, 16, %s755_s13, [#allocation25]  }
  0xda   : > { %s11181_s30 = smov [#allocation27]   ;;  %s13882_s15 = sld [smem:[#allocation73_spill]] }
  0xdb   : > { %s778_s29 = sshll.u32 %s11181_s30, 4  ;;  %s779_s29 = int_to_ptr.vmem [resolvable:$true] %s778_s29 }
  0xe0   : > { %s10647_s1 = scalar_lea.hbm %s13882_s15, 40960 }
  0xe1   : > { %p10648_p13 = scmp.ne.s32.totalorder %s13882_s15, %s10647_s1  ;;  %p10654_p5 = scmp.lt.u32.totalorder %s10647_s1, %s13882_s15 }
  0xe3   : > { %p10650_p1 = pnand %p10648_p13, %p11409_p0 }
  0xe5   : > { %p10651_p6 = pneg %p10650_p1 }
  0xe7   : > { %p10656_p9 = pnand %p10654_p5, %p10651_p6 }
  0xe9   : > { %10659 = shalt.err (!%p10656_p9)
}
  0xea   : > { %s10660_s13 = scalar_lea.vmem %s779_s29, 40960  ;;  %p10668_p4 = scmp.lt.s32.totalorder %s779_s29, %s779_s29 }
  0xeb   : > { %p10661_p10 = scmp.ne.s32.totalorder %s779_s29, %s10660_s13  ;;  %p10669_p7 = scmp.lt.s32.totalorder %s10660_s13, %s10660_s13 }
  0xed   : > { %p10663_p2 = pnand %p10661_p10, %p11409_p0  ;;  %p10670_p8 = por %p10669_p7, %p10668_p4 }
  0xef   : > { %p10664_p3 = pneg %p10663_p2 }
  0xf1   : > { %p10671_p11 = pnand %p10670_p8, %p10664_p3 }
  0xf3   : > { %10674 = shalt.err (!%p10671_p11)
}
  0xf4   : > { %s11182_s28 = smov 256   ;;  %s11183_s2 = smov 16  }
  0xf5   : > { %10341 = dma.hbm_to_vmem [thread:$0]  (!%p11393_p12), %s13882_s15, 40960, %s779_s29, [#allocation28], %s11182_s28, %s11182_s28, %s11183_s2  }
  0xf6   : > { %s11184_s25 = smov [#allocation30]   ;;  %s11185_s1 = smov [#allocation33]  }
  0xf7   : > { %s802_s0 = sshll.u32 %s11184_s25, 4  ;;  %s830_s5 = sshll.u32 %s11185_s1, 4  ;;  %s803_s0 = int_to_ptr.vmem [resolvable:$true] %s802_s0  ;;  %s831_s5 = int_to_ptr.vmem [resolvable:$true] %s830_s5 }
  0xf8   : > { %s13883_s17 = sld [smem:[#allocation74_spill]] }
  0xfe   : > { %s10675_s26 = scalar_lea.hbm %s13883_s17, 4096 }
  0xff   : > { %p10676_p13 = scmp.ne.s32.totalorder %s13883_s17, %s10675_s26  ;;  %p10682_p5 = scmp.lt.u32.totalorder %s10675_s26, %s13883_s17 }
 0x101   : > { %p10678_p1 = pnand %p10676_p13, %p11409_p0 }
 0x103   : > { %p10679_p6 = pneg %p10678_p1 }
 0x105   : > { %p10684_p9 = pnand %p10682_p5, %p10679_p6 }
 0x107   : > { %10687 = shalt.err (!%p10684_p9)
}
 0x108   : > { %s10688_s29 = scalar_lea.vmem %s803_s0, 4096  ;;  %p10696_p4 = scmp.lt.s32.totalorder %s803_s0, %s803_s0 }
 0x109   : > { %p10689_p10 = scmp.ne.s32.totalorder %s803_s0, %s10688_s29  ;;  %p10697_p7 = scmp.lt.s32.totalorder %s10688_s29, %s10688_s29 }
 0x10b   : > { %p10691_p2 = pnand %p10689_p10, %p11409_p0  ;;  %p10698_p8 = por %p10697_p7, %p10696_p4 }
 0x10d   : > { %p10692_p3 = pneg %p10691_p2 }
 0x10f   : > { %p10699_p11 = pnand %p10698_p8, %p10692_p3 }
 0x111   : > { %10702 = shalt.err (!%p10699_p11)
}
 0x112   : > { %10347 = dma.hbm_to_vmem [thread:$0]  (!%p11393_p12), %s13883_s17, 4096, %s803_s0, [#allocation31], %s11182_s28, %s11182_s28, %s11183_s2  }
 0x113   : > { %s13884_s20 = sld [smem:[#allocation76_spill]] }
 0x119   : > { %s10703_s30 = scalar_lea.hbm %s13884_s20, 16 }
 0x11a   : > { %p10704_p13 = scmp.ne.s32.totalorder %s13884_s20, %s10703_s30  ;;  %p10710_p5 = scmp.lt.u32.totalorder %s10703_s30, %s13884_s20 }
 0x11c   : > { %p10706_p1 = pnand %p10704_p13, %p11409_p0 }
 0x11e   : > { %p10707_p6 = pneg %p10706_p1 }
 0x120   : > { %p10712_p9 = pnand %p10710_p5, %p10707_p6 }
 0x122   : > { %10715 = shalt.err (!%p10712_p9)
}
 0x123   : > { %s10716_s26 = scalar_lea.vmem %s831_s5, 16  ;;  %s10723_s28 = scalar_lea.vmem %s831_s5, 32 }
 0x124   : > { %p10717_p10 = scmp.ne.s32.totalorder %s831_s5, %s10716_s26  ;;  %p10724_p4 = scmp.lt.s32.totalorder %s831_s5, %s831_s5 }
 0x125   : > { %p10725_p7 = scmp.lt.s32.totalorder %s10723_s28, %s10716_s26 }
 0x126   : > { %p10719_p2 = pnand %p10717_p10, %p11409_p0 }
 0x127   : > { %p10726_p8 = por %p10725_p7, %p10724_p4 }
 0x128   : > { %p10720_p3 = pneg %p10719_p2 }
 0x12a   : > { %p10727_p11 = pnand %p10726_p8, %p10720_p3 }
 0x12c   : > { %10730 = shalt.err (!%p10727_p11)
}
 0x12d   : > { %10353 = dma.hbm_to_vmem [thread:$0]  (!%p11393_p12), %s13884_s20, 16, %s831_s5, [#allocation34]  }
 0x12e   : > { %s11186_s29 = smov [#allocation36]   ;;  %s11187_s27 = smov [#allocation6]  }
 0x12f   : > { %s854_s4 = sshll.u32 %s11186_s29, 4  ;;  %s622_s10 = sshll.u32 %s11187_s27, 4  ;;  %s855_s4 = int_to_ptr.vmem [resolvable:$true] %s854_s4  ;;  %s623_s10 = int_to_ptr.vmem [resolvable:$true] %s622_s10 }
 0x130   : > { %s10731_s25 = scalar_lea.hbm %s13809_s22, 16 }
 0x131   : > { %p10732_p13 = scmp.ne.s32.totalorder %s13809_s22, %s10731_s25  ;;  %p10738_p5 = scmp.lt.u32.totalorder %s10731_s25, %s13809_s22 }
 0x133   : > { %p10734_p1 = pnand %p10732_p13, %p11409_p0 }
 0x135   : > { %p10735_p6 = pneg %p10734_p1 }
 0x137   : > { %p10740_p9 = pnand %p10738_p5, %p10735_p6 }
 0x139   : > { %10743 = shalt.err (!%p10740_p9)
}
 0x13a   : > { %s10744_s5 = scalar_lea.vmem %s855_s4, 16  ;;  %s10751_s28 = scalar_lea.vmem %s855_s4, 32 }
 0x13b   : > { %p10745_p10 = scmp.ne.s32.totalorder %s855_s4, %s10744_s5  ;;  %p10752_p4 = scmp.lt.s32.totalorder %s855_s4, %s855_s4 }
 0x13c   : > { %p10753_p7 = scmp.lt.s32.totalorder %s10751_s28, %s10744_s5 }
 0x13d   : > { %p10747_p2 = pnand %p10745_p10, %p11409_p0 }
 0x13e   : > { %p10754_p8 = por %p10753_p7, %p10752_p4 }
 0x13f   : > { %p10748_p3 = pneg %p10747_p2 }
 0x141   : > { %p10755_p11 = pnand %p10754_p8, %p10748_p3 }
 0x143   : > { %10758 = shalt.err (!%p10755_p11)
}
 0x144   : > { %10359 = dma.hbm_to_vmem [thread:$0]  (!%p11393_p12), %s13809_s22, 16, %s855_s4, [#allocation37]  }
 0x145   : > { %s13885_s12 = sld [smem:[#allocation61_spill]] }
 0x14b   : > { %s10759_s30 = scalar_lea.hbm %s13885_s12, 80 }
 0x14c   : > { %p10760_p13 = scmp.ne.s32.totalorder %s13885_s12, %s10759_s30  ;;  %p10766_p5 = scmp.lt.u32.totalorder %s10759_s30, %s13885_s12 }
 0x14e   : > { %p10762_p1 = pnand %p10760_p13, %p11409_p0 }
 0x150   : > { %p10763_p6 = pneg %p10762_p1 }
 0x152   : > { %p10768_p9 = pnand %p10766_p5, %p10763_p6 }
 0x154   : > { %10771 = shalt.err (!%p10768_p9)
}
 0x155   : > { %s10772_s26 = scalar_lea.vmem %s623_s10, 80  ;;  %s10779_s4 = scalar_lea.vmem %s623_s10, 96 }
 0x156   : > { %p10773_p10 = scmp.ne.s32.totalorder %s623_s10, %s10772_s26  ;;  %p10780_p4 = scmp.lt.s32.totalorder %s623_s10, %s623_s10 }
 0x157   : > { %p10781_p7 = scmp.lt.s32.totalorder %s10779_s4, %s10772_s26 }
 0x158   : > { %p10775_p2 = pnand %p10773_p10, %p11409_p0 }
 0x159   : > { %p10782_p8 = por %p10781_p7, %p10780_p4 }
 0x15a   : > { %p10776_p3 = pneg %p10775_p2 }
 0x15c   : > { %p10783_p11 = pnand %p10782_p8, %p10776_p3 }
 0x15e   : > { %10786 = shalt.err (!%p10783_p11)
}
 0x15f   : > { %s11188_s5 = smov 1   ;;  %s11189_s13 = smov [#allocation11]  }
 0x160   : > { %10302 = dma.hbm_to_vmem [thread:$0]  (!%p11393_p12), %s13885_s12, 80, %s623_s10, [#allocation7], %s11183_s2, %s11183_s2, %s11188_s5  }
 0x161   : > { %s646_s29 = sshll.u32 %s11189_s13, 4  ;;  %s13886_s25 = sld [smem:[#allocation63_spill]]  ;;  %s647_s29 = int_to_ptr.vmem [resolvable:$true] %s646_s29 }
 0x167   : > { %s10787_s1 = scalar_lea.hbm %s13886_s25, 5120 }
 0x168   : > { %p10788_p13 = scmp.ne.s32.totalorder %s13886_s25, %s10787_s1  ;;  %p10794_p5 = scmp.lt.u32.totalorder %s10787_s1, %s13886_s25 }
 0x16a   : > { %p10790_p1 = pnand %p10788_p13, %p11409_p0 }
 0x16c   : > { %p10791_p6 = pneg %p10790_p1 }
 0x16e   : > { %p10796_p9 = pnand %p10794_p5, %p10791_p6 }
 0x170   : > { %10799 = shalt.err (!%p10796_p9)
}
 0x171   : > { %s10800_s2 = scalar_lea.vmem %s647_s29, 5120  ;;  %p10808_p4 = scmp.lt.s32.totalorder %s647_s29, %s647_s29 }
 0x172   : > { %p10801_p10 = scmp.ne.s32.totalorder %s647_s29, %s10800_s2  ;;  %p10809_p7 = scmp.lt.s32.totalorder %s10800_s2, %s10800_s2 }
 0x174   : > { %p10803_p2 = pnand %p10801_p10, %p11409_p0  ;;  %p10810_p8 = por %p10809_p7, %p10808_p4 }
 0x176   : > { %p10804_p3 = pneg %p10803_p2 }
 0x178   : > { %p10811_p11 = pnand %p10810_p8, %p10804_p3 }
 0x17a   : > { %10814 = shalt.err (!%p10811_p11)
}
 0x17b   : > { %s11190_s10 = smov 128   ;;  %s11191_s5 = smov 8  }
 0x17c   : > { %10308 = dma.hbm_to_vmem [thread:$0]  (!%p11393_p12), %s13886_s25, 5120, %s647_s29, [#allocation10], %s11190_s10, %s11190_s10, %s11191_s5  }
 0x17d   : > { %s11192_s13 = smov [#allocation14]   ;;  %s11193_s30 = smov [#allocation17]  }
 0x17e   : > { %s671_s27 = sshll.u32 %s11192_s13, 4  ;;  %s692_s1 = sshll.u32 %s11193_s30, 4  ;;  %s672_s27 = int_to_ptr.vmem [resolvable:$true] %s671_s27  ;;  %s693_s1 = int_to_ptr.vmem [resolvable:$true] %s692_s1 }
 0x17f   : > { %s13887_s26 = sld [smem:[#allocation65_spill]] }
 0x185   : > { %s10815_s4 = scalar_lea.hbm %s13887_s26, 16 }
 0x186   : > { %p10816_p13 = scmp.ne.s32.totalorder %s13887_s26, %s10815_s4  ;;  %p10822_p5 = scmp.lt.u32.totalorder %s10815_s4, %s13887_s26 }
 0x188   : > { %p10818_p1 = pnand %p10816_p13, %p11409_p0 }
 0x18a   : > { %p10819_p6 = pneg %p10818_p1 }
 0x18c   : > { %p10824_p9 = pnand %p10822_p5, %p10819_p6 }
 0x18e   : > { %10827 = shalt.err (!%p10824_p9)
}
 0x18f   : > { %s10828_s29 = scalar_lea.vmem %s672_s27, 16  ;;  %s10835_s28 = scalar_lea.vmem %s672_s27, 32 }
 0x190   : > { %p10829_p10 = scmp.ne.s32.totalorder %s672_s27, %s10828_s29  ;;  %p10836_p4 = scmp.lt.s32.totalorder %s672_s27, %s672_s27 }
 0x191   : > { %p10837_p7 = scmp.lt.s32.totalorder %s10835_s28, %s10828_s29 }
 0x192   : > { %p10831_p2 = pnand %p10829_p10, %p11409_p0 }
 0x193   : > { %p10838_p8 = por %p10837_p7, %p10836_p4 }
 0x194   : > { %p10832_p3 = pneg %p10831_p2 }
 0x196   : > { %p10839_p11 = pnand %p10838_p8, %p10832_p3 }
 0x198   : > { %10842 = shalt.err (!%p10839_p11)
}
 0x199   : > { %10314 = dma.hbm_to_vmem [thread:$0]  (!%p11393_p12), %s13887_s26, 16, %s672_s27, [#allocation13]  }
 0x19a   : > { %s13888_s13 = sld [smem:[#allocation67_spill]] }
 0x1a0   : > { %s10843_s30 = scalar_lea.hbm %s13888_s13, 5120 }
 0x1a1   : > { %p10844_p13 = scmp.ne.s32.totalorder %s13888_s13, %s10843_s30  ;;  %p10850_p5 = scmp.lt.u32.totalorder %s10843_s30, %s13888_s13 }
 0x1a3   : > { %p10846_p1 = pnand %p10844_p13, %p11409_p0 }
 0x1a5   : > { %p10847_p6 = pneg %p10846_p1 }
 0x1a7   : > { %p10852_p9 = pnand %p10850_p5, %p10847_p6 }
 0x1a9   : > { %10855 = shalt.err (!%p10852_p9)
}
 0x1aa   : > { %s10856_s29 = scalar_lea.vmem %s693_s1, 5120  ;;  %p10864_p4 = scmp.lt.s32.totalorder %s693_s1, %s693_s1 }
 0x1ab   : > { %p10857_p10 = scmp.ne.s32.totalorder %s693_s1, %s10856_s29  ;;  %p10865_p7 = scmp.lt.s32.totalorder %s10856_s29, %s10856_s29 }
 0x1ad   : > { %p10859_p2 = pnand %p10857_p10, %p11409_p0  ;;  %p10866_p8 = por %p10865_p7, %p10864_p4 }
 0x1af   : > { %p10860_p3 = pneg %p10859_p2 }
 0x1b1   : > { %p10867_p11 = pnand %p10866_p8, %p10860_p3 }
 0x1b3   : > { %10870 = shalt.err (!%p10867_p11)
}
 0x1b4   : > { %10320 = dma.hbm_to_vmem [thread:$0]  (!%p11393_p12), %s13888_s13, 5120, %s693_s1, [#allocation16], %s11190_s10, %s11190_s10, %s11191_s5  }
 0x1b5   : > { %s11194_s12 = smov [#allocation20]   ;;  %s11195_s15 = smov [#allocation23]  }
 0x1b6   : > { %s716_s0 = sshll.u32 %s11194_s12, 4  ;;  %s740_s17 = sshll.u32 %s11195_s15, 4  ;;  %s717_s0 = int_to_ptr.vmem [resolvable:$true] %s716_s0  ;;  %s741_s17 = int_to_ptr.vmem [resolvable:$true] %s740_s17 }
 0x1b7   : > { %s13889_s6 = sld [smem:[#allocation69_spill]] }
 0x1bd   : > { %s13890_s4 = smov %s13889_s6  ;;  %s10871_s2 = scalar_lea.hbm %s13889_s6, 10240 }
 0x1be   : > { %p10872_p13 = scmp.ne.s32.totalorder %s13890_s4, %s10871_s2  ;;  %p10878_p5 = scmp.lt.u32.totalorder %s10871_s2, %s13890_s4 }
 0x1c0   : > { %p10874_p1 = pnand %p10872_p13, %p11409_p0 }
 0x1c2   : > { %p10875_p6 = pneg %p10874_p1 }
 0x1c4   : > { %p10880_p9 = pnand %p10878_p5, %p10875_p6 }
 0x1c6   : > { %10883 = shalt.err (!%p10880_p9)
}
 0x1c7   : > { %s10884_s1 = scalar_lea.vmem %s717_s0, 10240  ;;  %p10892_p4 = scmp.lt.s32.totalorder %s717_s0, %s717_s0 }
 0x1c8   : > { %p10885_p10 = scmp.ne.s32.totalorder %s717_s0, %s10884_s1  ;;  %p10893_p7 = scmp.lt.s32.totalorder %s10884_s1, %s10884_s1 }
 0x1ca   : > { %p10887_p2 = pnand %p10885_p10, %p11409_p0  ;;  %p10894_p8 = por %p10893_p7, %p10892_p4 }
 0x1cc   : > { %p10888_p3 = pneg %p10887_p2 }
 0x1ce   : > { %p10895_p11 = pnand %p10894_p8, %p10888_p3 }
 0x1d0   : > { %10898 = shalt.err (!%p10895_p11)
}
 0x1d1   : > { %10326 = dma.hbm_to_vmem [thread:$0]  (!%p11393_p12), %s13890_s4, 10240, %s717_s0, [#allocation19], %s11190_s10, %s11190_s10, %s11191_s5  }
 0x1d2   : > { %s10899_s15 = scalar_lea.hbm %s13798_s11, 1024 }
 0x1d3   : > { %p10900_p13 = scmp.ne.s32.totalorder %s13798_s11, %s10899_s15  ;;  %p10906_p5 = scmp.lt.u32.totalorder %s10899_s15, %s13798_s11 }
 0x1d5   : > { %p10902_p1 = pnand %p10900_p13, %p11409_p0 }
 0x1d7   : > { %p10903_p6 = pneg %p10902_p1 }
 0x1d9   : > { %p10908_p9 = pnand %p10906_p5, %p10903_p6 }
 0x1db   : > { %10911 = shalt.err (!%p10908_p9)
}
 0x1dc   : > { %s10912_s29 = scalar_lea.vmem %s741_s17, 1024  ;;  %p10920_p4 = scmp.lt.s32.totalorder %s741_s17, %s741_s17 }
 0x1dd   : > { %p10913_p10 = scmp.ne.s32.totalorder %s741_s17, %s10912_s29  ;;  %p10921_p7 = scmp.lt.s32.totalorder %s10912_s29, %s10912_s29 }
 0x1df   : > { %p10915_p2 = pnand %p10913_p10, %p11409_p0  ;;  %p10922_p8 = por %p10921_p7, %p10920_p4 }
 0x1e1   : > { %p10916_p3 = pneg %p10915_p2 }
 0x1e3   : > { %p10923_p11 = pnand %p10922_p8, %p10916_p3 }
 0x1e5   : > { %10926 = shalt.err (!%p10923_p11)
}
 0x1e6   : > { %10332 = dma.hbm_to_vmem [thread:$0]  (!%p11393_p12), %s13798_s11, 1024, %s741_s17, [#allocation22], %s11190_s10, %s11190_s10, %s11191_s5  }
 0x1e7   : > { %s11196_s1 = smov [#allocation26]   ;;  %s11197_s19 = smov [#allocation29]  }
 0x1e8   : > { %s768_s20 = sshll.u32 %s11196_s1, 4  ;;  %s792_s28 = sshll.u32 %s11197_s19, 4  ;;  %s769_s20 = int_to_ptr.vmem [resolvable:$true] %s768_s20  ;;  %s793_s28 = int_to_ptr.vmem [resolvable:$true] %s792_s28 }
 0x1e9   : > { %s10927_s30 = scalar_lea.hbm %s13801_s14, 32 }
 0x1ea   : > { %p10928_p13 = scmp.ne.s32.totalorder %s13801_s14, %s10927_s30  ;;  %p10934_p5 = scmp.lt.u32.totalorder %s10927_s30, %s13801_s14 }
 0x1ec   : > { %p10930_p1 = pnand %p10928_p13, %p11409_p0 }
 0x1ee   : > { %p10931_p6 = pneg %p10930_p1 }
 0x1f0   : > { %p10936_p9 = pnand %p10934_p5, %p10931_p6 }
 0x1f2   : > { %10939 = shalt.err (!%p10936_p9)
}
 0x1f3   : > { %s10940_s17 = scalar_lea.vmem %s769_s20, 32  ;;  %p10948_p4 = scmp.lt.s32.totalorder %s769_s20, %s769_s20 }
 0x1f4   : > { %p10941_p10 = scmp.ne.s32.totalorder %s769_s20, %s10940_s17  ;;  %p10949_p7 = scmp.lt.s32.totalorder %s10940_s17, %s10940_s17 }
 0x1f6   : > { %p10943_p2 = pnand %p10941_p10, %p11409_p0  ;;  %p10950_p8 = por %p10949_p7, %p10948_p4 }
 0x1f8   : > { %p10944_p3 = pneg %p10943_p2 }
 0x1fa   : > { %p10951_p11 = pnand %p10950_p8, %p10944_p3 }
 0x1fc   : > { %10954 = shalt.err (!%p10951_p11)
}
 0x1fd   : > { %10338 = dma.hbm_to_vmem [thread:$0]  (!%p11393_p12), %s13801_s14, 32, %s769_s20, [#allocation25]  }
 0x1fe   : > { %s10955_s12 = scalar_lea.hbm %s13803_s16, 32 }
 0x1ff   : > { %p10956_p13 = scmp.ne.s32.totalorder %s13803_s16, %s10955_s12  ;;  %p10962_p5 = scmp.lt.u32.totalorder %s10955_s12, %s13803_s16 }
 0x201   : > { %p10958_p1 = pnand %p10956_p13, %p11409_p0 }
 0x203   : > { %p10959_p6 = pneg %p10958_p1 }
 0x205   : > { %p10964_p9 = pnand %p10962_p5, %p10959_p6 }
 0x207   : > { %10967 = shalt.err (!%p10964_p9)
}
 0x208   : > { %s10968_s2 = scalar_lea.vmem %s793_s28, 32  ;;  %p10976_p4 = scmp.lt.s32.totalorder %s793_s28, %s793_s28 }
 0x209   : > { %p10969_p10 = scmp.ne.s32.totalorder %s793_s28, %s10968_s2  ;;  %p10977_p7 = scmp.lt.s32.totalorder %s10968_s2, %s10968_s2 }
 0x20b   : > { %p10971_p2 = pnand %p10969_p10, %p11409_p0  ;;  %p10978_p8 = por %p10977_p7, %p10976_p4 }
 0x20d   : > { %p10972_p3 = pneg %p10971_p2 }
 0x20f   : > { %p10979_p11 = pnand %p10978_p8, %p10972_p3 }
 0x211   : > { %10982 = shalt.err (!%p10979_p11)
}
 0x212   : > { %10344 = dma.hbm_to_vmem [thread:$0]  (!%p11393_p12), %s13803_s16, 32, %s793_s28, [#allocation28]  }
 0x213   : > { %s11198_s17 = smov [#allocation32]   ;;  %s11199_s27 = smov [#allocation35]  }
 0x214   : > { %s816_s0 = sshll.u32 %s11198_s17, 4  ;;  %s840_s1 = sshll.u32 %s11199_s27, 4  ;;  %s817_s0 = int_to_ptr.vmem [resolvable:$true] %s816_s0  ;;  %s841_s1 = int_to_ptr.vmem [resolvable:$true] %s840_s1 }
 0x215   : > { %s10983_s15 = scalar_lea.hbm %s13805_s18, 32 }
 0x216   : > { %p10984_p13 = scmp.ne.s32.totalorder %s13805_s18, %s10983_s15  ;;  %p10990_p5 = scmp.lt.u32.totalorder %s10983_s15, %s13805_s18 }
 0x218   : > { %p10986_p1 = pnand %p10984_p13, %p11409_p0 }
 0x21a   : > { %p10987_p6 = pneg %p10986_p1 }
 0x21c   : > { %p10992_p9 = pnand %p10990_p5, %p10987_p6 }
 0x21e   : > { %10995 = shalt.err (!%p10992_p9)
}
 0x21f   : > { %s10996_s28 = scalar_lea.vmem %s817_s0, 32  ;;  %p11004_p4 = scmp.lt.s32.totalorder %s817_s0, %s817_s0 }
 0x220   : > { %p10997_p10 = scmp.ne.s32.totalorder %s817_s0, %s10996_s28  ;;  %p11005_p7 = scmp.lt.s32.totalorder %s10996_s28, %s10996_s28 }
 0x222   : > { %p10999_p2 = pnand %p10997_p10, %p11409_p0  ;;  %p11006_p8 = por %p11005_p7, %p11004_p4 }
 0x224   : > { %p11000_p3 = pneg %p10999_p2 }
 0x226   : > { %p11007_p11 = pnand %p11006_p8, %p11000_p3 }
 0x228   : > { %11010 = shalt.err (!%p11007_p11)
}
 0x229   : > { %10350 = dma.hbm_to_vmem [thread:$0]  (!%p11393_p12), %s13805_s18, 32, %s817_s0, [#allocation31]  }
 0x22a   : > { %s11011_s19 = scalar_lea.hbm %s13808_s21, 2560 }
 0x22b   : > { %p11012_p13 = scmp.ne.s32.totalorder %s13808_s21, %s11011_s19  ;;  %p11018_p5 = scmp.lt.u32.totalorder %s11011_s19, %s13808_s21 }
 0x22d   : > { %p11014_p1 = pnand %p11012_p13, %p11409_p0 }
 0x22f   : > { %p11015_p6 = pneg %p11014_p1 }
 0x231   : > { %p11020_p9 = pnand %p11018_p5, %p11015_p6 }
 0x233   : > { %11023 = shalt.err (!%p11020_p9)
}
 0x234   : > { %s11024_s6 = scalar_lea.vmem %s841_s1, 2560  ;;  %p11032_p4 = scmp.lt.s32.totalorder %s841_s1, %s841_s1 }
 0x235   : > { %p11025_p10 = scmp.ne.s32.totalorder %s841_s1, %s11024_s6  ;;  %p11033_p7 = scmp.lt.s32.totalorder %s11024_s6, %s11024_s6 }
 0x237   : > { %p11027_p2 = pnand %p11025_p10, %p11409_p0  ;;  %p11034_p8 = por %p11033_p7, %p11032_p4 }
 0x239   : > { %p11028_p3 = pneg %p11027_p2 }
 0x23b   : > { %p11035_p11 = pnand %p11034_p8, %p11028_p3 }
 0x23d   : > { %11038 = shalt.err (!%p11035_p11)
}
 0x23e   : > { %10356 = dma.hbm_to_vmem [thread:$0]  (!%p11393_p12), %s13808_s21, 2560, %s841_s1, [#allocation34], %s11190_s10, %s11190_s10, %s11191_s5  }
 0x23f   : > { %s11200_s28 = smov [#allocation38]   ;;  %s11039_s27 = scalar_lea.hbm %s13811_s24, 16 }
 0x240   : > { %s868_s20 = sshll.u32 %s11200_s28, 4  ;;  %p11040_p13 = scmp.ne.s32.totalorder %s13811_s24, %s11039_s27  ;;  %s869_s20 = int_to_ptr.vmem [resolvable:$true] %s868_s20 }
 0x241   : > { %p11046_p5 = scmp.lt.u32.totalorder %s11039_s27, %s13811_s24 }
 0x242   : > { %p11042_p1 = pnand %p11040_p13, %p11409_p0 }
 0x244   : > { %p11043_p6 = pneg %p11042_p1 }
 0x246   : > { %p11048_p9 = pnand %p11046_p5, %p11043_p6 }
 0x248   : > { %11051 = shalt.err (!%p11048_p9)
}
 0x249   : > { %s11052_s10 = scalar_lea.vmem %s869_s20, 16  ;;  %s11059_s5 = scalar_lea.vmem %s869_s20, 32 }
 0x24a   : > { %p11053_p10 = scmp.ne.s32.totalorder %s869_s20, %s11052_s10  ;;  %p11060_p4 = scmp.lt.s32.totalorder %s869_s20, %s869_s20 }
 0x24b   : > { %p11061_p7 = scmp.lt.s32.totalorder %s11059_s5, %s11052_s10 }
 0x24c   : > { %p11055_p2 = pnand %p11053_p10, %p11409_p0 }
 0x24d   : > { %p11062_p8 = por %p11061_p7, %p11060_p4 }
 0x24e   : > { %p11056_p3 = pneg %p11055_p2 }
 0x250   : > { %p11063_p11 = pnand %p11062_p8, %p11056_p3 }
 0x252   : > { %11066 = shalt.err (!%p11063_p11)
}
 0x253   : > { %10362 = dma.hbm_to_vmem [thread:$0]  (!%p11393_p12), %s13811_s24, 16, %s869_s20, [#allocation37]  }
 0x254   : > { %p13891_p13 = scmp.ne.s32.totalorder %s13872_s9, 0 }
 0x255   : > { %p13892_p1 = scmp.eq.s32.totalorder (!%p13891_p13), %s11357_s7, 0 }
 0x256   : > { %889 = sbr.rel (%p13891_p13) target bundleno = 3821 (0xeed), region = 120 }
 0x25d   : > { %11112 = dma.done.wait (%p13892_p1), [#allocation7], 80   ;;  %p13893_p0 = pmov %p13892_p1 }
 0x25f   : > { %11114 = vsyncadd (%p13893_p0), [#allocation7], 4294967216  ;;  %p13894_p6 = pmov %p13893_p0 }
 0x260   : > { %p13895_p5 = pmov %p13893_p0 }
 0x261   : > { %11116 = dma.done.wait (%p13894_p6), [#allocation10], 5136  }
 0x262   : > { %11118 = vsyncadd (%p13895_p5), [#allocation10], 4294962160  ;;  %p13896_p9 = pmov %p13893_p0 }
 0x263   : > { %p13897_p12 = pmov %p13893_p0 }
 0x264   : > { %11120 = dma.done.wait (%p13896_p9), [#allocation13], 32  }
 0x265   : > { %11122 = vsyncadd (%p13897_p12), [#allocation13], 4294967264  ;;  %p13898_p10 = pmov %p13893_p0 }
 0x266   : > { %p13899_p2 = pmov %p13893_p0 }
 0x267   : > { %11124 = dma.done.wait (%p13898_p10), [#allocation16], 5136  }
 0x268   : > { %11126 = vsyncadd (%p13899_p2), [#allocation16], 4294962160  ;;  %p13900_p3 = pmov %p13893_p0 }
 0x269   : > { %p13901_p4 = pmov %p13893_p0 }
 0x26a   : > { %11128 = dma.done.wait (%p13900_p3), [#allocation19], 10256  }
 0x26b   : > { %11130 = vsyncadd (%p13901_p4), [#allocation19], 4294957040  ;;  %p13902_p7 = pmov %p13893_p0 }
 0x26c   : > { %p13903_p8 = pmov %p13893_p0 }
 0x26d   : > { %11132 = dma.done.wait (%p13902_p7), [#allocation22], 1040  }
 0x26e   : > { %11134 = vsyncadd (%p13903_p8), [#allocation22], 4294966256  ;;  %p13904_p11 = pmov %p13893_p0 }
 0x26f   : > { %p13905_p13 = pmov %p13893_p0 }
 0x270   : > { %11136 = dma.done.wait (%p13904_p11), [#allocation25], 48  }
 0x271   : > { %11138 = vsyncadd (%p13905_p13), [#allocation25], 4294967248  ;;  %p13906_p1 = pmov %p13893_p0 }
 0x273   : > { %11140 = dma.done.wait (%p13906_p1), [#allocation28], 40992  }
 0x274   : > { %11142 = vsyncadd (%p13893_p0), [#allocation28], 4294926304  ;;  %p13907_p6 = pmov %p13893_p0 }
 0x275   : > { %p13908_p5 = pmov %p13893_p0 }
 0x276   : > { %11144 = dma.done.wait (%p13907_p6), [#allocation31], 4128  }
 0x277   : > { %11146 = vsyncadd (%p13908_p5), [#allocation31], 4294963168  ;;  %p13909_p9 = pmov %p13893_p0 }
 0x278   : > { %p13910_p12 = pmov %p13893_p0 }
 0x279   : > { %11148 = dma.done.wait (%p13909_p9), [#allocation34], 2576  }
 0x27a   : > { %11150 = vsyncadd (%p13910_p12), [#allocation34], 4294964720  ;;  %p13911_p10 = pmov %p13893_p0 }
 0x27b   : > { %p13912_p2 = pmov %p13893_p0 }
 0x27c   : > { %11152 = dma.done.wait (%p13911_p10), [#allocation37], 32  }
 0x27d   : > { %11154 = vsyncadd (%p13912_p2), [#allocation37], 4294967264  ;;  %vm1041_vm0 = vcmask 7168   ;;  %p1036_p3 = scmp.lt.s32.totalorder %s11357_s7, 1  ;;  %v11201_v0 = vmov 0   ;;  %v11202_v1 = vmov 0.0  }
 0x27e   : > { %10472 = vset.pattern.permute.xlu0 %v11201_v0  ;;  %1042 = vst.msk [vmem:[#allocation2] sm:$0xff] %vm1041_vm0, %v11202_v1  ;;  %4109 = vst [vmem:[#allocation4] sm:$0xff] %v11202_v1  ;;  %10473 = vset.pattern.permute.xlu1 %v11201_v0  ;;  %s13913_s0 = sld [smem:[#allocation60_spill]]  ;;  %v1501_v29 = vld [vmem:[#allocation11 + $0x40] sm:$0xff]  ;;  %v1502_v30 = vld [vmem:[#allocation11 + $0x48] sm:$0xff]  ;;  %vm1536_vm1 = vcmask 523264  }
 0x27f   : > { %4110 = vst [vmem:[#allocation4 + $0x8] sm:$0xff] %v11202_v1  ;;  %4111 = vst [vmem:[#allocation4 + $0x10] sm:$0xff] %v11202_v1  ;;  %s1037_s9 = scalar_select %p1036_p3, %s11357_s7, 1  ;;  %v9011_v31 = vpack.c.bf16 %v1502_v30, %v1501_v29  ;;  %v1503_v34 = vld [vmem:[#allocation11 + $0x50] sm:$0xff]  ;;  %v1504_v35 = vld [vmem:[#allocation11 + $0x58] sm:$0xff]  ;;  %vm1518_vm4 = vcmask 1046528  }
 0x280   : > { %4112 = vst [vmem:[#allocation4 + $0x18] sm:$0xff] %v11202_v1  ;;  %v9015_v36 = vpack.c.bf16 %v1504_v35, %v1503_v34  ;;  %v1505_v39 = vld [vmem:[#allocation11 + $0x60] sm:$0xff]  ;;  %v1506_v40 = vld [vmem:[#allocation11 + $0x68] sm:$0xff]  ;;  %v1507_v44 = vld [vmem:[#allocation11 + $0x70] sm:$0xff]  ;;  %vm1788_vm5 = vcmask 1045504   ;;  %vm1944_vm6 = vcmask 1044480  }
 0x281   : > { %s7794_s8 = sshll.u32 %s1037_s9, 6  ;;  %9012 = vmatprep.subr.bf16.mxu0 %v9011_v31  ;;  %v9019_v41 = vpack.c.bf16 %v1506_v40, %v1505_v39  ;;  %v1508_v45 = vld [vmem:[#allocation11 + $0x78] sm:$0xff]  ;;  %2609 = vst.msk [vmem:[#allocation3] sm:$0xff] %vm1536_vm1, %v11202_v1  ;;  %2610 = vst.msk [vmem:[#allocation3 + $0x8] sm:$0xff] %vm1536_vm1, %v11202_v1  ;;  %vm2100_vm8 = vcmask 1043456   ;;  %s13914_s29 = sld [smem:[#allocation72_spill]] }
 0x282   : > { %9014 = vmatpush3.bf16.msra.mxu0 %v9011_v31  ;;  %v9023_v46 = vpack.c.bf16 %v1508_v45, %v1507_v44  ;;  %v11931_v39 = vld [vmem:[#allocation6 + $0x4] ss:$0 sm:$0xff]  ;;  %s13918_s6 = sld [smem:[#allocation77_spill]]  ;;  %s13920_s3 = sld [smem:[#allocation53_spill]] }
 0x283   : > { %9016 = vmatprep.subr.bf16.mxu0 %v9015_v36  ;;  %s7791_s20 = sshll.u32 %s11357_s7, 4  ;;  %s13922_s15 = sld [smem:[#allocation78_spill]] }
 0x284   : > { %s1040_s2 = scalar_lea.vmem %s13913_s0, %s7794_s8  ;;  %s11205_s7 = smov [#allocation39]  }
 0x285   : > { %v1043_v2 = vld [vmem:[%s1040_s2] sm:$0xff]  ;;  %v1044_v3 = vld [vmem:[%s1040_s2 + $0x8] sm:$0xff]  ;;  %v1045_v4 = vld [vmem:[%s1040_s2 + $0x10] sm:$0xff]  ;;  %s11071_s1 = sshll.u32 %s11205_s7, 4  ;;  %s11072_s1 = int_to_ptr.vmem [resolvable:$false] %s11071_s1 }
 0x286   : > { %v1059_v5 = vld [vmem:[#allocation2] sm:$0xff]  ;;  %1051 = vst.msk [vmem:[#allocation2 + $0x8] sm:$0xff] %vm1041_vm0, %v1043_v2  ;;  %1052 = vst.msk [vmem:[#allocation2 + $0x10] sm:$0xff] %vm1041_vm0, %v1044_v3  ;;  %v1046_v6 = vld [vmem:[%s1040_s2 + $0x18] sm:$0xff]  ;;  %9018 = vmatpush3.bf16.msra.mxu0 %v9015_v36  ;;  %s11073_s23 = scalar_lea.vmem %s11072_s1, 32 }
 0x287   : > { %1053 = vst.msk [vmem:[#allocation2 + $0x18] sm:$0xff] %vm1041_vm0, %v1045_v4  ;;  %v1047_v7 = vld [vmem:[%s1040_s2 + $0x20] sm:$0xff]  ;;  %1071 = vperm.xlu0 %10472, %v1059_v5   ;;  %1054 = vst.msk [vmem:[#allocation2 + $0x20] sm:$0xff] %vm1041_vm0, %v1046_v6  ;;  %v1048_v8 = vld [vmem:[%s1040_s2 + $0x28] sm:$0xff]  ;;  %9020 = vmatprep.subr.bf16.mxu0 %v9019_v41  ;;  %s13915_s17 = smov %s13914_s29 }
 0x288   : > { %1055 = vst.msk [vmem:[#allocation2 + $0x28] sm:$0xff] %vm1041_vm0, %v1047_v7  ;;  %v1049_v9 = vld [vmem:[%s1040_s2 + $0x30] sm:$0xff]  ;;  %v1050_v10 = vld [vmem:[%s1040_s2 + $0x38] sm:$0xff]  ;;  %1056 = vst.msk [vmem:[#allocation2 + $0x30] sm:$0xff] %vm1041_vm0, %v1048_v8  ;;  %s13916_s2 = sld [smem:[#allocation75_spill]]  ;;  %s13919_s0 = smov %s13918_s6 }
 0x289   : > { %1057 = vst.msk [vmem:[#allocation2 + $0x38] sm:$0xff] %vm1041_vm0, %v1049_v9  ;;  %1058 = vst.msk [vmem:[#allocation2 + $0x40] sm:$0xff] %vm1041_vm0, %v1050_v10  ;;  %v1492_v3 = vld [vmem:[#allocation11] sm:$0xff]  ;;  %v1493_v4 = vld [vmem:[#allocation11 + $0x8] sm:$0xff]  ;;  %s13745_s30 = scalar_lea.hbm %s13922_s15, %s7791_s20 }
 0x28a   : > { %9022 = vmatpush3.bf16.msra.mxu0 %v9019_v41  ;;  %v11900_v5 = vpack.c.bf16 %v1493_v4, %v1492_v3 }
 0x28b   : > { %9024 = vmatprep.subr.bf16.mxu0 %v9023_v46 }
 0x28d   : > { %v1129_v11 = vld [vmem:[#allocation2 + $0x1] sm:$0xff]  ;;  %v1130_v13 = vld [vmem:[#allocation2 + $0x9] sm:$0xff] }
 0x28e   : > { %v11881_v12 = vld [vmem:[#allocation2 + $0x8] sm:$0xff]  ;;  %1142 = vperm.xlu1 %10473, %v1129_v11   ;;  %v11884_v14 = vld [vmem:[#allocation2 + $0x10] sm:$0xff]  ;;  %v11887_v19 = vld [vmem:[#allocation2 + $0x18] sm:$0xff]  ;;  %9026 = vmatpush3.bf16.msra.mxu0 %v9023_v46  ;;  %s13917_s28 = smov %s13916_s2 }
 0x28f   : > { %1076 = vperm.xlu0 %10472, %v11881_v12   ;;  %v1131_v15 = vld [vmem:[#allocation2 + $0x11] sm:$0xff]  ;;  %v1209_v16 = vld [vmem:[#allocation2 + $0x2] sm:$0xff]  ;;  %v1132_v20 = vld [vmem:[#allocation2 + $0x19] sm:$0xff]  ;;  %9028 = vmatprep.subr.bf16.mxu0 %v11900_v5 }
 0x290   : > { %v1210_v17 = vld [vmem:[#allocation2 + $0xa] sm:$0xff]  ;;  %v1211_v18 = vld [vmem:[#allocation2 + $0x12] sm:$0xff]  ;;  %v11890_v23 = vld [vmem:[#allocation2 + $0x20] sm:$0xff] }
 0x291   : > { %v1289_v21 = vld [vmem:[#allocation2 + $0x3] sm:$0xff]  ;;  %v1290_v22 = vld [vmem:[#allocation2 + $0xb] sm:$0xff]  ;;  %v1291_v25 = vld [vmem:[#allocation2 + $0x13] sm:$0xff] }
 0x292   : > { %1147 = vperm.xlu1 %10473, %v1130_v13   ;;  %v1133_v24 = vld [vmem:[#allocation2 + $0x21] sm:$0xff]  ;;  %v1370_v28 = vld [vmem:[#allocation2 + $0xc] sm:$0xff]  ;;  %v1371_v33 = vld [vmem:[#allocation2 + $0x14] sm:$0xff] }
 0x293   : > { %1081 = vperm.xlu0 %10472, %v11884_v14   ;;  %v1212_v26 = vld [vmem:[#allocation2 + $0x1a] sm:$0xff]  ;;  %v1369_v27 = vld [vmem:[#allocation2 + $0x4] sm:$0xff]  ;;  %v1065_v43 = vld [vmem:[#allocation2 + $0x30] sm:$0xff] }
 0x294   : > { %v1213_v32 = vld [vmem:[#allocation2 + $0x22] sm:$0xff]  ;;  %v1135_v47 = vld [vmem:[#allocation2 + $0x31] sm:$0xff]  ;;  %v1136_v54 = vld [vmem:[#allocation2 + $0x39] sm:$0xff] }
 0x295   : > { %v11893_v37 = vld [vmem:[#allocation2 + $0x28] sm:$0xff]  ;;  %v1292_v42 = vld [vmem:[#allocation2 + $0x1b] sm:$0xff]  ;;  %v1215_v51 = vld [vmem:[#allocation2 + $0x32] sm:$0xff] }
 0x296   : > { %1152 = vperm.xlu1 %10473, %v1131_v15   ;;  %v1134_v38 = vld [vmem:[#allocation2 + $0x29] sm:$0xff]  ;;  %v1372_v50 = vld [vmem:[#allocation2 + $0x1c] sm:$0xff]  ;;  %v1295_v58 = vld [vmem:[#allocation2 + $0x33] sm:$0xff] }
 0x297   : > { %1222 = vperm.xlu0 %10472, %v1209_v16   ;;  %v1293_v48 = vld [vmem:[#allocation2 + $0x23] sm:$0xff]  ;;  %v1066_v53 = vld [vmem:[#allocation2 + $0x38] sm:$0xff]  ;;  %v1294_v55 = vld [vmem:[#allocation2 + $0x2b] sm:$0xff] }
 0x298   : > { %v1214_v49 = vld [vmem:[#allocation2 + $0x2a] sm:$0xff]  ;;  %v1067_v56 = vld [vmem:[#allocation2 + $0x40] sm:$0xf]  ;;  %v1375_v62 = vld [vmem:[#allocation2 + $0x34] sm:$0xff] }
 0x299   : > { %v1373_v52 = vld [vmem:[#allocation2 + $0x24] sm:$0xff]  ;;  %v1216_v59 = vld [vmem:[#allocation2 + $0x3a] sm:$0xff]  ;;  %v1374_v60 = vld [vmem:[#allocation2 + $0x2c] sm:$0xff] }
 0x29a   : > { %1227 = vperm.xlu1 %10473, %v1210_v17   ;;  %v1137_v57 = vld [vmem:[#allocation2 + $0x41] sm:$0xf] }
 0x29b   : > { %1232 = vperm.xlu0 %10472, %v1211_v18   ;;  %v1217_v61 = vld [vmem:[#allocation2 + $0x42] sm:$0xf] }
 0x29c   : > { %v1296_v63 = vld [vmem:[#allocation2 + $0x3b] sm:$0xff]  ;;  %v1297_v0 = vld [vmem:[#allocation2 + $0x43] sm:$0xf] }
 0x29d   : > { %v1376_v1 = vld [vmem:[#allocation2 + $0x3c] sm:$0xff]  ;;  %v1377_v2 = vld [vmem:[#allocation2 + $0x44] sm:$0xf] }
 0x29e   : > { %1086 = vperm.xlu1 %10473, %v11887_v19   ;;  %v2293_v6 = vld [vmem:[#allocation2 + $0x40] sm:$0xff] }
 0x29f   : > { %1157 = vperm.xlu0 %10472, %v1132_v20   ;;  %v11908_v20 = vld [vmem:[#allocation6 + $0x1] ss:$0 sm:$0xff] }
 0x2a2   : > { %1302 = vperm.xlu1 %10473, %v1289_v21   ;;  %v11910_v21 = vld [vmem:[#allocation6] ss:$0 sm:$0xff] }
 0x2a3   : > { %1307 = vperm.xlu0 %10472, %v1290_v22   ;;  %v11912_v22 = vld [vmem:[#allocation6 + $0x2] ss:$0 sm:$0xff] }
 0x2a6   : > { %1091 = vperm.xlu1 %10473, %v11890_v23  }
 0x2a7   : > { %1162 = vperm.xlu0 %10472, %v1133_v24  }
 0x2aa   : > { %1312 = vperm.xlu1 %10473, %v1291_v25  }
 0x2ab   : > { %1237 = vperm.xlu0 %10472, %v1212_v26  }
 0x2ae   : > { %1382 = vperm.xlu1 %10473, %v1369_v27   ;;  %v11920_v27 = vld [vmem:[#allocation6 + $0x3] ss:$0 sm:$0xff] }
 0x2af   : > { %1387 = vperm.xlu0 %10472, %v1370_v28  }
 0x2b2   : > { %1242 = vperm.xlu1 %10473, %v1213_v32  }
 0x2b3   : > { %1392 = vperm.xlu0 %10472, %v1371_v33  }
 0x2b6   : > { %1096 = vperm.xlu1 %10473, %v11893_v37  }
 0x2b7   : > { %1167 = vperm.xlu0 %10472, %v1134_v38  }
 0x2ba   : > { %1317 = vperm.xlu1 %10473, %v1292_v42  }
 0x2bb   : > { %1101 = vperm.xlu0 %10472, %v1065_v43  }
 0x2be   : > { %1172 = vperm.xlu1 %10473, %v1135_v47  }
 0x2bf   : > { %1322 = vperm.xlu0 %10472, %v1293_v48  }
 0x2c2   : > { %1247 = vperm.xlu1 %10473, %v1214_v49  }
 0x2c3   : > { %1397 = vperm.xlu0 %10472, %v1372_v50  }
 0x2c6   : > { %1252 = vperm.xlu1 %10473, %v1215_v51  }
 0x2c7   : > { %1402 = vperm.xlu0 %10472, %v1373_v52   ;;  %v11938_v52 = vld [vmem:[#allocation9] ss:$0 sm:$0xff] }
 0x2ca   : > { %1106 = vperm.xlu1 %10473, %v1066_v53  }
 0x2cb   : > { %1177 = vperm.xlu0 %10472, %v1136_v54  }
 0x2ce   : > { %1327 = vperm.xlu1 %10473, %v1294_v55  }
 0x2cf   : > { %1111 = vperm.xlu0 %10472, %v1067_v56  }
 0x2d2   : > { %1182 = vperm.xlu1 %10473, %v1137_v57  }
 0x2d3   : > { %1332 = vperm.xlu0 %10472, %v1295_v58  }
 0x2d6   : > { %1257 = vperm.xlu1 %10473, %v1216_v59  }
 0x2d7   : > { %1407 = vperm.xlu0 %10472, %v1374_v60  }
 0x2da   : > { %1262 = vperm.xlu1 %10473, %v1217_v61  }
 0x2db   : > { %1412 = vperm.xlu0 %10472, %v1375_v62  }
 0x2de   : > { %1337 = vperm.xlu1 %10473, %v1296_v63  }
 0x2df   : > { %1342 = vperm.xlu0 %10472, %v1297_v0  }
 0x2e2   : > { %1417 = vperm.xlu1 %10473, %v1376_v1  }
 0x2e3   : > { %1422 = vperm.xlu0 %10472, %v1377_v2  }
 0x2e6   : > { %2297 = vperm.xlu1 %10473, %v11881_v12  }
 0x2e7   : > { %2302 = vperm.xlu0 %10472, %v11884_v14  }
 0x2ea   : > { %2307 = vperm.xlu1 %10473, %v11887_v19  }
 0x2eb   : > { %2312 = vperm.xlu0 %10472, %v11890_v23  }
 0x2ee   : > { %2317 = vperm.xlu1 %10473, %v11893_v37  }
 0x2ef   : > { %2322 = vperm.xlu0 %10472, %v1065_v43  }
 0x2f2   : > { %2327 = vperm.xlu1 %10473, %v1066_v53  }
 0x2f3   : > { %2332 = vperm.xlu0 %10472, %v2293_v6  }
 0x306   : > { %v1072_v7 = vpop.permute.xlu0 %1071 }
 0x307   : > { %v1120_v28 = vmul.f32 %v11910_v21, %v1072_v7 }
 0x30d   : > { %v1143_v8 = vpop.permute.xlu1 %1142 }
 0x30e   : > { %v1077_v9 = vpop.permute.xlu0 %1076  ;;  %v1191_v25 = vmul.f32 %v11908_v20, %v1143_v8 }
 0x30f   : > { %v1121_v29 = vmul.f32 %v11910_v21, %v1077_v9 }
 0x310   : > { %v1200_v34 = vadd.f32 %v1191_v25, %v1120_v28 }
 0x311   : > { %v1148_v10 = vpop.permute.xlu1 %1147 }
 0x312   : > { %v1082_v11 = vpop.permute.xlu0 %1081  ;;  %v1192_v26 = vmul.f32 %v11908_v20, %v1148_v10 }
 0x313   : > { %v1122_v42 = vmul.f32 %v11910_v21, %v1082_v11 }
 0x314   : > { %v1201_v35 = vadd.f32 %v1192_v26, %v1121_v29 }
 0x315   : > { %v1153_v13 = vpop.permute.xlu1 %1152 }
 0x316   : > { %v1223_v15 = vpop.permute.xlu0 %1222  ;;  %v1193_v38 = vmul.f32 %v11908_v20, %v1153_v13  ;;  %v1494_v13 = vld [vmem:[#allocation11 + $0x10] sm:$0xff] }
 0x317   : > { %v1271_v30 = vmul.f32 %v11912_v22, %v1223_v15  ;;  %v1495_v15 = vld [vmem:[#allocation11 + $0x18] sm:$0xff] }
 0x318   : > { %v1202_v50 = vadd.f32 %v1193_v38, %v1122_v42 }
 0x319   : > { %v1228_v12 = vpop.permute.xlu1 %1227  ;;  %v1280_v40 = vadd.f32 %v1271_v30, %v1200_v34 }
 0x31a   : > { %v1233_v16 = vpop.permute.xlu0 %1232  ;;  %v1272_v31 = vmul.f32 %v11912_v22, %v1228_v12 }
 0x31b   : > { %v1273_v43 = vmul.f32 %v11912_v22, %v1233_v16 }
 0x31c   : > { %v1281_v41 = vadd.f32 %v1272_v31, %v1201_v35  ;;  %v9031_v31 = vpack.c.bf16 %v1495_v15, %v1494_v13 }
 0x31d   : > { %v1087_v14 = vpop.permute.xlu1 %1086  ;;  %v1282_v55 = vadd.f32 %v1273_v43, %v1202_v50 }
 0x31e   : > { %v1158_v17 = vpop.permute.xlu0 %1157  ;;  %v1123_v3 = vmul.f32 %v11910_v21, %v1087_v14 }
 0x31f   : > { %v1194_v11 = vmul.f32 %v11908_v20, %v1158_v17 }
 0x321   : > { %v1303_v18 = vpop.permute.xlu1 %1302  ;;  %v1203_v38 = vadd.f32 %v1194_v11, %v1123_v3  ;;  %v1781_v11 = vld [vmem:[#allocation11 + $0x88] sm:$0xff] }
 0x322   : > { %v1308_v19 = vpop.permute.xlu0 %1307  ;;  %v1351_v36 = vmul.f32 %v11920_v27, %v1303_v18 }
 0x323   : > { %v1352_v37 = vmul.f32 %v11920_v27, %v1308_v19 }
 0x324   : > { %v1360_v46 = vadd.f32 %v1351_v36, %v1280_v40 }
 0x325   : > { %v11914_v23 = vpop.permute.xlu1 %1091  ;;  %v1361_v47 = vadd.f32 %v1352_v37, %v1281_v41 }
 0x326   : > { %v11916_v24 = vpop.permute.xlu0 %1162  ;;  %v1124_v40 = vmul.f32 %v11910_v21, %v11914_v23 }
 0x329   : > { %v1313_v32 = vpop.permute.xlu1 %1312 }
 0x32a   : > { %v11926_v33 = vpop.permute.xlu0 %1237  ;;  %v1353_v51 = vmul.f32 %v11920_v27, %v1313_v32 }
 0x32b   : > { %v1274_v34 = vmul.f32 %v11912_v22, %v11926_v33  ;;  %v1195_v33 = vmul.f32 %v11908_v20, %v11916_v24 }
 0x32c   : > { %v1362_v61 = vadd.f32 %v1353_v51, %v1282_v55 }
 0x32d   : > { %v1383_v44 = vpop.permute.xlu1 %1382  ;;  %v1283_v24 = vadd.f32 %v1274_v34, %v1203_v38 }
 0x32e   : > { %v1388_v45 = vpop.permute.xlu0 %1387  ;;  %v1431_v48 = vmul.f32 %v11931_v39, %v1383_v44 }
 0x32f   : > { %v1432_v49 = vmul.f32 %v11931_v39, %v1388_v45 }
 0x330   : > { %v1440_v53 = vadd.f32 %v1431_v48, %v1360_v46  ;;  %v1497_v48 = vld [vmem:[#allocation11 + $0x28] sm:$0xff] }
 0x331   : > { %v1441_v54 = vadd.f32 %v1432_v49, %v1361_v47  ;;  %v1243_v56 = vpop.permute.xlu1 %1242  ;;  %v1496_v47 = vld [vmem:[#allocation11 + $0x20] sm:$0xff] }
 0x332   : > { %v1393_v57 = vpop.permute.xlu0 %1392  ;;  %v1456_v58 = vadd.f32 %v11938_v52, %v1440_v53  ;;  %v1275_v51 = vmul.f32 %v11912_v22, %v1243_v56  ;;  %v9035_v55 = vpack.c.bf16 %v1497_v48, %v1496_v47 }
 0x333   : > { %v1457_v59 = vadd.f32 %v11938_v52, %v1441_v54  ;;  %v1433_v60 = vmul.f32 %v11931_v39, %v1393_v57  ;;  %v1204_v57 = vadd.f32 %v1195_v33, %v1124_v40 }
 0x334   : > { %vm1465_vm2 = vcmp.ge.f32.partialorder %v1456_v58, 0.0  ;;  %v1474_v62 = vmul.f32 0.01, %v1456_v58 }
 0x335   : > { %vm1466_vm3 = vcmp.ge.f32.partialorder %v1457_v59, 0.0  ;;  %v1475_v63 = vmul.f32 0.01, %v1457_v59  ;;  %v1442_v0 = vadd.f32 %v1433_v60, %v1362_v61  ;;  %v11943_v1 = vpop.permute.xlu1 %1096  ;;  %v1498_v61 = vld [vmem:[#allocation11 + $0x30] sm:$0xff] }
 0x336   : > { %v11945_v2 = vpop.permute.xlu0 %1167  ;;  %v11948_v4 = vsel %vm1465_vm2, %v1456_v58, %v1474_v62  ;;  %v1499_v62 = vld [vmem:[#allocation11 + $0x38] sm:$0xff] }
 0x337   : > { %v11950_v6 = vsel %vm1466_vm3, %v1457_v59, %v1475_v63  ;;  %v1458_v7 = vadd.f32 %v11938_v52, %v1442_v0  ;;  %v1519_v8 = vrot.slane %v11948_v4, 1  ;;  %v1789_v10 = vrot.slane %v11948_v4, 2 }
 0x338   : > { %v1520_v9 = vrot.slane %v11950_v6, 1  ;;  %v1790_v12 = vrot.slane %v11950_v6, 2  ;;  %v1945_v16 = vrot.slane %v11948_v4, 3  ;;  %v1946_v14 = vrot.slane %v11950_v6, 3 }
 0x339   : > { %vm1467_vm7 = vcmp.ge.f32.partialorder %v1458_v7, 0.0  ;;  %v1476_v18 = vmul.f32 0.01, %v1458_v7  ;;  %v1318_v19 = vpop.permute.xlu1 %1317  ;;  %v2101_v28 = vrot.slane %v11948_v4, 4  ;;  %v2102_v32 = vrot.slane %v11950_v6, 4 }
 0x33a   : > { %v11960_v25 = vpop.permute.xlu0 %1101  ;;  %v1521_v26 = vsel %vm1518_vm4, %v1519_v8, %v1520_v9  ;;  %v11966_v17 = vsel %vm1788_vm5, %v1789_v10, %v1790_v12  ;;  %v11969_v29 = vsel %vm1944_vm6, %v1945_v16, %v1946_v14  ;;  %v1354_v45 = vmul.f32 %v11920_v27, %v1318_v19  ;;  %v1780_v10 = vld [vmem:[#allocation11 + $0x80] sm:$0xff] }
 0x33b   : > { %8399 = vmatprep.mubr.msk.f32.mxu0 %vm1536_vm1, %v1521_v26  ;;  %v11971_v30 = vsel %vm1467_vm7, %v1458_v7, %v1476_v18  ;;  %v11984_v43 = vsel %vm2100_vm8, %v2101_v28, %v2102_v32  ;;  %v1284_v63 = vadd.f32 %v1275_v51, %v1204_v57  ;;  %v9039_v56 = vpack.c.bf16 %v1499_v62, %v1498_v61 }
 0x33c   : > { %v1522_v35 = vrot.slane %v11971_v30, 1  ;;  %v1792_v36 = vrot.slane %v11971_v30, 2  ;;  %v1948_v37 = vrot.slane %v11971_v30, 3  ;;  %v2104_v44 = vrot.slane %v11971_v30, 4 }
 0x33d   : > { %v11981_v41 = vpop.permute.xlu1 %1172  ;;  %v1363_v58 = vadd.f32 %v1354_v45, %v1283_v24  ;;  %v1125_v45 = vmul.f32 %v11910_v21, %v11943_v1 }
 0x33e   : > { %v1323_v42 = vpop.permute.xlu0 %1322  ;;  %v1523_v46 = vsel %vm1518_vm4, %v1520_v9, %v1522_v35  ;;  %v11994_v23 = vsel %vm1788_vm5, %v1790_v12, %v1792_v36  ;;  %v11998_v49 = vsel %vm1944_vm6, %v1946_v14, %v1948_v37  ;;  %v12001_v50 = vsel %vm2100_vm8, %v2102_v32, %v2104_v44 }
 0x33f   : > { %8400 = vmatmul.mubr.msk.f32.vlgmr.msra.gmra.mrb[0].mxu0 %vm1536_vm1, %v1523_v46  ;;  %v1355_v59 = vmul.f32 %v11920_v27, %v1323_v42  ;;  %v12009_v14 = vpack.c.bf16 %v1781_v11, %v1780_v10  ;;  %v1196_v46 = vmul.f32 %v11908_v20, %v11945_v2  ;;  %v1197_v57 = vmul.f32 %v11908_v20, %v11981_v41 }
 0x340   : > { %9030 = vmatpush3.bf16.msra.mxu0 %v11900_v5 }
 0x341   : > { %v1248_v53 = vpop.permute.xlu1 %1247  ;;  %9032 = vmatprep.subr.bf16.mxu0 %v9031_v31  ;;  %v1364_v5 = vadd.f32 %v1355_v59, %v1284_v63 }
 0x342   : > { %v1398_v54 = vpop.permute.xlu0 %1397  ;;  %v1276_v24 = vmul.f32 %v11912_v22, %v1248_v53  ;;  %v1126_v53 = vmul.f32 %v11910_v21, %v11960_v25 }
 0x343   : > { %v1434_v60 = vmul.f32 %v11931_v39, %v1398_v54 }
 0x344   : > { %9034 = vmatpush3.bf16.msra.mxu0 %v9031_v31  ;;  %v1206_v63 = vadd.f32 %v1197_v57, %v1126_v53 }
 0x345   : > { %v1443_v0 = vadd.f32 %v1434_v60, %v1363_v58  ;;  %v1253_v3 = vpop.permute.xlu1 %1252  ;;  %9036 = vmatprep.subr.bf16.mxu0 %v9035_v55 }
 0x346   : > { %v1403_v7 = vpop.permute.xlu0 %1402  ;;  %v1277_v60 = vmul.f32 %v11912_v22, %v1253_v3 }
 0x347   : > { %v1459_v8 = vadd.f32 %v11938_v52, %v1443_v0  ;;  %v1435_v9 = vmul.f32 %v11931_v39, %v1403_v7 }
 0x348   : > { %9038 = vmatpush3.bf16.msra.mxu0 %v9035_v55  ;;  %v1205_v55 = vadd.f32 %v1196_v46, %v1125_v45 }
 0x349   : > { %vm1468_vm9 = vcmp.ge.f32.partialorder %v1459_v8, 0.0  ;;  %v1477_v13 = vmul.f32 0.01, %v1459_v8  ;;  %v1444_v15 = vadd.f32 %v1435_v9, %v1364_v5  ;;  %v1107_v12 = vpop.permute.xlu1 %1106  ;;  %9040 = vmatprep.subr.bf16.mxu0 %v9039_v56  ;;  %v1286_v5 = vadd.f32 %v1277_v60, %v1206_v63 }
 0x34a   : > { %v1178_v16 = vpop.permute.xlu0 %1177  ;;  %v1285_v59 = vadd.f32 %v1276_v24, %v1205_v55 }
 0x34b   : > { %v12011_v18 = vsel %vm1468_vm9, %v1459_v8, %v1477_v13  ;;  %v1460_v19 = vadd.f32 %v11938_v52, %v1444_v15  ;;  %v1127_v8 = vmul.f32 %v11910_v21, %v1107_v12  ;;  %v1198_v9 = vmul.f32 %v11908_v20, %v1178_v16 }
 0x34c   : > { %v1524_v26 = vrot.slane %v12011_v18, 1  ;;  %v1950_v28 = vrot.slane %v12011_v18, 3  ;;  %v2106_v31 = vrot.slane %v12011_v18, 4  ;;  %9042 = vmatpush3.bf16.msra.mxu0 %v9039_v56 }
 0x34d   : > { %vm1469_vm10 = vcmp.ge.f32.partialorder %v1460_v19, 0.0  ;;  %v1478_v32 = vmul.f32 0.01, %v1460_v19  ;;  %v1328_v34 = vpop.permute.xlu1 %1327  ;;  %9044 = vmatprep.subr.bf16.mxu0 %v12009_v14 }
 0x34e   : > { %v1112_v38 = vpop.permute.xlu0 %1111  ;;  %v1525_v40 = vsel %vm1518_vm4, %v1522_v35, %v1524_v26  ;;  %v12020_v42 = vsel %vm1944_vm6, %v1948_v37, %v1950_v28  ;;  %v12023_v33 = vsel %vm2100_vm8, %v2104_v44, %v2106_v31  ;;  %v1356_v58 = vmul.f32 %v11920_v27, %v1328_v34 }
 0x34f   : > { %v12029_v47 = vsel %vm1469_vm10, %v1460_v19, %v1478_v32  ;;  %8402 = vmatprep.mubr.msk.f32.mxu0 %vm1536_vm1, %v1525_v40  ;;  %v1128_v19 = vmul.f32 %v11910_v21, %v1112_v38  ;;  %v1207_v32 = vadd.f32 %v1198_v9, %v1127_v8 }
 0x350   : > { %v1526_v35 = vrot.slane %v12029_v47, 1  ;;  %v1952_v48 = vrot.slane %v12029_v47, 3  ;;  %v2108_v37 = vrot.slane %v12029_v47, 4  ;;  %v1365_v0 = vadd.f32 %v1356_v58, %v1285_v59 }
 0x351   : > { %v1183_v44 = vpop.permute.xlu1 %1182 }
 0x352   : > { %v1333_v51 = vpop.permute.xlu0 %1332  ;;  %v1527_v54 = vsel %vm1518_vm4, %v1524_v26, %v1526_v35  ;;  %v12040_v1 = vsel %vm1944_vm6, %v1950_v28, %v1952_v48  ;;  %v12043_v2 = vsel %vm2100_vm8, %v2106_v31, %v2108_v37  ;;  %v1199_v10 = vmul.f32 %v11908_v20, %v1183_v44 }
 0x353   : > { %8403 = vmatmul.mubr.msk.f32.gmra.mrb[2].mxu0 %vm1536_vm1, %v1527_v54  ;;  %v1357_v7 = vmul.f32 %v11920_v27, %v1333_v51 }
 0x354   : > { %v1208_v16 = vadd.f32 %v1199_v10, %v1128_v19  ;;  %v1784_v19 = vld [vmem:[#allocation11 + $0xa0] sm:$0xff] }
 0x355   : > { %v1258_v61 = vpop.permute.xlu1 %1257  ;;  %v1366_v13 = vadd.f32 %v1357_v7, %v1286_v5 }
 0x356   : > { %v1408_v62 = vpop.permute.xlu0 %1407  ;;  %v1278_v26 = vmul.f32 %v11912_v22, %v1258_v61 }
 0x357   : > { %v1436_v56 = vmul.f32 %v11931_v39, %v1408_v62 }
 0x358   : > { %v1287_v21 = vadd.f32 %v1278_v26, %v1207_v32  ;;  %v1785_v26 = vld [vmem:[#allocation11 + $0xa8] sm:$0xff]  ;;  %v1936_v32 = vld [vmem:[#allocation11 + $0xc0] sm:$0xff] }
 0x359   : > { %v1445_v41 = vadd.f32 %v1436_v56, %v1365_v0  ;;  %v1263_v25 = vpop.permute.xlu1 %1262 }
 0x35a   : > { %v1413_v11 = vpop.permute.xlu0 %1412  ;;  %v1279_v31 = vmul.f32 %v11912_v22, %v1263_v25 }
 0x35b   : > { %v1461_v3 = vadd.f32 %v11938_v52, %v1445_v41  ;;  %v1437_v15 = vmul.f32 %v11931_v39, %v1413_v11 }
 0x35c   : > { %v1288_v51 = vadd.f32 %v1279_v31, %v1208_v16  ;;  %v1786_v31 = vld [vmem:[#allocation11 + $0xb0] sm:$0xff] }
 0x35d   : > { %vm1470_vm11 = vcmp.ge.f32.partialorder %v1461_v3, 0.0  ;;  %v1479_v28 = vmul.f32 0.01, %v1461_v3  ;;  %v1446_v12 = vadd.f32 %v1437_v15, %v1366_v13  ;;  %v1338_v34 = vpop.permute.xlu1 %1337  ;;  %v1938_v16 = vld [vmem:[#allocation11 + $0xd0] sm:$0xff] }
 0x35e   : > { %v1343_v20 = vpop.permute.xlu0 %1342  ;;  %v1358_v46 = vmul.f32 %v11920_v27, %v1338_v34  ;;  %v1939_v34 = vld [vmem:[#allocation11 + $0xd8] sm:$0xff] }
 0x35f   : > { %v12062_v40 = vsel %vm1470_vm11, %v1461_v3, %v1479_v28  ;;  %v1462_v45 = vadd.f32 %v11938_v52, %v1446_v12  ;;  %v1359_v24 = vmul.f32 %v11920_v27, %v1343_v20  ;;  %v1783_v3 = vld [vmem:[#allocation11 + $0x98] sm:$0xff]  ;;  %v9051_v28 = vpack.c.bf16 %v1785_v26, %v1784_v19  ;;  %v7470_v26 = vld [vmem:[#allocation12] ss:$0 sm:$0xff] }
 0x360   : > { %v1528_v38 = vrot.slane %v12062_v40, 1  ;;  %v2110_v44 = vrot.slane %v12062_v40, 4  ;;  %v1367_v54 = vadd.f32 %v1358_v46, %v1287_v21  ;;  %v1787_v12 = vld [vmem:[#allocation11 + $0xb8] sm:$0xff]  ;;  %v1794_v20 = vrot.slane %v12011_v18, 2  ;;  %v1941_v21 = vld [vmem:[#allocation11 + $0xe8] sm:$0xff] }
 0x361   : > { %vm1471_vm12 = vcmp.ge.f32.partialorder %v1462_v45, 0.0  ;;  %v1480_v22 = vmul.f32 0.01, %v1462_v45  ;;  %v1418_v55 = vpop.permute.xlu1 %1417  ;;  %v1368_v60 = vadd.f32 %v1359_v24, %v1288_v51  ;;  %v1796_v46 = vrot.slane %v12029_v47, 2  ;;  %v1940_v24 = vld [vmem:[#allocation11 + $0xe0] sm:$0xff] }
 0x362   : > { %v1423_v57 = vpop.permute.xlu0 %1422  ;;  %v1529_v58 = vsel %vm1518_vm4, %v1526_v35, %v1528_v38  ;;  %v12071_v53 = vsel %vm2100_vm8, %v2108_v37, %v2110_v44  ;;  %v1438_v27 = vmul.f32 %v11931_v39, %v1418_v55 }
 0x363   : > { %v12073_v59 = vsel %vm1471_vm12, %v1462_v45, %v1480_v22  ;;  %v1439_v61 = vmul.f32 %v11931_v39, %v1423_v57  ;;  %8405 = vmatprep.mubr.msk.f32.mxu0 %vm1536_vm1, %v1529_v58  ;;  %v9063_v45 = vpack.c.bf16 %v1939_v34, %v1938_v16  ;;  %v1942_v22 = vld [vmem:[#allocation11 + $0xf0] sm:$0xff]  ;;  %v2092_v58 = vld [vmem:[#allocation11 + $0x100] sm:$0xff] }
 0x364   : > { %v1530_v62 = vrot.slane %v12073_v59, 1  ;;  %v2112_v63 = vrot.slane %v12073_v59, 4  ;;  %v1447_v0 = vadd.f32 %v1438_v27, %v1367_v54  ;;  %v1800_v51 = vrot.slane %v12073_v59, 2  ;;  %v1943_v54 = vld [vmem:[#allocation11 + $0xf8] sm:$0xff] }
 0x365   : > { %v1448_v7 = vadd.f32 %v1439_v61, %v1368_v60  ;;  %v2093_v60 = vld [vmem:[#allocation11 + $0x108] sm:$0xff] }
 0x366   : > { %v1531_v35 = vsel %vm1518_vm4, %v1528_v38, %v1530_v62  ;;  %v12084_v37 = vsel %vm2100_vm8, %v2110_v44, %v2112_v63  ;;  %v1463_v56 = vadd.f32 %v11938_v52, %v1447_v0  ;;  %v1795_v38 = vsel %vm1788_vm5, %v1792_v36, %v1794_v20  ;;  %v2094_v0 = vld [vmem:[#allocation11 + $0x110] sm:$0xff] }
 0x367   : > { %v1464_v5 = vadd.f32 %v11938_v52, %v1448_v7  ;;  %8406 = vmatmul.mubr.msk.f32.gmra.mrb[4].mxu0 %vm1536_vm1, %v1531_v35  ;;  %v1782_v52 = vld [vmem:[#allocation11 + $0x90] sm:$0xff]  ;;  %v1798_v44 = vrot.slane %v12062_v40, 2  ;;  %v9071_v36 = vpack.c.bf16 %v1943_v54, %v1942_v22  ;;  %v9075_v61 = vpack.c.bf16 %v2093_v60, %v2092_v58  ;;  %v2095_v7 = vld [vmem:[#allocation11 + $0x118] sm:$0xff] }
 0x368   : > { %vm1472_vm13 = vcmp.ge.f32.partialorder %v1463_v56, 0.0  ;;  %v1481_v39 = vmul.f32 0.01, %v1463_v56  ;;  %v9047_v15 = vpack.c.bf16 %v1783_v3, %v1782_v52  ;;  %v9079_v35 = vpack.c.bf16 %v2095_v7, %v2094_v0  ;;  %v2298_v3 = vpop.permute.xlu1 %2297 }
 0x369   : > { %vm1473_vm14 = vcmp.ge.f32.partialorder %v1464_v5, 0.0  ;;  %v1482_v41 = vmul.f32 0.01, %v1464_v5  ;;  %v1801_v55 = vsel %vm1788_vm5, %v1798_v44, %v1800_v51 }
 0x36a   : > { %v12089_v8 = vsel %vm1472_vm13, %v1463_v56, %v1481_v39  ;;  %v2096_v56 = vld [vmem:[#allocation11 + $0x120] sm:$0xff]  ;;  %v1954_v39 = vrot.slane %v12062_v40, 3 }
 0x36b   : > { %v12091_v9 = vsel %vm1473_vm14, %v1464_v5, %v1482_v41  ;;  %v1532_v10 = vrot.slane %v12089_v8, 1  ;;  %v2097_v5 = vld [vmem:[#allocation11 + $0x128] sm:$0xff] }
 0x36c   : > { %v1534_v25 = vrot.slane %v12091_v9, 1  ;;  %v1804_v57 = vrot.slane %v12091_v9, 2  ;;  %v9083_v41 = vpack.c.bf16 %v2097_v5, %v2096_v56  ;;  %v2308_v19 = vpop.permute.xlu1 %2307 }
 0x36d   : > { %v1533_v11 = vsel %vm1518_vm4, %v1530_v62, %v1532_v10 }
 0x36e   : > { %v1535_v13 = vsel %vm1518_vm4, %v1532_v10, %v1534_v25  ;;  %8408 = vmatprep.mubr.msk.f32.mxu0 %vm1536_vm1, %v1533_v11  ;;  %v1956_v10 = vrot.slane %v12073_v59, 3  ;;  %v2098_v25 = vld [vmem:[#allocation11 + $0x130] sm:$0xff]  ;;  %v2099_v11 = vld [vmem:[#allocation11 + $0x138] sm:$0xff] }
 0x36f   : > { %8409 = vmatmul.mubr.msk.f32.gmra.mrb[6].mxu0 %vm1536_vm1, %v1535_v13  ;;  %v1960_v13 = vrot.slane %v12091_v9, 3 }
 0x370   : > { %8427 = vmatprep.mubr.msk.f32.mxu0 %vm1536_vm1, %v11948_v4  ;;  %v9055_v4 = vpack.c.bf16 %v1787_v12, %v1786_v31  ;;  %v12198_v31 = vld [vmem:[#allocation14] ss:$0 sm:$0xff]  ;;  %v2318_v34 = vpop.permute.xlu1 %2317 }
 0x373   : > { %8428 = vmatmul.mubr.msk.f32.vlgmr.msra.gmra.mrb[0].mxu0 %vm1536_vm1, %v11950_v6  ;;  %v1937_v6 = vld [vmem:[#allocation11 + $0xc8] sm:$0xff] }
 0x374   : > { %8430 = vmatprep.mubr.msk.f32.mxu0 %vm1536_vm1, %v11971_v30  ;;  %9046 = vmatpush3.bf16.msra.mxu0 %v12009_v14  ;;  %v9059_v14 = vpack.c.bf16 %v1937_v6, %v1936_v32  ;;  %v1802_v30 = vrot.slane %v12089_v8, 2 }
 0x375   : > { %9048 = vmatprep.subr.bf16.mxu0 %v9047_v15 }
 0x376   : > { %v1803_v27 = vsel %vm1788_vm5, %v1800_v51, %v1802_v30  ;;  %v1805_v62 = vsel %vm1788_vm5, %v1802_v30, %v1804_v57 }
 0x377   : > { %8431 = vmatmul.mubr.msk.f32.gmra.mrb[2].mxu0 %vm1536_vm1, %v12011_v18  ;;  %v1797_v18 = vsel %vm1788_vm5, %v1794_v20, %v1796_v46 }
 0x378   : > { %8433 = vmatprep.mubr.msk.f32.mxu0 %vm1536_vm1, %v12029_v47  ;;  %9050 = vmatpush3.bf16.msra.mxu0 %v9047_v15 }
 0x379   : > { %9052 = vmatprep.subr.bf16.mxu0 %v9051_v28 }
 0x37b   : > { %8434 = vmatmul.mubr.msk.f32.gmra.mrb[4].mxu0 %vm1536_vm1, %v12062_v40  ;;  %v1957_v40 = vsel %vm1944_vm6, %v1954_v39, %v1956_v10 }
 0x37c   : > { %8436 = vmatprep.mubr.msk.f32.mxu0 %vm1536_vm1, %v12073_v59  ;;  %9054 = vmatpush3.bf16.msra.mxu0 %v9051_v28  ;;  %v12191_v59 = vld [vmem:[#allocation4] sm:$0xff] }
 0x37d   : > { %9056 = vmatprep.subr.bf16.mxu0 %v9055_v4 }
 0x37f   : > { %8437 = vmatmul.mubr.msk.f32.gmra.mrb[6].mxu0 %vm1536_vm1, %v12089_v8 }
 0x380   : > { %9058 = vmatpush3.bf16.msra.mxu0 %v9055_v4  ;;  %8455 = vmatprep.mubr.msk.f32.mxu0 %vm1536_vm1, %v11966_v17  ;;  %v9067_v17 = vpack.c.bf16 %v1941_v21, %v1940_v24  ;;  %v2343_v24 = vmul.f32 %v12198_v31, %v2308_v19 }
 0x381   : > { %9060 = vmatprep.subr.bf16.mxu0 %v9059_v14 }
 0x383   : > { %8456 = vmatmul.mubr.msk.f32.vlgmr.msra.gmra.mrb[0].mxu0 %vm1536_vm1, %v11994_v23  ;;  %v1799_v23 = vsel %vm1788_vm5, %v1796_v46, %v1798_v44  ;;  %v2341_v46 = vmul.f32 %v12198_v31, %v2298_v3 }
 0x384   : > { %8458 = vmatprep.mubr.msk.f32.mxu0 %vm1536_vm1, %v1795_v38  ;;  %9062 = vmatpush3.bf16.msra.mxu0 %v9059_v14  ;;  %v12203_v38 = vld [vmem:[#allocation15] ss:$0 sm:$0xff] }
 0x385   : > { %9064 = vmatprep.subr.bf16.mxu0 %v9063_v45 }
 0x387   : > { %8459 = vmatmul.mubr.msk.f32.gmra.mrb[2].mxu0 %vm1536_vm1, %v1797_v18 }
 0x388   : > { %8461 = vmatprep.mubr.msk.f32.mxu0 %vm1536_vm1, %v1799_v23  ;;  %9066 = vmatpush3.bf16.msra.mxu0 %v9063_v45  ;;  %v2345_v23 = vmul.f32 %v12198_v31, %v2318_v34 }
 0x389   : > { %9068 = vmatprep.subr.bf16.mxu0 %v9067_v17 }
 0x38b   : > { %8462 = vmatmul.mubr.msk.f32.gmra.mrb[4].mxu0 %vm1536_vm1, %v1801_v55 }
 0x38c   : > { %8464 = vmatprep.mubr.msk.f32.mxu0 %vm1536_vm1, %v1803_v27  ;;  %9070 = vmatpush3.bf16.msra.mxu0 %v9067_v17 }
 0x38d   : > { %9072 = vmatprep.subr.bf16.mxu0 %v9071_v36 }
 0x38f   : > { %8465 = vmatmul.mubr.msk.f32.gmra.mrb[6].mxu0 %vm1536_vm1, %v1805_v62 }
 0x390   : > { %9074 = vmatpush3.bf16.msra.mxu0 %v9071_v36  ;;  %8483 = vmatprep.mubr.msk.f32.mxu0 %vm1536_vm1, %v11969_v29  ;;  %v1955_v29 = vsel %vm1944_vm6, %v1952_v48, %v1954_v39  ;;  %v2114_v48 = vrot.slane %v12089_v8, 4 }
 0x391   : > { %9076 = vmatprep.subr.bf16.mxu0 %v9075_v61 }
 0x393   : > { %8484 = vmatmul.mubr.msk.f32.vlgmr.msra.gmra.mrb[0].mxu0 %vm1536_vm1, %v11998_v49  ;;  %v1958_v49 = vrot.slane %v12089_v8, 3 }
 0x394   : > { %8486 = vmatprep.mubr.msk.f32.mxu0 %vm1536_vm1, %v12020_v42  ;;  %9078 = vmatpush3.bf16.msra.mxu0 %v9075_v61  ;;  %v9087_v42 = vpack.c.bf16 %v2099_v11, %v2098_v25 }
 0x395   : > { %9080 = vmatprep.subr.bf16.mxu0 %v9079_v35  ;;  %v1959_v52 = vsel %vm1944_vm6, %v1956_v10, %v1958_v49  ;;  %v1961_v47 = vsel %vm1944_vm6, %v1958_v49, %v1960_v13 }
 0x397   : > { %8487 = vmatmul.mubr.msk.f32.gmra.mrb[2].mxu0 %vm1536_vm1, %v12040_v1  ;;  %v2116_v1 = vrot.slane %v12091_v9, 4 }
 0x398   : > { %8489 = vmatprep.mubr.msk.f32.mxu0 %vm1536_vm1, %v1955_v29  ;;  %9082 = vmatpush3.bf16.msra.mxu0 %v9079_v35 }
 0x399   : > { %9084 = vmatprep.subr.bf16.mxu0 %v9083_v41 }
 0x39b   : > { %8490 = vmatmul.mubr.msk.f32.gmra.mrb[4].mxu0 %vm1536_vm1, %v1957_v40 }
 0x39c   : > { %8492 = vmatprep.mubr.msk.f32.mxu0 %vm1536_vm1, %v1959_v52  ;;  %9086 = vmatpush3.bf16.msra.mxu0 %v9083_v41 }
 0x39d   : > { %9088 = vmatprep.subr.bf16.mxu0 %v9087_v42 }
 0x39f   : > { %8493 = vmatmul.mubr.msk.f32.gmra.mrb[6].mxu0 %vm1536_vm1, %v1961_v47 }
 0x3a0   : > { %9090 = vmatpush3.bf16.msra.mxu0 %v9087_v42  ;;  %8511 = vmatprep.mubr.msk.f32.mxu0 %vm1536_vm1, %v11984_v43  ;;  %v2115_v43 = vsel %vm2100_vm8, %v2112_v63, %v2114_v48 }
 0x3a3   : > { %8512 = vmatmul.mubr.msk.f32.vlgmr.msra.gmra.mrb[0].mxu0 %vm1536_vm1, %v12001_v50  ;;  %v2117_v50 = vsel %vm2100_vm8, %v2114_v48, %v2116_v1 }
 0x3a4   : > { %8514 = vmatprep.mubr.msk.f32.mxu0 %vm1536_vm1, %v12023_v33  ;;  %v2372_v33 = vlaneseq }
 0x3a6   : > { %v12184_v8 = vand.u32 127, %v2372_v33 }
 0x3a7   : > { %8515 = vmatmul.mubr.msk.f32.gmra.mrb[2].mxu0 %vm1536_vm1, %v12043_v2  ;;  %v12182_v2 = vshrl.u32 %v2372_v33, 7 }
 0x3a8   : > { %8517 = vmatprep.mubr.msk.f32.mxu0 %vm1536_vm1, %v12071_v53 }
 0x3a9   : > { %v2379_v53 = vmul.u32 2, %v12182_v2  ;;  %v2374_v35 = vadd.s32 8, %v12182_v2  ;;  %v2375_v40 = vadd.s32 16, %v12182_v2 }
 0x3ab   : > { %8518 = vmatmul.mubr.msk.f32.gmra.mrb[4].mxu0 %vm1536_vm1, %v12084_v37  ;;  %v12188_v9 = vsub.s32 %v12184_v8, %v2379_v53  ;;  %v2303_v37 = vpop.permute.xlu0 %2302  ;;  %v2380_v1 = vmul.u32 2, %v2374_v35 }
 0x3ac   : > { %8520 = vmatprep.mubr.msk.f32.mxu0 %vm1536_vm1, %v2115_v43  ;;  %v2342_v16 = vmul.f32 %v12198_v31, %v2303_v37  ;;  %v2328_v43 = vpop.permute.xlu1 %2327  ;;  %v2376_v37 = vadd.s32 24, %v12182_v2 }
 0x3ad   : > { %vm2387_vm15 = vcmp.eq.s32.totalorder %v12188_v9, 0  ;;  %vm2399_vm14 = vcmp.eq.s32.totalorder %v12188_v9, 1 }
 0x3ae   : > { %v12194_v63 = vsel %vm2387_vm15, 1.0, %v12191_v59 }
 0x3af   : > { %8521 = vmatmul.mubr.msk.f32.gmra.mrb[6].mxu0 %vm1536_vm1, %v2117_v50  ;;  %8539 = vmatprep.mubr.msk.f32.mxu1 %vm1536_vm1, %v12194_v63  ;;  %v2313_v15 = vpop.permute.xlu0 %2312 }
 0x3b0   : > { %v2344_v18 = vmul.f32 %v12198_v31, %v2313_v15 }
 0x3b3   : > { %v2323_v12 = vpop.permute.xlu0 %2322 }
 0x3b4   : > { %v2346_v57 = vmul.f32 %v12198_v31, %v2323_v12 }
 0x3b7   : > { %v2333_v30 = vpop.permute.xlu0 %2332 }
 0x3b8   : > { %v2348_v56 = vmul.f32 %v12198_v31, %v2333_v30  ;;  %v2635_v30 = vld [vmem:[#allocation17 + $0x48] sm:$0xff] }
 0x476   : > { %v8513_v28 = vpop.f32.mrb[0].mxu0 }
 0x477   : > { %v2255_v4 = vadd.f32 %v8513_v28, %v7470_v26  ;;  %v2200_v32 = vpop.f32.mrb[1].mxu0 }
 0x478   : > { %v2254_v6 = vadd.f32 %v7470_v26, %v2200_v32  ;;  %v2347_v32 = vmul.f32 %v12198_v31, %v2328_v43 }
 0x479   : > { %vm2263_vm0 = vcmp.ge.f32.partialorder %v2255_v4, 0.0  ;;  %v2271_v14 = vmul.f32 0.01, %v2255_v4 }
 0x47a   : > { %vm2262_vm2 = vcmp.ge.f32.partialorder %v2254_v6, 0.0  ;;  %v2270_v20 = vmul.f32 0.01, %v2254_v6  ;;  %v8516_v45 = vpop.f32.mrb[2].mxu0 }
 0x47b   : > { %v2279_v21 = vsel %vm2263_vm0, %v2255_v4, %v2271_v14  ;;  %v2257_v44 = vadd.f32 %v8516_v45, %v7470_v26  ;;  %v2210_v17 = vpop.f32.mrb[3].mxu0  ;;  %v2381_v4 = vmul.u32 2, %v2375_v40  ;;  %v2384_v45 = vsub.s32 %v12184_v8, %v2380_v1  ;;  %v2989_v40 = vld [vmem:[#allocation17 + $0xf8] sm:$0xff]  ;;  %v2621_v1 = vld [vmem:[#allocation17 + $0x8] sm:$0xff] }
 0x47c   : > { %v2350_v51 = vadd.f32 %v2342_v16, %v2279_v21  ;;  %v2278_v22 = vsel %vm2262_vm2, %v2254_v6, %v2270_v20  ;;  %v2256_v54 = vadd.f32 %v7470_v26, %v2210_v17 }
 0x47d   : > { %v2349_v36 = vadd.f32 %v2341_v46, %v2278_v22  ;;  %vm2265_vm3 = vcmp.ge.f32.partialorder %v2257_v44, 0.0  ;;  %v2273_v55 = vmul.f32 0.01, %v2257_v44  ;;  %v2382_v46 = vmul.u32 2, %v2376_v37  ;;  %v2624_v37 = vld [vmem:[#allocation17 + $0x20] sm:$0xff] }
 0x47e   : > { %v2365_v58 = vadd.f32 %v12203_v38, %v2350_v51  ;;  %vm2264_vm4 = vcmp.ge.f32.partialorder %v2256_v54, 0.0  ;;  %v2272_v60 = vmul.f32 0.01, %v2256_v54  ;;  %v8519_v27 = vpop.f32.mrb[4].mxu0  ;;  %v2385_v21 = vsub.s32 %v12184_v8, %v2381_v4 }
 0x47f   : > { %v2364_v61 = vadd.f32 %v12203_v38, %v2349_v36  ;;  %v2281_v62 = vsel %vm2265_vm3, %v2257_v44, %v2273_v55  ;;  %v2259_v0 = vadd.f32 %v8519_v27, %v7470_v26  ;;  %v2220_v7 = vpop.f32.mrb[5].mxu0  ;;  %vm2388_vm11 = vcmp.eq.s32.totalorder %v2384_v45, 0  ;;  %v2982_v36 = vld [vmem:[#allocation17 + $0xc0] sm:$0xff]  ;;  %v2636_v27 = vld [vmem:[#allocation17 + $0x50] sm:$0xff] }
 0x480   : > { %v2352_v5 = vadd.f32 %v2344_v18, %v2281_v62  ;;  %v2280_v39 = vsel %vm2264_vm4, %v2256_v54, %v2272_v60  ;;  %v2258_v41 = vadd.f32 %v7470_v26, %v2220_v7  ;;  %v2386_v17 = vsub.s32 %v12184_v8, %v2382_v46  ;;  %v2984_v62 = vld [vmem:[#allocation17 + $0xd0] sm:$0xff]  ;;  %v2985_v7 = vld [vmem:[#allocation17 + $0xd8] sm:$0xff] }
 0x481   : > { %v2351_v10 = vadd.f32 %v2343_v24, %v2280_v39  ;;  %vm2267_vm6 = vcmp.ge.f32.partialorder %v2259_v0, 0.0  ;;  %v2275_v25 = vmul.f32 0.01, %v2259_v0  ;;  %v9091_v11 = vpack.c.bf16 %v2365_v58, %v2364_v61  ;;  %v2983_v58 = vld [vmem:[#allocation17 + $0xc8] sm:$0xff]  ;;  %v2637_v61 = vld [vmem:[#allocation17 + $0x58] sm:$0xff] }
 0x482   : > { %v2367_v29 = vadd.f32 %v12203_v38, %v2352_v5  ;;  %vm2266_vm7 = vcmp.ge.f32.partialorder %v2258_v41, 0.0  ;;  %v2274_v49 = vmul.f32 0.01, %v2258_v41  ;;  %v8522_v42 = vpop.f32.mrb[6].mxu0  ;;  %vm2389_vm12 = vcmp.eq.s32.totalorder %v2385_v21, 0  ;;  %v2639_v5 = vld [vmem:[#allocation17 + $0x68] sm:$0xff] }
 0x483   : > { %v2366_v13 = vadd.f32 %v12203_v38, %v2351_v10  ;;  %v2283_v52 = vsel %vm2267_vm6, %v2259_v0, %v2275_v25  ;;  %v2261_v47 = vadd.f32 %v8522_v42, %v7470_v26  ;;  %v2230_v48 = vpop.f32.mrb[7].mxu0  ;;  %9092 = vmatprep.subr.bf16.mxu1 %v9091_v11  ;;  %v12225_v18 = vsel %vm2388_vm11, 1.0, %v12191_v59  ;;  %v2987_v10 = vld [vmem:[#allocation17 + $0xe8] sm:$0xff]  ;;  %v2988_v42 = vld [vmem:[#allocation17 + $0xf0] sm:$0xff] }
 0x484   : > { %v2354_v50 = vadd.f32 %v2346_v57, %v2283_v52  ;;  %v2282_v33 = vsel %vm2266_vm7, %v2258_v41, %v2274_v49  ;;  %v2260_v53 = vadd.f32 %v7470_v26, %v2230_v48  ;;  %9094 = vmatpush3.bf16.msra.mxu1 %v9091_v11  ;;  %v7475_v51 = vsel %vm2389_vm12, 1.0, %v12191_v59  ;;  %v2986_v41 = vld [vmem:[#allocation17 + $0xe0] sm:$0xff]  ;;  %v2628_v52 = vld [vmem:[#allocation3 + $0x2] sm:$0xff] }
 0x485   : > { %v2353_v3 = vadd.f32 %v2345_v23, %v2282_v33  ;;  %vm2269_vm9 = vcmp.ge.f32.partialorder %v2261_v47, 0.0  ;;  %v2277_v15 = vmul.f32 0.01, %v2261_v47  ;;  %v9095_v19 = vpack.c.bf16 %v2367_v29, %v2366_v13  ;;  %v2634_v23 = vld [vmem:[#allocation17 + $0x40] sm:$0xff]  ;;  %v2641_v29 = vld [vmem:[#allocation17 + $0x78] sm:$0xff] }
 0x486   : > { %v2369_v28 = vadd.f32 %v12203_v38, %v2354_v50  ;;  %vm2268_vm10 = vcmp.ge.f32.partialorder %v2260_v53, 0.0  ;;  %v2276_v12 = vmul.f32 0.01, %v2260_v53  ;;  %vm2390_vm13 = vcmp.eq.s32.totalorder %v2386_v17, 0  ;;  %v2620_v48 = vld [vmem:[#allocation17] sm:$0xff]  ;;  %v2622_v50 = vld [vmem:[#allocation17 + $0x10] sm:$0xff] }
 0x487   : > { %v2368_v6 = vadd.f32 %v12203_v38, %v2353_v3  ;;  %v2285_v14 = vsel %vm2269_vm9, %v2261_v47, %v2277_v15  ;;  %9096 = vmatprep.subr.bf16.mxu1 %v9095_v19  ;;  %v7476_v8 = vsel %vm2390_vm13, 1.0, %v12191_v59  ;;  %vm2400_vm15 = vcmp.eq.s32.totalorder %v2384_v45, 1  ;;  %v2976_v47 = vld [vmem:[#allocation3 + $0x6] sm:$0xff]  ;;  %v2625_v3 = vld [vmem:[#allocation17 + $0x28] sm:$0xff] }
 0x488   : > { %v2356_v16 = vadd.f32 %v2348_v56, %v2285_v14  ;;  %v2284_v26 = vsel %vm2268_vm10, %v2260_v53, %v2276_v12  ;;  %9098 = vmatpush3.bf16.msra.mxu1 %v9095_v19  ;;  %vm2401_vm0 = vcmp.eq.s32.totalorder %v2385_v21, 1  ;;  %v12240_v9 = vsel %vm2400_vm15, 1.0, %v12191_v59  ;;  %v2638_v56 = vld [vmem:[#allocation17 + $0x60] sm:$0xff]  ;;  %v2623_v33 = vld [vmem:[#allocation17 + $0x18] sm:$0xff] }
 0x489   : > { %v2355_v34 = vadd.f32 %v2347_v32, %v2284_v26  ;;  %v9099_v20 = vpack.c.bf16 %v2369_v28, %v2368_v6  ;;  %v7479_v22 = vsel %vm2401_vm0, 1.0, %v12191_v59  ;;  %vm2402_vm2 = vcmp.eq.s32.totalorder %v2386_v17, 1  ;;  %v2627_v28 = vld [vmem:[#allocation17 + $0x38] sm:$0xff] }
 0x48a   : > { %v2371_v24 = vadd.f32 %v12203_v38, %v2356_v16  ;;  %v7480_v54 = vsel %vm2402_vm2, 1.0, %v12191_v59  ;;  %v11203_v55 = vmov 0.0|0.0   ;;  %v9124_v57 = vpack.c.bf16 %v2635_v30, %v2634_v23  ;;  %v2859_v23 = vld [vmem:[#allocation17 + $0x88] sm:$0xff] }
 0x48b   : > { %v2370_v44 = vadd.f32 %v12203_v38, %v2355_v34  ;;  %9100 = vmatprep.subr.bf16.mxu1 %v9099_v20  ;;  %v12234_v38 = vsel %vm2399_vm14, 1.0, %v12191_v59  ;;  %9159 = vmatprep.subr.bf16.mxu0 %v11203_v55  ;;  %v9160_v60 = vpack.c.bf16 %v2983_v58, %v2982_v36  ;;  %v9127_v0 = vpack.c.bf16 %v2637_v61, %v2636_v27  ;;  %v2861_v27 = vld [vmem:[#allocation17 + $0x98] sm:$0xff] }
 0x48c   : > { %9102 = vmatpush3.bf16.msra.mxu1 %v9099_v20  ;;  %v9163_v35 = vpack.c.bf16 %v2985_v7, %v2984_v62  ;;  %v9130_v39 = vpack.c.bf16 %v2639_v5, %v2638_v56  ;;  %v9166_v25 = vpack.c.bf16 %v2987_v10, %v2986_v41  ;;  %v9169_v13 = vpack.c.bf16 %v2989_v40, %v2988_v42  ;;  %v12300_v61 = vld [vmem:[#allocation3 + $0x8] sm:$0xff]  ;;  %v2863_v7 = vld [vmem:[#allocation17 + $0xa8] sm:$0xff]  ;;  %v2864_v56 = vld [vmem:[#allocation17 + $0xb0] sm:$0xff] }
 0x48d   : > { %v9103_v31 = vpack.c.bf16 %v2371_v24, %v2370_v44  ;;  %9161 = vmatpush3.bf16.msra.mxu0 %v9160_v60  ;;  %vm11204_vm3 = vmmov 0   ;;  %v9136_v43 = vpack.c.bf16 %v2621_v1, %v2620_v48  ;;  %v9139_v53 = vpack.c.bf16 %v2623_v33, %v2622_v50  ;;  %v2860_v60 = vld [vmem:[#allocation17 + $0x90] sm:$0xff]  ;;  %v2865_v5 = vld [vmem:[#allocation17 + $0xb8] sm:$0xff]  ;;  %v3111_v48 = vld [vmem:[#allocation17 + $0x128] sm:$0xff] }
 0x48e   : > { %9162 = vmatprep.subr.bf16.mxu0 %v11203_v55  ;;  %8676 = vmatprep.mubr.msk.f32.mxu0 %vm11204_vm3, %v12191_v59  ;;  %v9142_v15 = vpack.c.bf16 %v2625_v3, %v2624_v37  ;;  %v9151_v62 = vpack.c.bf16 %v2861_v27, %v2860_v60  ;;  %v9157_v41 = vpack.c.bf16 %v2865_v5, %v2864_v56  ;;  %v3108_v40 = vld [vmem:[#allocation17 + $0x110] sm:$0xff]  ;;  %v3113_v33 = vld [vmem:[#allocation17 + $0x138] sm:$0xff]  ;;  %v3840_v37 = vld [vmem:[#allocation23] sm:$0xff]  ;;  %vm3948_vm10 = vcmask 261120  }
 0x48f   : > { %9104 = vmatprep.subr.bf16.mxu1 %v9103_v31  ;;  %v3112_v50 = vld [vmem:[#allocation17 + $0x130] sm:$0xff]  ;;  %v3276_v27 = vld [vmem:[#allocation20 + $0xc0] sm:$0xff] }
 0x490   : > { %9106 = vmatpush3.bf16.msra.mxu1 %v9103_v31  ;;  %v3841_v3 = vld [vmem:[#allocation23 + $0x8] sm:$0xff]  ;;  %v3280_v56 = vld [vmem:[#allocation20 + $0xe0] sm:$0xff] }
 0x491   : > { %9108 = vmatprep.subr.bf16.mxu1 %v9091_v11  ;;  %9164 = vmatpush3.bf16.msra.mxu0 %v9163_v35  ;;  %v3281_v5 = vld [vmem:[#allocation20 + $0xe8] sm:$0xff] }
 0x492   : > { %9165 = vmatprep.subr.bf16.mxu0 %v11203_v55 }
 0x493   : > { %8540 = vmatmul.mubr.msk.f32.vlgmr.msra.gmra.mrb[0].mxu1 %vm1536_vm1, %v12225_v18 }
 0x494   : > { %9110 = vmatpush3.bf16.msra.mxu1 %v9091_v11  ;;  %8542 = vmatprep.mubr.msk.f32.mxu1 %vm1536_vm1, %v7475_v51  ;;  %v2640_v11 = vld [vmem:[#allocation17 + $0x70] sm:$0xff] }
 0x495   : > { %9112 = vmatprep.subr.bf16.mxu1 %v9095_v19  ;;  %9167 = vmatpush3.bf16.msra.mxu0 %v9166_v25  ;;  %v9133_v49 = vpack.c.bf16 %v2641_v29, %v2640_v11  ;;  %v3106_v25 = vld [vmem:[#allocation17 + $0x100] sm:$0xff]  ;;  %v3107_v11 = vld [vmem:[#allocation17 + $0x108] sm:$0xff] }
 0x496   : > { %9168 = vmatprep.subr.bf16.mxu0 %v11203_v55  ;;  %v9172_v42 = vpack.c.bf16 %v3107_v11, %v3106_v25  ;;  %v3251_v11 = vld [vmem:[#allocation20] sm:$0xff] }
 0x497   : > { %8543 = vmatmul.mubr.msk.f32.gmra.mrb[2].mxu1 %vm1536_vm1, %v7476_v8 }
 0x498   : > { %9114 = vmatpush3.bf16.msra.mxu1 %v9095_v19  ;;  %8561 = vmatprep.mubr.msk.f32.mxu1 %vm1536_vm1, %v12234_v38  ;;  %v2626_v19 = vld [vmem:[#allocation17 + $0x30] sm:$0xff] }
 0x499   : > { %9116 = vmatprep.subr.bf16.mxu1 %v9099_v20  ;;  %9170 = vmatpush3.bf16.msra.mxu0 %v9169_v13  ;;  %v9145_v12 = vpack.c.bf16 %v2627_v28, %v2626_v19  ;;  %v3109_v13 = vld [vmem:[#allocation17 + $0x118] sm:$0xff]  ;;  %v9343_v19 = vpack.c.bf16 %v3841_v3, %v3840_v37 }
 0x49c   : > { %9118 = vmatpush3.bf16.msra.mxu1 %v9099_v20  ;;  %8677 = vmatmul.mubr.msk.f32.vlgmr.msra.gmra.mrb[8].mxu0 %vm1536_vm1, %v2976_v47  ;;  %v3110_v47 = vld [vmem:[#allocation17 + $0x120] sm:$0xff] }
 0x49d   : > { %9120 = vmatprep.subr.bf16.mxu1 %v9103_v31  ;;  %8679 = vmatprep.mubr.msk.f32.mxu0 %vm11204_vm3, %v12191_v59 }
 0x4a0   : > { %9122 = vmatpush3.bf16.msra.mxu1 %v9103_v31 }
 0x4a1   : > { %9123 = vmatprep.subr.bf16.mxu1 %v11203_v55 }
 0x4a3   : > { %8562 = vmatmul.mubr.msk.f32.vlgmr.msra.gmra.mrb[4].mxu1 %vm1536_vm1, %v12240_v9 }
 0x4a4   : > { %8564 = vmatprep.mubr.msk.f32.mxu1 %vm1536_vm1, %v7479_v22  ;;  %9125 = vmatpush3.bf16.msra.mxu1 %v9124_v57  ;;  %v2615_v57 = vld [vmem:[#allocation3] sm:$0xff] }
 0x4a5   : > { %9126 = vmatprep.subr.bf16.mxu1 %v11203_v55 }
 0x4a7   : > { %8565 = vmatmul.mubr.msk.f32.gmra.mrb[6].mxu1 %vm1536_vm1, %v7480_v54  ;;  %v2858_v54 = vld [vmem:[#allocation17 + $0x80] sm:$0xff] }
 0x4a8   : > { %9128 = vmatpush3.bf16.msra.mxu1 %v9127_v0  ;;  %8583 = vmatprep.mubr.msk.f32.mxu1 %vm11204_vm3, %v12191_v59  ;;  %v9148_v58 = vpack.c.bf16 %v2859_v23, %v2858_v54  ;;  %v2862_v0 = vld [vmem:[#allocation17 + $0xa0] sm:$0xff] }
 0x4a9   : > { %9129 = vmatprep.subr.bf16.mxu1 %v11203_v55  ;;  %v9154_v35 = vpack.c.bf16 %v2863_v7, %v2862_v0  ;;  %v3272_v23 = vld [vmem:[#allocation20 + $0xa0] sm:$0xff]  ;;  %v3278_v0 = vld [vmem:[#allocation20 + $0xd0] sm:$0xff]  ;;  %v3279_v7 = vld [vmem:[#allocation20 + $0xd8] sm:$0xff] }
 0x4ac   : > { %9131 = vmatpush3.bf16.msra.mxu1 %v9130_v39 }
 0x4ad   : > { %9132 = vmatprep.subr.bf16.mxu1 %v11203_v55 }
 0x4b0   : > { %9134 = vmatpush3.bf16.msra.mxu1 %v9133_v49  ;;  %v2852_v49 = vld [vmem:[#allocation3 + $0x4] sm:$0xff] }
 0x4b1   : > { %9135 = vmatprep.subr.bf16.mxu1 %v11203_v55 }
 0x4b3   : > { %8584 = vmatmul.mubr.msk.f32.vlgmr.msra.gmra.mrb[8].mxu1 %vm1536_vm1, %v2628_v52  ;;  %v9175_v52 = vpack.c.bf16 %v3109_v13, %v3108_v40 }
 0x4b4   : > { %8586 = vmatprep.mubr.msk.f32.mxu1 %vm11204_vm3, %v12191_v59  ;;  %9137 = vmatpush3.bf16.msra.mxu1 %v9136_v43  ;;  %v9178_v43 = vpack.c.bf16 %v3111_v48, %v3110_v47 }
 0x4b5   : > { %9138 = vmatprep.subr.bf16.mxu1 %v11203_v55 }
 0x4b8   : > { %9140 = vmatpush3.bf16.msra.mxu1 %v9139_v53 }
 0x4b9   : > { %9141 = vmatprep.subr.bf16.mxu1 %v11203_v55 }
 0x4bc   : > { %9143 = vmatpush3.bf16.msra.mxu1 %v9142_v15  ;;  %v9181_v15 = vpack.c.bf16 %v3113_v33, %v3112_v50 }
 0x4bd   : > { %9144 = vmatprep.subr.bf16.mxu1 %v11203_v55 }
 0x4c0   : > { %9146 = vmatpush3.bf16.msra.mxu1 %v9145_v12 }
 0x4c1   : > { %9147 = vmatprep.subr.bf16.mxu1 %v11203_v55 }
 0x566   : > { %v8541_v4 = vpop.f32.mrb[0].mxu1 }
 0x567   : > { %v2489_v32 = vpop.f32.mrb[1].mxu1 }
 0x56a   : > { %v8544_v6 = vpop.f32.mrb[2].mxu1 }
 0x56b   : > { %v2499_v14 = vpop.f32.mrb[3].mxu1 }
 0x576   : > { %v8563_v16 = vpop.f32.mrb[4].mxu1 }
 0x577   : > { %v2606_v26 = vmax.f32 %v8541_v4, %v8563_v16  ;;  %v2586_v34 = vpop.f32.mrb[5].mxu1  ;;  %v3842_v4 = vld [vmem:[#allocation23 + $0x10] sm:$0xff]  ;;  %v3845_v16 = vld [vmem:[#allocation23 + $0x28] sm:$0xff] }
 0x578   : > { %v2605_v20 = vmax.f32 %v2489_v32, %v2586_v34  ;;  %v3843_v32 = vld [vmem:[#allocation23 + $0x18] sm:$0xff]  ;;  %v3846_v34 = vld [vmem:[#allocation23 + $0x30] sm:$0xff] }
 0x579   : > { %2612 = vst.msk [vmem:[#allocation3 + $0x18] sm:$0xff] %vm1536_vm1, %v2606_v26 }
 0x57a   : > { %2611 = vst.msk [vmem:[#allocation3 + $0x10] sm:$0xff] %vm1536_vm1, %v2605_v20  ;;  %v8566_v45 = vpop.f32.mrb[6].mxu1  ;;  %v3847_v20 = vld [vmem:[#allocation23 + $0x38] sm:$0xff] }
 0x57b   : > { %v2608_v46 = vmax.f32 %v8544_v6, %v8566_v45  ;;  %v2596_v24 = vpop.f32.mrb[7].mxu1  ;;  %v9347_v6 = vpack.c.bf16 %v3843_v32, %v3842_v4  ;;  %v9355_v45 = vpack.c.bf16 %v3847_v20, %v3846_v34 }
 0x57c   : > { %v2607_v21 = vmax.f32 %v2499_v14, %v2596_v24  ;;  %v3844_v14 = vld [vmem:[#allocation23 + $0x20] sm:$0xff] }
 0x57d   : > { %2614 = vst.msk [vmem:[#allocation3 + $0x28] sm:$0xff] %vm1536_vm1, %v2608_v46  ;;  %v9351_v26 = vpack.c.bf16 %v3845_v16, %v3844_v14 }
 0x57e   : > { %2613 = vst.msk [vmem:[#allocation3 + $0x20] sm:$0xff] %vm1536_vm1, %v2607_v21 }
 0x580   : > { %v12315_v10 = vld [vmem:[#allocation3 + $0x18] sm:$0xff] }
 0x581   : > { %v2629_v44 = vld [vmem:[#allocation3 + $0xa] sm:$0xff]  ;;  %v2630_v17 = vld [vmem:[#allocation3 + $0x12] sm:$0xff] }
 0x582   : > { %v2977_v31 = vld [vmem:[#allocation3 + $0xe] sm:$0xff]  ;;  %8587 = vmatmul.mubr.msk.f32.gmra.mrb[10].mxu1 %vm1536_vm1, %v2629_v44  ;;  %v2978_v51 = vld [vmem:[#allocation3 + $0x16] sm:$0xff]  ;;  %v12372_v44 = vpop.f32.mrb[8].mxu0 }
 0x583   : > { %8680 = vmatmul.mubr.msk.f32.gmra.mrb[10].mxu0 %vm1536_vm1, %v2977_v31  ;;  %8589 = vmatprep.mubr.msk.f32.mxu1 %vm11204_vm3, %v12191_v59  ;;  %v12308_v39 = vld [vmem:[#allocation3 + $0x10] sm:$0xff] }
 0x584   : > { %8682 = vmatprep.mubr.msk.f32.mxu0 %vm11204_vm3, %v12191_v59  ;;  %v2853_v1 = vld [vmem:[#allocation3 + $0xc] sm:$0xff]  ;;  %v2854_v53 = vld [vmem:[#allocation3 + $0x14] sm:$0xff] }
 0x585   : > { %v2631_v8 = vld [vmem:[#allocation3 + $0x1a] sm:$0xff]  ;;  %v2632_v30 = vld [vmem:[#allocation3 + $0x22] sm:$0xff]  ;;  %v3268_v31 = vld [vmem:[#allocation20 + $0x80] sm:$0xff] }
 0x586   : > { %8590 = vmatmul.mubr.msk.f32.gmra.mrb[12].mxu1 %vm1536_vm1, %v2630_v17  ;;  %v2979_v22 = vld [vmem:[#allocation3 + $0x1e] sm:$0xff]  ;;  %v2980_v36 = vld [vmem:[#allocation3 + $0x26] sm:$0xff]  ;;  %v12370_v24 = vpop.f32.mrb[8].mxu1 }
 0x587   : > { %8683 = vmatmul.mubr.msk.f32.gmra.mrb[12].mxu0 %vm1536_vm1, %v2978_v51  ;;  %8592 = vmatprep.mubr.msk.f32.mxu1 %vm11204_vm3, %v12191_v59  ;;  %v12322_v29 = vld [vmem:[#allocation3 + $0x20] sm:$0xff]  ;;  %v3104_v46 = vld [vmem:[#allocation3 + $0x28] sm:$0xff]  ;;  %v8585_v21 = vpop.f32.mrb[9].mxu1  ;;  %v3269_v17 = vld [vmem:[#allocation20 + $0x88] sm:$0xff] }
 0x588   : > { %8685 = vmatprep.mubr.msk.f32.mxu0 %vm11204_vm3, %v12191_v59  ;;  %v2855_v28 = vld [vmem:[#allocation3 + $0x1c] sm:$0xff]  ;;  %v2856_v12 = vld [vmem:[#allocation3 + $0x24] sm:$0xff]  ;;  %v9183_v51 = vpack.c.bf16 %v3269_v17, %v3268_v31 }
 0x58a   : > { %8593 = vmatmul.mubr.msk.f32.gmra.mrb[14].mxu1 %vm1536_vm1, %v2631_v8  ;;  %9184 = vmatprep.subr.bf16.mxu0 %v9183_v51  ;;  %v3270_v8 = vld [vmem:[#allocation20 + $0x90] sm:$0xff] }
 0x58b   : > { %8686 = vmatmul.mubr.msk.f32.gmra.mrb[14].mxu0 %vm1536_vm1, %v2979_v22  ;;  %8595 = vmatprep.mubr.msk.f32.mxu1 %vm11204_vm3, %v12191_v59  ;;  %v3271_v22 = vld [vmem:[#allocation20 + $0x98] sm:$0xff] }
 0x58c   : > { %8688 = vmatprep.mubr.msk.f32.mxu0 %vm11204_vm3, %v12191_v59  ;;  %9186 = vmatpush3.bf16.msra.mxu0 %v9183_v51  ;;  %v9187_v54 = vpack.c.bf16 %v3271_v22, %v3270_v8 }
 0x58e   : > { %8596 = vmatmul.mubr.msk.f32.gmra.mrb[16].mxu1 %vm1536_vm1, %v2632_v30  ;;  %9188 = vmatprep.subr.bf16.mxu0 %v9187_v54  ;;  %v3273_v30 = vld [vmem:[#allocation20 + $0xa8] sm:$0xff] }
 0x58f   : > { %8689 = vmatmul.mubr.msk.f32.gmra.mrb[16].mxu0 %vm1536_vm1, %v2980_v36  ;;  %8614 = vmatprep.mubr.msk.f32.mxu1 %vm11204_vm3, %v12191_v59  ;;  %v9191_v36 = vpack.c.bf16 %v3273_v30, %v3272_v23 }
 0x590   : > { %9190 = vmatpush3.bf16.msra.mxu0 %v9187_v54 }
 0x591   : > { %9192 = vmatprep.subr.bf16.mxu0 %v9191_v36 }
 0x592   : > { %8615 = vmatmul.mubr.msk.f32.vlgmr.msra.gmra.mrb[18].mxu1 %vm1536_vm1, %v2615_v57  ;;  %v3274_v57 = vld [vmem:[#allocation20 + $0xb0] sm:$0xff] }
 0x593   : > { %8617 = vmatprep.mubr.msk.f32.mxu1 %vm11204_vm3, %v12191_v59  ;;  %9149 = vmatpush3.bf16.msra.mxu1 %v9148_v58  ;;  %v3275_v58 = vld [vmem:[#allocation20 + $0xb8] sm:$0xff] }
 0x594   : > { %9150 = vmatprep.subr.bf16.mxu1 %v11203_v55  ;;  %9194 = vmatpush3.bf16.msra.mxu0 %v9191_v36  ;;  %v9195_v60 = vpack.c.bf16 %v3275_v58, %v3274_v57 }
 0x596   : > { %8618 = vmatmul.mubr.msk.f32.gmra.mrb[20].mxu1 %vm1536_vm1, %v12300_v61  ;;  %9196 = vmatprep.subr.bf16.mxu0 %v9195_v60 }
 0x597   : > { %8620 = vmatprep.mubr.msk.f32.mxu1 %vm11204_vm3, %v12191_v59  ;;  %9152 = vmatpush3.bf16.msra.mxu1 %v9151_v62 }
 0x598   : > { %9153 = vmatprep.subr.bf16.mxu1 %v11203_v55  ;;  %9198 = vmatpush3.bf16.msra.mxu0 %v9195_v60 }
 0x59a   : > { %8621 = vmatmul.mubr.msk.f32.gmra.mrb[22].mxu1 %vm1536_vm1, %v12308_v39 }
 0x59b   : > { %8623 = vmatprep.mubr.msk.f32.mxu1 %vm11204_vm3, %v12191_v59  ;;  %9155 = vmatpush3.bf16.msra.mxu1 %v9154_v35  ;;  %v9203_v35 = vpack.c.bf16 %v3279_v7, %v3278_v0 }
 0x59c   : > { %9156 = vmatprep.subr.bf16.mxu1 %v11203_v55 }
 0x59e   : > { %8624 = vmatmul.mubr.msk.f32.gmra.mrb[24].mxu1 %vm1536_vm1, %v12315_v10 }
 0x59f   : > { %8626 = vmatprep.mubr.msk.f32.mxu1 %vm11204_vm3, %v12191_v59  ;;  %9158 = vmatpush3.bf16.msra.mxu1 %v9157_v41  ;;  %v3282_v41 = vld [vmem:[#allocation20 + $0xf0] sm:$0xff] }
 0x5a0   : > { %9171 = vmatprep.subr.bf16.mxu1 %v11203_v55 }
 0x5a2   : > { %8627 = vmatmul.mubr.msk.f32.gmra.mrb[26].mxu1 %vm1536_vm1, %v12322_v29 }
 0x5a3   : > { %8645 = vmatprep.mubr.msk.f32.mxu1 %vm11204_vm3, %v12191_v59 }
 0x5a6   : > { %8646 = vmatmul.mubr.msk.f32.vlgmr.msra.gmra.mrb[28].mxu1 %vm1536_vm1, %v2852_v49 }
 0x5a7   : > { %8648 = vmatprep.mubr.msk.f32.mxu1 %vm11204_vm3, %v12191_v59  ;;  %9173 = vmatpush3.bf16.msra.mxu1 %v9172_v42 }
 0x5a8   : > { %9174 = vmatprep.subr.bf16.mxu1 %v11203_v55 }
 0x5aa   : > { %8649 = vmatmul.mubr.msk.f32.gmra.mrb[30].mxu1 %vm1536_vm1, %v2853_v1 }
 0x5ab   : > { %8651 = vmatprep.mubr.msk.f32.mxu1 %vm11204_vm3, %v12191_v59  ;;  %9176 = vmatpush3.bf16.msra.mxu1 %v9175_v52 }
 0x5ac   : > { %9177 = vmatprep.subr.bf16.mxu1 %v11203_v55 }
 0x5ae   : > { %8652 = vmatmul.mubr.msk.f32.gmra.mrb[32].mxu1 %vm1536_vm1, %v2854_v53 }
 0x5af   : > { %8654 = vmatprep.mubr.msk.f32.mxu1 %vm11204_vm3, %v12191_v59  ;;  %9179 = vmatpush3.bf16.msra.mxu1 %v9178_v43 }
 0x5b0   : > { %9180 = vmatprep.subr.bf16.mxu1 %v11203_v55 }
 0x5b2   : > { %8655 = vmatmul.mubr.msk.f32.gmra.mrb[34].mxu1 %vm1536_vm1, %v2855_v28 }
 0x5b3   : > { %8657 = vmatprep.mubr.msk.f32.mxu1 %vm11204_vm3, %v12191_v59  ;;  %9182 = vmatpush3.bf16.msra.mxu1 %v9181_v15 }
 0x5b4   : > { %9344 = vmatprep.subr.bf16.mxu1 %v9343_v19 }
 0x5b6   : > { %8658 = vmatmul.mubr.msk.f32.gmra.mrb[36].mxu1 %vm1536_vm1, %v2856_v12 }
 0x5b7   : > { %8707 = vmatprep.mubr.msk.f32.mxu1 %vm11204_vm3, %v12191_v59 }
 0x5ba   : > { %8708 = vmatmul.mubr.msk.f32.vlgmr.msra.gmra.mrb[38].mxu1 %vm1536_vm1, %v12300_v61  ;;  %v3277_v61 = vld [vmem:[#allocation20 + $0xc8] sm:$0xff] }
 0x5bb   : > { %8710 = vmatprep.mubr.msk.f32.mxu1 %vm11204_vm3, %v12191_v59  ;;  %9346 = vmatpush3.bf16.msra.mxu1 %v9343_v19  ;;  %v9199_v62 = vpack.c.bf16 %v3277_v61, %v3276_v27 }
 0x5bc   : > { %9348 = vmatprep.subr.bf16.mxu1 %v9347_v6 }
 0x5bd   : > { %9200 = vmatprep.subr.bf16.mxu0 %v9199_v62 }
 0x5be   : > { %8711 = vmatmul.mubr.msk.f32.gmra.mrb[40].mxu1 %vm1536_vm1, %v12308_v39  ;;  %9202 = vmatpush3.bf16.msra.mxu0 %v9199_v62 }
 0x5bf   : > { %8713 = vmatprep.mubr.msk.f32.mxu1 %vm11204_vm3, %v12191_v59  ;;  %9350 = vmatpush3.bf16.msra.mxu1 %v9347_v6 }
 0x5c0   : > { %9352 = vmatprep.subr.bf16.mxu1 %v9351_v26  ;;  %9204 = vmatprep.subr.bf16.mxu0 %v9203_v35 }
 0x5c2   : > { %8714 = vmatmul.mubr.msk.f32.gmra.mrb[42].mxu1 %vm1536_vm1, %v12315_v10  ;;  %9206 = vmatpush3.bf16.msra.mxu0 %v9203_v35 }
 0x5c3   : > { %8716 = vmatprep.mubr.msk.f32.mxu1 %vm11204_vm3, %v12191_v59  ;;  %9354 = vmatpush3.bf16.msra.mxu1 %v9351_v26 }
 0x5c4   : > { %9356 = vmatprep.subr.bf16.mxu1 %v9355_v45 }
 0x5c6   : > { %8717 = vmatmul.mubr.msk.f32.gmra.mrb[44].mxu1 %vm1536_vm1, %v12322_v29 }
 0x5c7   : > { %8719 = vmatprep.mubr.msk.f32.mxu1 %vm11204_vm3, %v12191_v59  ;;  %9358 = vmatpush3.bf16.msra.mxu1 %v9355_v45  ;;  %v8678_v59 = vpop.f32.mrb[9].mxu0 }
 0x5ca   : > { %8720 = vmatmul.mubr.msk.f32.gmra.mrb[46].mxu1 %vm1536_vm1, %v3104_v46 }
 0x5cb   : > { %8928 = vmatprep.mubr.msk.f32.mxu1 %vm1536_vm1, %v12308_v39  ;;  %v9207_v39 = vpack.c.bf16 %v3281_v5, %v3280_v56 }
 0x5cd   : > { %9208 = vmatprep.subr.bf16.mxu0 %v9207_v39 }
 0x5ce   : > { %8929 = vmatmul.mubr.msk.f32.vlgmr.msra.gmra.mrb[48].mxu1 %vm1536_vm1, %v12315_v10  ;;  %9210 = vmatpush3.bf16.msra.mxu0 %v9207_v39  ;;  %v3283_v10 = vld [vmem:[#allocation20 + $0xf8] sm:$0xff] }
 0x5cf   : > { %8931 = vmatprep.mubr.msk.f32.mxu1 %vm1536_vm1, %v12322_v29  ;;  %v9211_v25 = vpack.c.bf16 %v3283_v10, %v3282_v41  ;;  %v3252_v29 = vld [vmem:[#allocation20 + $0x8] sm:$0xff]  ;;  %v7514_v10 = vld [vmem:[#allocation18] ss:$0 sm:$0xff] }
 0x5d0   : > { %v12374_v49 = vpack.c.bf16 %v3252_v29, %v3251_v11 }
 0x5d1   : > { %9212 = vmatprep.subr.bf16.mxu0 %v9211_v25 }
 0x5d2   : > { %8932 = vmatmul.mubr.msk.f32.gmra.mrb[50].mxu1 %vm1536_vm1, %v3104_v46  ;;  %9214 = vmatpush3.bf16.msra.mxu0 %v9211_v25 }
 0x5d3   : > { %9216 = vmatprep.subr.bf16.mxu0 %v12374_v49  ;;  %8942 = vmatprep.mubr.msk.f32.mxu1 %vm3948_vm10, %v12194_v63 }
 0x655   : > { %v2728_v42 = vpop.f32.mrb[10].mxu1 }
 0x656   : > { %v3076_v40 = vpop.f32.mrb[10].mxu0  ;;  %v8588_v13 = vpop.f32.mrb[11].mxu1 }
 0x657   : > { %v8681_v52 = vpop.f32.mrb[11].mxu0 }
 0x659   : > { %v2733_v47 = vpop.f32.mrb[12].mxu1 }
 0x65a   : > { %v3081_v48 = vpop.f32.mrb[12].mxu0  ;;  %v8591_v1 = vpop.f32.mrb[13].mxu1 }
 0x65b   : > { %v8684_v43 = vpop.f32.mrb[13].mxu0 }
 0x65d   : > { %v2738_v50 = vpop.f32.mrb[14].mxu1 }
 0x65e   : > { %v3086_v33 = vpop.f32.mrb[14].mxu0  ;;  %v8594_v53 = vpop.f32.mrb[15].mxu1 }
 0x65f   : > { %v8687_v37 = vpop.f32.mrb[15].mxu0 }
 0x661   : > { %v2743_v3 = vpop.f32.mrb[16].mxu1 }
 0x662   : > { %v3091_v15 = vpop.f32.mrb[16].mxu0  ;;  %v8597_v19 = vpop.f32.mrb[17].mxu1 }
 0x663   : > { %v8690_v28 = vpop.f32.mrb[17].mxu0 }
 0x665   : > { %v2828_v12 = vpop.f32.mrb[18].mxu1 }
 0x666   : > { %v2829_v4 = vadd.f32 %v2828_v12, %v12370_v24  ;;  %v8616_v32 = vpop.f32.mrb[19].mxu1 }
 0x667   : > { %v3253_v32 = vld [vmem:[#allocation20 + $0x10] sm:$0xff] }
 0x669   : > { %v2833_v6 = vpop.f32.mrb[20].mxu1 }
 0x66a   : > { %v2834_v14 = vadd.f32 %v2833_v6, %v2728_v42  ;;  %v8619_v16 = vpop.f32.mrb[21].mxu1  ;;  %v3254_v6 = vld [vmem:[#allocation20 + $0x18] sm:$0xff] }
 0x66d   : > { %v2838_v26 = vpop.f32.mrb[22].mxu1 }
 0x66e   : > { %v2839_v34 = vadd.f32 %v2838_v26, %v2733_v47  ;;  %v8622_v20 = vpop.f32.mrb[23].mxu1 }
 0x671   : > { %v2843_v45 = vpop.f32.mrb[24].mxu1 }
 0x672   : > { %v2844_v46 = vadd.f32 %v2843_v45, %v2738_v50  ;;  %v8625_v21 = vpop.f32.mrb[25].mxu1 }
 0x673   : > { %v9219_v21 = vpack.c.bf16 %v3254_v6, %v3253_v32  ;;  %v3481_v32 = vld [vmem:[#allocation20 + $0x140] sm:$0xff]  ;;  %v3482_v6 = vld [vmem:[#allocation20 + $0x148] sm:$0xff] }
 0x675   : > { %v2848_v59 = vpop.f32.mrb[26].mxu1 }
 0x676   : > { %v2849_v31 = vadd.f32 %v2848_v59, %v2743_v3  ;;  %v8628_v17 = vpop.f32.mrb[27].mxu1 }
 0x677   : > { %v3256_v17 = vld [vmem:[#allocation20 + $0x28] sm:$0xff] }
 0x679   : > { %v2947_v51 = vpop.f32.mrb[28].mxu1 }
 0x67a   : > { %v2971_v8 = vadd.f32 %v2947_v51, %v2829_v4  ;;  %v8647_v22 = vpop.f32.mrb[29].mxu1 }
 0x67c   : > { %v3095_v54 = vadd.f32 %v12372_v44, %v2971_v8 }
 0x67d   : > { %v2952_v23 = vpop.f32.mrb[30].mxu1 }
 0x67e   : > { %v2972_v24 = vadd.f32 %v2952_v23, %v2834_v14  ;;  %v8650_v30 = vpop.f32.mrb[31].mxu1 }
 0x680   : > { %v3096_v36 = vadd.f32 %v3076_v40, %v2972_v24 }
 0x681   : > { %v2957_v57 = vpop.f32.mrb[32].mxu1 }
 0x682   : > { %v2973_v58 = vadd.f32 %v2957_v57, %v2839_v34  ;;  %v8653_v60 = vpop.f32.mrb[33].mxu1  ;;  %v3257_v57 = vld [vmem:[#allocation20 + $0x30] sm:$0xff] }
 0x684   : > { %v3097_v27 = vadd.f32 %v3081_v48, %v2973_v58  ;;  %v3258_v58 = vld [vmem:[#allocation20 + $0x38] sm:$0xff] }
 0x685   : > { %v2962_v61 = vpop.f32.mrb[34].mxu1 }
 0x686   : > { %v2974_v62 = vadd.f32 %v2962_v61, %v2844_v46  ;;  %v8656_v0 = vpop.f32.mrb[35].mxu1 }
 0x688   : > { %v3098_v7 = vadd.f32 %v3086_v33, %v2974_v62  ;;  %v9227_v62 = vpack.c.bf16 %v3258_v58, %v3257_v57  ;;  %v3595_v57 = vld [vmem:[#allocation20 + $0x198] sm:$0xff] }
 0x689   : > { %v2967_v35 = vpop.f32.mrb[36].mxu1 }
 0x68a   : > { %v2975_v56 = vadd.f32 %v2967_v35, %v2849_v31  ;;  %v8659_v5 = vpop.f32.mrb[37].mxu1  ;;  %v3255_v31 = vld [vmem:[#allocation20 + $0x20] sm:$0xff]  ;;  %v3260_v35 = vld [vmem:[#allocation20 + $0x48] sm:$0xff] }
 0x68b   : > { %v9223_v30 = vpack.c.bf16 %v3256_v17, %v3255_v31  ;;  %v3261_v5 = vld [vmem:[#allocation20 + $0x50] sm:$0xff]  ;;  %v3488_v31 = vld [vmem:[#allocation20 + $0x178] sm:$0xff] }
 0x68c   : > { %v3099_v39 = vadd.f32 %v3091_v15, %v2975_v56 }
 0x68d   : > { %v3195_v41 = vpop.f32.mrb[38].mxu1 }
 0x68e   : > { %v3219_v25 = vadd.f32 %v3195_v41, %v3095_v54  ;;  %v8709_v44 = vpop.f32.mrb[39].mxu1 }
 0x690   : > { %v3231_v11 = vadd.f32 %v7514_v10, %v3219_v25  ;;  %v3264_v25 = vld [vmem:[#allocation20 + $0x68] sm:$0xff] }
 0x691   : > { %v3200_v29 = vpop.f32.mrb[40].mxu1 }
 0x692   : > { %v3241_v42 = vmul.f32 0.01, %v3231_v11  ;;  %v3220_v40 = vadd.f32 %v3200_v29, %v3096_v36  ;;  %v8712_v13 = vpop.f32.mrb[41].mxu1  ;;  %vm3236_vm1 = vcmp.ge.f32.partialorder %v3231_v11, 0.0  ;;  %v3266_v29 = vld [vmem:[#allocation20 + $0x78] sm:$0xff] }
 0x693   : > { %v3474_v13 = vld [vmem:[#allocation20 + $0x108] sm:$0xff] }
 0x694   : > { %v3232_v52 = vadd.f32 %v7514_v10, %v3220_v40  ;;  %v12379_v48 = vsel %vm3236_vm1, %v3231_v11, %v3241_v42  ;;  %v3265_v11 = vld [vmem:[#allocation20 + $0x70] sm:$0xff]  ;;  %v3473_v40 = vld [vmem:[#allocation20 + $0x100] sm:$0xff] }
 0x695   : > { %v3205_v47 = vpop.f32.mrb[42].mxu1  ;;  %v3289_v3 = vrot.slane %v12379_v48, 2  ;;  %v9243_v42 = vpack.c.bf16 %v3266_v29, %v3265_v11 }
 0x696   : > { %vm3237_vm4 = vcmp.ge.f32.partialorder %v3232_v52, 0.0  ;;  %v3242_v1 = vmul.f32 0.01, %v3232_v52  ;;  %v3221_v43 = vadd.f32 %v3205_v47, %v3097_v27  ;;  %v8715_v50 = vpop.f32.mrb[43].mxu1  ;;  %v3475_v47 = vld [vmem:[#allocation20 + $0x110] sm:$0xff] }
 0x697   : > { %v3477_v50 = vld [vmem:[#allocation20 + $0x120] sm:$0xff] }
 0x698   : > { %v12381_v33 = vsel %vm3237_vm4, %v3232_v52, %v3242_v1  ;;  %v3233_v53 = vadd.f32 %v7514_v10, %v3221_v43  ;;  %v9247_v52 = vpack.c.bf16 %v3474_v13, %v3473_v40  ;;  %v3476_v1 = vld [vmem:[#allocation20 + $0x118] sm:$0xff]  ;;  %v3601_v40 = vld [vmem:[#allocation20 + $0x1c8] sm:$0xff] }
 0x699   : > { %v3210_v37 = vpop.f32.mrb[44].mxu1  ;;  %v3290_v15 = vrot.slane %v12381_v33, 2  ;;  %v9251_v43 = vpack.c.bf16 %v3476_v1, %v3475_v47  ;;  %v3603_v47 = vld [vmem:[#allocation20 + $0x1d8] sm:$0xff]  ;;  %v3604_v1 = vld [vmem:[#allocation20 + $0x1e0] sm:$0xff] }
 0x69a   : > { %vm3238_vm6 = vcmp.ge.f32.partialorder %v3233_v53, 0.0  ;;  %v3243_v19 = vmul.f32 0.01, %v3233_v53  ;;  %v3222_v28 = vadd.f32 %v3210_v37, %v3098_v7  ;;  %v8718_v12 = vpop.f32.mrb[45].mxu1  ;;  %v3259_v7 = vld [vmem:[#allocation20 + $0x40] sm:$0xff]  ;;  %v3490_v37 = vrot.slane %v12381_v33, 4 }
 0x69b   : > { %v3291_v4 = vsel %vm1788_vm5, %v3289_v3, %v3290_v15  ;;  %v9231_v56 = vpack.c.bf16 %v3260_v35, %v3259_v7  ;;  %v3489_v3 = vrot.slane %v12379_v48, 4  ;;  %v3596_v7 = vld [vmem:[#allocation20 + $0x1a0] sm:$0xff]  ;;  %v3597_v35 = vld [vmem:[#allocation20 + $0x1a8] sm:$0xff] }
 0x69c   : > { %v12386_v14 = vsel %vm3238_vm6, %v3233_v53, %v3243_v19  ;;  %v3234_v16 = vadd.f32 %v7514_v10, %v3222_v28  ;;  %8754 = vmatprep.mubr.f32.mxu0 %v3291_v4  ;;  %v3478_v53 = vld [vmem:[#allocation20 + $0x128] sm:$0xff]  ;;  %v3479_v19 = vld [vmem:[#allocation20 + $0x130] sm:$0xff]  ;;  %v3480_v28 = vld [vmem:[#allocation20 + $0x138] sm:$0xff] }
 0x69d   : > { %v3215_v26 = vpop.f32.mrb[46].mxu1  ;;  %v3292_v34 = vrot.slane %v12386_v14, 2  ;;  %v3491_v12 = vsel %vm2100_vm8, %v3489_v3, %v3490_v37  ;;  %v9259_v4 = vpack.c.bf16 %v3480_v28, %v3479_v19  ;;  %v3713_v19 = vld [vmem:[#allocation20 + $0x208] sm:$0xff] }
 0x69e   : > { %vm3239_vm7 = vcmp.ge.f32.partialorder %v3234_v16, 0.0  ;;  %v3244_v20 = vmul.f32 0.01, %v3234_v16  ;;  %v3223_v45 = vadd.f32 %v3215_v26, %v3099_v39  ;;  %v8721_v46 = vpop.f32.mrb[47].mxu1  ;;  %v3262_v39 = vld [vmem:[#allocation20 + $0x58] sm:$0xff]  ;;  %v3483_v26 = vld [vmem:[#allocation20 + $0x150] sm:$0xff] }
 0x69f   : > { %v3293_v59 = vsel %vm1788_vm5, %v3290_v15, %v3292_v34  ;;  %v9235_v41 = vpack.c.bf16 %v3262_v39, %v3261_v5  ;;  %v9255_v15 = vpack.c.bf16 %v3478_v53, %v3477_v50  ;;  %v3486_v46 = vld [vmem:[#allocation20 + $0x168] sm:$0xff]  ;;  %v3610_v5 = vrot.slane %v12381_v33, 6  ;;  %v3606_v53 = vld [vmem:[#allocation20 + $0x1f0] sm:$0xff] }
 0x6a0   : > { %v12390_v51 = vsel %vm3239_vm7, %v3234_v16, %v3244_v20  ;;  %v3235_v8 = vadd.f32 %v7514_v10, %v3223_v45  ;;  %8755 = vmatmul.mubr.f32.vlgmr.msra.gmra.mrb[18].mxu0 %v3293_v59  ;;  %v3263_v10 = vld [vmem:[#allocation20 + $0x60] sm:$0xff]  ;;  %v9263_v16 = vpack.c.bf16 %v3482_v6, %v3481_v32  ;;  %v3487_v59 = vld [vmem:[#allocation20 + $0x170] sm:$0xff]  ;;  %v3609_v39 = vrot.slane %v12379_v48, 6  ;;  %v3715_v32 = vld [vmem:[#allocation20 + $0x218] sm:$0xff] }
 0x6a1   : > { %9218 = vmatpush3.bf16.msra.mxu0 %v12374_v49  ;;  %v12393_v22 = vpop.f32.mrb[48].mxu1  ;;  %v3294_v54 = vrot.slane %v12390_v51, 2  ;;  %v9239_v44 = vpack.c.bf16 %v3264_v25, %v3263_v10  ;;  %v3485_v45 = vld [vmem:[#allocation20 + $0x160] sm:$0xff]  ;;  %v9275_v17 = vpack.c.bf16 %v3488_v31, %v3487_v59  ;;  %v3494_v58 = vrot.slane %v12390_v51, 4  ;;  %v3598_v25 = vld [vmem:[#allocation20 + $0x1b0] sm:$0xff] }
 0x6a2   : > { %vm3240_vm9 = vcmp.ge.f32.partialorder %v3235_v8, 0.0  ;;  %v3245_v23 = vmul.f32 0.01, %v3235_v8  ;;  %v12396_v24 = vpop.f32.mrb[49].mxu1  ;;  %9220 = vmatprep.subr.bf16.mxu0 %v9219_v21  ;;  %v3614_v6 = vrot.slane %v12390_v51, 6  ;;  %v3718_v31 = vld [vmem:[#allocation20 + $0x230] sm:$0xff] }
 0x6a3   : > { %v3295_v36 = vsel %vm1788_vm5, %v3292_v34, %v3294_v54  ;;  %v3484_v34 = vld [vmem:[#allocation20 + $0x158] sm:$0xff] }
 0x6a4   : > { %v12399_v60 = vsel %vm3240_vm9, %v3235_v8, %v3245_v23  ;;  %8757 = vmatprep.mubr.f32.mxu0 %v3295_v36  ;;  %v9267_v20 = vpack.c.bf16 %v3484_v34, %v3483_v26  ;;  %v3592_v8 = vld [vmem:[#allocation20 + $0x180] sm:$0xff]  ;;  %v3594_v36 = vld [vmem:[#allocation20 + $0x190] sm:$0xff] }
 0x6a5   : > { %9222 = vmatpush3.bf16.msra.mxu0 %v9219_v21  ;;  %v12401_v27 = vpop.f32.mrb[50].mxu1  ;;  %v3296_v49 = vrot.slane %v12399_v60, 2  ;;  %v9271_v21 = vpack.c.bf16 %v3486_v46, %v3485_v45  ;;  %v3616_v34 = vrot.slane %v12399_v60, 6  ;;  %v3717_v45 = vld [vmem:[#allocation20 + $0x228] sm:$0xff] }
 0x6a6   : > { %v12404_v61 = vpop.f32.mrb[51].mxu1  ;;  %9224 = vmatprep.subr.bf16.mxu0 %v9223_v30 }
 0x6a7   : > { %v3297_v0 = vsel %vm1788_vm5, %v3294_v54, %v3296_v49  ;;  %v3593_v54 = vld [vmem:[#allocation20 + $0x188] sm:$0xff]  ;;  %v9283_v49 = vpack.c.bf16 %v3595_v57, %v3594_v36  ;;  %vm3608_vm5 = vcmask 1041408   ;;  %v3722_v36 = vld [vmem:[#allocation20 + $0x250] sm:$0xff]  ;;  %v3723_v57 = vld [vmem:[#allocation20 + $0x258] sm:$0xff] }
 0x6a8   : > { %8758 = vmatmul.mubr.f32.gmra.mrb[20].mxu0 %v3297_v0  ;;  %v9279_v23 = vpack.c.bf16 %v3593_v54, %v3592_v8  ;;  %v3496_v0 = vrot.slane %v12399_v60, 4  ;;  %v3611_v11 = vsel %vm3608_vm5, %v3609_v39, %v3610_v5  ;;  %v3617_v59 = vsel %vm3608_vm5, %v3614_v6, %v3616_v34  ;;  %v3720_v54 = vld [vmem:[#allocation20 + $0x240] sm:$0xff]  ;;  %v7531_v34 = vld [vmem:[%s13915_s17 + $0x130] sm:$0xff] }
 0x6a9   : > { %9226 = vmatpush3.bf16.msra.mxu0 %v9223_v30  ;;  %8792 = vmatprep.mubr.f32.mxu0 %v12379_v48  ;;  %v3492_v30 = vrot.slane %v12386_v14, 4 }
 0x6aa   : > { %9228 = vmatprep.subr.bf16.mxu0 %v9227_v62  ;;  %v3497_v10 = vsel %vm2100_vm8, %v3494_v58, %v3496_v0 }
 0x6ad   : > { %9230 = vmatpush3.bf16.msra.mxu0 %v9227_v62  ;;  %v3493_v62 = vsel %vm2100_vm8, %v3490_v37, %v3492_v30  ;;  %v3607_v37 = vld [vmem:[#allocation20 + $0x1f8] sm:$0xff] }
 0x6ae   : > { %9232 = vmatprep.subr.bf16.mxu0 %v9231_v56  ;;  %v9307_v3 = vpack.c.bf16 %v3607_v37, %v3606_v53 }
 0x6b1   : > { %9234 = vmatpush3.bf16.msra.mxu0 %v9231_v56  ;;  %v3495_v56 = vsel %vm2100_vm8, %v3492_v30, %v3494_v58  ;;  %v9331_v58 = vpack.c.bf16 %v3723_v57, %v3722_v36  ;;  %v7539_v36 = vld [vmem:[%s13915_s17 + $0x170] sm:$0xff]  ;;  %v7542_v57 = vld [vmem:[%s13915_s17 + $0x188] sm:$0xff] }
 0x6b2   : > { %9236 = vmatprep.subr.bf16.mxu0 %v9235_v41 }
 0x6b5   : > { %9238 = vmatpush3.bf16.msra.mxu0 %v9235_v41  ;;  %v9287_v41 = vpack.c.bf16 %v3597_v35, %v3596_v7  ;;  %v3726_v7 = vld [vmem:[#allocation20 + $0x270] sm:$0xff]  ;;  %v3727_v35 = vld [vmem:[#allocation20 + $0x278] sm:$0xff] }
 0x6b6   : > { %9240 = vmatprep.subr.bf16.mxu0 %v9239_v44 }
 0x6b9   : > { %9242 = vmatpush3.bf16.msra.mxu0 %v9239_v44  ;;  %v3599_v44 = vld [vmem:[#allocation20 + $0x1b8] sm:$0xff] }
 0x6ba   : > { %9244 = vmatprep.subr.bf16.mxu0 %v9243_v42  ;;  %v9291_v29 = vpack.c.bf16 %v3599_v44, %v3598_v25 }
 0x6bd   : > { %9246 = vmatpush3.bf16.msra.mxu0 %v9243_v42  ;;  %v3600_v42 = vld [vmem:[#allocation20 + $0x1c0] sm:$0xff] }
 0x6be   : > { %9248 = vmatprep.subr.bf16.mxu0 %v9247_v52  ;;  %v9295_v13 = vpack.c.bf16 %v3601_v40, %v3600_v42 }
 0x6c0   : > { %8793 = vmatmul.mubr.f32.vlgmr.msra.gmra.mrb[18].mxu0 %v12381_v33 }
 0x6c1   : > { %8795 = vmatprep.mubr.f32.mxu0 %v12386_v14  ;;  %9250 = vmatpush3.bf16.msra.mxu0 %v9247_v52  ;;  %v3602_v52 = vld [vmem:[#allocation20 + $0x1d0] sm:$0xff] }
 0x6c2   : > { %9252 = vmatprep.subr.bf16.mxu0 %v9251_v43  ;;  %v9299_v48 = vpack.c.bf16 %v3603_v47, %v3602_v52 }
 0x6c4   : > { %8796 = vmatmul.mubr.f32.gmra.mrb[20].mxu0 %v12390_v51 }
 0x6c5   : > { %9254 = vmatpush3.bf16.msra.mxu0 %v9251_v43  ;;  %8830 = vmatprep.mubr.f32.mxu0 %v3491_v12  ;;  %v3605_v43 = vld [vmem:[#allocation20 + $0x1e8] sm:$0xff]  ;;  %v3612_v12 = vrot.slane %v12386_v14, 6 }
 0x6c6   : > { %9256 = vmatprep.subr.bf16.mxu0 %v9255_v15  ;;  %v9303_v50 = vpack.c.bf16 %v3605_v43, %v3604_v1 }
 0x6c7   : > { %v3613_v26 = vsel %vm3608_vm5, %v3610_v5, %v3612_v12  ;;  %v3615_v46 = vsel %vm3608_vm5, %v3612_v12, %v3614_v6  ;;  %v7525_v12 = vld [vmem:[%s13915_s17 + $0x100] sm:$0xff] }
 0x6c9   : > { %9258 = vmatpush3.bf16.msra.mxu0 %v9255_v15  ;;  %v3712_v15 = vld [vmem:[#allocation20 + $0x200] sm:$0xff] }
 0x6ca   : > { %9260 = vmatprep.subr.bf16.mxu0 %v9259_v4  ;;  %v9311_v28 = vpack.c.bf16 %v3713_v19, %v3712_v15 }
 0x6cd   : > { %9262 = vmatpush3.bf16.msra.mxu0 %v9259_v4  ;;  %v3714_v4 = vld [vmem:[#allocation20 + $0x210] sm:$0xff] }
 0x6ce   : > { %9264 = vmatprep.subr.bf16.mxu0 %v9263_v16 }
 0x6d1   : > { %9266 = vmatpush3.bf16.msra.mxu0 %v9263_v16  ;;  %v9315_v16 = vpack.c.bf16 %v3715_v32, %v3714_v4  ;;  %v7527_v4 = vld [vmem:[%s13915_s17 + $0x110] sm:$0xff]  ;;  %v7530_v32 = vld [vmem:[%s13915_s17 + $0x128] sm:$0xff] }
 0x6d2   : > { %9268 = vmatprep.subr.bf16.mxu0 %v9267_v20  ;;  %v9377_v6 = vpack.c.bf16 %v7527_v4, %v7525_v12 }
 0x6d5   : > { %9270 = vmatpush3.bf16.msra.mxu0 %v9267_v20  ;;  %v3716_v20 = vld [vmem:[#allocation20 + $0x220] sm:$0xff] }
 0x6d6   : > { %9272 = vmatprep.subr.bf16.mxu0 %v9271_v21 }
 0x6d9   : > { %9274 = vmatpush3.bf16.msra.mxu0 %v9271_v21  ;;  %v9319_v21 = vpack.c.bf16 %v3717_v45, %v3716_v20  ;;  %v7534_v20 = vld [vmem:[%s13915_s17 + $0x148] sm:$0xff]  ;;  %v7536_v45 = vld [vmem:[%s13915_s17 + $0x158] sm:$0xff] }
 0x6da   : > { %9276 = vmatprep.subr.bf16.mxu0 %v9275_v17 }
 0x6dd   : > { %9278 = vmatpush3.bf16.msra.mxu0 %v9275_v17  ;;  %v3719_v17 = vld [vmem:[#allocation20 + $0x238] sm:$0xff] }
 0x6de   : > { %9280 = vmatprep.subr.bf16.mxu0 %v9279_v23  ;;  %v9323_v8 = vpack.c.bf16 %v3719_v17, %v3718_v31  ;;  %v7533_v31 = vld [vmem:[%s13915_s17 + $0x140] sm:$0xff]  ;;  %v7535_v17 = vld [vmem:[%s13915_s17 + $0x150] sm:$0xff] }
 0x6e0   : > { %8831 = vmatmul.mubr.f32.vlgmr.msra.gmra.mrb[18].mxu0 %v3493_v62  ;;  %v3725_v62 = vld [vmem:[#allocation20 + $0x268] sm:$0xff] }
 0x6e1   : > { %8833 = vmatprep.mubr.f32.mxu0 %v3495_v56  ;;  %9282 = vmatpush3.bf16.msra.mxu0 %v9279_v23  ;;  %v3721_v23 = vld [vmem:[#allocation20 + $0x248] sm:$0xff]  ;;  %v7515_v56 = vld [vmem:[#allocation21] ss:$0 sm:$0xff] }
 0x6e2   : > { %9284 = vmatprep.subr.bf16.mxu0 %v9283_v49  ;;  %v9327_v30 = vpack.c.bf16 %v3721_v23, %v3720_v54  ;;  %v9385_v54 = vpack.c.bf16 %v7535_v17, %v7533_v31 }
 0x6e4   : > { %8834 = vmatmul.mubr.f32.gmra.mrb[20].mxu0 %v3497_v10 }
 0x6e5   : > { %9286 = vmatpush3.bf16.msra.mxu0 %v9283_v49  ;;  %8868 = vmatprep.mubr.f32.mxu0 %v3611_v11  ;;  %v3724_v49 = vld [vmem:[#allocation20 + $0x260] sm:$0xff] }
 0x6e6   : > { %9288 = vmatprep.subr.bf16.mxu0 %v9287_v41  ;;  %v9335_v0 = vpack.c.bf16 %v3725_v62, %v3724_v49 }
 0x6e9   : > { %9290 = vmatpush3.bf16.msra.mxu0 %v9287_v41 }
 0x6ea   : > { %9292 = vmatprep.subr.bf16.mxu0 %v9291_v29 }
 0x6ed   : > { %9294 = vmatpush3.bf16.msra.mxu0 %v9291_v29 }
 0x6ee   : > { %9296 = vmatprep.subr.bf16.mxu0 %v9295_v13 }
 0x6f1   : > { %9298 = vmatpush3.bf16.msra.mxu0 %v9295_v13 }
 0x6f2   : > { %9300 = vmatprep.subr.bf16.mxu0 %v9299_v48 }
 0x6f5   : > { %9302 = vmatpush3.bf16.msra.mxu0 %v9299_v48 }
 0x6f6   : > { %9304 = vmatprep.subr.bf16.mxu0 %v9303_v50 }
 0x6f9   : > { %9306 = vmatpush3.bf16.msra.mxu0 %v9303_v50 }
 0x6fa   : > { %9308 = vmatprep.subr.bf16.mxu0 %v9307_v3 }
 0x6fd   : > { %9310 = vmatpush3.bf16.msra.mxu0 %v9307_v3 }
 0x6fe   : > { %9312 = vmatprep.subr.bf16.mxu0 %v9311_v28 }
 0x700   : > { %8869 = vmatmul.mubr.f32.vlgmr.msra.gmra.mrb[18].mxu0 %v3613_v26  ;;  %v7529_v26 = vld [vmem:[%s13915_s17 + $0x120] sm:$0xff] }
 0x701   : > { %8871 = vmatprep.mubr.f32.mxu0 %v3615_v46  ;;  %9314 = vmatpush3.bf16.msra.mxu0 %v9311_v28  ;;  %v9381_v46 = vpack.c.bf16 %v7531_v34, %v7529_v26  ;;  %v4134_v26 = vld [vmem:[%s13915_s17 + $0x78] sm:$0xff]  ;;  %v4131_v34 = vld [vmem:[%s13915_s17 + $0x60] sm:$0xff] }
 0x702   : > { %9316 = vmatprep.subr.bf16.mxu0 %v9315_v16 }
 0x704   : > { %8872 = vmatmul.mubr.f32.gmra.mrb[20].mxu0 %v3617_v59  ;;  %v9383_v59 = vpack.c.bf16 %v7536_v45, %v7534_v20  ;;  %v4133_v45 = vld [vmem:[%s13915_s17 + $0x70] sm:$0xff] }
 0x705   : > { %9318 = vmatpush3.bf16.msra.mxu0 %v9315_v16  ;;  %8906 = vmatprep.mubr.f32.mxu0 %v12381_v33  ;;  %v9339_v33 = vpack.c.bf16 %v3727_v35, %v3726_v7  ;;  %v7543_v7 = vld [vmem:[%s13915_s17 + $0x190] sm:$0xff]  ;;  %v7546_v35 = vld [vmem:[%s13915_s17 + $0x1a8] sm:$0xff]  ;;  %v9421_v31 = vpack.c.bf16 %v4133_v45, %v4131_v34 }
 0x706   : > { %9320 = vmatprep.subr.bf16.mxu0 %v9319_v21  ;;  %v4880_v34 = vld [vmem:[#allocation27 + $0x218] sm:$0xff] }
 0x709   : > { %9322 = vmatpush3.bf16.msra.mxu0 %v9319_v21  ;;  %v12475_v21 = vld [vmem:[#allocation4] sm:$0xff] }
 0x70a   : > { %9324 = vmatprep.subr.bf16.mxu0 %v9323_v8 }
 0x70d   : > { %9326 = vmatpush3.bf16.msra.mxu0 %v9323_v8  ;;  %v7540_v8 = vld [vmem:[%s13915_s17 + $0x178] sm:$0xff] }
 0x70e   : > { %9328 = vmatprep.subr.bf16.mxu0 %v9327_v30 }
 0x711   : > { %9330 = vmatpush3.bf16.msra.mxu0 %v9327_v30  ;;  %v7537_v30 = vld [vmem:[%s13915_s17 + $0x160] sm:$0xff] }
 0x712   : > { %9332 = vmatprep.subr.bf16.mxu0 %v9331_v58  ;;  %v9389_v49 = vpack.c.bf16 %v7539_v36, %v7537_v30  ;;  %v4142_v30 = vld [vmem:[%s13915_s17 + $0xb8] sm:$0xff] }
 0x715   : > { %9334 = vmatpush3.bf16.msra.mxu0 %v9331_v58  ;;  %v7544_v58 = vld [vmem:[%s13915_s17 + $0x198] sm:$0xff] }
 0x716   : > { %9336 = vmatprep.subr.bf16.mxu0 %v9335_v0  ;;  %v9391_v62 = vpack.c.bf16 %v7544_v58, %v7542_v57  ;;  %v12611_v57 = vld [vmem:[#allocation4 + $0xc] sm:$0xff] }
 0x717   : > { %v4139_v58 = vld [vmem:[%s13915_s17 + $0xa0] sm:$0xff] }
 0x719   : > { %9338 = vmatpush3.bf16.msra.mxu0 %v9335_v0  ;;  %v7541_v0 = vld [vmem:[%s13915_s17 + $0x180] sm:$0xff] }
 0x71a   : > { %9340 = vmatprep.subr.bf16.mxu0 %v9339_v33 }
 0x71d   : > { %9342 = vmatpush3.bf16.msra.mxu0 %v9339_v33  ;;  %v7548_v33 = vld [vmem:[%s13915_s17 + $0x1b8] sm:$0xff] }
 0x720   : > { %8907 = vmatmul.mubr.f32.vlgmr.msra.gmra.mrb[18].mxu0 %v12386_v14  ;;  %v7520_v14 = vld [vmem:[#allocation24] ss:$0 sm:$0xff] }
 0x721   : > { %8909 = vmatprep.mubr.f32.mxu0 %v12390_v51 }
 0x724   : > { %8910 = vmatmul.mubr.f32.gmra.mrb[20].mxu0 %v12399_v60 }
 0x7f3   : > { %v8908_v5 = vpop.f32.mrb[18].mxu0 }
 0x7f4   : > { %v3825_v39 = vadd.f32 %v8908_v5, %v7515_v56  ;;  %v3794_v41 = vpop.f32.mrb[19].mxu0  ;;  %v9395_v5 = vpack.c.bf16 %v7548_v33, %v7546_v35  ;;  %v12626_v35 = vld [vmem:[#allocation4 + $0x14] sm:$0xff] }
 0x7f5   : > { %v3824_v10 = vadd.f32 %v7515_v56, %v3794_v41  ;;  %v7547_v41 = vld [vmem:[%s13915_s17 + $0x1b0] sm:$0xff] }
 0x7f6   : > { %vm3829_vm11 = vcmp.ge.f32.partialorder %v3825_v39, 0.0  ;;  %v3833_v25 = vmul.f32 0.01, %v3825_v39 }
 0x7f7   : > { %vm3828_vm12 = vcmp.ge.f32.partialorder %v3824_v10, 0.0  ;;  %v3832_v44 = vmul.f32 0.01, %v3824_v10  ;;  %v8911_v11 = vpop.f32.mrb[20].mxu0 }
 0x7f8   : > { %v3837_v29 = vsel %vm3829_vm11, %v3825_v39, %v3833_v25  ;;  %v3827_v42 = vadd.f32 %v8911_v11, %v7515_v56  ;;  %v3804_v51 = vpop.f32.mrb[21].mxu0  ;;  %v7545_v39 = vld [vmem:[%s13915_s17 + $0x1a0] sm:$0xff]  ;;  %v7552_v25 = vld [vmem:[%s13915_s17 + $0x1d8] sm:$0xff] }
 0x7f9   : > { %v3934_v60 = vadd.f32 %v12393_v22, %v3837_v29  ;;  %v3836_v40 = vsel %vm3828_vm12, %v3824_v10, %v3832_v44  ;;  %v3826_v13 = vadd.f32 %v7515_v56, %v3804_v51  ;;  %v9393_v56 = vpack.c.bf16 %v7543_v7, %v7541_v0  ;;  %v7550_v10 = vld [vmem:[%s13915_s17 + $0x1c8] sm:$0xff]  ;;  %v7549_v29 = vld [vmem:[%s13915_s17 + $0x1c0] sm:$0xff]  ;;  %v7556_v51 = vld [vmem:[%s13915_s17 + $0x1f8] sm:$0xff] }
 0x7fa   : > { %v3933_v52 = vadd.f32 %v12396_v24, %v3836_v40  ;;  %vm3831_vm13 = vcmp.ge.f32.partialorder %v3827_v42, 0.0  ;;  %v3835_v47 = vmul.f32 0.01, %v3827_v42  ;;  %v7526_v24 = vld [vmem:[%s13914_s29 + $0x108] sm:$0xff]  ;;  %v9397_v44 = vpack.c.bf16 %v7547_v41, %v7545_v39  ;;  %v4146_v7 = vld [vmem:[%s13915_s17 + $0xd8] sm:$0xff] }
 0x7fb   : > { %v3945_v48 = vadd.f32 %v7520_v14, %v3934_v60  ;;  %vm3830_vm14 = vcmp.ge.f32.partialorder %v3826_v13, 0.0  ;;  %v3834_v1 = vmul.f32 0.01, %v3826_v13  ;;  %v9399_v11 = vpack.c.bf16 %v7552_v25, %v7550_v10  ;;  %v4144_v0 = vld [vmem:[%s13915_s17 + $0xc8] sm:$0xff]  ;;  %v4150_v10 = vld [vmem:[%s13915_s17 + $0xf8] sm:$0xff] }
 0x7fc   : > { %v3944_v43 = vadd.f32 %v7520_v14, %v3933_v52  ;;  %v3839_v50 = vsel %vm3831_vm13, %v3827_v42, %v3835_v47  ;;  %v7554_v42 = vld [vmem:[%s13915_s17 + $0x1e8] sm:$0xff]  ;;  %v7555_v52 = vld [vmem:[%s13915_s17 + $0x1f0] sm:$0xff]  ;;  %v9431_v33 = vpack.c.bf16 %v4146_v7, %v4144_v0  ;;  %vm5718_vm13 = vcmask 130048  }
 0x7fd   : > { %v3936_v53 = vadd.f32 %v12401_v27, %v3839_v50  ;;  %v3838_v37 = vsel %vm3830_vm14, %v3826_v13, %v3834_v1  ;;  %v7528_v27 = vld [vmem:[%s13915_s17 + $0x118] sm:$0xff]  ;;  %v9403_v40 = vpack.c.bf16 %v7556_v51, %v7554_v42  ;;  %v7553_v13 = vld [vmem:[%s13915_s17 + $0x1e0] sm:$0xff]  ;;  %v4120_v47 = vld [vmem:[%s13915_s17 + $0x8] sm:$0xff] }
 0x7fe   : > { %v3935_v3 = vadd.f32 %v12404_v61, %v3838_v37  ;;  %v9359_v15 = vpack.c.bf16 %v3945_v48, %v3944_v43  ;;  %v9375_v61 = vpack.c.bf16 %v7528_v27, %v7526_v24  ;;  %v4122_v48 = vld [vmem:[%s13915_s17 + $0x18] sm:$0xff]  ;;  %v9405_v1 = vpack.c.bf16 %v7555_v52, %v7553_v13  ;;  %v4119_v50 = vld [vmem:[%s13915_s17] sm:$0xff]  ;;  %v4124_v37 = vld [vmem:[%s13915_s17 + $0x28] sm:$0xff] }
 0x7ff   : > { %v3947_v19 = vadd.f32 %v7520_v14, %v3936_v53  ;;  %v9407_v43 = vpack.c.bf16 %v4122_v48, %v4120_v47  ;;  %v4121_v53 = vld [vmem:[%s13915_s17 + $0x10] sm:$0xff]  ;;  %v4128_v27 = vld [vmem:[%s13915_s17 + $0x48] sm:$0xff]  ;;  %v7560_v42 = vld [vmem:[%s13915_s17 + $0x218] sm:$0xff] }
 0x800   : > { %v3946_v28 = vadd.f32 %v7520_v14, %v3935_v3  ;;  %9360 = vmatprep.subr.bf16.mxu1 %v9359_v15  ;;  %v7551_v14 = vld [vmem:[%s13915_s17 + $0x1d0] sm:$0xff]  ;;  %v4126_v3 = vld [vmem:[%s13915_s17 + $0x38] sm:$0xff]  ;;  %v4148_v39 = vld [vmem:[%s13915_s17 + $0xe8] sm:$0xff] }
 0x801   : > { %9362 = vmatpush3.bf16.msra.mxu1 %v9359_v15  ;;  %v9401_v60 = vpack.c.bf16 %v7551_v14, %v7549_v29  ;;  %v4125_v24 = vld [vmem:[%s13915_s17 + $0x30] sm:$0xff]  ;;  %v9435_v25 = vpack.c.bf16 %v4150_v10, %v4148_v39  ;;  %v7558_v14 = vld [vmem:[%s13915_s17 + $0x208] sm:$0xff] }
 0x802   : > { %v9363_v22 = vpack.c.bf16 %v3947_v19, %v3946_v28  ;;  %v9409_v19 = vpack.c.bf16 %v4121_v53, %v4119_v50  ;;  %v9411_v28 = vpack.c.bf16 %v4126_v3, %v4124_v37  ;;  %v9439_v51 = vpack.c.bf16 %v7560_v42, %v7558_v14  ;;  %v7562_v53 = vld [vmem:[%s13915_s17 + $0x228] sm:$0xff]  ;;  %v7564_v37 = vld [vmem:[%s13915_s17 + $0x238] sm:$0xff] }
 0x804   : > { %9364 = vmatprep.subr.bf16.mxu1 %v9363_v22 }
 0x805   : > { %9366 = vmatpush3.bf16.msra.mxu1 %v9363_v22 }
 0x806   : > { %9368 = vmatprep.subr.bf16.mxu1 %v9359_v15 }
 0x808   : > { %8943 = vmatmul.mubr.msk.f32.vlgmr.msra.gmra.mrb[52].mxu1 %vm3948_vm10, %v12225_v18  ;;  %v7532_v18 = vld [vmem:[%s13915_s17 + $0x138] sm:$0xff] }
 0x809   : > { %9370 = vmatpush3.bf16.msra.mxu1 %v9359_v15  ;;  %8953 = vmatprep.mubr.msk.f32.mxu1 %vm3948_vm10, %v12234_v38  ;;  %v9379_v16 = vpack.c.bf16 %v7532_v18, %v7530_v32  ;;  %v4151_v15 = vld [vmem:[#allocation4 + $0x4] sm:$0xff]  ;;  %v4129_v18 = vld [vmem:[%s13915_s17 + $0x50] sm:$0xff] }
 0x80a   : > { %9372 = vmatprep.subr.bf16.mxu1 %v9363_v22  ;;  %v4127_v32 = vld [vmem:[%s13915_s17 + $0x40] sm:$0xff] }
 0x80d   : > { %9374 = vmatpush3.bf16.msra.mxu1 %v9363_v22  ;;  %v4123_v22 = vld [vmem:[%s13915_s17 + $0x20] sm:$0xff] }
 0x80e   : > { %9376 = vmatprep.subr.bf16.mxu1 %v9375_v61  ;;  %v4130_v61 = vld [vmem:[%s13915_s17 + $0x58] sm:$0xff]  ;;  %v9413_v12 = vpack.c.bf16 %v4125_v24, %v4123_v22  ;;  %v7566_v22 = vld [vmem:[%s13915_s17 + $0x248] sm:$0xff] }
 0x80f   : > { %v9415_v4 = vpack.c.bf16 %v4130_v61, %v4128_v27  ;;  %v7568_v24 = vld [vmem:[%s13915_s17 + $0x258] sm:$0xff] }
 0x810   : > { %8954 = vmatmul.mubr.msk.f32.vlgmr.msra.gmra.mrb[54].mxu1 %vm3948_vm10, %v12240_v9  ;;  %v7538_v9 = vld [vmem:[%s13915_s17 + $0x168] sm:$0xff]  ;;  %v9447_v61 = vpack.c.bf16 %v7568_v24, %v7566_v22  ;;  %v4893_v24 = vld [vmem:[#allocation27 + $0x280] sm:$0xff] }
 0x811   : > { %9378 = vmatpush1.bf16.msra.mxu1 %v9377_v6  ;;  %4252 = vmatprep.mubr.f32.mxu1 %v12475_v21  ;;  %v9387_v23 = vpack.c.bf16 %v7540_v8, %v7538_v9  ;;  %v9417_v6 = vpack.c.bf16 %v4129_v18, %v4127_v32  ;;  %v4135_v9 = vld [vmem:[%s13915_s17 + $0x80] sm:$0xff]  ;;  %v4137_v8 = vld [vmem:[%s13915_s17 + $0x90] sm:$0xff]  ;;  %v7570_v32 = vld [vmem:[%s13915_s17 + $0x268] sm:$0xff] }
 0x812   : > { %9380 = vmatprep.subr.bf16.mxu1 %v9379_v16  ;;  %v4132_v16 = vld [vmem:[%s13915_s17 + $0x68] sm:$0xff]  ;;  %v7572_v18 = vld [vmem:[%s13915_s17 + $0x278] sm:$0xff] }
 0x813   : > { %v9419_v20 = vpack.c.bf16 %v4134_v26, %v4132_v16  ;;  %v7571_v16 = vld [vmem:[%s13915_s17 + $0x270] sm:$0xff]  ;;  %v4878_v26 = vld [vmem:[#allocation27 + $0x208] sm:$0xff] }
 0x815   : > { %9382 = vmatpush1.bf16.msra.mxu1 %v9381_v46  ;;  %v4136_v46 = vld [vmem:[%s13915_s17 + $0x88] sm:$0xff] }
 0x816   : > { %9384 = vmatprep.subr.bf16.mxu1 %v9383_v59  ;;  %v4138_v59 = vld [vmem:[%s13915_s17 + $0x98] sm:$0xff] }
 0x817   : > { %v9423_v17 = vpack.c.bf16 %v4138_v59, %v4136_v46  ;;  %v9535_v46 = vpack.c.bf16 %v4880_v34, %v4878_v26  ;;  %v4879_v59 = vld [vmem:[#allocation27 + $0x210] sm:$0xff]  ;;  %v7585_v34 = vld [vmem:[%s13915_s17 + $0x2e0] sm:$0xff] }
 0x819   : > { %9386 = vmatpush1.bf16.msra.mxu1 %v9385_v54  ;;  %v9425_v54 = vpack.c.bf16 %v4137_v8, %v4135_v9  ;;  %v9451_v9 = vpack.c.bf16 %v7572_v18, %v7570_v32  ;;  %v7574_v8 = vld [vmem:[%s13915_s17 + $0x288] sm:$0xff]  ;;  %9536 = vmatprep.subr.bf16.mxu0 %v9535_v46  ;;  %v4900_v32 = vld [vmem:[#allocation27 + $0x2b8] sm:$0xff] }
 0x81a   : > { %9388 = vmatprep.subr.bf16.mxu1 %v9387_v23  ;;  %v4140_v23 = vld [vmem:[%s13915_s17 + $0xa8] sm:$0xff] }
 0x81b   : > { %v9427_v36 = vpack.c.bf16 %v4142_v30, %v4140_v23  ;;  %v4881_v30 = vld [vmem:[#allocation27 + $0x220] sm:$0xff]  ;;  %v7586_v18 = vld [vmem:[%s13915_s17 + $0x2e8] sm:$0xff] }
 0x81c   : > { %v4899_v46 = vld [vmem:[#allocation27 + $0x2b0] sm:$0xff] }
 0x81d   : > { %9390 = vmatpush1.bf16.msra.mxu1 %v9389_v49  ;;  %v4141_v49 = vld [vmem:[%s13915_s17 + $0xb0] sm:$0xff] }
 0x81e   : > { %9392 = vmatprep.subr.bf16.mxu1 %v9391_v62  ;;  %v9429_v62 = vpack.c.bf16 %v4141_v49, %v4139_v58  ;;  %v7576_v58 = vld [vmem:[%s13915_s17 + $0x298] sm:$0xff]  ;;  %v4886_v49 = vld [vmem:[#allocation27 + $0x248] sm:$0xff] }
 0x81f   : > { %v9455_v39 = vpack.c.bf16 %v7576_v58, %v7574_v8  ;;  %v7590_v8 = vld [vmem:[%s13915_s17 + $0x308] sm:$0xff]  ;;  %v4901_v58 = vld [vmem:[#allocation27 + $0x2c0] sm:$0xff] }
 0x821   : > { %9394 = vmatpush1.bf16.msra.mxu1 %v9393_v56  ;;  %v4143_v56 = vld [vmem:[%s13915_s17 + $0xc0] sm:$0xff] }
 0x822   : > { %9396 = vmatprep.subr.bf16.mxu1 %v9395_v5  ;;  %v4145_v5 = vld [vmem:[%s13915_s17 + $0xd0] sm:$0xff] }
 0x823   : > { %v9433_v41 = vpack.c.bf16 %v4145_v5, %v4143_v56  ;;  %v4885_v56 = vld [vmem:[#allocation27 + $0x240] sm:$0xff]  ;;  %v4887_v5 = vld [vmem:[#allocation27 + $0x250] sm:$0xff] }
 0x824   : > { %v9545_v14 = vpack.c.bf16 %v4887_v5, %v4885_v56  ;;  %v7596_v56 = vld [vmem:[%s13915_s17 + $0x338] sm:$0xff]  ;;  %v4906_v5 = vld [vmem:[#allocation27 + $0x2e8] sm:$0xff] }
 0x825   : > { %9398 = vmatpush1.bf16.msra.mxu1 %v9397_v44  ;;  %v4147_v44 = vld [vmem:[%s13915_s17 + $0xe0] sm:$0xff] }
 0x826   : > { %9400 = vmatprep.subr.bf16.mxu1 %v9399_v11  ;;  %v4149_v11 = vld [vmem:[%s13915_s17 + $0xf0] sm:$0xff] }
 0x827   : > { %v9437_v29 = vpack.c.bf16 %v4149_v11, %v4147_v44  ;;  %v4892_v44 = vld [vmem:[#allocation27 + $0x278] sm:$0xff]  ;;  %v7578_v11 = vld [vmem:[%s13915_s17 + $0x2a8] sm:$0xff] }
 0x829   : > { %9402 = vmatpush1.bf16.msra.mxu1 %v9401_v60 }
 0x82a   : > { %9404 = vmatprep.subr.bf16.mxu1 %v9403_v40 }
 0x82d   : > { %9406 = vmatpush1.bf16.msra.mxu1 %v9405_v1  ;;  %v7557_v1 = vld [vmem:[%s13915_s17 + $0x200] sm:$0xff] }
 0x82e   : > { %9408 = vmatprep.subr.bf16.mxu1 %v9407_v43  ;;  %v7559_v43 = vld [vmem:[%s13915_s17 + $0x210] sm:$0xff] }
 0x82f   : > { %v9441_v3 = vpack.c.bf16 %v7559_v43, %v7557_v1  ;;  %v7579_v1 = vld [vmem:[%s13915_s17 + $0x2b0] sm:$0xff]  ;;  %v4894_v43 = vld [vmem:[#allocation27 + $0x288] sm:$0xff] }
 0x830   : > { %4253 = vmatmul.mubr.f32.vlgmr.msra.gmra.mrb[56].mxu1 %v4151_v15  ;;  %v9443_v15 = vpack.c.bf16 %v7564_v37, %v7562_v53  ;;  %v4896_v53 = vld [vmem:[#allocation27 + $0x298] sm:$0xff]  ;;  %v7582_v37 = vld [vmem:[%s13915_s17 + $0x2c8] sm:$0xff] }
 0x831   : > { %9410 = vmatpush1.bf16.msra.mxu1 %v9409_v19  ;;  %4258 = vmatprep.mubr.f32.mxu1 %v12475_v21  ;;  %v7561_v19 = vld [vmem:[%s13915_s17 + $0x220] sm:$0xff]  ;;  %v9551_v22 = vpack.c.bf16 %v4896_v53, %v4894_v43  ;;  %v4911_v53 = vld [vmem:[#allocation27 + $0x310] sm:$0xff] }
 0x832   : > { %9412 = vmatprep.subr.bf16.mxu1 %v9411_v28  ;;  %v7563_v28 = vld [vmem:[%s13915_s17 + $0x230] sm:$0xff]  ;;  %v4909_v43 = vld [vmem:[#allocation27 + $0x300] sm:$0xff] }
 0x833   : > { %v9445_v27 = vpack.c.bf16 %v7563_v28, %v7561_v19  ;;  %v7581_v28 = vld [vmem:[%s13915_s17 + $0x2c0] sm:$0xff] }
 0x834   : > { %4259 = vmatmul.mubr.f32.gmra.mrb[58].mxu1 %v12611_v57 }
 0x835   : > { %9414 = vmatpush1.bf16.msra.mxu1 %v9413_v12  ;;  %4264 = vmatprep.mubr.f32.mxu1 %v12475_v21  ;;  %v7565_v12 = vld [vmem:[%s13915_s17 + $0x240] sm:$0xff] }
 0x836   : > { %9416 = vmatprep.subr.bf16.mxu1 %v9415_v4  ;;  %v7567_v4 = vld [vmem:[%s13915_s17 + $0x250] sm:$0xff] }
 0x837   : > { %v9449_v45 = vpack.c.bf16 %v7567_v4, %v7565_v12  ;;  %v7583_v12 = vld [vmem:[%s13915_s17 + $0x2d0] sm:$0xff]  ;;  %v4898_v4 = vld [vmem:[#allocation27 + $0x2a8] sm:$0xff] }
 0x838   : > { %4265 = vmatmul.mubr.f32.gmra.mrb[60].mxu1 %v12626_v35  ;;  %v9465_v26 = vpack.c.bf16 %v7583_v12, %v7581_v28 }
 0x839   : > { %9418 = vmatpush1.bf16.msra.mxu1 %v9417_v6  ;;  %4270 = vmatprep.mubr.f32.mxu1 %v12475_v21  ;;  %v7569_v6 = vld [vmem:[%s13915_s17 + $0x260] sm:$0xff] }
 0x83a   : > { %9420 = vmatprep.subr.bf16.mxu1 %v9419_v20  ;;  %v4877_v20 = vld [vmem:[#allocation27 + $0x200] sm:$0xff]  ;;  %v9453_v7 = vpack.c.bf16 %v7571_v16, %v7569_v6 }
 0x83b   : > { %v7588_v6 = vld [vmem:[%s13915_s17 + $0x2f8] sm:$0xff] }
 0x83d   : > { %9422 = vmatpush1.bf16.msra.mxu1 %v9421_v31  ;;  %v4882_v31 = vld [vmem:[#allocation27 + $0x228] sm:$0xff] }
 0x83e   : > { %9424 = vmatprep.subr.bf16.mxu1 %v9423_v17  ;;  %v4884_v17 = vld [vmem:[#allocation27 + $0x238] sm:$0xff] }
 0x83f   : > { %v9539_v23 = vpack.c.bf16 %v4884_v17, %v4882_v31  ;;  %v7587_v31 = vld [vmem:[%s13915_s17 + $0x2f0] sm:$0xff]  ;;  %v4902_v17 = vld [vmem:[#allocation27 + $0x2c8] sm:$0xff] }
 0x841   : > { %9426 = vmatpush1.bf16.msra.mxu1 %v9425_v54  ;;  %v9537_v54 = vpack.c.bf16 %v4879_v59, %v4877_v20  ;;  %v9555_v20 = vpack.c.bf16 %v4900_v32, %v4898_v4  ;;  %v9467_v59 = vpack.c.bf16 %v7588_v6, %v7586_v18  ;;  %v4913_v4 = vld [vmem:[#allocation27 + $0x320] sm:$0xff]  ;;  %v4915_v32 = vld [vmem:[#allocation27 + $0x330] sm:$0xff] }
 0x842   : > { %9428 = vmatprep.subr.bf16.mxu1 %v9427_v36  ;;  %v4883_v36 = vld [vmem:[#allocation27 + $0x230] sm:$0xff]  ;;  %v7601_v6 = vld [vmem:[%s13915_s17 + $0x360] sm:$0xff] }
 0x843   : > { %9538 = vmatpush1.bf16.msra.mxu0 %v9537_v54  ;;  %v9541_v0 = vpack.c.bf16 %v4883_v36, %v4881_v30  ;;  %v7592_v54 = vld [vmem:[%s13915_s17 + $0x318] sm:$0xff]  ;;  %v9469_v30 = vpack.c.bf16 %v7587_v31, %v7585_v34 }
 0x844   : > { %9540 = vmatprep.subr.bf16.mxu0 %v9539_v23 }
 0x845   : > { %9430 = vmatpush1.bf16.msra.mxu1 %v9429_v62  ;;  %v4888_v62 = vld [vmem:[#allocation27 + $0x258] sm:$0xff] }
 0x846   : > { %9432 = vmatprep.subr.bf16.mxu1 %v9431_v33  ;;  %v7573_v33 = vld [vmem:[%s13915_s17 + $0x280] sm:$0xff]  ;;  %v9543_v10 = vpack.c.bf16 %v4888_v62, %v4886_v49  ;;  %v4903_v49 = vld [vmem:[#allocation27 + $0x2d0] sm:$0xff]  ;;  %v9471_v62 = vpack.c.bf16 %v7592_v54, %v7590_v8 }
 0x847   : > { %9542 = vmatpush1.bf16.msra.mxu0 %v9541_v0  ;;  %v7589_v0 = vld [vmem:[%s13915_s17 + $0x300] sm:$0xff]  ;;  %v4919_v8 = vld [vmem:[#allocation27 + $0x350] sm:$0xff] }
 0x848   : > { %9544 = vmatprep.subr.bf16.mxu0 %v9543_v10 }
 0x849   : > { %9434 = vmatpush1.bf16.msra.mxu1 %v9433_v41  ;;  %v7575_v41 = vld [vmem:[%s13915_s17 + $0x290] sm:$0xff] }
 0x84a   : > { %9436 = vmatprep.subr.bf16.mxu1 %v9435_v25  ;;  %v4890_v25 = vld [vmem:[#allocation27 + $0x268] sm:$0xff]  ;;  %v9457_v42 = vpack.c.bf16 %v7575_v41, %v7573_v33  ;;  %v9561_v41 = vpack.c.bf16 %v4903_v49, %v4901_v58  ;;  %v4924_v58 = vld [vmem:[#allocation27 + $0x378] sm:$0xff] }
 0x84b   : > { %9546 = vmatpush1.bf16.msra.mxu0 %v9545_v14  ;;  %v7594_v33 = vld [vmem:[%s13915_s17 + $0x328] sm:$0xff]  ;;  %v7595_v14 = vld [vmem:[%s13915_s17 + $0x330] sm:$0xff] }
 0x84c   : > { %v7610_v49 = vld [vmem:[%s13915_s17 + $0x3a8] sm:$0xff] }
 0x84d   : > { %9438 = vmatpush1.bf16.msra.mxu1 %v9437_v29  ;;  %v7580_v29 = vld [vmem:[%s13915_s17 + $0x2b8] sm:$0xff] }
 0x84e   : > { %9440 = vmatprep.subr.bf16.mxu1 %v9439_v51  ;;  %v7577_v51 = vld [vmem:[%s13915_s17 + $0x2a0] sm:$0xff] }
 0x84f   : > { %v9461_v19 = vpack.c.bf16 %v7579_v1, %v7577_v51 }
 0x8db   : > { %v8944_v60 = vpop.f32.mrb[52].mxu1 }
 0x8dc   : > { %v4019_v40 = vpop.f32.mrb[53].mxu1 }
 0x8e3   : > { %v8955_v13 = vpop.f32.mrb[54].mxu1 }
 0x8e4   : > { %v12655_v52 = vmax.f32 %v8944_v60, %v8955_v13  ;;  %v4098_v47 = vpop.f32.mrb[55].mxu1  ;;  %v9547_v60 = vpack.c.bf16 %v4892_v44, %v4890_v25  ;;  %v4891_v13 = vld [vmem:[#allocation27 + $0x270] sm:$0xff]  ;;  %v4905_v25 = vld [vmem:[#allocation27 + $0x2e0] sm:$0xff] }
 0x8e5   : > { %v12657_v48 = vmax.f32 %v4019_v40, %v4098_v47  ;;  %v4889_v40 = vld [vmem:[#allocation27 + $0x260] sm:$0xff]  ;;  %v9459_v47 = vpack.c.bf16 %v7580_v29, %v7578_v11  ;;  %v4907_v44 = vld [vmem:[#allocation27 + $0x2f0] sm:$0xff]  ;;  %v9475_v11 = vpack.c.bf16 %v7596_v56, %v7594_v33 }
 0x8e6   : > { %4114 = vst [vmem:[#allocation4 + $0x28] sm:$0xff] %v12655_v52  ;;  %9548 = vmatprep.subr.bf16.mxu0 %v9547_v60  ;;  %v7593_v29 = vld [vmem:[%s13915_s17 + $0x320] sm:$0xff]  ;;  %v7600_v60 = vld [vmem:[%s13915_s17 + $0x358] sm:$0xff] }
 0x8e7   : > { %4113 = vst [vmem:[#allocation4 + $0x20] sm:$0xff] %v12657_v48  ;;  %v9477_v1 = vpack.c.bf16 %v7595_v14, %v7593_v29  ;;  %v7609_v33 = vld [vmem:[%s13915_s17 + $0x3a0] sm:$0xff]  ;;  %v7616_v29 = vld [vmem:[%s13915_s17 + $0x3d8] sm:$0xff] }
 0x8ee   : > { %v12667_v50 = vld [vmem:[#allocation4 + $0x1c] sm:$0xff] }
 0x8ef   : > { %4271 = vmatmul.mubr.f32.gmra.mrb[62].mxu1 %v12667_v50 }
 0x8f0   : > { %4341 = vmatprep.mubr.f32.mxu1 %v12475_v21 }
 0x8f3   : > { %4342 = vmatmul.mubr.f32.vlgmr.msra.gmra.mrb[56].mxu1 %v12475_v21 }
 0x8f4   : > { %9442 = vmatpush1.bf16.msra.mxu1 %v9441_v3  ;;  %4347 = vmatprep.mubr.f32.mxu1 %v12475_v21  ;;  %v7584_v3 = vld [vmem:[%s13915_s17 + $0x2d8] sm:$0xff] }
 0x8f5   : > { %9444 = vmatprep.subr.bf16.mxu1 %v9443_v15  ;;  %v9549_v15 = vpack.c.bf16 %v4891_v13, %v4889_v40  ;;  %v4910_v40 = vld [vmem:[#allocation27 + $0x308] sm:$0xff]  ;;  %v4912_v13 = vld [vmem:[#allocation27 + $0x318] sm:$0xff] }
 0x8f6   : > { %v9567_v28 = vpack.c.bf16 %v4912_v13, %v4910_v40  ;;  %v4927_v40 = vld [vmem:[#allocation27 + $0x390] sm:$0xff] }
 0x8f7   : > { %4348 = vmatmul.mubr.f32.gmra.mrb[58].mxu1 %v12475_v21  ;;  %9550 = vmatpush1.bf16.msra.mxu0 %v9549_v15  ;;  %v7599_v15 = vld [vmem:[%s13915_s17 + $0x350] sm:$0xff] }
 0x8f8   : > { %9446 = vmatpush1.bf16.msra.mxu1 %v9445_v27  ;;  %4353 = vmatprep.mubr.f32.mxu1 %v12475_v21  ;;  %v4895_v27 = vld [vmem:[#allocation27 + $0x290] sm:$0xff] }
 0x8f9   : > { %9448 = vmatprep.subr.bf16.mxu1 %v9447_v61  ;;  %v9463_v61 = vpack.c.bf16 %v7584_v3, %v7582_v37  ;;  %v9553_v16 = vpack.c.bf16 %v4895_v27, %v4893_v24  ;;  %9552 = vmatprep.subr.bf16.mxu0 %v9551_v22  ;;  %v7597_v3 = vld [vmem:[%s13915_s17 + $0x340] sm:$0xff]  ;;  %v7604_v22 = vld [vmem:[%s13915_s17 + $0x378] sm:$0xff] }
 0x8fa   : > { %v4914_v24 = vld [vmem:[#allocation27 + $0x328] sm:$0xff]  ;;  %v4916_v27 = vld [vmem:[#allocation27 + $0x338] sm:$0xff]  ;;  %v9481_v12 = vpack.c.bf16 %v7599_v15, %v7597_v3 }
 0x8fb   : > { %4354 = vmatmul.mubr.f32.gmra.mrb[60].mxu1 %v12475_v21  ;;  %9554 = vmatpush1.bf16.msra.mxu0 %v9553_v16  ;;  %v7603_v16 = vld [vmem:[%s13915_s17 + $0x370] sm:$0xff]  ;;  %v9571_v34 = vpack.c.bf16 %v4916_v27, %v4914_v24  ;;  %v7624_v24 = vld [vmem:[%s13915_s17 + $0x418] sm:$0xff] }
 0x8fc   : > { %9450 = vmatpush1.bf16.msra.mxu1 %v9449_v45  ;;  %4359 = vmatprep.mubr.f32.mxu1 %v12475_v21  ;;  %v4897_v45 = vld [vmem:[#allocation27 + $0x2a0] sm:$0xff]  ;;  %v9485_v31 = vpack.c.bf16 %v7603_v16, %v7601_v6 }
 0x8fd   : > { %9452 = vmatprep.subr.bf16.mxu1 %v9451_v9  ;;  %v4904_v9 = vld [vmem:[#allocation27 + $0x2d8] sm:$0xff]  ;;  %v9557_v23 = vpack.c.bf16 %v4899_v46, %v4897_v45  ;;  %9556 = vmatprep.subr.bf16.mxu0 %v9555_v20  ;;  %v4918_v45 = vld [vmem:[#allocation27 + $0x348] sm:$0xff] }
 0x8fe   : > { %v9559_v36 = vpack.c.bf16 %v4904_v9, %v4902_v17  ;;  %v7608_v20 = vld [vmem:[%s13915_s17 + $0x398] sm:$0xff]  ;;  %v7605_v17 = vld [vmem:[%s13915_s17 + $0x380] sm:$0xff] }
 0x8ff   : > { %4360 = vmatmul.mubr.f32.gmra.mrb[62].mxu1 %v12475_v21  ;;  %9558 = vmatpush1.bf16.msra.mxu0 %v9557_v23  ;;  %v4920_v46 = vld [vmem:[#allocation27 + $0x358] sm:$0xff]  ;;  %v4917_v9 = vld [vmem:[#allocation27 + $0x340] sm:$0xff] }
 0x900   : > { %9454 = vmatpush1.bf16.msra.mxu1 %v9453_v7  ;;  %4467 = vmatprep.mubr.f32.mxu1 %v12475_v21  ;;  %v7591_v7 = vld [vmem:[%s13915_s17 + $0x310] sm:$0xff] }
 0x901   : > { %9456 = vmatprep.subr.bf16.mxu1 %v9455_v39  ;;  %v4908_v39 = vld [vmem:[#allocation27 + $0x2f8] sm:$0xff]  ;;  %v9473_v10 = vpack.c.bf16 %v7591_v7, %v7589_v0  ;;  %9560 = vmatprep.subr.bf16.mxu0 %v9559_v36  ;;  %v4922_v36 = vld [vmem:[#allocation27 + $0x368] sm:$0xff]  ;;  %v9577_v0 = vpack.c.bf16 %v4919_v8, %v4917_v9 }
 0x902   : > { %v9563_v51 = vpack.c.bf16 %v4908_v39, %v4906_v5  ;;  %v7607_v23 = vld [vmem:[%s13915_s17 + $0x390] sm:$0xff]  ;;  %v9579_v56 = vpack.c.bf16 %v4924_v58, %v4922_v36  ;;  %v4921_v5 = vld [vmem:[#allocation27 + $0x360] sm:$0xff]  ;;  %v7634_v9 = vld [vmem:[%s13915_s17 + $0x468] sm:$0xff] }
 0x903   : > { %9562 = vmatpush1.bf16.msra.mxu0 %v9561_v41  ;;  %v9489_v7 = vpack.c.bf16 %v7607_v23, %v7605_v17  ;;  %v4923_v39 = vld [vmem:[#allocation27 + $0x370] sm:$0xff]  ;;  %v7633_v23 = vld [vmem:[%s13915_s17 + $0x460] sm:$0xff] }
 0x904   : > { %9458 = vmatpush1.bf16.msra.mxu1 %v9457_v42  ;;  %v7598_v42 = vld [vmem:[%s13915_s17 + $0x348] sm:$0xff]  ;;  %9564 = vmatprep.subr.bf16.mxu0 %v9563_v51  ;;  %v9581_v14 = vpack.c.bf16 %v4923_v39, %v4921_v5  ;;  %v7631_v17 = vld [vmem:[%s13915_s17 + $0x450] sm:$0xff]  ;;  %v7641_v39 = vld [vmem:[%s13915_s17 + $0x4a0] sm:$0xff] }
 0x905   : > { %9460 = vmatprep.subr.bf16.mxu1 %v9459_v47  ;;  %v9565_v47 = vpack.c.bf16 %v4907_v44, %v4905_v25  ;;  %v9479_v37 = vpack.c.bf16 %v7600_v60, %v7598_v42  ;;  %v4926_v25 = vld [vmem:[#allocation27 + $0x388] sm:$0xff]  ;;  %v4928_v44 = vld [vmem:[#allocation27 + $0x398] sm:$0xff]  ;;  %v4925_v60 = vld [vmem:[#allocation27 + $0x380] sm:$0xff] }
 0x906   : > { %v9583_v51 = vpack.c.bf16 %v4928_v44, %v4926_v25  ;;  %v7638_v36 = vld [vmem:[%s13915_s17 + $0x488] sm:$0xff]  ;;  %v7648_v25 = vld [vmem:[%s13915_s17 + $0x4d8] sm:$0xff] }
 0x907   : > { %9566 = vmatpush1.bf16.msra.mxu0 %v9565_v47  ;;  %v7613_v47 = vld [vmem:[%s13915_s17 + $0x3c0] sm:$0xff] }
 0x908   : > { %9462 = vmatpush1.bf16.msra.mxu1 %v9461_v19  ;;  %v7602_v19 = vld [vmem:[%s13915_s17 + $0x368] sm:$0xff]  ;;  %9568 = vmatprep.subr.bf16.mxu0 %v9567_v28  ;;  %v7619_v28 = vld [vmem:[%s13915_s17 + $0x3f0] sm:$0xff] }
 0x909   : > { %9464 = vmatprep.subr.bf16.mxu1 %v9463_v61  ;;  %v9569_v61 = vpack.c.bf16 %v4911_v53, %v4909_v43  ;;  %v9483_v18 = vpack.c.bf16 %v7604_v22, %v7602_v19  ;;  %v7618_v43 = vld [vmem:[%s13915_s17 + $0x3e8] sm:$0xff]  ;;  %v7620_v53 = vld [vmem:[%s13915_s17 + $0x3f8] sm:$0xff]  ;;  %v7617_v19 = vld [vmem:[%s13915_s17 + $0x3e0] sm:$0xff] }
 0x90a   : > { %v9499_v15 = vpack.c.bf16 %v7620_v53, %v7618_v43  ;;  %v7622_v22 = vld [vmem:[%s13915_s17 + $0x408] sm:$0xff]  ;;  %v9501_v27 = vpack.c.bf16 %v7619_v28, %v7617_v19  ;;  %v5592_v43 = vld [vmem:[#allocation30 + $0x18] sm:$0xff] }
 0x90b   : > { %9570 = vmatpush1.bf16.msra.mxu0 %v9569_v61  ;;  %v9503_v61 = vpack.c.bf16 %v7624_v24, %v7622_v22  ;;  %v5594_v19 = vld [vmem:[#allocation30 + $0x28] sm:$0xff]  ;;  %v5596_v28 = vld [vmem:[#allocation30 + $0x38] sm:$0xff] }
 0x90c   : > { %9466 = vmatpush1.bf16.msra.mxu1 %v9465_v26  ;;  %v7606_v26 = vld [vmem:[%s13915_s17 + $0x388] sm:$0xff]  ;;  %9572 = vmatprep.subr.bf16.mxu0 %v9571_v34  ;;  %v7627_v34 = vld [vmem:[%s13915_s17 + $0x430] sm:$0xff]  ;;  %v9859_v24 = vpack.c.bf16 %v5596_v28, %v5594_v19 }
 0x90d   : > { %9468 = vmatprep.subr.bf16.mxu1 %v9467_v59  ;;  %v9573_v59 = vpack.c.bf16 %v4915_v32, %v4913_v4  ;;  %v9487_v54 = vpack.c.bf16 %v7608_v20, %v7606_v26  ;;  %v7623_v4 = vld [vmem:[%s13915_s17 + $0x410] sm:$0xff]  ;;  %v7626_v32 = vld [vmem:[%s13915_s17 + $0x428] sm:$0xff]  ;;  %v7625_v26 = vld [vmem:[%s13915_s17 + $0x420] sm:$0xff] }
 0x90e   : > { %v7630_v20 = vld [vmem:[%s13915_s17 + $0x448] sm:$0xff] }
 0x90f   : > { %9574 = vmatpush1.bf16.msra.mxu0 %v9573_v59  ;;  %v4939_v19 = vld [vmem:[#allocation27 + $0x3f0] sm:$0xff] }
 0x910   : > { %9470 = vmatpush1.bf16.msra.mxu1 %v9469_v30  ;;  %v9575_v30 = vpack.c.bf16 %v4920_v46, %v4918_v45  ;;  %v7632_v45 = vld [vmem:[%s13915_s17 + $0x458] sm:$0xff]  ;;  %v9509_v46 = vpack.c.bf16 %v7627_v34, %v7625_v26  ;;  %v5602_v26 = vld [vmem:[#allocation30 + $0x68] sm:$0xff] }
 0x911   : > { %9472 = vmatprep.subr.bf16.mxu1 %v9471_v62  ;;  %v7612_v62 = vld [vmem:[%s13915_s17 + $0x3b8] sm:$0xff]  ;;  %v9511_v59 = vpack.c.bf16 %v7632_v45, %v7630_v20 }
 0x912   : > { %v9491_v41 = vpack.c.bf16 %v7612_v62, %v7610_v49  ;;  %9576 = vmatprep.subr.bf16.mxu0 %v9575_v30  ;;  %v7635_v30 = vld [vmem:[%s13915_s17 + $0x470] sm:$0xff]  ;;  %v7637_v62 = vld [vmem:[%s13915_s17 + $0x480] sm:$0xff]  ;;  %v5604_v34 = vld [vmem:[#allocation30 + $0x78] sm:$0xff] }
 0x913   : > { %4468 = vmatmul.mubr.f32.vlgmr.msra.gmra.mrb[56].mxu1 %v12475_v21  ;;  %9578 = vmatpush1.bf16.msra.mxu0 %v9577_v0  ;;  %v9517_v58 = vpack.c.bf16 %v7635_v30, %v7633_v23  ;;  %v7639_v0 = vld [vmem:[%s13915_s17 + $0x490] sm:$0xff]  ;;  %v9867_v45 = vpack.c.bf16 %v5604_v34, %v5602_v26  ;;  %v5610_v23 = vld [vmem:[#allocation30 + $0xa8] sm:$0xff]  ;;  %v5612_v30 = vld [vmem:[#allocation30 + $0xb8] sm:$0xff] }
 0x914   : > { %9474 = vmatpush1.bf16.msra.mxu1 %v9473_v10  ;;  %4473 = vmatprep.mubr.f32.mxu1 %v12475_v21  ;;  %v7611_v10 = vld [vmem:[%s13915_s17 + $0x3b0] sm:$0xff] }
 0x915   : > { %9476 = vmatprep.subr.bf16.mxu1 %v9475_v11  ;;  %v7614_v11 = vld [vmem:[%s13915_s17 + $0x3c8] sm:$0xff]  ;;  %v9493_v42 = vpack.c.bf16 %v7611_v10, %v7609_v33  ;;  %9580 = vmatprep.subr.bf16.mxu0 %v9579_v56  ;;  %v9521_v56 = vpack.c.bf16 %v7639_v0, %v7637_v62  ;;  %v5616_v0 = vld [vmem:[#allocation30 + $0xd8] sm:$0xff] }
 0x916   : > { %v9495_v13 = vpack.c.bf16 %v7616_v29, %v7614_v11  ;;  %v7642_v33 = vld [vmem:[%s13915_s17 + $0x4a8] sm:$0xff]  ;;  %v7645_v29 = vld [vmem:[%s13915_s17 + $0x4c0] sm:$0xff] }
 0x917   : > { %4474 = vmatmul.mubr.f32.gmra.mrb[58].mxu1 %v12475_v21  ;;  %9582 = vmatpush1.bf16.msra.mxu0 %v9581_v14  ;;  %v7646_v10 = vld [vmem:[%s13915_s17 + $0x4c8] sm:$0xff]  ;;  %v7647_v14 = vld [vmem:[%s13915_s17 + $0x4d0] sm:$0xff] }
 0x918   : > { %9478 = vmatpush1.bf16.msra.mxu1 %v9477_v1  ;;  %4479 = vmatprep.mubr.f32.mxu1 %v12475_v21  ;;  %v7615_v1 = vld [vmem:[%s13915_s17 + $0x3d0] sm:$0xff]  ;;  %v9527_v11 = vpack.c.bf16 %v7648_v25, %v7646_v10  ;;  %v5614_v62 = vld [vmem:[#allocation30 + $0xc8] sm:$0xff]  ;;  %v5617_v25 = vld [vmem:[#allocation30 + $0xe0] sm:$0xff] }
 0x919   : > { %9480 = vmatprep.subr.bf16.mxu1 %v9479_v37  ;;  %v9585_v37 = vpack.c.bf16 %v4927_v40, %v4925_v60  ;;  %v9497_v3 = vpack.c.bf16 %v7615_v1, %v7613_v47  ;;  %9584 = vmatprep.subr.bf16.mxu0 %v9583_v51  ;;  %v7652_v51 = vld [vmem:[%s13915_s17 + $0x4f8] sm:$0xff]  ;;  %v9529_v60 = vpack.c.bf16 %v7647_v14, %v7645_v29  ;;  %v7651_v47 = vld [vmem:[%s13915_s17 + $0x4f0] sm:$0xff]  ;;  %v5590_v1 = vld [vmem:[#allocation30 + $0x8] sm:$0xff] }
 0x91a   : > { %v4930_v29 = vld [vmem:[#allocation27 + $0x3a8] sm:$0xff]  ;;  %v4932_v14 = vld [vmem:[#allocation27 + $0x3b8] sm:$0xff] }
 0x91b   : > { %4480 = vmatmul.mubr.f32.gmra.mrb[60].mxu1 %v12475_v21  ;;  %9586 = vmatpush1.bf16.msra.mxu0 %v9585_v37  ;;  %v9855_v37 = vpack.c.bf16 %v5592_v43, %v5590_v1  ;;  %v4933_v43 = vld [vmem:[#allocation27 + $0x3c0] sm:$0xff] }
 0x91c   : > { %9482 = vmatpush1.bf16.msra.mxu1 %v9481_v12  ;;  %4485 = vmatprep.mubr.f32.mxu1 %v12475_v21  ;;  %v7621_v12 = vld [vmem:[%s13915_s17 + $0x400] sm:$0xff] }
 0x91d   : > { %9484 = vmatprep.subr.bf16.mxu1 %v9483_v18  ;;  %v7628_v18 = vld [vmem:[%s13915_s17 + $0x438] sm:$0xff]  ;;  %v9505_v6 = vpack.c.bf16 %v7623_v4, %v7621_v12  ;;  %v5598_v12 = vld [vmem:[#allocation30 + $0x48] sm:$0xff] }
 0x91e   : > { %v9507_v16 = vpack.c.bf16 %v7628_v18, %v7626_v32  ;;  %v5600_v4 = vld [vmem:[#allocation30 + $0x58] sm:$0xff] }
 0x91f   : > { %4486 = vmatmul.mubr.f32.gmra.mrb[62].mxu1 %v12657_v48  ;;  %v9863_v18 = vpack.c.bf16 %v5600_v4, %v5598_v12  ;;  %v4768_v12 = vld [vmem:[#allocation26] sm:$0x3]  ;;  %v12984_v4 = vsub.s32 1, %v12182_v2 }
 0x920   : > { %9486 = vmatpush1.bf16.msra.mxu1 %v9485_v31  ;;  %4601 = vmatprep.mubr.f32.mxu1 %v12475_v21  ;;  %v7629_v31 = vld [vmem:[%s13915_s17 + $0x440] sm:$0xff] }
 0x921   : > { %9488 = vmatprep.subr.bf16.mxu1 %v9487_v54  ;;  %v9513_v8 = vpack.c.bf16 %v7631_v17, %v7629_v31  ;;  %v5606_v31 = vld [vmem:[#allocation30 + $0x88] sm:$0xff]  ;;  %v5608_v17 = vld [vmem:[#allocation30 + $0x98] sm:$0xff] }
 0x924   : > { %9490 = vmatpush1.bf16.msra.mxu1 %v9489_v7  ;;  %v4503_v7 = vld [vmem:[#allocation4 + $0x24] sm:$0xff] }
 0x925   : > { %9492 = vmatprep.subr.bf16.mxu1 %v9491_v41  ;;  %v7643_v41 = vld [vmem:[%s13915_s17 + $0x4b0] sm:$0xff] }
 0x926   : > { %v9525_v44 = vpack.c.bf16 %v7643_v41, %v7641_v39  ;;  %v5620_v39 = vld [vmem:[#allocation30 + $0xf8] sm:$0xff] }
 0x928   : > { %9494 = vmatpush1.bf16.msra.mxu1 %v9493_v42  ;;  %v7650_v42 = vld [vmem:[%s13915_s17 + $0x4e8] sm:$0xff] }
 0x929   : > { %9496 = vmatprep.subr.bf16.mxu1 %v9495_v13  ;;  %v9531_v40 = vpack.c.bf16 %v7652_v51, %v7650_v42  ;;  %v7649_v13 = vld [vmem:[%s13915_s17 + $0x4e0] sm:$0xff]  ;;  %v9587_v42 = vpack.c.bf16 %v4932_v14, %v4930_v29 }
 0x92a   : > { %v9533_v53 = vpack.c.bf16 %v7651_v47, %v7649_v13  ;;  %v4929_v51 = vld [vmem:[#allocation27 + $0x3a0] sm:$0xff]  ;;  %v4934_v13 = vld [vmem:[#allocation27 + $0x3c8] sm:$0xff]  ;;  %v4936_v47 = vld [vmem:[#allocation27 + $0x3d8] sm:$0xff] }
 0x92b   : > { %9588 = vmatprep.subr.bf16.mxu0 %v9587_v42  ;;  %v9591_v1 = vpack.c.bf16 %v4936_v47, %v4934_v13  ;;  %v4816_v42 = vld [vmem:[#allocation27 + $0x20] sm:$0xff] }
 0x92c   : > { %9498 = vmatpush1.bf16.msra.mxu1 %v9497_v3  ;;  %v5589_v3 = vld [vmem:[#allocation30] sm:$0xff] }
 0x92d   : > { %9500 = vmatprep.subr.bf16.mxu1 %v9499_v15  ;;  %v5591_v15 = vld [vmem:[#allocation30 + $0x10] sm:$0xff] }
 0x92e   : > { %v9857_v22 = vpack.c.bf16 %v5591_v15, %v5589_v3  ;;  %v4940_v3 = vld [vmem:[#allocation27 + $0x3f8] sm:$0xff]  ;;  %v4937_v15 = vld [vmem:[#allocation27 + $0x3e0] sm:$0xff] }
 0x92f   : > { %v9597_v28 = vpack.c.bf16 %v4939_v19, %v4937_v15  ;;  %v4822_v15 = vld [vmem:[#allocation27 + $0x50] sm:$0xff] }
 0x930   : > { %9502 = vmatpush1.bf16.msra.mxu1 %v9501_v27  ;;  %v5593_v27 = vld [vmem:[#allocation30 + $0x20] sm:$0xff] }
 0x931   : > { %9504 = vmatprep.subr.bf16.mxu1 %v9503_v61  ;;  %v5595_v61 = vld [vmem:[#allocation30 + $0x30] sm:$0xff] }
 0x932   : > { %v9861_v32 = vpack.c.bf16 %v5595_v61, %v5593_v27  ;;  %v12981_v61 = vsub.s32 0, %v12182_v2 }
 0x933   : > { %4602 = vmatmul.mubr.f32.vlgmr.msra.gmra.mrb[56].mxu1 %v12611_v57  ;;  %v7636_v57 = vld [vmem:[%s13915_s17 + $0x478] sm:$0xff] }
 0x934   : > { %9506 = vmatpush1.bf16.msra.mxu1 %v9505_v6  ;;  %4607 = vmatprep.mubr.f32.mxu1 %v12475_v21  ;;  %v9515_v54 = vpack.c.bf16 %v7636_v57, %v7634_v9  ;;  %v5597_v6 = vld [vmem:[#allocation30 + $0x40] sm:$0xff]  ;;  %v9871_v57 = vpack.c.bf16 %v5608_v17, %v5606_v31 }
 0x935   : > { %9508 = vmatprep.subr.bf16.mxu1 %v9507_v16  ;;  %v5599_v16 = vld [vmem:[#allocation30 + $0x50] sm:$0xff] }
 0x936   : > { %v9865_v20 = vpack.c.bf16 %v5599_v16, %v5597_v6 }
 0x937   : > { %4608 = vmatmul.mubr.f32.gmra.mrb[58].mxu1 %v12626_v35  ;;  %v7640_v35 = vld [vmem:[%s13915_s17 + $0x498] sm:$0xff] }
 0x938   : > { %9510 = vmatpush1.bf16.msra.mxu1 %v9509_v46  ;;  %4613 = vmatprep.mubr.f32.mxu1 %v12475_v21  ;;  %v9519_v49 = vpack.c.bf16 %v7640_v35, %v7638_v36  ;;  %v5601_v46 = vld [vmem:[#allocation30 + $0x60] sm:$0xff]  ;;  %v9875_v35 = vpack.c.bf16 %v5612_v30, %v5610_v23 }
 0x939   : > { %9512 = vmatprep.subr.bf16.mxu1 %v9511_v59  ;;  %v5603_v59 = vld [vmem:[#allocation30 + $0x70] sm:$0xff] }
 0x93a   : > { %v9869_v9 = vpack.c.bf16 %v5603_v59, %v5601_v46 }
 0x93b   : > { %4614 = vmatmul.mubr.f32.gmra.mrb[60].mxu1 %v12667_v50  ;;  %v7644_v50 = vld [vmem:[%s13915_s17 + $0x4b8] sm:$0xff] }
 0x93c   : > { %9514 = vmatpush1.bf16.msra.mxu1 %v9513_v8  ;;  %4619 = vmatprep.mubr.f32.mxu1 %v12475_v21  ;;  %v9523_v5 = vpack.c.bf16 %v7644_v50, %v7642_v33  ;;  %v5605_v8 = vld [vmem:[#allocation30 + $0x80] sm:$0xff]  ;;  %v9879_v33 = vpack.c.bf16 %v5616_v0, %v5614_v62 }
 0x93d   : > { %9516 = vmatprep.subr.bf16.mxu1 %v9515_v54  ;;  %v5607_v54 = vld [vmem:[#allocation30 + $0x90] sm:$0xff]  ;;  %v5613_v50 = vld [vmem:[#allocation30 + $0xc0] sm:$0xff] }
 0x93e   : > { %v9873_v36 = vpack.c.bf16 %v5607_v54, %v5605_v8 }
 0x93f   : > { %4620 = vmatmul.mubr.f32.gmra.mrb[62].mxu1 %v4503_v7 }
 0x940   : > { %9518 = vmatpush1.bf16.msra.mxu1 %v9517_v58  ;;  %4735 = vmatprep.mubr.f32.mxu1 %v12475_v21  ;;  %v5609_v58 = vld [vmem:[#allocation30 + $0xa0] sm:$0xff] }
 0x941   : > { %9520 = vmatprep.subr.bf16.mxu1 %v9519_v49  ;;  %v5611_v49 = vld [vmem:[#allocation30 + $0xb0] sm:$0xff] }
 0x942   : > { %v9877_v7 = vpack.c.bf16 %v5611_v49, %v5609_v58  ;;  %v4814_v58 = vld [vmem:[#allocation27 + $0x10] sm:$0xff] }
 0x944   : > { %9522 = vmatpush1.bf16.msra.mxu1 %v9521_v56  ;;  %v5615_v56 = vld [vmem:[#allocation30 + $0xd0] sm:$0xff] }
 0x945   : > { %9524 = vmatprep.subr.bf16.mxu1 %v9523_v5  ;;  %v5618_v5 = vld [vmem:[#allocation30 + $0xe8] sm:$0xff]  ;;  %v9881_v41 = vpack.c.bf16 %v5615_v56, %v5613_v50 }
 0x946   : > { %v9883_v10 = vpack.c.bf16 %v5620_v39, %v5618_v5 }
 0x948   : > { %9526 = vmatpush1.bf16.msra.mxu1 %v9525_v44 }
 0x949   : > { %9528 = vmatprep.subr.bf16.mxu1 %v9527_v11  ;;  %v10476_v11 = vld [vmem:[#allocation4] sm:$0xff] }
 0x94c   : > { %9530 = vmatpush1.bf16.msra.mxu1 %v9529_v60  ;;  %v4931_v60 = vld [vmem:[#allocation27 + $0x3b0] sm:$0xff] }
 0x94d   : > { %9532 = vmatprep.subr.bf16.mxu1 %v9531_v40  ;;  %v9589_v40 = vpack.c.bf16 %v4931_v60, %v4929_v51  ;;  %v4818_v51 = vld [vmem:[#allocation27 + $0x30] sm:$0xff] }
 0x94f   : > { %9590 = vmatpush1.bf16.msra.mxu0 %v9589_v40 }
 0x950   : > { %9534 = vmatpush1.bf16.msra.mxu1 %v9533_v53  ;;  %v4935_v53 = vld [vmem:[#allocation27 + $0x3d0] sm:$0xff]  ;;  %9592 = vmatprep.subr.bf16.mxu0 %v9591_v1  ;;  %v4821_v1 = vld [vmem:[#allocation27 + $0x48] sm:$0xff] }
 0x951   : > { %9856 = vmatprep.subr.bf16.mxu1 %v9855_v37  ;;  %v9593_v37 = vpack.c.bf16 %v4935_v53, %v4933_v43  ;;  %v4823_v43 = vld [vmem:[#allocation27 + $0x58] sm:$0xff] }
 0x953   : > { %4736 = vmatmul.mubr.f32.vlgmr.msra.gmra.mrb[56].mxu1 %v12475_v21  ;;  %9594 = vmatpush1.bf16.msra.mxu0 %v9593_v37  ;;  %v9605_v37 = vpack.c.bf16 %v4818_v51, %v4816_v42  ;;  %v4846_v42 = vld [vmem:[#allocation27 + $0x110] sm:$0xff]  ;;  %v4849_v51 = vld [vmem:[#allocation27 + $0x128] sm:$0xff] }
 0x954   : > { %9858 = vmatpush1.bf16.msra.mxu1 %v9857_v22  ;;  %4741 = vmatprep.mubr.f32.mxu1 %v12475_v21  ;;  %v4813_v22 = vld [vmem:[#allocation27 + $0x8] sm:$0xff] }
 0x955   : > { %9860 = vmatprep.subr.bf16.mxu1 %v9859_v24  ;;  %v4815_v24 = vld [vmem:[#allocation27 + $0x18] sm:$0xff] }
 0x956   : > { %v9599_v27 = vpack.c.bf16 %v4815_v24, %v4813_v22  ;;  %v4827_v22 = vld [vmem:[#allocation27 + $0x78] sm:$0xff] }
 0x957   : > { %4742 = vmatmul.mubr.f32.gmra.mrb[58].mxu1 %v12475_v21 }
 0x958   : > { %9862 = vmatpush1.bf16.msra.mxu1 %v9861_v32  ;;  %4747 = vmatprep.mubr.f32.mxu1 %v12475_v21  ;;  %v4773_v32 = vrot.slane %v4768_v12, %v12981_v61 }
 0x959   : > { %9864 = vmatprep.subr.bf16.mxu1 %v9863_v18  ;;  %v4777_v18 = vrot.slane %v4768_v12, %v12984_v4  ;;  %v4824_v12 = vld [vmem:[#allocation27 + $0x60] sm:$0xff] }
 0x95b   : > { %4748 = vmatmul.mubr.f32.gmra.mrb[60].mxu1 %v12657_v48 }
 0x95c   : > { %9866 = vmatpush1.bf16.msra.mxu1 %v9865_v20  ;;  %4753 = vmatprep.mubr.f32.mxu1 %v12475_v21 }
 0x95d   : > { %9868 = vmatprep.subr.bf16.mxu1 %v9867_v45 }
 0x95f   : > { %4754 = vmatmul.mubr.f32.gmra.mrb[62].mxu1 %v12655_v52 }
 0x960   : > { %9870 = vmatpush1.bf16.msra.mxu1 %v9869_v9  ;;  %5685 = vmatprep.mubr.f32.mxu1 %v12475_v21  ;;  %v5619_v21 = vld [vmem:[#allocation30 + $0xf0] sm:$0xff] }
 0x961   : > { %9872 = vmatprep.subr.bf16.mxu1 %v9871_v57  ;;  %v9885_v44 = vpack.c.bf16 %v5619_v21, %v5617_v25 }
 0x964   : > { %9874 = vmatpush1.bf16.msra.mxu1 %v9873_v36 }
 0x965   : > { %9876 = vmatprep.subr.bf16.mxu1 %v9875_v35  ;;  %v4812_v35 = vld [vmem:[#allocation27] sm:$0xff] }
 0x966   : > { %v9601_v25 = vpack.c.bf16 %v4814_v58, %v4812_v35  ;;  %v4836_v58 = vld [vmem:[#allocation27 + $0xc0] sm:$0xff] }
 0x968   : > { %9878 = vmatpush1.bf16.msra.mxu1 %v9877_v7  ;;  %v4817_v7 = vld [vmem:[#allocation27 + $0x28] sm:$0xff] }
 0x969   : > { %9880 = vmatprep.subr.bf16.mxu1 %v9879_v33  ;;  %v4819_v33 = vld [vmem:[#allocation27 + $0x38] sm:$0xff] }
 0x96a   : > { %v9603_v14 = vpack.c.bf16 %v4819_v33, %v4817_v7  ;;  %v4843_v7 = vld [vmem:[#allocation27 + $0xf8] sm:$0xff] }
 0x96c   : > { %9882 = vmatpush1.bf16.msra.mxu1 %v9881_v41 }
 0x96d   : > { %9884 = vmatprep.subr.bf16.mxu1 %v9883_v10 }
 0x970   : > { %9886 = vmatpush1.bf16.msra.mxu1 %v9885_v44 }
 0x973   : > { %5686 = vmatmul.mubr.f32.vlgmr.msra.gmra.mrb[64].mxu1 %v12657_v48  ;;  %v4938_v48 = vld [vmem:[#allocation27 + $0x3e8] sm:$0xff] }
 0x974   : > { %5691 = vmatprep.mubr.f32.mxu1 %v10476_v11 }
 0x977   : > { %5692 = vmatmul.mubr.f32.gmra.mrb[66].mxu1 %v12655_v52  ;;  %v9595_v52 = vpack.c.bf16 %v4940_v3, %v4938_v48  ;;  %v9607_v3 = vpack.c.bf16 %v4823_v43, %v4821_v1 }
 0x978   : > { %5785 = vmatprep.mubr.f32.mxu1 %v10476_v11 }
 0x979   : > { %9596 = vmatprep.subr.bf16.mxu0 %v9595_v52  ;;  %v4820_v52 = vld [vmem:[#allocation27 + $0x40] sm:$0xff] }
 0x97a   : > { %9598 = vmatpush1.bf16.msra.mxu0 %v9597_v28  ;;  %v4825_v28 = vld [vmem:[#allocation27 + $0x68] sm:$0xff]  ;;  %v9609_v24 = vpack.c.bf16 %v4822_v15, %v4820_v52  ;;  %v4855_v15 = vld [vmem:[#allocation27 + $0x158] sm:$0xff] }
 0x97b   : > { %9600 = vmatprep.subr.bf16.mxu0 %v9599_v27  ;;  %v9611_v27 = vpack.c.bf16 %v4827_v22, %v4825_v28  ;;  %v4853_v52 = vld [vmem:[#allocation27 + $0x148] sm:$0xff] }
 0x97c   : > { %v9639_v22 = vpack.c.bf16 %v4855_v15, %v4853_v52 }
 0xa26   : > { %v4737_v6 = vpop.f32.mrb[56].mxu1 }
 0xa27   : > { %v4780_v16 = vadd.f32 %v4773_v32, %v4737_v6  ;;  %v4739_v26 = vpop.f32.mrb[57].mxu1  ;;  %v4831_v6 = vld [vmem:[#allocation27 + $0x98] sm:$0xff] }
 0xa28   : > { %v4781_v34 = vadd.f32 %v4777_v18, %v4739_v26 }
 0xa29   : > { %v4796_v46 = vmul.f32 0.01, %v4780_v16  ;;  %vm4788_vm0 = vcmp.ge.f32.partialorder %v4780_v16, 0.0 }
 0xa2a   : > { %v4797_v20 = vmul.f32 0.01, %v4781_v34  ;;  %v4743_v45 = vpop.f32.mrb[58].mxu1  ;;  %vm4789_vm15 = vcmp.ge.f32.partialorder %v4781_v34, 0.0 }
 0xa2b   : > { %v4782_v59 = vadd.f32 %v4773_v32, %v4743_v45  ;;  %v4745_v31 = vpop.f32.mrb[59].mxu1  ;;  %v12988_v54 = vsel %vm4788_vm0, %v4780_v16, %v4796_v46  ;;  %v4833_v45 = vld [vmem:[#allocation27 + $0xa8] sm:$0xff]  ;;  %v4835_v46 = vld [vmem:[#allocation27 + $0xb8] sm:$0xff] }
 0xa2c   : > { %v4783_v17 = vadd.f32 %v4777_v18, %v4745_v31  ;;  %v4805_v2 = vsel %vm4789_vm15, %v4781_v34, %v4797_v20  ;;  %v4947_v39 = vrot.slane %v12988_v54, 4  ;;  %v4828_v34 = vld [vmem:[#allocation27 + $0x80] sm:$0xff]  ;;  %v4830_v20 = vld [vmem:[#allocation27 + $0x90] sm:$0xff]  ;;  %v9619_v31 = vpack.c.bf16 %v4835_v46, %v4833_v45 }
 0xa2d   : > { %vm4790_vm2 = vcmp.ge.f32.partialorder %v4782_v59, 0.0  ;;  %v4798_v9 = vmul.f32 0.01, %v4782_v59  ;;  %v4950_v50 = vrot.slane %v4805_v2, 4 }
 0xa2e   : > { %vm4791_vm1 = vcmp.ge.f32.partialorder %v4783_v17, 0.0  ;;  %v4799_v57 = vmul.f32 0.01, %v4783_v17  ;;  %v4749_v8 = vpop.f32.mrb[60].mxu1 }
 0xa2f   : > { %v12990_v23 = vsel %vm4790_vm2, %v4782_v59, %v4798_v9  ;;  %v4784_v30 = vadd.f32 %v4773_v32, %v4749_v8  ;;  %v4751_v36 = vpop.f32.mrb[61].mxu1  ;;  %v9617_v59 = vpack.c.bf16 %v4830_v20, %v4828_v34  ;;  %v4834_v9 = vld [vmem:[#allocation27 + $0xb0] sm:$0xff]  ;;  %v4861_v34 = vld [vmem:[#allocation27 + $0x188] sm:$0xff]  ;;  %v4863_v20 = vld [vmem:[#allocation27 + $0x198] sm:$0xff] }
 0xa30   : > { %v4948_v49 = vrot.slane %v12990_v23, 4  ;;  %v12993_v62 = vsel %vm4791_vm1, %v4783_v17, %v4799_v57  ;;  %v4785_v0 = vadd.f32 %v4777_v18, %v4751_v36  ;;  %v4832_v17 = vld [vmem:[#allocation27 + $0xa0] sm:$0xff]  ;;  %v4839_v57 = vld [vmem:[#allocation27 + $0xd8] sm:$0xff]  ;;  %v9647_v46 = vpack.c.bf16 %v4863_v20, %v4861_v34 }
 0xa31   : > { %vm4792_vm4 = vcmp.ge.f32.partialorder %v4784_v30, 0.0  ;;  %v4800_v56 = vmul.f32 0.01, %v4784_v30  ;;  %v4951_v5 = vrot.slane %v12993_v62, 4 }
 0xa32   : > { %vm4793_vm6 = vcmp.ge.f32.partialorder %v4785_v0, 0.0  ;;  %v4801_v41 = vmul.f32 0.01, %v4785_v0  ;;  %v4755_v10 = vpop.f32.mrb[62].mxu1  ;;  %v4949_v13 = vsel %vm2100_vm8, %v4947_v39, %v4948_v49  ;;  %v4840_v39 = vld [vmem:[#allocation27 + $0xe0] sm:$0xff] }
 0xa33   : > { %v12997_v21 = vsel %vm4792_vm4, %v4784_v30, %v4800_v56  ;;  %v12999_v44 = vadd.f32 %v4773_v32, %v4755_v10  ;;  %v4757_v11 = vpop.f32.mrb[63].mxu1  ;;  %v4952_v29 = vsel %vm2100_vm8, %v4950_v50, %v4951_v5  ;;  %v4826_v32 = vld [vmem:[#allocation27 + $0x70] sm:$0xff]  ;;  %v9621_v30 = vpack.c.bf16 %v4834_v9, %v4832_v17  ;;  %v4845_v10 = vld [vmem:[#allocation27 + $0x108] sm:$0xff]  ;;  %v4867_v9 = vld [vmem:[#allocation27 + $0x1b8] sm:$0xff] }
 0xa34   : > { %v13002_v60 = vsel %vm4793_vm6, %v4785_v0, %v4801_v41  ;;  %v13004_v40 = vadd.f32 %v4777_v18, %v4757_v11  ;;  %5025 = vmatprep.mubr.f32.mxu0 %v4952_v29  ;;  %v4953_v47 = vrot.slane %v12997_v21, 4  ;;  %v4829_v18 = vld [vmem:[#allocation27 + $0x88] sm:$0xff]  ;;  %v9613_v16 = vpack.c.bf16 %v4826_v32, %v4824_v12  ;;  %v4842_v41 = vld [vmem:[#allocation27 + $0xf0] sm:$0xff]  ;;  %v4859_v32 = vld [vmem:[#allocation27 + $0x178] sm:$0xff] }
 0xa35   : > { %5026 = vmatmul.mubr.f32.vlgmr.msra.gmra.mrb[22].mxu0 %v4949_v13  ;;  %v4955_v53 = vrot.slane %v13002_v60, 4  ;;  %v9615_v26 = vpack.c.bf16 %v4831_v6, %v4829_v18  ;;  %v4841_v0 = vld [vmem:[#allocation27 + $0xe8] sm:$0xff]  ;;  %v9629_v11 = vpack.c.bf16 %v4842_v41, %v4840_v39  ;;  %v4851_v13 = vld [vmem:[#allocation27 + $0x138] sm:$0xff]  ;;  %vm4794_vm9 = vcmp.ge.f32.partialorder %v12999_v44, 0.0 }
 0xa36   : > { %9602 = vmatpush1.bf16.msra.mxu0 %v9601_v25  ;;  %v13018_v19 = vsel %vm2100_vm8, %v4948_v49, %v4953_v47  ;;  %v4838_v49 = vld [vmem:[#allocation27 + $0xd0] sm:$0xff]  ;;  %v4847_v25 = vld [vmem:[#allocation27 + $0x118] sm:$0xff]  ;;  %v9635_v43 = vpack.c.bf16 %v4851_v13, %v4849_v51  ;;  %v4857_v12 = vld [vmem:[#allocation27 + $0x168] sm:$0xff]  ;;  %vm4795_vm7 = vcmp.ge.f32.partialorder %v13004_v40, 0.0  ;;  %vm7104_vm4 = vcmask 253952  }
 0xa37   : > { %v13012_v48 = vsel %vm2100_vm8, %v4951_v5, %v4955_v53  ;;  %9604 = vmatprep.subr.bf16.mxu0 %v9603_v14  ;;  %v9625_v50 = vpack.c.bf16 %v4838_v49, %v4836_v58  ;;  %v9627_v5 = vpack.c.bf16 %v4843_v7, %v4841_v0  ;;  %v9631_v29 = vpack.c.bf16 %v4847_v25, %v4845_v10  ;;  %v4844_v14 = vld [vmem:[#allocation27 + $0x100] sm:$0xff]  ;;  %v4865_v17 = vld [vmem:[#allocation27 + $0x1a8] sm:$0xff]  ;;  %v4871_v49 = vld [vmem:[#allocation27 + $0x1d8] sm:$0xff] }
 0xa38   : > { %5031 = vmatprep.mubr.f32.mxu0 %v13012_v48  ;;  %v9633_v1 = vpack.c.bf16 %v4846_v42, %v4844_v14  ;;  %v9643_v6 = vpack.c.bf16 %v4859_v32, %v4857_v12  ;;  %v4869_v58 = vld [vmem:[#allocation27 + $0x1c8] sm:$0xff]  ;;  %v4875_v41 = vld [vmem:[#allocation27 + $0x1f8] sm:$0xff] }
 0xa39   : > { %5032 = vmatmul.mubr.f32.gmra.mrb[24].mxu0 %v13018_v19  ;;  %v9655_v7 = vpack.c.bf16 %v4871_v49, %v4869_v58  ;;  %v4873_v39 = vld [vmem:[#allocation27 + $0x1e8] sm:$0xff]  ;;  %v5119_v42 = vld [vmem:[#allocation27 + $0x418] sm:$0xff]  ;;  %v5138_v49 = vld [vmem:[#allocation27 + $0x4b0] sm:$0xff] }
 0xa3a   : > { %9606 = vmatpush1.bf16.msra.mxu0 %v9605_v37  ;;  %5102 = vmatprep.mubr.f32.mxu0 %v4805_v2  ;;  %v4837_v2 = vld [vmem:[#allocation27 + $0xc8] sm:$0xff]  ;;  %v4848_v37 = vld [vmem:[#allocation27 + $0x120] sm:$0xff]  ;;  %v9659_v25 = vpack.c.bf16 %v4875_v41, %v4873_v39  ;;  %v5142_v41 = vld [vmem:[#allocation27 + $0x4d0] sm:$0xff] }
 0xa3b   : > { %9608 = vmatprep.subr.bf16.mxu0 %v9607_v3  ;;  %v9623_v35 = vpack.c.bf16 %v4839_v57, %v4837_v2  ;;  %v4850_v3 = vld [vmem:[#allocation27 + $0x130] sm:$0xff]  ;;  %v9651_v57 = vpack.c.bf16 %v4867_v9, %v4865_v17  ;;  %v5117_v14 = vld [vmem:[#allocation27 + $0x408] sm:$0xff]  ;;  %v5132_v9 = vld [vmem:[#allocation27 + $0x480] sm:$0xff] }
 0xa3c   : > { %v9637_v28 = vpack.c.bf16 %v4850_v3, %v4848_v37  ;;  %v9663_v13 = vpack.c.bf16 %v5119_v42, %v5117_v14  ;;  %v5121_v37 = vld [vmem:[#allocation27 + $0x428] sm:$0xff]  ;;  %v5123_v3 = vld [vmem:[#allocation27 + $0x438] sm:$0xff]  ;;  %v5140_v39 = vld [vmem:[#allocation27 + $0x4c0] sm:$0xff] }
 0xa3d   : > { %v9667_v15 = vpack.c.bf16 %v5123_v3, %v5121_v37  ;;  %v5144_v14 = vld [vmem:[#allocation27 + $0x4e0] sm:$0xff]  ;;  %v5146_v42 = vld [vmem:[#allocation27 + $0x4f0] sm:$0xff] }
 0xa3e   : > { %9610 = vmatpush1.bf16.msra.mxu0 %v9609_v24  ;;  %v4852_v24 = vld [vmem:[#allocation27 + $0x140] sm:$0xff]  ;;  %v5150_v3 = vld [vmem:[#allocation27 + $0x510] sm:$0xff] }
 0xa3f   : > { %9612 = vmatprep.subr.bf16.mxu0 %v9611_v27  ;;  %v4854_v27 = vld [vmem:[#allocation27 + $0x150] sm:$0xff]  ;;  %v5148_v37 = vld [vmem:[#allocation27 + $0x500] sm:$0xff] }
 0xa40   : > { %v9641_v18 = vpack.c.bf16 %v4854_v27, %v4852_v24  ;;  %v5125_v24 = vld [vmem:[#allocation27 + $0x448] sm:$0xff]  ;;  %v5127_v27 = vld [vmem:[#allocation27 + $0x458] sm:$0xff] }
 0xa41   : > { %v9671_v32 = vpack.c.bf16 %v5127_v27, %v5125_v24  ;;  %v5152_v24 = vld [vmem:[#allocation27 + $0x520] sm:$0xff]  ;;  %v5154_v27 = vld [vmem:[#allocation27 + $0x530] sm:$0xff] }
 0xa42   : > { %9614 = vmatpush1.bf16.msra.mxu0 %v9613_v16  ;;  %v4856_v16 = vld [vmem:[#allocation27 + $0x160] sm:$0xff] }
 0xa43   : > { %9616 = vmatprep.subr.bf16.mxu0 %v9615_v26  ;;  %v4858_v26 = vld [vmem:[#allocation27 + $0x170] sm:$0xff] }
 0xa44   : > { %v9645_v45 = vpack.c.bf16 %v4858_v26, %v4856_v16  ;;  %v5129_v16 = vld [vmem:[#allocation27 + $0x468] sm:$0xff]  ;;  %v5131_v26 = vld [vmem:[#allocation27 + $0x478] sm:$0xff] }
 0xa45   : > { %v9675_v20 = vpack.c.bf16 %v5131_v26, %v5129_v16  ;;  %v5156_v16 = vld [vmem:[#allocation27 + $0x540] sm:$0xff]  ;;  %v5158_v26 = vld [vmem:[#allocation27 + $0x550] sm:$0xff] }
 0xa46   : > { %9618 = vmatpush1.bf16.msra.mxu0 %v9617_v59  ;;  %v13021_v8 = vpop.f32.mrb[64].mxu1  ;;  %v4860_v59 = vld [vmem:[#allocation27 + $0x180] sm:$0xff] }
 0xa47   : > { %v13023_v36 = vpop.f32.mrb[65].mxu1  ;;  %9620 = vmatprep.subr.bf16.mxu0 %v9619_v31  ;;  %v4862_v31 = vld [vmem:[#allocation27 + $0x190] sm:$0xff] }
 0xa48   : > { %v9649_v2 = vpack.c.bf16 %v4862_v31, %v4860_v59  ;;  %v5135_v59 = vld [vmem:[#allocation27 + $0x498] sm:$0xff] }
 0xa4a   : > { %9622 = vmatpush1.bf16.msra.mxu0 %v9621_v30  ;;  %v13025_v33 = vpop.f32.mrb[66].mxu1  ;;  %v4864_v30 = vld [vmem:[#allocation27 + $0x1a0] sm:$0xff] }
 0xa4b   : > { %v13027_v56 = vpop.f32.mrb[67].mxu1  ;;  %9624 = vmatprep.subr.bf16.mxu0 %v9623_v35  ;;  %v4866_v35 = vld [vmem:[#allocation27 + $0x1b0] sm:$0xff] }
 0xa4c   : > { %v9653_v0 = vpack.c.bf16 %v4866_v35, %v4864_v30  ;;  %v5139_v30 = vld [vmem:[#allocation27 + $0x4b8] sm:$0xff] }
 0xa4e   : > { %9626 = vmatpush1.bf16.msra.mxu0 %v9625_v50  ;;  %v4868_v50 = vld [vmem:[#allocation27 + $0x1c0] sm:$0xff] }
 0xa4f   : > { %9628 = vmatprep.subr.bf16.mxu0 %v9627_v5  ;;  %v4870_v5 = vld [vmem:[#allocation27 + $0x1d0] sm:$0xff] }
 0xa50   : > { %v9657_v10 = vpack.c.bf16 %v4870_v5, %v4868_v50 }
 0xa52   : > { %9630 = vmatpush1.bf16.msra.mxu0 %v9629_v11  ;;  %v4872_v11 = vld [vmem:[#allocation27 + $0x1e0] sm:$0xff] }
 0xa53   : > { %9632 = vmatprep.subr.bf16.mxu0 %v9631_v29  ;;  %v4874_v29 = vld [vmem:[#allocation27 + $0x1f0] sm:$0xff] }
 0xa54   : > { %v9661_v51 = vpack.c.bf16 %v4874_v29, %v4872_v11  ;;  %v9689_v11 = vpack.c.bf16 %v5142_v41, %v5140_v39 }
 0xa56   : > { %9634 = vmatpush1.bf16.msra.mxu0 %v9633_v1  ;;  %v5116_v1 = vld [vmem:[#allocation27 + $0x400] sm:$0xff] }
 0xa57   : > { %9636 = vmatprep.subr.bf16.mxu0 %v9635_v43  ;;  %v5118_v43 = vld [vmem:[#allocation27 + $0x410] sm:$0xff] }
 0xa58   : > { %v9665_v52 = vpack.c.bf16 %v5118_v43, %v5116_v1  ;;  %v9693_v1 = vpack.c.bf16 %v5146_v42, %v5144_v14 }
 0xa5a   : > { %9638 = vmatpush1.bf16.msra.mxu0 %v9637_v28  ;;  %v5120_v28 = vld [vmem:[#allocation27 + $0x420] sm:$0xff] }
 0xa5b   : > { %9640 = vmatprep.subr.bf16.mxu0 %v9639_v22  ;;  %v5122_v22 = vld [vmem:[#allocation27 + $0x430] sm:$0xff] }
 0xa5c   : > { %v9669_v12 = vpack.c.bf16 %v5122_v22, %v5120_v28  ;;  %v9697_v28 = vpack.c.bf16 %v5150_v3, %v5148_v37 }
 0xa5e   : > { %9642 = vmatpush1.bf16.msra.mxu0 %v9641_v18  ;;  %v5124_v18 = vld [vmem:[#allocation27 + $0x440] sm:$0xff] }
 0xa5f   : > { %9644 = vmatprep.subr.bf16.mxu0 %v9643_v6  ;;  %v5126_v6 = vld [vmem:[#allocation27 + $0x450] sm:$0xff] }
 0xa60   : > { %v9673_v34 = vpack.c.bf16 %v5126_v6, %v5124_v18  ;;  %v9701_v18 = vpack.c.bf16 %v5154_v27, %v5152_v24 }
 0xa62   : > { %9646 = vmatpush1.bf16.msra.mxu0 %v9645_v45  ;;  %v5128_v45 = vld [vmem:[#allocation27 + $0x460] sm:$0xff] }
 0xa63   : > { %9648 = vmatprep.subr.bf16.mxu0 %v9647_v46  ;;  %v5133_v46 = vld [vmem:[#allocation27 + $0x488] sm:$0xff] }
 0xa64   : > { %v9679_v17 = vpack.c.bf16 %v5135_v59, %v5133_v46  ;;  %v5160_v46 = vld [vmem:[#allocation27 + $0x560] sm:$0xff]  ;;  %v5162_v59 = vld [vmem:[#allocation27 + $0x570] sm:$0xff] }
 0xa66   : > { %9650 = vmatpush1.bf16.msra.mxu0 %v9649_v2  ;;  %v5134_v2 = vld [vmem:[#allocation27 + $0x490] sm:$0xff] }
 0xa67   : > { %9652 = vmatprep.subr.bf16.mxu0 %v9651_v57  ;;  %v5137_v57 = vld [vmem:[#allocation27 + $0x4a8] sm:$0xff]  ;;  %v9681_v35 = vpack.c.bf16 %v5134_v2, %v5132_v9  ;;  %v9709_v9 = vpack.c.bf16 %v5162_v59, %v5160_v46 }
 0xa68   : > { %v9683_v58 = vpack.c.bf16 %v5139_v30, %v5137_v57  ;;  %v5164_v57 = vld [vmem:[#allocation27 + $0x580] sm:$0xff]  ;;  %v5166_v30 = vld [vmem:[#allocation27 + $0x590] sm:$0xff] }
 0xa6a   : > { %9654 = vmatpush1.bf16.msra.mxu0 %v9653_v0  ;;  %v5141_v0 = vld [vmem:[#allocation27 + $0x4c8] sm:$0xff] }
 0xa6b   : > { %9656 = vmatprep.subr.bf16.mxu0 %v9655_v7  ;;  %v5143_v7 = vld [vmem:[#allocation27 + $0x4d8] sm:$0xff] }
 0xa6c   : > { %v9687_v5 = vpack.c.bf16 %v5143_v7, %v5141_v0  ;;  %v5168_v0 = vld [vmem:[#allocation27 + $0x5a0] sm:$0xff]  ;;  %v5170_v7 = vld [vmem:[#allocation27 + $0x5b0] sm:$0xff] }
 0xa6d   : > { %v9717_v39 = vpack.c.bf16 %v5170_v7, %v5168_v0  ;;  %v5284_v7 = vld [vmem:[#allocation27 + $0x6b0] sm:$0xff] }
 0xa6e   : > { %9658 = vmatpush1.bf16.msra.mxu0 %v9657_v10  ;;  %v5145_v10 = vld [vmem:[#allocation27 + $0x4e8] sm:$0xff] }
 0xa6f   : > { %9660 = vmatprep.subr.bf16.mxu0 %v9659_v25  ;;  %v5147_v25 = vld [vmem:[#allocation27 + $0x4f8] sm:$0xff] }
 0xa70   : > { %v9691_v29 = vpack.c.bf16 %v5147_v25, %v5145_v10  ;;  %v5172_v10 = vld [vmem:[#allocation27 + $0x5c0] sm:$0xff]  ;;  %v5174_v25 = vld [vmem:[#allocation27 + $0x5d0] sm:$0xff] }
 0xa71   : > { %v9721_v14 = vpack.c.bf16 %v5174_v25, %v5172_v10  ;;  %v5286_v10 = vld [vmem:[#allocation27 + $0x6c0] sm:$0xff]  ;;  %v5288_v25 = vld [vmem:[#allocation27 + $0x6d0] sm:$0xff] }
 0xa72   : > { %9662 = vmatpush1.bf16.msra.mxu0 %v9661_v51  ;;  %v5149_v51 = vld [vmem:[#allocation27 + $0x508] sm:$0xff] }
 0xa73   : > { %9664 = vmatprep.subr.bf16.mxu0 %v9663_v13  ;;  %v5151_v13 = vld [vmem:[#allocation27 + $0x518] sm:$0xff] }
 0xa74   : > { %v9695_v43 = vpack.c.bf16 %v5151_v13, %v5149_v51  ;;  %v5176_v51 = vld [vmem:[#allocation27 + $0x5e0] sm:$0xff]  ;;  %v5178_v13 = vld [vmem:[#allocation27 + $0x5f0] sm:$0xff] }
 0xa75   : > { %5103 = vmatmul.mubr.f32.vlgmr.msra.gmra.mrb[22].mxu0 %v12988_v54  ;;  %v5130_v54 = vld [vmem:[#allocation27 + $0x470] sm:$0xff]  ;;  %v9725_v37 = vpack.c.bf16 %v5178_v13, %v5176_v51  ;;  %v5290_v51 = vld [vmem:[#allocation27 + $0x6e0] sm:$0xff] }
 0xa76   : > { %5108 = vmatprep.mubr.f32.mxu0 %v12993_v62  ;;  %9666 = vmatpush1.bf16.msra.mxu0 %v9665_v52  ;;  %v9677_v31 = vpack.c.bf16 %v5130_v54, %v5128_v45  ;;  %v5153_v52 = vld [vmem:[#allocation27 + $0x528] sm:$0xff]  ;;  %v9705_v45 = vpack.c.bf16 %v5158_v26, %v5156_v16  ;;  %v5292_v13 = vld [vmem:[#allocation27 + $0x6f0] sm:$0xff] }
 0xa77   : > { %9668 = vmatprep.subr.bf16.mxu0 %v9667_v15  ;;  %v5155_v15 = vld [vmem:[#allocation27 + $0x538] sm:$0xff] }
 0xa78   : > { %v9699_v22 = vpack.c.bf16 %v5155_v15, %v5153_v52  ;;  %v5262_v52 = vld [vmem:[#allocation27 + $0x600] sm:$0xff]  ;;  %v5264_v15 = vld [vmem:[#allocation27 + $0x610] sm:$0xff] }
 0xa79   : > { %5109 = vmatmul.mubr.f32.gmra.mrb[24].mxu0 %v12990_v23  ;;  %v9729_v24 = vpack.c.bf16 %v5264_v15, %v5262_v52  ;;  %v5294_v52 = vld [vmem:[#allocation27 + $0x700] sm:$0xff]  ;;  %v5296_v15 = vld [vmem:[#allocation27 + $0x710] sm:$0xff] }
 0xa7a   : > { %9670 = vmatpush1.bf16.msra.mxu0 %v9669_v12  ;;  %5244 = vmatprep.mubr.f32.mxu0 %v12993_v62  ;;  %v5136_v62 = vld [vmem:[#allocation27 + $0x4a0] sm:$0xff]  ;;  %v5157_v12 = vld [vmem:[#allocation27 + $0x548] sm:$0xff] }
 0xa7b   : > { %9672 = vmatprep.subr.bf16.mxu0 %v9671_v32  ;;  %v9685_v50 = vpack.c.bf16 %v5138_v49, %v5136_v62  ;;  %v5159_v32 = vld [vmem:[#allocation27 + $0x558] sm:$0xff]  ;;  %v9713_v62 = vpack.c.bf16 %v5166_v30, %v5164_v57  ;;  %v5278_v30 = vld [vmem:[#allocation27 + $0x680] sm:$0xff] }
 0xa7c   : > { %v9703_v6 = vpack.c.bf16 %v5159_v32, %v5157_v12  ;;  %v5266_v12 = vld [vmem:[#allocation27 + $0x620] sm:$0xff]  ;;  %v5268_v32 = vld [vmem:[#allocation27 + $0x630] sm:$0xff] }
 0xa7d   : > { %v9733_v16 = vpack.c.bf16 %v5268_v32, %v5266_v12  ;;  %v5298_v12 = vld [vmem:[#allocation27 + $0x720] sm:$0xff]  ;;  %v5300_v32 = vld [vmem:[#allocation27 + $0x730] sm:$0xff] }
 0xa7e   : > { %9674 = vmatpush1.bf16.msra.mxu0 %v9673_v34  ;;  %v5161_v34 = vld [vmem:[#allocation27 + $0x568] sm:$0xff] }
 0xa7f   : > { %9676 = vmatprep.subr.bf16.mxu0 %v9675_v20  ;;  %v5163_v20 = vld [vmem:[#allocation27 + $0x578] sm:$0xff] }
 0xa80   : > { %v9707_v54 = vpack.c.bf16 %v5163_v20, %v5161_v34  ;;  %v5270_v34 = vld [vmem:[#allocation27 + $0x640] sm:$0xff]  ;;  %v5272_v20 = vld [vmem:[#allocation27 + $0x650] sm:$0xff] }
 0xa81   : > { %v9737_v46 = vpack.c.bf16 %v5272_v20, %v5270_v34  ;;  %v5302_v34 = vld [vmem:[#allocation27 + $0x740] sm:$0xff]  ;;  %v5304_v20 = vld [vmem:[#allocation27 + $0x750] sm:$0xff] }
 0xa82   : > { %9678 = vmatpush1.bf16.msra.mxu0 %v9677_v31  ;;  %v5165_v31 = vld [vmem:[#allocation27 + $0x588] sm:$0xff] }
 0xa83   : > { %9680 = vmatprep.subr.bf16.mxu0 %v9679_v17  ;;  %v5167_v17 = vld [vmem:[#allocation27 + $0x598] sm:$0xff] }
 0xa84   : > { %v9711_v2 = vpack.c.bf16 %v5167_v17, %v5165_v31  ;;  %v5274_v31 = vld [vmem:[#allocation27 + $0x660] sm:$0xff]  ;;  %v5279_v17 = vld [vmem:[#allocation27 + $0x688] sm:$0xff] }
 0xa86   : > { %9682 = vmatpush1.bf16.msra.mxu0 %v9681_v35  ;;  %v5169_v35 = vld [vmem:[#allocation27 + $0x5a8] sm:$0xff] }
 0xa87   : > { %9684 = vmatprep.subr.bf16.mxu0 %v9683_v58  ;;  %v5171_v58 = vld [vmem:[#allocation27 + $0x5b8] sm:$0xff] }
 0xa88   : > { %v9715_v49 = vpack.c.bf16 %v5171_v58, %v5169_v35  ;;  %v5280_v35 = vld [vmem:[#allocation27 + $0x690] sm:$0xff]  ;;  %v5283_v58 = vld [vmem:[#allocation27 + $0x6a8] sm:$0xff] }
 0xa8a   : > { %9686 = vmatpush1.bf16.msra.mxu0 %v9685_v50  ;;  %v5173_v50 = vld [vmem:[#allocation27 + $0x5c8] sm:$0xff] }
 0xa8b   : > { %9688 = vmatprep.subr.bf16.mxu0 %v9687_v5  ;;  %v5175_v5 = vld [vmem:[#allocation27 + $0x5d8] sm:$0xff] }
 0xa8c   : > { %v9719_v41 = vpack.c.bf16 %v5175_v5, %v5173_v50  ;;  %v5287_v50 = vld [vmem:[#allocation27 + $0x6c8] sm:$0xff]  ;;  %v5289_v5 = vld [vmem:[#allocation27 + $0x6d8] sm:$0xff] }
 0xa8e   : > { %9690 = vmatpush1.bf16.msra.mxu0 %v9689_v11  ;;  %v5177_v11 = vld [vmem:[#allocation27 + $0x5e8] sm:$0xff] }
 0xa8f   : > { %9692 = vmatprep.subr.bf16.mxu0 %v9691_v29  ;;  %v5179_v29 = vld [vmem:[#allocation27 + $0x5f8] sm:$0xff] }
 0xa90   : > { %v9723_v42 = vpack.c.bf16 %v5179_v29, %v5177_v11  ;;  %v5291_v11 = vld [vmem:[#allocation27 + $0x6e8] sm:$0xff]  ;;  %v5293_v29 = vld [vmem:[#allocation27 + $0x6f8] sm:$0xff] }
 0xa92   : > { %9694 = vmatpush1.bf16.msra.mxu0 %v9693_v1  ;;  %v5263_v1 = vld [vmem:[#allocation27 + $0x608] sm:$0xff] }
 0xa93   : > { %9696 = vmatprep.subr.bf16.mxu0 %v9695_v43  ;;  %v5265_v43 = vld [vmem:[#allocation27 + $0x618] sm:$0xff] }
 0xa94   : > { %v9727_v3 = vpack.c.bf16 %v5265_v43, %v5263_v1  ;;  %v5295_v1 = vld [vmem:[#allocation27 + $0x708] sm:$0xff]  ;;  %v5297_v43 = vld [vmem:[#allocation27 + $0x718] sm:$0xff] }
 0xa96   : > { %9698 = vmatpush1.bf16.msra.mxu0 %v9697_v28  ;;  %v5267_v28 = vld [vmem:[#allocation27 + $0x628] sm:$0xff] }
 0xa97   : > { %9700 = vmatprep.subr.bf16.mxu0 %v9699_v22  ;;  %v5269_v22 = vld [vmem:[#allocation27 + $0x638] sm:$0xff] }
 0xa98   : > { %v9731_v27 = vpack.c.bf16 %v5269_v22, %v5267_v28  ;;  %v5299_v28 = vld [vmem:[#allocation27 + $0x728] sm:$0xff]  ;;  %v5301_v22 = vld [vmem:[#allocation27 + $0x738] sm:$0xff] }
 0xa9a   : > { %9702 = vmatpush1.bf16.msra.mxu0 %v9701_v18  ;;  %v5271_v18 = vld [vmem:[#allocation27 + $0x648] sm:$0xff] }
 0xa9b   : > { %9704 = vmatprep.subr.bf16.mxu0 %v9703_v6  ;;  %v5273_v6 = vld [vmem:[#allocation27 + $0x658] sm:$0xff] }
 0xa9c   : > { %v9735_v26 = vpack.c.bf16 %v5273_v6, %v5271_v18  ;;  %v5303_v18 = vld [vmem:[#allocation27 + $0x748] sm:$0xff]  ;;  %v5305_v6 = vld [vmem:[#allocation27 + $0x758] sm:$0xff] }
 0xa9e   : > { %9706 = vmatpush1.bf16.msra.mxu0 %v9705_v45  ;;  %v5275_v45 = vld [vmem:[#allocation27 + $0x668] sm:$0xff] }
 0xa9f   : > { %9708 = vmatprep.subr.bf16.mxu0 %v9707_v54  ;;  %v5277_v54 = vld [vmem:[#allocation27 + $0x678] sm:$0xff] }
 0xaa0   : > { %v9739_v59 = vpack.c.bf16 %v5277_v54, %v5275_v45  ;;  %v5307_v45 = vld [vmem:[#allocation27 + $0x768] sm:$0xff]  ;;  %v5309_v54 = vld [vmem:[#allocation27 + $0x778] sm:$0xff] }
 0xaa2   : > { %9710 = vmatpush1.bf16.msra.mxu0 %v9709_v9  ;;  %v5281_v9 = vld [vmem:[#allocation27 + $0x698] sm:$0xff] }
 0xaa3   : > { %9712 = vmatprep.subr.bf16.mxu0 %v9711_v2  ;;  %v9743_v57 = vpack.c.bf16 %v5281_v9, %v5279_v17  ;;  %v5311_v17 = vld [vmem:[#allocation27 + $0x788] sm:$0xff]  ;;  %v5313_v9 = vld [vmem:[#allocation27 + $0x798] sm:$0xff] }
 0xaa6   : > { %9714 = vmatpush1.bf16.msra.mxu0 %v9713_v62  ;;  %v5285_v62 = vld [vmem:[#allocation27 + $0x6b8] sm:$0xff] }
 0xaa7   : > { %9716 = vmatprep.subr.bf16.mxu0 %v9715_v49  ;;  %v9745_v49 = vpack.c.bf16 %v5280_v35, %v5278_v30  ;;  %v9747_v0 = vpack.c.bf16 %v5285_v62, %v5283_v58  ;;  %v5310_v30 = vld [vmem:[#allocation27 + $0x780] sm:$0xff]  ;;  %v5312_v35 = vld [vmem:[#allocation27 + $0x790] sm:$0xff]  ;;  %v5315_v58 = vld [vmem:[#allocation27 + $0x7a8] sm:$0xff] }
 0xaa8   : > { %v5317_v62 = vld [vmem:[#allocation27 + $0x7b8] sm:$0xff] }
 0xaaa   : > { %9718 = vmatpush1.bf16.msra.mxu0 %v9717_v39 }
 0xaab   : > { %9720 = vmatprep.subr.bf16.mxu0 %v9719_v41  ;;  %v9751_v41 = vpack.c.bf16 %v5289_v5, %v5287_v50  ;;  %v5319_v50 = vld [vmem:[#allocation27 + $0x7c8] sm:$0xff]  ;;  %v5321_v5 = vld [vmem:[#allocation27 + $0x7d8] sm:$0xff] }
 0xaae   : > { %9722 = vmatpush1.bf16.msra.mxu0 %v9721_v14  ;;  %v9753_v14 = vpack.c.bf16 %v5288_v25, %v5286_v10  ;;  %v5318_v10 = vld [vmem:[#allocation27 + $0x7c0] sm:$0xff]  ;;  %v5320_v25 = vld [vmem:[#allocation27 + $0x7d0] sm:$0xff] }
 0xaaf   : > { %9724 = vmatprep.subr.bf16.mxu0 %v9723_v42  ;;  %v9755_v42 = vpack.c.bf16 %v5293_v29, %v5291_v11  ;;  %v5323_v11 = vld [vmem:[#allocation27 + $0x7e8] sm:$0xff]  ;;  %v5325_v29 = vld [vmem:[#allocation27 + $0x7f8] sm:$0xff] }
 0xab2   : > { %9726 = vmatpush1.bf16.msra.mxu0 %v9725_v37  ;;  %v9757_v37 = vpack.c.bf16 %v5292_v13, %v5290_v51  ;;  %v9787_v51 = vpack.c.bf16 %v5325_v29, %v5323_v11  ;;  %v5322_v13 = vld [vmem:[#allocation27 + $0x7e0] sm:$0xff]  ;;  %v5442_v29 = vld [vmem:[#allocation27 + $0x8d0] sm:$0xff] }
 0xab3   : > { %9728 = vmatprep.subr.bf16.mxu0 %v9727_v3  ;;  %v9759_v3 = vpack.c.bf16 %v5297_v43, %v5295_v1  ;;  %v5324_v1 = vld [vmem:[#allocation27 + $0x7f0] sm:$0xff]  ;;  %v5417_v43 = vld [vmem:[#allocation27 + $0x808] sm:$0xff]  ;;  %v5440_v11 = vld [vmem:[#allocation27 + $0x8c0] sm:$0xff] }
 0xab5   : > { %5245 = vmatmul.mubr.f32.vlgmr.msra.gmra.mrb[22].mxu0 %v12990_v23  ;;  %v5276_v23 = vld [vmem:[#allocation27 + $0x670] sm:$0xff] }
 0xab6   : > { %5250 = vmatprep.mubr.f32.mxu0 %v13002_v60  ;;  %9730 = vmatpush1.bf16.msra.mxu0 %v9729_v24  ;;  %v9741_v2 = vpack.c.bf16 %v5276_v23, %v5274_v31  ;;  %v9761_v24 = vpack.c.bf16 %v5296_v15, %v5294_v52  ;;  %v5306_v31 = vld [vmem:[#allocation27 + $0x760] sm:$0xff]  ;;  %v5308_v23 = vld [vmem:[#allocation27 + $0x770] sm:$0xff]  ;;  %v9789_v15 = vpack.c.bf16 %v5324_v1, %v5322_v13 }
 0xab7   : > { %9732 = vmatprep.subr.bf16.mxu0 %v9731_v27  ;;  %v9763_v27 = vpack.c.bf16 %v5301_v22, %v5299_v28  ;;  %v5416_v22 = vld [vmem:[#allocation27 + $0x800] sm:$0xff] }
 0xab8   : > { %v5444_v1 = vld [vmem:[#allocation27 + $0x8e0] sm:$0xff] }
 0xab9   : > { %5251 = vmatmul.mubr.f32.gmra.mrb[24].mxu0 %v12997_v21 }
 0xaba   : > { %9734 = vmatpush1.bf16.msra.mxu0 %v9733_v16  ;;  %5398 = vmatprep.mubr.f32.mxu0 %v13012_v48  ;;  %v5282_v48 = vld [vmem:[#allocation27 + $0x6a0] sm:$0xff]  ;;  %v9765_v16 = vpack.c.bf16 %v5300_v32, %v5298_v12  ;;  %v5423_v12 = vld [vmem:[#allocation27 + $0x838] sm:$0xff] }
 0xabb   : > { %9736 = vmatprep.subr.bf16.mxu0 %v9735_v26  ;;  %v9749_v39 = vpack.c.bf16 %v5284_v7, %v5282_v48  ;;  %v9767_v26 = vpack.c.bf16 %v5305_v6, %v5303_v18  ;;  %v5314_v48 = vld [vmem:[#allocation27 + $0x7a0] sm:$0xff]  ;;  %v5316_v7 = vld [vmem:[#allocation27 + $0x7b0] sm:$0xff] }
 0xabe   : > { %9738 = vmatpush1.bf16.msra.mxu0 %v9737_v46  ;;  %v9769_v46 = vpack.c.bf16 %v5304_v20, %v5302_v34  ;;  %v5425_v20 = vld [vmem:[#allocation27 + $0x848] sm:$0xff] }
 0xabf   : > { %9740 = vmatprep.subr.bf16.mxu0 %v9739_v59  ;;  %v9771_v59 = vpack.c.bf16 %v5309_v54, %v5307_v45  ;;  %v5427_v45 = vld [vmem:[#allocation27 + $0x858] sm:$0xff] }
 0xac2   : > { %9742 = vmatpush1.bf16.msra.mxu0 %v9741_v2  ;;  %v9773_v2 = vpack.c.bf16 %v5308_v23, %v5306_v31  ;;  %v5426_v31 = vld [vmem:[#allocation27 + $0x850] sm:$0xff] }
 0xac3   : > { %9744 = vmatprep.subr.bf16.mxu0 %v9743_v57  ;;  %v9775_v57 = vpack.c.bf16 %v5313_v9, %v5311_v17  ;;  %v5429_v17 = vld [vmem:[#allocation27 + $0x868] sm:$0xff]  ;;  %v5431_v9 = vld [vmem:[#allocation27 + $0x878] sm:$0xff] }
 0xac6   : > { %9746 = vmatpush1.bf16.msra.mxu0 %v9745_v49  ;;  %v9777_v49 = vpack.c.bf16 %v5312_v35, %v5310_v30  ;;  %v5433_v30 = vld [vmem:[#allocation27 + $0x888] sm:$0xff]  ;;  %v5435_v35 = vld [vmem:[#allocation27 + $0x898] sm:$0xff] }
 0xac7   : > { %9748 = vmatprep.subr.bf16.mxu0 %v9747_v0  ;;  %v9779_v0 = vpack.c.bf16 %v5317_v62, %v5315_v58  ;;  %v9807_v62 = vpack.c.bf16 %v5435_v35, %v5433_v30  ;;  %v5464_v30 = vld [vmem:[#allocation27 + $0x980] sm:$0xff]  ;;  %v5466_v35 = vld [vmem:[#allocation27 + $0x990] sm:$0xff] }
 0xaca   : > { %9750 = vmatpush1.bf16.msra.mxu0 %v9749_v39  ;;  %v9781_v39 = vpack.c.bf16 %v5316_v7, %v5314_v48  ;;  %v5439_v48 = vld [vmem:[#allocation27 + $0x8b8] sm:$0xff] }
 0xacb   : > { %9752 = vmatprep.subr.bf16.mxu0 %v9751_v41  ;;  %v9783_v41 = vpack.c.bf16 %v5321_v5, %v5319_v50  ;;  %v5438_v5 = vld [vmem:[#allocation27 + $0x8b0] sm:$0xff] }
 0xace   : > { %9754 = vmatpush1.bf16.msra.mxu0 %v9753_v14  ;;  %v4803_v14 = vmul.f32 0.01, %v13004_v40 }
 0xacf   : > { %9756 = vmatprep.subr.bf16.mxu0 %v9755_v42  ;;  %v9785_v42 = vpack.c.bf16 %v5320_v25, %v5318_v10 }
 0xad0   : > { %v13042_v52 = vsel %vm4795_vm7, %v13004_v40, %v4803_v14  ;;  %v5422_v40 = vld [vmem:[#allocation27 + $0x830] sm:$0xff]  ;;  %v5445_v14 = vld [vmem:[#allocation27 + $0x8e8] sm:$0xff] }
 0xad1   : > { %v5330_v18 = vrot.slane %v13042_v52, 4 }
 0xad2   : > { %9758 = vmatpush1.bf16.msra.mxu0 %v9757_v37  ;;  %v5419_v37 = vld [vmem:[#allocation27 + $0x818] sm:$0xff] }
 0xad3   : > { %9760 = vmatprep.subr.bf16.mxu0 %v9759_v3  ;;  %v4802_v3 = vmul.f32 0.01, %v12999_v44  ;;  %v9791_v28 = vpack.c.bf16 %v5419_v37, %v5417_v43  ;;  %v5331_v54 = vsel %vm2100_vm8, %v4955_v53, %v5330_v18  ;;  %v9803_v53 = vpack.c.bf16 %v5431_v9, %v5429_v17  ;;  %v5446_v43 = vld [vmem:[#allocation27 + $0x8f0] sm:$0xff]  ;;  %v5449_v37 = vld [vmem:[#allocation27 + $0x908] sm:$0xff]  ;;  %v5460_v17 = vld [vmem:[#allocation27 + $0x960] sm:$0xff] }
 0xad4   : > { %v5462_v9 = vld [vmem:[#allocation27 + $0x970] sm:$0xff] }
 0xad5   : > { %v13045_v32 = vsel %vm4794_vm9, %v12999_v44, %v4802_v3  ;;  %v5451_v3 = vld [vmem:[#allocation27 + $0x918] sm:$0xff] }
 0xad6   : > { %9762 = vmatpush1.bf16.msra.mxu0 %v9761_v24  ;;  %v5418_v24 = vld [vmem:[#allocation27 + $0x810] sm:$0xff]  ;;  %v5328_v34 = vrot.slane %v13045_v32, 4 }
 0xad7   : > { %9764 = vmatprep.subr.bf16.mxu0 %v9763_v27  ;;  %v5421_v27 = vld [vmem:[#allocation27 + $0x828] sm:$0xff]  ;;  %v9793_v6 = vpack.c.bf16 %v5418_v24, %v5416_v22  ;;  %v5448_v22 = vld [vmem:[#allocation27 + $0x900] sm:$0xff]  ;;  %v5450_v24 = vld [vmem:[#allocation27 + $0x910] sm:$0xff] }
 0xad8   : > { %v5329_v23 = vsel %vm2100_vm8, %v4953_v47, %v5328_v34  ;;  %v5437_v47 = vld [vmem:[#allocation27 + $0x8a8] sm:$0xff]  ;;  %v9825_v18 = vpack.c.bf16 %v5450_v24, %v5448_v22  ;;  %v5459_v34 = vld [vmem:[#allocation27 + $0x958] sm:$0xff] }
 0xad9   : > { %v9811_v50 = vpack.c.bf16 %v5439_v48, %v5437_v47  ;;  %v5468_v47 = vld [vmem:[#allocation27 + $0x9a0] sm:$0xff]  ;;  %v5470_v48 = vld [vmem:[#allocation27 + $0x9b0] sm:$0xff] }
 0xada   : > { %9766 = vmatpush1.bf16.msra.mxu0 %v9765_v16  ;;  %v9795_v16 = vpack.c.bf16 %v5423_v12, %v5421_v27  ;;  %v5453_v27 = vld [vmem:[#allocation27 + $0x928] sm:$0xff]  ;;  %v5455_v12 = vld [vmem:[#allocation27 + $0x938] sm:$0xff] }
 0xadb   : > { %9768 = vmatprep.subr.bf16.mxu0 %v9767_v26  ;;  %v5420_v26 = vld [vmem:[#allocation27 + $0x820] sm:$0xff] }
 0xadc   : > { %v9797_v44 = vpack.c.bf16 %v5422_v40, %v5420_v26  ;;  %v5454_v26 = vld [vmem:[#allocation27 + $0x930] sm:$0xff]  ;;  %v5457_v40 = vld [vmem:[#allocation27 + $0x948] sm:$0xff] }
 0xade   : > { %9770 = vmatpush1.bf16.msra.mxu0 %v9769_v46  ;;  %v9799_v46 = vpack.c.bf16 %v5427_v45, %v5425_v20  ;;  %v9831_v45 = vpack.c.bf16 %v5459_v34, %v5457_v40 }
 0xadf   : > { %9772 = vmatprep.subr.bf16.mxu0 %v9771_v59  ;;  %v5424_v59 = vld [vmem:[#allocation27 + $0x840] sm:$0xff] }
 0xae2   : > { %9774 = vmatpush1.bf16.msra.mxu0 %v9773_v2  ;;  %v5428_v2 = vld [vmem:[#allocation27 + $0x860] sm:$0xff] }
 0xae3   : > { %9776 = vmatprep.subr.bf16.mxu0 %v9775_v57  ;;  %v5430_v57 = vld [vmem:[#allocation27 + $0x870] sm:$0xff] }
 0xae4   : > { %v9805_v58 = vpack.c.bf16 %v5430_v57, %v5428_v2  ;;  %v9837_v2 = vpack.c.bf16 %v5462_v9, %v5460_v17 }
 0xae6   : > { %9778 = vmatpush1.bf16.msra.mxu0 %v9777_v49  ;;  %v5432_v49 = vld [vmem:[#allocation27 + $0x880] sm:$0xff] }
 0xae7   : > { %9780 = vmatprep.subr.bf16.mxu0 %v9779_v0  ;;  %v5434_v0 = vld [vmem:[#allocation27 + $0x890] sm:$0xff] }
 0xae8   : > { %v9809_v7 = vpack.c.bf16 %v5434_v0, %v5432_v49  ;;  %v9841_v49 = vpack.c.bf16 %v5466_v35, %v5464_v30 }
 0xaea   : > { %9782 = vmatpush1.bf16.msra.mxu0 %v9781_v39  ;;  %v5441_v39 = vld [vmem:[#allocation27 + $0x8c8] sm:$0xff] }
 0xaeb   : > { %9784 = vmatprep.subr.bf16.mxu0 %v9783_v41  ;;  %v5443_v41 = vld [vmem:[#allocation27 + $0x8d8] sm:$0xff] }
 0xaec   : > { %v9815_v25 = vpack.c.bf16 %v5443_v41, %v5441_v39  ;;  %v5472_v39 = vld [vmem:[#allocation27 + $0x9c0] sm:$0xff]  ;;  %v5474_v41 = vld [vmem:[#allocation27 + $0x9d0] sm:$0xff] }
 0xaee   : > { %9786 = vmatpush1.bf16.msra.mxu0 %v9785_v42  ;;  %v5447_v42 = vld [vmem:[#allocation27 + $0x8f8] sm:$0xff] }
 0xaef   : > { %9788 = vmatprep.subr.bf16.mxu0 %v9787_v51  ;;  %v9817_v51 = vpack.c.bf16 %v5442_v29, %v5440_v11  ;;  %v9819_v13 = vpack.c.bf16 %v5447_v42, %v5445_v14  ;;  %v9849_v11 = vpack.c.bf16 %v5474_v41, %v5472_v39  ;;  %v5476_v14 = vld [vmem:[#allocation27 + $0x9e0] sm:$0xff]  ;;  %v5478_v42 = vld [vmem:[#allocation27 + $0x9f0] sm:$0xff] }
 0xaf0   : > { %v7661_v39 = vld [vmem:[%s13917_s28 + $0x130] sm:$0xff]  ;;  %v7662_v41 = vld [vmem:[%s13917_s28 + $0x138] sm:$0xff] }
 0xaf2   : > { %9790 = vmatpush1.bf16.msra.mxu0 %v9789_v15  ;;  %v9821_v15 = vpack.c.bf16 %v5446_v43, %v5444_v1  ;;  %v5561_v1 = vld [vmem:[#allocation29] sm:$0x3] }
 0xaf3   : > { %9792 = vmatprep.subr.bf16.mxu0 %v9791_v28  ;;  %v9823_v28 = vpack.c.bf16 %v5451_v3, %v5449_v37  ;;  %v5566_v43 = vrot.slane %v5561_v1, %v12981_v61  ;;  %v5570_v37 = vrot.slane %v5561_v1, %v12984_v4  ;;  %v7682_v1 = vld [vmem:[%s13917_s28 + $0x1d8] sm:$0xff] }
 0xaf5   : > { %5399 = vmatmul.mubr.f32.vlgmr.msra.gmra.mrb[22].mxu0 %v13018_v19  ;;  %v9801_v19 = vpack.c.bf16 %v5426_v31, %v5424_v59  ;;  %v5463_v59 = vld [vmem:[#allocation27 + $0x978] sm:$0xff] }
 0xaf6   : > { %5404 = vmatprep.mubr.f32.mxu0 %v5331_v54  ;;  %9794 = vmatpush1.bf16.msra.mxu0 %v9793_v6  ;;  %v9827_v6 = vpack.c.bf16 %v5455_v12, %v5453_v27  ;;  %v5456_v54 = vld [vmem:[#allocation27 + $0x940] sm:$0xff] }
 0xaf7   : > { %9796 = vmatprep.subr.bf16.mxu0 %v9795_v16  ;;  %v5452_v16 = vld [vmem:[#allocation27 + $0x920] sm:$0xff] }
 0xaf8   : > { %v9829_v20 = vpack.c.bf16 %v5454_v26, %v5452_v16  ;;  %v5702_v27 = vld [vmem:[#allocation32] sm:$0x3] }
 0xaf9   : > { %5405 = vmatmul.mubr.f32.gmra.mrb[24].mxu0 %v5329_v23 }
 0xafa   : > { %9798 = vmatpush1.bf16.msra.mxu0 %v9797_v44  ;;  %5544 = vmatprep.mubr.f32.mxu0 %v13002_v60  ;;  %v5436_v60 = vld [vmem:[#allocation27 + $0x8a0] sm:$0xff]  ;;  %v5458_v44 = vld [vmem:[#allocation27 + $0x950] sm:$0xff] }
 0xafb   : > { %9800 = vmatprep.subr.bf16.mxu0 %v9799_v46  ;;  %v9813_v10 = vpack.c.bf16 %v5438_v5, %v5436_v60  ;;  %v5461_v46 = vld [vmem:[#allocation27 + $0x968] sm:$0xff]  ;;  %v9833_v31 = vpack.c.bf16 %v5458_v44, %v5456_v54  ;;  %v9845_v60 = vpack.c.bf16 %v5470_v48, %v5468_v47  ;;  %v5711_v44 = vrot.slane %v5702_v27, %v12984_v4 }
 0xafc   : > { %v9835_v23 = vpack.c.bf16 %v5463_v59, %v5461_v46  ;;  %v7659_v48 = vld [vmem:[%s13917_s28 + $0x120] sm:$0xff] }
 0xafe   : > { %9802 = vmatpush1.bf16.msra.mxu0 %v9801_v19  ;;  %v5465_v19 = vld [vmem:[#allocation27 + $0x988] sm:$0xff] }
 0xaff   : > { %9804 = vmatprep.subr.bf16.mxu0 %v9803_v53  ;;  %v5467_v53 = vld [vmem:[#allocation27 + $0x998] sm:$0xff] }
 0xb00   : > { %v9839_v57 = vpack.c.bf16 %v5467_v53, %v5465_v19  ;;  %v7672_v53 = vld [vmem:[%s13917_s28 + $0x188] sm:$0xff] }
 0xb02   : > { %9806 = vmatpush1.bf16.msra.mxu0 %v9805_v58  ;;  %v5469_v58 = vld [vmem:[#allocation27 + $0x9a8] sm:$0xff] }
 0xb03   : > { %9808 = vmatprep.subr.bf16.mxu0 %v9807_v62  ;;  %v5471_v62 = vld [vmem:[#allocation27 + $0x9b8] sm:$0xff] }
 0xb04   : > { %v9843_v0 = vpack.c.bf16 %v5471_v62, %v5469_v58  ;;  %v7657_v58 = vld [vmem:[%s13917_s28 + $0x110] sm:$0xff]  ;;  %v7658_v62 = vld [vmem:[%s13917_s28 + $0x118] sm:$0xff] }
 0xb06   : > { %9810 = vmatpush1.bf16.msra.mxu0 %v9809_v7  ;;  %v5473_v7 = vld [vmem:[#allocation27 + $0x9c8] sm:$0xff] }
 0xb07   : > { %9812 = vmatprep.subr.bf16.mxu0 %v9811_v50  ;;  %v5475_v50 = vld [vmem:[#allocation27 + $0x9d8] sm:$0xff] }
 0xb08   : > { %v9847_v5 = vpack.c.bf16 %v5475_v50, %v5473_v7  ;;  %v7660_v7 = vld [vmem:[%s13917_s28 + $0x128] sm:$0xff]  ;;  %v7677_v50 = vld [vmem:[%s13917_s28 + $0x1b0] sm:$0xff] }
 0xb0a   : > { %9814 = vmatpush1.bf16.msra.mxu0 %v9813_v10  ;;  %v5477_v10 = vld [vmem:[#allocation27 + $0x9e8] sm:$0xff] }
 0xb0b   : > { %9816 = vmatprep.subr.bf16.mxu0 %v9815_v25  ;;  %v5479_v25 = vld [vmem:[#allocation27 + $0x9f8] sm:$0xff] }
 0xb0c   : > { %v9851_v29 = vpack.c.bf16 %v5479_v25, %v5477_v10  ;;  %v7679_v10 = vld [vmem:[%s13917_s28 + $0x1c0] sm:$0xff]  ;;  %v7680_v25 = vld [vmem:[%s13917_s28 + $0x1c8] sm:$0xff] }
 0xb0e   : > { %9818 = vmatpush1.bf16.msra.mxu0 %v9817_v51  ;;  %v9853_v51 = vpack.c.bf16 %v5478_v42, %v5476_v14  ;;  %v7663_v14 = vld [vmem:[%s13917_s28 + $0x140] sm:$0xff]  ;;  %v7664_v42 = vld [vmem:[%s13917_s28 + $0x148] sm:$0xff] }
 0xb0f   : > { %9820 = vmatprep.subr.bf16.mxu0 %v9819_v13  ;;  %v13061_v13 = vld [vmem:[#allocation4] sm:$0xff] }
 0xb12   : > { %9822 = vmatpush1.bf16.msra.mxu0 %v9821_v15 }
 0xb13   : > { %9824 = vmatprep.subr.bf16.mxu0 %v9823_v28 }
 0xb16   : > { %9826 = vmatpush1.bf16.msra.mxu0 %v9825_v18 }
 0xb17   : > { %9828 = vmatprep.subr.bf16.mxu0 %v9827_v6 }
 0xb1a   : > { %9830 = vmatpush1.bf16.msra.mxu0 %v9829_v20  ;;  %v5707_v20 = vrot.slane %v5702_v27, %v12981_v61  ;;  %v7671_v61 = vld [vmem:[%s13916_s2 + $0x180] sm:$0xff]  ;;  %v7685_v27 = vld [vmem:[%s13917_s28 + $0x1f0] sm:$0xff]  ;;  %s13921_s2 = sld [smem:[#allocation58_spill]] }
 0xb1b   : > { %9832 = vmatprep.subr.bf16.mxu0 %v9831_v45  ;;  %v9895_v4 = vpack.c.bf16 %v7672_v53, %v7671_v61  ;;  %v5899_v53 = vld [vmem:[%s13917_s28 + $0x20] sm:$0xff] }
 0xb1e   : > { %9834 = vmatpush1.bf16.msra.mxu0 %v9833_v31 }
 0xb1f   : > { %9836 = vmatprep.subr.bf16.mxu0 %v9835_v23 }
 0xb20   : > { %p13923_p7 = scmp.ne.s32.totalorder %s13921_s2, 0 }
 0xb22   : > { %9838 = vmatpush1.bf16.msra.mxu0 %v9837_v2  ;;  %v7673_v2 = vld [vmem:[%s13917_s28 + $0x190] sm:$0xff] }
 0xb23   : > { %9840 = vmatprep.subr.bf16.mxu0 %v9839_v57  ;;  %v7674_v57 = vld [vmem:[%s13917_s28 + $0x198] sm:$0xff] }
 0xb24   : > { %v9899_v35 = vpack.c.bf16 %v7674_v57, %v7673_v2 }
 0xb26   : > { %9842 = vmatpush1.bf16.msra.mxu0 %v9841_v49  ;;  %v7675_v49 = vld [vmem:[%s13917_s28 + $0x1a0] sm:$0xff] }
 0xb27   : > { %9844 = vmatprep.subr.bf16.mxu0 %v9843_v0  ;;  %v9901_v0 = vpack.c.bf16 %v7658_v62, %v7657_v58  ;;  %v5919_v58 = vld [vmem:[%s13917_s28 + $0xc0] sm:$0xff]  ;;  %v5920_v62 = vld [vmem:[%s13917_s28 + $0xc8] sm:$0xff] }
 0xb2a   : > { %9846 = vmatpush1.bf16.msra.mxu0 %v9845_v60  ;;  %v9905_v60 = vpack.c.bf16 %v7660_v7, %v7659_v48  ;;  %v5921_v48 = vld [vmem:[%s13917_s28 + $0xd0] sm:$0xff]  ;;  %v5922_v7 = vld [vmem:[%s13917_s28 + $0xd8] sm:$0xff] }
 0xb2b   : > { %9848 = vmatprep.subr.bf16.mxu0 %v9847_v5 }
 0xb2e   : > { %9850 = vmatpush1.bf16.msra.mxu0 %v9849_v11  ;;  %v9909_v11 = vpack.c.bf16 %v7662_v41, %v7661_v39  ;;  %v5923_v39 = vld [vmem:[%s13917_s28 + $0xe0] sm:$0xff]  ;;  %v5924_v41 = vld [vmem:[%s13917_s28 + $0xe8] sm:$0xff] }
 0xb2f   : > { %9852 = vmatprep.subr.bf16.mxu0 %v9851_v29  ;;  %v9911_v29 = vpack.c.bf16 %v7680_v25, %v7679_v10  ;;  %v9951_v25 = vpack.c.bf16 %v5924_v41, %v5923_v39 }
 0xb32   : > { %9854 = vmatpush1.bf16.msra.mxu0 %v9853_v51  ;;  %v7681_v51 = vld [vmem:[%s13917_s28 + $0x1d0] sm:$0xff] }
 0xb33   : > { %10055 = vmatprep.subr.bf16.mxu0 %v11203_v55 }
 0xb35   : > { %5545 = vmatmul.mubr.f32.vlgmr.msra.gmra.mrb[22].mxu0 %v12997_v21 }
 0xb36   : > { %5550 = vmatprep.mubr.f32.mxu0 %v13042_v52 }
 0xb39   : > { %5551 = vmatmul.mubr.f32.gmra.mrb[24].mxu0 %v13045_v32 }
 0xb3a   : > { %8964 = vmatprep.mubr.msk.f32.mxu0 %vm11204_vm3, %v13061_v13 }
 0xc08   : > { %v5546_v3 = vpop.f32.mrb[22].mxu0 }
 0xc09   : > { %v5573_v15 = vadd.f32 %v5566_v43, %v5546_v3  ;;  %v5548_v28 = vpop.f32.mrb[23].mxu0  ;;  %v7665_v3 = vld [vmem:[%s13917_s28 + $0x150] sm:$0xff] }
 0xc0a   : > { %v5574_v22 = vadd.f32 %v5570_v37, %v5548_v28  ;;  %v7683_v28 = vld [vmem:[%s13917_s28 + $0x1e0] sm:$0xff] }
 0xc0b   : > { %vm5577_vm8 = vcmp.ge.f32.partialorder %v5573_v15, 0.0  ;;  %v5581_v21 = vmul.f32 0.01, %v5573_v15 }
 0xc0c   : > { %vm5578_vm5 = vcmp.ge.f32.partialorder %v5574_v22, 0.0  ;;  %v5582_v52 = vmul.f32 0.01, %v5574_v22  ;;  %v5552_v24 = vpop.f32.mrb[24].mxu0 }
 0xc0d   : > { %v5585_v32 = vsel %vm5577_vm8, %v5573_v15, %v5581_v21  ;;  %v5575_v12 = vadd.f32 %v5566_v43, %v5552_v24  ;;  %v5554_v18 = vpop.f32.mrb[25].mxu0  ;;  %v9913_v43 = vpack.c.bf16 %v7664_v42, %v7663_v14  ;;  %v7666_v15 = vld [vmem:[%s13917_s28 + $0x158] sm:$0xff]  ;;  %v7667_v24 = vld [vmem:[%s13917_s28 + $0x160] sm:$0xff]  ;;  %v5925_v14 = vld [vmem:[%s13917_s28 + $0xf0] sm:$0xff] }
 0xc0e   : > { %v5698_v6 = vadd.f32 %v13021_v8, %v5585_v32  ;;  %v5586_v16 = vsel %vm5578_vm5, %v5574_v22, %v5582_v52  ;;  %v5576_v26 = vadd.f32 %v5570_v37, %v5554_v18  ;;  %v9915_v37 = vpack.c.bf16 %v7682_v1, %v7681_v51  ;;  %v7684_v22 = vld [vmem:[%s13917_s28 + $0x1e8] sm:$0xff]  ;;  %v5926_v42 = vld [vmem:[%s13917_s28 + $0xf8] sm:$0xff] }
 0xc0f   : > { %v5699_v40 = vadd.f32 %v13023_v36, %v5586_v16  ;;  %vm5579_vm11 = vcmp.ge.f32.partialorder %v5575_v12, 0.0  ;;  %v5583_v34 = vmul.f32 0.01, %v5575_v12  ;;  %v9917_v21 = vpack.c.bf16 %v7666_v15, %v7665_v3  ;;  %v7668_v32 = vld [vmem:[%s13917_s28 + $0x168] sm:$0xff]  ;;  %v7669_v16 = vld [vmem:[%s13917_s28 + $0x170] sm:$0xff]  ;;  %v7703_v3 = vld [vmem:[%s13917_s28 + $0x280] sm:$0xff] }
 0xc10   : > { %vm5580_vm12 = vcmp.ge.f32.partialorder %v5576_v26, 0.0  ;;  %v5584_v45 = vmul.f32 0.01, %v5576_v26  ;;  %v5714_v23 = vadd.f32 %v5707_v20, %v5698_v6  ;;  %v9919_v52 = vpack.c.bf16 %v7684_v22, %v7683_v28  ;;  %v7704_v15 = vld [vmem:[%s13917_s28 + $0x288] sm:$0xff] }
 0xc11   : > { %v5587_v54 = vsel %vm5579_vm11, %v5575_v12, %v5583_v34  ;;  %v5715_v17 = vadd.f32 %v5711_v44, %v5699_v40  ;;  %v7686_v12 = vld [vmem:[%s13917_s28 + $0x1f8] sm:$0xff]  ;;  %v9921_v18 = vpack.c.bf16 %v7668_v32, %v7667_v24  ;;  %v5911_v40 = vld [vmem:[%s13917_s28 + $0x80] sm:$0xff]  ;;  %v5912_v34 = vld [vmem:[%s13917_s28 + $0x88] sm:$0xff]  ;;  %v9955_v1 = vpack.c.bf16 %v5926_v42, %v5925_v14 }
 0xc12   : > { %v5700_v46 = vadd.f32 %v13025_v33, %v5587_v54  ;;  %v5588_v59 = vsel %vm5580_vm12, %v5576_v26, %v5584_v45  ;;  %v7655_v33 = vld [vmem:[%s13917_s28 + $0x100] sm:$0xff]  ;;  %v9923_v6 = vpack.c.bf16 %v7686_v12, %v7685_v27  ;;  %v7670_v26 = vld [vmem:[%s13917_s28 + $0x178] sm:$0xff]  ;;  %v9927_v45 = vpack.c.bf16 %v5912_v34, %v5911_v40  ;;  %v7705_v24 = vld [vmem:[%s13917_s28 + $0x290] sm:$0xff] }
 0xc13   : > { %v5701_v31 = vadd.f32 %v13027_v56, %v5588_v59  ;;  %v7656_v56 = vld [vmem:[%s13917_s28 + $0x108] sm:$0xff]  ;;  %v5895_v54 = vld [vmem:[%s13917_s28] sm:$0xff]  ;;  %v5914_v59 = vld [vmem:[%s13917_s28 + $0x98] sm:$0xff]  ;;  %v9959_v22 = vpack.c.bf16 %v7704_v15, %v7703_v3 }
 0xc14   : > { %v5716_v8 = vadd.f32 %v5707_v20, %v5700_v46  ;;  %v9897_v30 = vpack.c.bf16 %v7656_v56, %v7655_v33  ;;  %v9925_v20 = vpack.c.bf16 %v7670_v26, %v7669_v16  ;;  %v5913_v46 = vld [vmem:[%s13917_s28 + $0x90] sm:$0xff]  ;;  %v5918_v56 = vld [vmem:[%s13917_s28 + $0xb8] sm:$0xff]  ;;  %v7707_v16 = vld [vmem:[%s13917_s28 + $0x2a0] sm:$0xff] }
 0xc15   : > { %v5717_v9 = vadd.f32 %v5711_v44, %v5701_v31  ;;  %v5896_v44 = vld [vmem:[%s13917_s28 + $0x8] sm:$0xff]  ;;  %v5917_v33 = vld [vmem:[%s13917_s28 + $0xb0] sm:$0xff]  ;;  %v7706_v32 = vld [vmem:[%s13917_s28 + $0x298] sm:$0xff] }
 0xc16   : > { %v9889_v19 = vpack.c.bf16 %v5716_v8, %v5714_v23  ;;  %v9929_v31 = vpack.c.bf16 %v5896_v44, %v5895_v54  ;;  %v9931_v23 = vpack.c.bf16 %v5914_v59, %v5913_v46  ;;  %v5897_v8 = vld [vmem:[%s13917_s28 + $0x10] sm:$0xff]  ;;  %v9939_v57 = vpack.c.bf16 %v5918_v56, %v5917_v33  ;;  %v7708_v26 = vld [vmem:[%s13917_s28 + $0x2a8] sm:$0xff]  ;;  %v7710_v44 = vld [vmem:[%s13917_s28 + $0x2b8] sm:$0xff] }
 0xc17   : > { %v9887_v36 = vpack.c.bf16 %v5717_v9, %v5715_v17  ;;  %v5898_v17 = vld [vmem:[%s13917_s28 + $0x18] sm:$0xff]  ;;  %v5915_v9 = vld [vmem:[%s13917_s28 + $0xa0] sm:$0xff]  ;;  %v9963_v12 = vpack.c.bf16 %v7706_v32, %v7705_v24  ;;  %v9967_v34 = vpack.c.bf16 %v7708_v26, %v7707_v16  ;;  %v7709_v54 = vld [vmem:[%s13917_s28 + $0x2b0] sm:$0xff] }
 0xc18   : > { %v9971_v59 = vpack.c.bf16 %v7710_v44, %v7709_v54 }
 0xc19   : > { %9888 = vmatprep.subr.bf16.mxu1 %v9887_v36 }
 0xc1a   : > { %9890 = vmatpush1.bf16.msra.mxu1 %v9889_v19 }
 0xc1b   : > { %9892 = vmatprep.subr.bf16.mxu1 %v9887_v36  ;;  %v9933_v36 = vpack.c.bf16 %v5898_v17, %v5897_v8  ;;  %v7711_v8 = vld [vmem:[%s13917_s28 + $0x2c0] sm:$0xff]  ;;  %v7712_v17 = vld [vmem:[%s13917_s28 + $0x2c8] sm:$0xff] }
 0xc1d   : > { %7653 = vmatmul.mubr.msk.f32.vlgmr.msra.gmra.mrb[68].mxu1 %vm5718_vm13, %v12194_v63  ;;  %v7676_v63 = vld [vmem:[%s13917_s28 + $0x1a8] sm:$0xff] }
 0xc1e   : > { %9894 = vmatpush1.bf16.msra.mxu1 %v9889_v19  ;;  %5858 = vmatprep.mubr.f32.mxu1 %v13061_v13  ;;  %v9903_v47 = vpack.c.bf16 %v7676_v63, %v7675_v49  ;;  %v5916_v19 = vld [vmem:[%s13917_s28 + $0xa8] sm:$0xff]  ;;  %v9943_v63 = vpack.c.bf16 %v5920_v62, %v5919_v58 }
 0xc1f   : > { %9896 = vmatprep.subr.bf16.mxu1 %v9895_v4  ;;  %v9935_v61 = vpack.c.bf16 %v5916_v19, %v5915_v9  ;;  %v5900_v4 = vld [vmem:[%s13917_s28 + $0x28] sm:$0xff]  ;;  %v9975_v19 = vpack.c.bf16 %v7712_v17, %v7711_v8 }
 0xc20   : > { %v9937_v2 = vpack.c.bf16 %v5900_v4, %v5899_v53  ;;  %v7713_v53 = vld [vmem:[%s13917_s28 + $0x2d0] sm:$0xff]  ;;  %v7714_v4 = vld [vmem:[%s13917_s28 + $0x2d8] sm:$0xff] }
 0xc21   : > { %7654 = vmatmul.mubr.msk.f32.vlgmr.msra.gmra.mrb[70].mxu1 %vm5718_vm13, %v12234_v38  ;;  %v7678_v38 = vld [vmem:[%s13917_s28 + $0x1b8] sm:$0xff]  ;;  %v9979_v56 = vpack.c.bf16 %v7714_v4, %v7713_v53 }
 0xc22   : > { %9898 = vmatpush3.bf16.msra.mxu1 %v9897_v30  ;;  %6026 = vmatprep.mubr.f32.mxu1 %v13061_v13  ;;  %v9907_v5 = vpack.c.bf16 %v7678_v38, %v7677_v50  ;;  %v5901_v30 = vld [vmem:[%s13917_s28 + $0x30] sm:$0xff]  ;;  %v9947_v38 = vpack.c.bf16 %v5922_v7, %v5921_v48 }
 0xc23   : > { %9900 = vmatprep.subr.bf16.mxu1 %v9899_v35  ;;  %v5902_v35 = vld [vmem:[%s13917_s28 + $0x38] sm:$0xff] }
 0xc24   : > { %v9941_v49 = vpack.c.bf16 %v5902_v35, %v5901_v30  ;;  %v7715_v30 = vld [vmem:[%s13917_s28 + $0x2e0] sm:$0xff]  ;;  %v7716_v35 = vld [vmem:[%s13917_s28 + $0x2e8] sm:$0xff] }
 0xc25   : > { %v9983_v62 = vpack.c.bf16 %v7716_v35, %v7715_v30 }
 0xc26   : > { %9902 = vmatpush3.bf16.msra.mxu1 %v9901_v0  ;;  %v5903_v0 = vld [vmem:[%s13917_s28 + $0x40] sm:$0xff] }
 0xc27   : > { %9904 = vmatprep.subr.bf16.mxu1 %v9903_v47  ;;  %v5904_v47 = vld [vmem:[%s13917_s28 + $0x48] sm:$0xff] }
 0xc28   : > { %v9945_v50 = vpack.c.bf16 %v5904_v47, %v5903_v0  ;;  %v7717_v0 = vld [vmem:[%s13917_s28 + $0x2f0] sm:$0xff]  ;;  %v7718_v47 = vld [vmem:[%s13917_s28 + $0x2f8] sm:$0xff] }
 0xc29   : > { %v9987_v7 = vpack.c.bf16 %v7718_v47, %v7717_v0 }
 0xc2a   : > { %9906 = vmatpush3.bf16.msra.mxu1 %v9905_v60  ;;  %v5905_v60 = vld [vmem:[%s13917_s28 + $0x50] sm:$0xff] }
 0xc2b   : > { %9908 = vmatprep.subr.bf16.mxu1 %v9907_v5  ;;  %v5906_v5 = vld [vmem:[%s13917_s28 + $0x58] sm:$0xff] }
 0xc2c   : > { %v9949_v10 = vpack.c.bf16 %v5906_v5, %v5905_v60  ;;  %v7735_v60 = vld [vmem:[%s13917_s28 + $0x380] sm:$0xff]  ;;  %v7736_v5 = vld [vmem:[%s13917_s28 + $0x388] sm:$0xff] }
 0xc2d   : > { %v9991_v41 = vpack.c.bf16 %v7736_v5, %v7735_v60 }
 0xc2e   : > { %9910 = vmatpush3.bf16.msra.mxu1 %v9909_v11  ;;  %v5907_v11 = vld [vmem:[%s13917_s28 + $0x60] sm:$0xff] }
 0xc2f   : > { %9912 = vmatprep.subr.bf16.mxu1 %v9911_v29  ;;  %v5908_v29 = vld [vmem:[%s13917_s28 + $0x68] sm:$0xff] }
 0xc30   : > { %v9953_v51 = vpack.c.bf16 %v5908_v29, %v5907_v11  ;;  %v7737_v11 = vld [vmem:[%s13917_s28 + $0x390] sm:$0xff]  ;;  %v7738_v29 = vld [vmem:[%s13917_s28 + $0x398] sm:$0xff] }
 0xc31   : > { %v9995_v42 = vpack.c.bf16 %v7738_v29, %v7737_v11 }
 0xc32   : > { %9914 = vmatpush3.bf16.msra.mxu1 %v9913_v43  ;;  %v5909_v43 = vld [vmem:[%s13917_s28 + $0x70] sm:$0xff] }
 0xc33   : > { %9916 = vmatprep.subr.bf16.mxu1 %v9915_v37  ;;  %v5910_v37 = vld [vmem:[%s13917_s28 + $0x78] sm:$0xff] }
 0xc34   : > { %v9957_v28 = vpack.c.bf16 %v5910_v37, %v5909_v43  ;;  %v7739_v43 = vld [vmem:[%s13917_s28 + $0x3a0] sm:$0xff]  ;;  %v7740_v37 = vld [vmem:[%s13917_s28 + $0x3a8] sm:$0xff] }
 0xc35   : > { %v9999_v15 = vpack.c.bf16 %v7740_v37, %v7739_v43 }
 0xc36   : > { %9918 = vmatpush3.bf16.msra.mxu1 %v9917_v21  ;;  %v7687_v21 = vld [vmem:[%s13917_s28 + $0x200] sm:$0xff] }
 0xc37   : > { %9920 = vmatprep.subr.bf16.mxu1 %v9919_v52  ;;  %v7688_v52 = vld [vmem:[%s13917_s28 + $0x208] sm:$0xff] }
 0xc38   : > { %v9961_v27 = vpack.c.bf16 %v7688_v52, %v7687_v21  ;;  %v7741_v21 = vld [vmem:[%s13917_s28 + $0x3b0] sm:$0xff]  ;;  %v7742_v52 = vld [vmem:[%s13917_s28 + $0x3b8] sm:$0xff] }
 0xc39   : > { %v10003_v32 = vpack.c.bf16 %v7742_v52, %v7741_v21 }
 0xc3a   : > { %9922 = vmatpush3.bf16.msra.mxu1 %v9921_v18  ;;  %v7689_v18 = vld [vmem:[%s13917_s28 + $0x210] sm:$0xff] }
 0xc3b   : > { %9924 = vmatprep.subr.bf16.mxu1 %v9923_v6  ;;  %v7690_v6 = vld [vmem:[%s13917_s28 + $0x218] sm:$0xff] }
 0xc3c   : > { %v9965_v40 = vpack.c.bf16 %v7690_v6, %v7689_v18  ;;  %v7743_v18 = vld [vmem:[%s13917_s28 + $0x3c0] sm:$0xff]  ;;  %v7744_v6 = vld [vmem:[%s13917_s28 + $0x3c8] sm:$0xff] }
 0xc3d   : > { %v10007_v26 = vpack.c.bf16 %v7744_v6, %v7743_v18 }
 0xc3e   : > { %9926 = vmatpush3.bf16.msra.mxu1 %v9925_v20  ;;  %v7691_v20 = vld [vmem:[%s13917_s28 + $0x220] sm:$0xff] }
 0xc3f   : > { %9928 = vmatprep.subr.bf16.mxu1 %v9927_v45  ;;  %v7692_v45 = vld [vmem:[%s13917_s28 + $0x228] sm:$0xff] }
 0xc40   : > { %v9969_v46 = vpack.c.bf16 %v7692_v45, %v7691_v20  ;;  %v7745_v20 = vld [vmem:[%s13917_s28 + $0x3d0] sm:$0xff]  ;;  %v7746_v45 = vld [vmem:[%s13917_s28 + $0x3d8] sm:$0xff] }
 0xc41   : > { %6027 = vmatmul.mubr.f32.vlgmr.msra.gmra.mrb[72].mxu1 %v13061_v13  ;;  %v10011_v44 = vpack.c.bf16 %v7746_v45, %v7745_v20 }
 0xc42   : > { %9930 = vmatpush3.bf16.msra.mxu1 %v9929_v31  ;;  %6031 = vmatprep.mubr.f32.mxu1 %v13061_v13  ;;  %v7693_v31 = vld [vmem:[%s13917_s28 + $0x230] sm:$0xff] }
 0xc43   : > { %9932 = vmatprep.subr.bf16.mxu1 %v9931_v23  ;;  %v7694_v23 = vld [vmem:[%s13917_s28 + $0x238] sm:$0xff] }
 0xc44   : > { %v9973_v9 = vpack.c.bf16 %v7694_v23, %v7693_v31  ;;  %v7747_v31 = vld [vmem:[%s13917_s28 + $0x3e0] sm:$0xff]  ;;  %v7748_v23 = vld [vmem:[%s13917_s28 + $0x3e8] sm:$0xff] }
 0xc45   : > { %6032 = vmatmul.mubr.f32.gmra.mrb[74].mxu1 %v13061_v13  ;;  %v10015_v17 = vpack.c.bf16 %v7748_v23, %v7747_v31 }
 0xc46   : > { %9934 = vmatpush3.bf16.msra.mxu1 %v9933_v36  ;;  %6036 = vmatprep.mubr.f32.mxu1 %v13061_v13  ;;  %v7695_v36 = vld [vmem:[%s13917_s28 + $0x240] sm:$0xff] }
 0xc47   : > { %9936 = vmatprep.subr.bf16.mxu1 %v9935_v61  ;;  %v7696_v61 = vld [vmem:[%s13917_s28 + $0x248] sm:$0xff] }
 0xc48   : > { %v9977_v33 = vpack.c.bf16 %v7696_v61, %v7695_v36  ;;  %v7749_v36 = vld [vmem:[%s13917_s28 + $0x3f0] sm:$0xff]  ;;  %v7750_v61 = vld [vmem:[%s13917_s28 + $0x3f8] sm:$0xff] }
 0xc49   : > { %6037 = vmatmul.mubr.f32.gmra.mrb[76].mxu1 %v13061_v13  ;;  %v10019_v4 = vpack.c.bf16 %v7750_v61, %v7749_v36  ;;  %v6583_v61 = vld [vmem:[#allocation35] sm:$0xff] }
 0xc4a   : > { %9938 = vmatpush3.bf16.msra.mxu1 %v9937_v2  ;;  %6041 = vmatprep.mubr.f32.mxu1 %v13061_v13  ;;  %v7697_v2 = vld [vmem:[%s13917_s28 + $0x250] sm:$0xff] }
 0xc4b   : > { %9940 = vmatprep.subr.bf16.mxu1 %v9939_v57  ;;  %v7698_v57 = vld [vmem:[%s13917_s28 + $0x258] sm:$0xff] }
 0xc4c   : > { %v9981_v58 = vpack.c.bf16 %v7698_v57, %v7697_v2  ;;  %v7767_v2 = vld [vmem:[%s13917_s28 + $0x480] sm:$0xff]  ;;  %v7768_v57 = vld [vmem:[%s13917_s28 + $0x488] sm:$0xff] }
 0xc4d   : > { %6042 = vmatmul.mubr.f32.gmra.mrb[78].mxu1 %v13061_v13  ;;  %v10023_v35 = vpack.c.bf16 %v7768_v57, %v7767_v2  ;;  %v6585_v57 = vld [vmem:[#allocation35 + $0x10] sm:$0xff] }
 0xc4e   : > { %9942 = vmatpush3.bf16.msra.mxu1 %v9941_v49  ;;  %6046 = vmatprep.mubr.f32.mxu1 %v13061_v13  ;;  %v7699_v49 = vld [vmem:[%s13917_s28 + $0x260] sm:$0xff] }
 0xc4f   : > { %9944 = vmatprep.subr.bf16.mxu1 %v9943_v63  ;;  %v7700_v63 = vld [vmem:[%s13917_s28 + $0x268] sm:$0xff] }
 0xc50   : > { %v9985_v48 = vpack.c.bf16 %v7700_v63, %v7699_v49  ;;  %v7769_v49 = vld [vmem:[%s13917_s28 + $0x490] sm:$0xff]  ;;  %v7770_v63 = vld [vmem:[%s13917_s28 + $0x498] sm:$0xff] }
 0xc51   : > { %6047 = vmatmul.mubr.f32.gmra.mrb[80].mxu1 %v13061_v13  ;;  %v10027_v47 = vpack.c.bf16 %v7770_v63, %v7769_v49  ;;  %v6589_v49 = vld [vmem:[#allocation35 + $0x28] sm:$0xff] }
 0xc52   : > { %9946 = vmatpush3.bf16.msra.mxu1 %v9945_v50  ;;  %6116 = vmatprep.mubr.f32.mxu1 %v13061_v13  ;;  %v7701_v50 = vld [vmem:[%s13917_s28 + $0x270] sm:$0xff] }
 0xc53   : > { %9948 = vmatprep.subr.bf16.mxu1 %v9947_v38  ;;  %v7702_v38 = vld [vmem:[%s13917_s28 + $0x278] sm:$0xff] }
 0xc54   : > { %v9989_v39 = vpack.c.bf16 %v7702_v38, %v7701_v50  ;;  %v7771_v50 = vld [vmem:[%s13917_s28 + $0x4a0] sm:$0xff]  ;;  %v7772_v38 = vld [vmem:[%s13917_s28 + $0x4a8] sm:$0xff] }
 0xc55   : > { %v10031_v5 = vpack.c.bf16 %v7772_v38, %v7771_v50 }
 0xc56   : > { %9950 = vmatpush3.bf16.msra.mxu1 %v9949_v10  ;;  %v7719_v10 = vld [vmem:[%s13917_s28 + $0x300] sm:$0xff] }
 0xc57   : > { %9952 = vmatprep.subr.bf16.mxu1 %v9951_v25  ;;  %v7720_v25 = vld [vmem:[%s13917_s28 + $0x308] sm:$0xff] }
 0xc58   : > { %v9993_v14 = vpack.c.bf16 %v7720_v25, %v7719_v10  ;;  %v7773_v10 = vld [vmem:[%s13917_s28 + $0x4b0] sm:$0xff]  ;;  %v7774_v25 = vld [vmem:[%s13917_s28 + $0x4b8] sm:$0xff] }
 0xc59   : > { %v10035_v29 = vpack.c.bf16 %v7774_v25, %v7773_v10 }
 0xc5a   : > { %9954 = vmatpush3.bf16.msra.mxu1 %v9953_v51  ;;  %v7721_v51 = vld [vmem:[%s13917_s28 + $0x310] sm:$0xff] }
 0xc5b   : > { %9956 = vmatprep.subr.bf16.mxu1 %v9955_v1  ;;  %v7722_v1 = vld [vmem:[%s13917_s28 + $0x318] sm:$0xff] }
 0xc5c   : > { %v9997_v3 = vpack.c.bf16 %v7722_v1, %v7721_v51  ;;  %v7775_v51 = vld [vmem:[%s13917_s28 + $0x4c0] sm:$0xff]  ;;  %v7776_v1 = vld [vmem:[%s13917_s28 + $0x4c8] sm:$0xff] }
 0xc5d   : > { %v10039_v37 = vpack.c.bf16 %v7776_v1, %v7775_v51 }
 0xc5e   : > { %9958 = vmatpush3.bf16.msra.mxu1 %v9957_v28  ;;  %v7723_v28 = vld [vmem:[%s13917_s28 + $0x320] sm:$0xff] }
 0xc5f   : > { %9960 = vmatprep.subr.bf16.mxu1 %v9959_v22  ;;  %v7724_v22 = vld [vmem:[%s13917_s28 + $0x328] sm:$0xff] }
 0xc60   : > { %v10001_v24 = vpack.c.bf16 %v7724_v22, %v7723_v28  ;;  %v7777_v28 = vld [vmem:[%s13917_s28 + $0x4d0] sm:$0xff]  ;;  %v7778_v22 = vld [vmem:[%s13917_s28 + $0x4d8] sm:$0xff] }
 0xc61   : > { %6117 = vmatmul.mubr.f32.vlgmr.msra.gmra.mrb[82].mxu1 %v13061_v13  ;;  %v10043_v52 = vpack.c.bf16 %v7778_v22, %v7777_v28 }
 0xc62   : > { %9962 = vmatpush3.bf16.msra.mxu1 %v9961_v27  ;;  %6121 = vmatprep.mubr.f32.mxu1 %v13061_v13  ;;  %v7725_v27 = vld [vmem:[%s13917_s28 + $0x330] sm:$0xff] }
 0xc63   : > { %9964 = vmatprep.subr.bf16.mxu1 %v9963_v12  ;;  %v7726_v12 = vld [vmem:[%s13917_s28 + $0x338] sm:$0xff] }
 0xc64   : > { %v10005_v16 = vpack.c.bf16 %v7726_v12, %v7725_v27  ;;  %v7779_v27 = vld [vmem:[%s13917_s28 + $0x4e0] sm:$0xff]  ;;  %v7780_v12 = vld [vmem:[%s13917_s28 + $0x4e8] sm:$0xff] }
 0xc65   : > { %6122 = vmatmul.mubr.f32.gmra.mrb[84].mxu1 %v13061_v13  ;;  %v10047_v6 = vpack.c.bf16 %v7780_v12, %v7779_v27 }
 0xc66   : > { %9966 = vmatpush3.bf16.msra.mxu1 %v9965_v40  ;;  %6126 = vmatprep.mubr.f32.mxu1 %v13061_v13  ;;  %v7727_v40 = vld [vmem:[%s13917_s28 + $0x340] sm:$0xff] }
 0xc67   : > { %9968 = vmatprep.subr.bf16.mxu1 %v9967_v34  ;;  %v7728_v34 = vld [vmem:[%s13917_s28 + $0x348] sm:$0xff] }
 0xc68   : > { %v10009_v54 = vpack.c.bf16 %v7728_v34, %v7727_v40  ;;  %v7781_v40 = vld [vmem:[%s13917_s28 + $0x4f0] sm:$0xff]  ;;  %v7782_v34 = vld [vmem:[%s13917_s28 + $0x4f8] sm:$0xff] }
 0xc69   : > { %6127 = vmatmul.mubr.f32.gmra.mrb[86].mxu1 %v13061_v13  ;;  %v10051_v45 = vpack.c.bf16 %v7782_v34, %v7781_v40 }
 0xc6a   : > { %9970 = vmatpush3.bf16.msra.mxu1 %v9969_v46  ;;  %6131 = vmatprep.mubr.f32.mxu1 %v13061_v13  ;;  %v7729_v46 = vld [vmem:[%s13917_s28 + $0x350] sm:$0xff] }
 0xc6b   : > { %9972 = vmatprep.subr.bf16.mxu1 %v9971_v59  ;;  %v7730_v59 = vld [vmem:[%s13917_s28 + $0x358] sm:$0xff] }
 0xc6c   : > { %v10013_v8 = vpack.c.bf16 %v7730_v59, %v7729_v46 }
 0xc6d   : > { %6132 = vmatmul.mubr.f32.gmra.mrb[88].mxu1 %v13061_v13 }
 0xc6e   : > { %9974 = vmatpush3.bf16.msra.mxu1 %v9973_v9  ;;  %6136 = vmatprep.mubr.f32.mxu1 %v13061_v13  ;;  %v7731_v9 = vld [vmem:[%s13917_s28 + $0x360] sm:$0xff] }
 0xc6f   : > { %9976 = vmatprep.subr.bf16.mxu1 %v9975_v19  ;;  %v7732_v19 = vld [vmem:[%s13917_s28 + $0x368] sm:$0xff] }
 0xc70   : > { %v10017_v53 = vpack.c.bf16 %v7732_v19, %v7731_v9 }
 0xc71   : > { %6137 = vmatmul.mubr.f32.gmra.mrb[90].mxu1 %v13061_v13 }
 0xc72   : > { %9978 = vmatpush3.bf16.msra.mxu1 %v9977_v33  ;;  %6249 = vmatprep.mubr.f32.mxu1 %v13061_v13  ;;  %v7733_v33 = vld [vmem:[%s13917_s28 + $0x370] sm:$0xff] }
 0xc73   : > { %9980 = vmatprep.subr.bf16.mxu1 %v9979_v56  ;;  %v7734_v56 = vld [vmem:[%s13917_s28 + $0x378] sm:$0xff] }
 0xc74   : > { %v10021_v30 = vpack.c.bf16 %v7734_v56, %v7733_v33 }
 0xc76   : > { %9982 = vmatpush3.bf16.msra.mxu1 %v9981_v58  ;;  %v7751_v58 = vld [vmem:[%s13917_s28 + $0x400] sm:$0xff] }
 0xc77   : > { %9984 = vmatprep.subr.bf16.mxu1 %v9983_v62  ;;  %v7752_v62 = vld [vmem:[%s13917_s28 + $0x408] sm:$0xff] }
 0xc78   : > { %v10025_v0 = vpack.c.bf16 %v7752_v62, %v7751_v58  ;;  %v6588_v62 = vld [vmem:[#allocation35 + $0x20] sm:$0xff] }
 0xc79   : > { %v10056_v63 = vpack.c.bf16 %v6589_v49, %v6588_v62 }
 0xc7a   : > { %9986 = vmatpush3.bf16.msra.mxu1 %v9985_v48  ;;  %v7753_v48 = vld [vmem:[%s13917_s28 + $0x410] sm:$0xff] }
 0xc7b   : > { %9988 = vmatprep.subr.bf16.mxu1 %v9987_v7  ;;  %v7754_v7 = vld [vmem:[%s13917_s28 + $0x418] sm:$0xff]  ;;  %10057 = vmatpush3.bf16.msra.mxu0 %v10056_v63 }
 0xc7c   : > { %v10029_v60 = vpack.c.bf16 %v7754_v7, %v7753_v48  ;;  %10058 = vmatprep.subr.bf16.mxu0 %v11203_v55  ;;  %v6590_v48 = vld [vmem:[#allocation35 + $0x30] sm:$0xff]  ;;  %v6591_v7 = vld [vmem:[#allocation35 + $0x38] sm:$0xff] }
 0xc7d   : > { %v10059_v50 = vpack.c.bf16 %v6591_v7, %v6590_v48 }
 0xc7e   : > { %9990 = vmatpush3.bf16.msra.mxu1 %v9989_v39  ;;  %v7755_v39 = vld [vmem:[%s13917_s28 + $0x420] sm:$0xff] }
 0xc7f   : > { %9992 = vmatprep.subr.bf16.mxu1 %v9991_v41  ;;  %v7756_v41 = vld [vmem:[%s13917_s28 + $0x428] sm:$0xff]  ;;  %10060 = vmatpush3.bf16.msra.mxu0 %v10059_v50 }
 0xc80   : > { %v10033_v11 = vpack.c.bf16 %v7756_v41, %v7755_v39 }
 0xc81   : > { %6250 = vmatmul.mubr.f32.vlgmr.msra.gmra.mrb[92].mxu1 %v13061_v13 }
 0xc82   : > { %9994 = vmatpush3.bf16.msra.mxu1 %v9993_v14  ;;  %6254 = vmatprep.mubr.f32.mxu1 %v13061_v13  ;;  %v7757_v14 = vld [vmem:[%s13917_s28 + $0x430] sm:$0xff] }
 0xc83   : > { %9996 = vmatprep.subr.bf16.mxu1 %v9995_v42  ;;  %v7758_v42 = vld [vmem:[%s13917_s28 + $0x438] sm:$0xff] }
 0xc84   : > { %v10037_v43 = vpack.c.bf16 %v7758_v42, %v7757_v14 }
 0xc85   : > { %6255 = vmatmul.mubr.f32.gmra.mrb[94].mxu1 %v13061_v13 }
 0xc86   : > { %9998 = vmatpush3.bf16.msra.mxu1 %v9997_v3  ;;  %6259 = vmatprep.mubr.f32.mxu1 %v13061_v13  ;;  %v7759_v3 = vld [vmem:[%s13917_s28 + $0x440] sm:$0xff] }
 0xc87   : > { %10000 = vmatprep.subr.bf16.mxu1 %v9999_v15  ;;  %v7760_v15 = vld [vmem:[%s13917_s28 + $0x448] sm:$0xff] }
 0xc88   : > { %v10041_v21 = vpack.c.bf16 %v7760_v15, %v7759_v3 }
 0xc89   : > { %6260 = vmatmul.mubr.f32.gmra.mrb[96].mxu1 %v13061_v13 }
 0xc8a   : > { %10002 = vmatpush3.bf16.msra.mxu1 %v10001_v24  ;;  %6264 = vmatprep.mubr.f32.mxu1 %v13061_v13  ;;  %v7761_v24 = vld [vmem:[%s13917_s28 + $0x450] sm:$0xff] }
 0xc8b   : > { %10004 = vmatprep.subr.bf16.mxu1 %v10003_v32  ;;  %v7762_v32 = vld [vmem:[%s13917_s28 + $0x458] sm:$0xff] }
 0xc8c   : > { %v10045_v18 = vpack.c.bf16 %v7762_v32, %v7761_v24 }
 0xc8d   : > { %6265 = vmatmul.mubr.f32.gmra.mrb[98].mxu1 %v13061_v13 }
 0xc8e   : > { %10006 = vmatpush3.bf16.msra.mxu1 %v10005_v16  ;;  %6269 = vmatprep.mubr.f32.mxu1 %v13061_v13  ;;  %v7763_v16 = vld [vmem:[%s13917_s28 + $0x460] sm:$0xff] }
 0xc8f   : > { %10008 = vmatprep.subr.bf16.mxu1 %v10007_v26  ;;  %v7764_v26 = vld [vmem:[%s13917_s28 + $0x468] sm:$0xff] }
 0xc90   : > { %v10049_v20 = vpack.c.bf16 %v7764_v26, %v7763_v16 }
 0xc91   : > { %6270 = vmatmul.mubr.f32.gmra.mrb[100].mxu1 %v13061_v13 }
 0xc92   : > { %10010 = vmatpush3.bf16.msra.mxu1 %v10009_v54  ;;  %6387 = vmatprep.mubr.f32.mxu1 %v13061_v13  ;;  %v7765_v54 = vld [vmem:[%s13917_s28 + $0x470] sm:$0xff] }
 0xc93   : > { %10012 = vmatprep.subr.bf16.mxu1 %v10011_v44  ;;  %v7766_v44 = vld [vmem:[%s13917_s28 + $0x478] sm:$0xff] }
 0xc94   : > { %v10053_v46 = vpack.c.bf16 %v7766_v44, %v7765_v54 }
 0xc96   : > { %10014 = vmatpush3.bf16.msra.mxu1 %v10013_v8 }
 0xc97   : > { %10016 = vmatprep.subr.bf16.mxu1 %v10015_v17 }
 0xc9a   : > { %10018 = vmatpush3.bf16.msra.mxu1 %v10017_v53  ;;  %v6584_v53 = vld [vmem:[#allocation35 + $0x8] sm:$0xff] }
 0xc9b   : > { %10020 = vmatprep.subr.bf16.mxu1 %v10019_v4  ;;  %v10062_v33 = vpack.c.bf16 %v6584_v53, %v6583_v61 }
 0xc9e   : > { %10022 = vmatpush3.bf16.msra.mxu1 %v10021_v30  ;;  %v6586_v30 = vld [vmem:[#allocation35 + $0x18] sm:$0xff] }
 0xc9f   : > { %10024 = vmatprep.subr.bf16.mxu1 %v10023_v35  ;;  %v10065_v58 = vpack.c.bf16 %v6586_v30, %v6585_v57 }
 0xca1   : > { %6388 = vmatmul.mubr.f32.vlgmr.msra.gmra.mrb[102].mxu1 %v13061_v13 }
 0xca2   : > { %10026 = vmatpush3.bf16.msra.mxu1 %v10025_v0  ;;  %6392 = vmatprep.mubr.f32.mxu1 %v13061_v13 }
 0xca3   : > { %10028 = vmatprep.subr.bf16.mxu1 %v10027_v47 }
 0xca5   : > { %6393 = vmatmul.mubr.f32.gmra.mrb[104].mxu1 %v13061_v13 }
 0xca6   : > { %10030 = vmatpush3.bf16.msra.mxu1 %v10029_v60  ;;  %6397 = vmatprep.mubr.f32.mxu1 %v13061_v13 }
 0xca7   : > { %10032 = vmatprep.subr.bf16.mxu1 %v10031_v5 }
 0xca9   : > { %6398 = vmatmul.mubr.f32.gmra.mrb[106].mxu1 %v13061_v13 }
 0xcaa   : > { %10034 = vmatpush3.bf16.msra.mxu1 %v10033_v11  ;;  %6402 = vmatprep.mubr.f32.mxu1 %v13061_v13 }
 0xcab   : > { %10036 = vmatprep.subr.bf16.mxu1 %v10035_v29 }
 0xcad   : > { %6403 = vmatmul.mubr.f32.gmra.mrb[108].mxu1 %v13061_v13 }
 0xcae   : > { %10038 = vmatpush3.bf16.msra.mxu1 %v10037_v43  ;;  %6407 = vmatprep.mubr.f32.mxu1 %v13061_v13 }
 0xcaf   : > { %10040 = vmatprep.subr.bf16.mxu1 %v10039_v37 }
 0xcb1   : > { %6408 = vmatmul.mubr.f32.gmra.mrb[110].mxu1 %v13061_v13 }
 0xcb2   : > { %10042 = vmatpush3.bf16.msra.mxu1 %v10041_v21  ;;  %6525 = vmatprep.mubr.f32.mxu1 %v13061_v13 }
 0xcb3   : > { %10044 = vmatprep.subr.bf16.mxu1 %v10043_v52 }
 0xcb6   : > { %10046 = vmatpush3.bf16.msra.mxu1 %v10045_v18 }
 0xcb7   : > { %10048 = vmatprep.subr.bf16.mxu1 %v10047_v6 }
 0xcba   : > { %10050 = vmatpush3.bf16.msra.mxu1 %v10049_v20 }
 0xcbb   : > { %10052 = vmatprep.subr.bf16.mxu1 %v10051_v45 }
 0xcbe   : > { %10054 = vmatpush3.bf16.msra.mxu1 %v10053_v46 }
 0xcbf   : > { %10061 = vmatprep.subr.bf16.mxu1 %v11203_v55 }
 0xcc1   : > { %6526 = vmatmul.mubr.f32.vlgmr.msra.gmra.mrb[112].mxu1 %v13061_v13 }
 0xcc2   : > { %6530 = vmatprep.mubr.f32.mxu1 %v13061_v13  ;;  %10063 = vmatpush3.bf16.msra.mxu1 %v10062_v33 }
 0xcc3   : > { %10064 = vmatprep.subr.bf16.mxu1 %v11203_v55 }
 0xcc5   : > { %6531 = vmatmul.mubr.f32.gmra.mrb[114].mxu1 %v13061_v13 }
 0xcc6   : > { %6535 = vmatprep.mubr.f32.mxu1 %v13061_v13  ;;  %10066 = vmatpush3.bf16.msra.mxu1 %v10065_v58 }
 0xcc7   : > { %10067 = vmatprep.subr.bf16.mxu1 %v11203_v55 }
 0xcc9   : > { %6536 = vmatmul.mubr.f32.gmra.mrb[116].mxu1 %v13061_v13 }
 0xcca   : > { %6540 = vmatprep.mubr.f32.mxu1 %v13061_v13 }
 0xccd   : > { %6541 = vmatmul.mubr.f32.gmra.mrb[118].mxu1 %v13061_v13 }
 0xcf0   : > { %v5787_v59 = vpop.f32.mrb[68].mxu1 }
 0xcf1   : > { %v5789_v31 = vpop.f32.mrb[69].mxu1 }
 0xcf4   : > { %v5860_v23 = vpop.f32.mrb[70].mxu1 }
 0xcf5   : > { %v13607_v8 = vmax.f32 %v5787_v59, %v5860_v23  ;;  %v5862_v17 = vpop.f32.mrb[71].mxu1 }
 0xcf6   : > { %v13609_v9 = vmax.f32 %v5789_v31, %v5862_v17 }
 0xcf8   : > { %6545 = vmatprep.mubr.f32.mxu1 %v13609_v9 }
 0xcf9   : > { %6546 = vmatmul.mubr.f32.gmra.mrb[120].mxu1 %v13607_v8 }
 0xcfa   : > { %8975 = vmatprep.mubr.msk.f32.mxu1 %vm11204_vm3, %v13061_v13 }
 0xd14   : > { %v8120_v19 = vpop.f32.mrb[72].mxu1 }
 0xd15   : > { %v8121_v36 = vpop.f32.mrb[73].mxu1 }
 0xd16   : > { %v8122_v4 = vadd.f32 %v8121_v36, %v8120_v19 }
 0xd18   : > { %v8123_v56 = vpop.f32.mrb[74].mxu1 }
 0xd19   : > { %v8124_v2 = vpop.f32.mrb[75].mxu1 }
 0xd1a   : > { %v8125_v35 = vadd.f32 %v8124_v2, %v8123_v56 }
 0xd1c   : > { %v8126_v0 = vpop.f32.mrb[76].mxu1 }
 0xd1d   : > { %v8127_v13 = vpop.f32.mrb[77].mxu1 }
 0xd1e   : > { %v8128_v47 = vadd.f32 %v8127_v13, %v8126_v0 }
 0xd20   : > { %v8129_v38 = vpop.f32.mrb[78].mxu1 }
 0xd21   : > { %v8130_v60 = vpop.f32.mrb[79].mxu1 }
 0xd22   : > { %v8131_v5 = vadd.f32 %v8130_v60, %v8129_v38 }
 0xd24   : > { %v8132_v39 = vpop.f32.mrb[80].mxu1 }
 0xd25   : > { %v8133_v41 = vpop.f32.mrb[81].mxu1 }
 0xd26   : > { %v8134_v10 = vadd.f32 %v8133_v41, %v8132_v39 }
 0xd34   : > { %v8167_v25 = vpop.f32.mrb[82].mxu1 }
 0xd35   : > { %v8168_v11 = vpop.f32.mrb[83].mxu1 }
 0xd36   : > { %v8169_v29 = vadd.f32 %v8168_v11, %v8167_v25 }
 0xd38   : > { %v6119_v14 = vadd.f32 %v8169_v29, %v8122_v4  ;;  %v8170_v42 = vpop.f32.mrb[84].mxu1  ;;  %v13620_v29 = vld [vmem:[#allocation33] ss:$0 sm:$0xff] }
 0xd39   : > { %v8171_v51 = vpop.f32.mrb[85].mxu1 }
 0xd3a   : > { %v8172_v1 = vadd.f32 %v8171_v51, %v8170_v42 }
 0xd3c   : > { %v6124_v43 = vadd.f32 %v8172_v1, %v8125_v35  ;;  %v8173_v37 = vpop.f32.mrb[86].mxu1  ;;  %v6739_v1 = vld [vmem:[#allocation35 + $0x40] sm:$0xff] }
 0xd3d   : > { %v8174_v3 = vpop.f32.mrb[87].mxu1 }
 0xd3e   : > { %v8175_v15 = vadd.f32 %v8174_v3, %v8173_v37 }
 0xd40   : > { %v6129_v28 = vadd.f32 %v8175_v15, %v8128_v47  ;;  %v8176_v22 = vpop.f32.mrb[88].mxu1 }
 0xd41   : > { %v8177_v21 = vpop.f32.mrb[89].mxu1 }
 0xd42   : > { %v8178_v52 = vadd.f32 %v8177_v21, %v8176_v22 }
 0xd44   : > { %v6134_v24 = vadd.f32 %v8178_v52, %v8131_v5  ;;  %v8179_v32 = vpop.f32.mrb[90].mxu1 }
 0xd45   : > { %v8180_v27 = vpop.f32.mrb[91].mxu1 }
 0xd46   : > { %v8181_v12 = vadd.f32 %v8180_v27, %v8179_v32  ;;  %v6742_v32 = vld [vmem:[#allocation35 + $0x58] sm:$0xff] }
 0xd48   : > { %v6139_v18 = vadd.f32 %v8181_v12, %v8134_v10 }
 0xd54   : > { %v8214_v6 = vpop.f32.mrb[92].mxu1 }
 0xd55   : > { %v8215_v16 = vpop.f32.mrb[93].mxu1 }
 0xd56   : > { %v8216_v26 = vadd.f32 %v8215_v16, %v8214_v6 }
 0xd58   : > { %v6275_v40 = vadd.f32 %v8216_v26, %v6119_v14  ;;  %v8217_v34 = vpop.f32.mrb[94].mxu1 }
 0xd59   : > { %v8218_v20 = vpop.f32.mrb[95].mxu1 }
 0xd5a   : > { %v8219_v45 = vadd.f32 %v8218_v20, %v8217_v34  ;;  %v10478_v34 = vld [vmem:[#allocation4] sm:$0xff] }
 0xd5c   : > { %v6276_v54 = vadd.f32 %v8219_v45, %v6124_v43  ;;  %v8220_v44 = vpop.f32.mrb[96].mxu1  ;;  %v6740_v43 = vld [vmem:[#allocation35 + $0x48] sm:$0xff]  ;;  %v6818_v45 = vld [vmem:[#allocation35 + $0x60] sm:$0xff] }
 0xd5d   : > { %v8221_v46 = vpop.f32.mrb[97].mxu1  ;;  %v10068_v21 = vpack.c.bf16 %v6740_v43, %v6739_v1  ;;  %v6990_v43 = vld [vmem:[%s13919_s0 + $0x20] sm:$0xff] }
 0xd5e   : > { %v8222_v59 = vadd.f32 %v8221_v46, %v8220_v44 }
 0xd60   : > { %v6277_v31 = vadd.f32 %v8222_v59, %v6129_v28  ;;  %v8223_v23 = vpop.f32.mrb[98].mxu1 }
 0xd61   : > { %v8224_v17 = vpop.f32.mrb[99].mxu1 }
 0xd62   : > { %v8225_v19 = vadd.f32 %v8224_v17, %v8223_v23 }
 0xd64   : > { %v6278_v36 = vadd.f32 %v8225_v19, %v6134_v24  ;;  %v8226_v61 = vpop.f32.mrb[100].mxu1  ;;  %v6741_v24 = vld [vmem:[#allocation35 + $0x50] sm:$0xff] }
 0xd65   : > { %v8227_v53 = vpop.f32.mrb[101].mxu1  ;;  %v6820_v19 = vld [vmem:[#allocation35 + $0x70] sm:$0xff] }
 0xd66   : > { %v8228_v4 = vadd.f32 %v8227_v53, %v8226_v61 }
 0xd68   : > { %v6279_v33 = vadd.f32 %v8228_v4, %v6139_v18 }
 0xd74   : > { %v8261_v56 = vpop.f32.mrb[102].mxu1 }
 0xd75   : > { %v8262_v2 = vpop.f32.mrb[103].mxu1 }
 0xd76   : > { %v8263_v57 = vadd.f32 %v8262_v2, %v8261_v56  ;;  %v6898_v56 = vld [vmem:[#allocation35 + $0x88] sm:$0xff] }
 0xd78   : > { %v6413_v30 = vadd.f32 %v8263_v57, %v6275_v40  ;;  %v8264_v35 = vpop.f32.mrb[104].mxu1  ;;  %v10071_v40 = vpack.c.bf16 %v6742_v32, %v6741_v24  ;;  %v7011_v24 = vld [vmem:[%s13919_s0 + $0xc8] sm:$0xff] }
 0xd79   : > { %v8265_v58 = vpop.f32.mrb[105].mxu1 }
 0xd7a   : > { %v8266_v62 = vadd.f32 %v8265_v58, %v8264_v35  ;;  %v6900_v35 = vld [vmem:[#allocation35 + $0x98] sm:$0xff] }
 0xd7c   : > { %v6414_v49 = vadd.f32 %v8266_v62, %v6276_v54  ;;  %v8267_v63 = vpop.f32.mrb[106].mxu1  ;;  %v6819_v54 = vld [vmem:[#allocation35 + $0x68] sm:$0xff]  ;;  %v7002_v62 = vld [vmem:[%s13918_s6 + $0x80] sm:$0xff]  ;;  %s1034_s6 = sand.u32 1, %s13920_s3  }
 0xd7d   : > { %v8268_v0 = vpop.f32.mrb[107].mxu1  ;;  %v10074_v17 = vpack.c.bf16 %v6819_v54, %v6818_v45  ;;  %v7014_v45 = vld [vmem:[%s13919_s0 + $0xe0] sm:$0xff]  ;;  %v7015_v54 = vld [vmem:[%s13919_s0 + $0xe8] sm:$0xff]  ;;  %s1035_s29 = scalar_lea.vmem [#allocation39], %s1034_s6  ;;  %s7107_s10 = scalar_lea.sflag [#allocation8], %s1034_s6 }
 0xd7e   : > { %v8269_v13 = vadd.f32 %v8268_v0, %v8267_v63  ;;  %s7119_s27 = sshll.u32 %s1035_s29, 4  ;;  %s13747_s27 = int_to_ptr.vmem [resolvable:$true] %s7119_s27 }
 0xd7f   : > { %s11067_s5 = scalar_lea.vmem %s13747_s27, 16  ;;  %p11074_p13 = scmp.lt.s32.totalorder %s13747_s27, %s11072_s1 }
 0xd80   : > { %v6415_v47 = vadd.f32 %v8269_v13, %v6277_v31  ;;  %v8270_v48 = vpop.f32.mrb[108].mxu1  ;;  %p11068_p4 = scmp.ne.s32.totalorder %s13747_s27, %s11067_s5  ;;  %p11075_p1 = scmp.lt.s32.totalorder %s11073_s23, %s11067_s5 }
 0xd81   : > { %v8271_v7 = vpop.f32.mrb[109].mxu1 }
 0xd82   : > { %v8272_v50 = vadd.f32 %v8271_v7, %v8270_v48  ;;  %p11069_p8 = pnand %p11068_p4, %p13923_p7  ;;  %p11076_p0 = por %p11075_p1, %p11074_p13 }
 0xd84   : > { %v6416_v38 = vadd.f32 %v8272_v50, %v6278_v36  ;;  %v8273_v60 = vpop.f32.mrb[110].mxu1  ;;  %v6821_v36 = vld [vmem:[#allocation35 + $0x78] sm:$0xff]  ;;  %p11070_p11 = pneg %p11069_p8 }
 0xd85   : > { %v8274_v5 = vpop.f32.mrb[111].mxu1  ;;  %v10077_v4 = vpack.c.bf16 %v6821_v36, %v6820_v19  ;;  %v6986_v50 = vld [vmem:[%s13919_s0] sm:$0xff] }
 0xd86   : > { %v8275_v39 = vadd.f32 %v8274_v5, %v8273_v60  ;;  %v7005_v5 = vld [vmem:[%s13919_s0 + $0x98] sm:$0xff]  ;;  %p11077_p6 = pnand %p11076_p0, %p11070_p11 }
 0xd88   : > { %v13618_v41 = vadd.f32 %v8275_v39, %v6279_v33  ;;  %v6897_v33 = vld [vmem:[#allocation35 + $0x80] sm:$0xff] }
 0xd89   : > { %v10080_v57 = vpack.c.bf16 %v6898_v56, %v6897_v33 }
 0xd94   : > { %v8308_v10 = vpop.f32.mrb[112].mxu1 }
 0xd95   : > { %v8309_v25 = vpop.f32.mrb[113].mxu1 }
 0xd96   : > { %v8310_v11 = vadd.f32 %v8309_v25, %v8308_v10  ;;  %v6988_v25 = vld [vmem:[%s13919_s0 + $0x10] sm:$0xff] }
 0xd98   : > { %v6551_v14 = vadd.f32 %v8310_v11, %v6413_v30  ;;  %v8311_v42 = vpop.f32.mrb[114].mxu1  ;;  %v6899_v30 = vld [vmem:[#allocation35 + $0x90] sm:$0xff] }
 0xd99   : > { %v8312_v51 = vpop.f32.mrb[115].mxu1  ;;  %v10083_v63 = vpack.c.bf16 %v6900_v35, %v6899_v30  ;;  %v6989_v11 = vld [vmem:[%s13919_s0 + $0x18] sm:$0xff] }
 0xd9a   : > { %v6563_v37 = vadd.f32 %v13620_v29, %v6551_v14  ;;  %v8313_v3 = vadd.f32 %v8312_v51, %v8311_v42  ;;  %v7006_v14 = vld [vmem:[%s13919_s0 + $0xa0] sm:$0xff]  ;;  %v7007_v42 = vld [vmem:[%s13919_s0 + $0xa8] sm:$0xff]  ;;  %v10091_v51 = vpack.c.bf16 %v6989_v11, %v6988_v25 }
 0xd9b   : > { %v10093_v1 = vpack.c.bf16 %v7007_v42, %v7006_v14 }
 0xd9c   : > { %vm6568_vm14 = vcmp.ge.f32.partialorder %v6563_v37, 0.0  ;;  %v6573_v15 = vmul.f32 0.01, %v6563_v37  ;;  %v6552_v28 = vadd.f32 %v8313_v3, %v6414_v49  ;;  %v8314_v22 = vpop.f32.mrb[116].mxu1  ;;  %v7003_v49 = vld [vmem:[%s13919_s0 + $0x88] sm:$0xff]  ;;  %v7008_v3 = vld [vmem:[%s13919_s0 + $0xb0] sm:$0xff] }
 0xd9d   : > { %v8315_v52 = vpop.f32.mrb[117].mxu1  ;;  %v10085_v0 = vpack.c.bf16 %v7003_v49, %v7002_v62 }
 0xd9e   : > { %v6564_v27 = vadd.f32 %v13620_v29, %v6552_v28  ;;  %v8316_v12 = vadd.f32 %v8315_v52, %v8314_v22  ;;  %v6578_v18 = vsel %vm6568_vm14, %v6563_v37, %v6573_v15  ;;  %v6991_v37 = vld [vmem:[%s13919_s0 + $0x28] sm:$0xff]  ;;  %v7009_v15 = vld [vmem:[%s13919_s0 + $0xb8] sm:$0xff]  ;;  %v6992_v22 = vld [vmem:[%s13919_s0 + $0x30] sm:$0xff] }
 0xd9f   : > { %8976 = vmatmul.mubr.msk.f32.vlgmr.msra.gmra.mrb[122].mxu1 %vm3948_vm10, %v6578_v18  ;;  %v10097_v28 = vpack.c.bf16 %v7009_v15, %v7008_v3  ;;  %v7010_v52 = vld [vmem:[%s13919_s0 + $0xc0] sm:$0xff]  ;;  %v6995_v18 = vld [vmem:[%s13919_s0 + $0x48] sm:$0xff] }
 0xda0   : > { %vm6569_vm15 = vcmp.ge.f32.partialorder %v6564_v27, 0.0  ;;  %v6574_v6 = vmul.f32 0.01, %v6564_v27  ;;  %v6553_v16 = vadd.f32 %v8316_v12, %v6415_v47  ;;  %10069 = vmatpush3.bf16.msra.mxu1 %v10068_v21  ;;  %v8317_v26 = vpop.f32.mrb[118].mxu1  ;;  %8986 = vmatprep.mubr.msk.f32.mxu1 %vm11204_vm3, %v10478_v34  ;;  %v6993_v21 = vld [vmem:[%s13919_s0 + $0x38] sm:$0xff]  ;;  %v6994_v12 = vld [vmem:[%s13919_s0 + $0x40] sm:$0xff] }
 0xda1   : > { %v8318_v20 = vpop.f32.mrb[119].mxu1  ;;  %10070 = vmatprep.subr.bf16.mxu1 %v11203_v55  ;;  %v10099_v32 = vpack.c.bf16 %v6993_v21, %v6992_v22 }
 0xda2   : > { %v6565_v44 = vadd.f32 %v13620_v29, %v6553_v16  ;;  %v8319_v46 = vadd.f32 %v8318_v20, %v8317_v26  ;;  %v6579_v59 = vsel %vm6569_vm15, %v6564_v27, %v6574_v6  ;;  %v10101_v27 = vpack.c.bf16 %v7011_v24, %v7010_v52  ;;  %v7012_v6 = vld [vmem:[%s13919_s0 + $0xd0] sm:$0xff]  ;;  %v7013_v16 = vld [vmem:[%s13919_s0 + $0xd8] sm:$0xff] }
 0xda3   : > { %8965 = vmatmul.mubr.msk.f32.vlgmr.msra.gmra.mrb[26].mxu0 %vm3948_vm10, %v6579_v59  ;;  %v10103_v26 = vpack.c.bf16 %v6995_v18, %v6994_v12  ;;  %v6997_v20 = vld [vmem:[%s13919_s0 + $0x58] sm:$0xff]  ;;  %v6998_v59 = vld [vmem:[%s13919_s0 + $0x60] sm:$0xff] }
 0xda4   : > { %v6575_v31 = vmul.f32 0.01, %v6565_v44  ;;  %v6554_v23 = vadd.f32 %v8319_v46, %v6416_v38  ;;  %10072 = vmatpush3.bf16.msra.mxu1 %v10071_v40  ;;  %vm6570_vm0 = vcmp.ge.f32.partialorder %v6565_v44, 0.0  ;;  %v6987_v38 = vld [vmem:[%s13919_s0 + $0x8] sm:$0xff]  ;;  %v10105_v40 = vpack.c.bf16 %v7013_v16, %v7012_v6 }
 0xda5   : > { %10073 = vmatprep.subr.bf16.mxu1 %v11203_v55  ;;  %v10109_v46 = vpack.c.bf16 %v7015_v54, %v7014_v45 }
 0xda6   : > { %v6566_v61 = vadd.f32 %v13620_v29, %v6554_v23  ;;  %v6580_v53 = vsel %vm6570_vm0, %v6565_v44, %v6575_v31  ;;  %v6999_v31 = vld [vmem:[%s13919_s0 + $0x68] sm:$0xff]  ;;  %v7016_v23 = vld [vmem:[%s13919_s0 + $0xf0] sm:$0xff] }
 0xda7   : > { %8987 = vmatmul.mubr.msk.f32.vlgmr.msra.gmra.mrb[124].mxu1 %vm3948_vm10, %v6580_v53  ;;  %v10111_v19 = vpack.c.bf16 %v6999_v31, %v6998_v59  ;;  %v7001_v53 = vld [vmem:[%s13919_s0 + $0x78] sm:$0xff] }
 0xda8   : > { %10075 = vmatpush3.bf16.msra.mxu1 %v10074_v17  ;;  %8997 = vmatprep.mubr.msk.f32.mxu1 %vm11204_vm3, %v10478_v34  ;;  %v6576_v2 = vmul.f32 0.01, %v6566_v61  ;;  %vm6571_vm2 = vcmp.ge.f32.partialorder %v6566_v61, 0.0  ;;  %v7017_v17 = vld [vmem:[%s13919_s0 + $0xf8] sm:$0xff] }
 0xda9   : > { %10076 = vmatprep.subr.bf16.mxu1 %v11203_v55  ;;  %v10113_v36 = vpack.c.bf16 %v7017_v17, %v7016_v23 }
 0xdaa   : > { %v6581_v58 = vsel %vm6571_vm2, %v6566_v61, %v6576_v2  ;;  %v7000_v61 = vld [vmem:[%s13919_s0 + $0x70] sm:$0xff] }
 0xdac   : > { %10078 = vmatpush3.bf16.msra.mxu1 %v10077_v4  ;;  %v10115_v4 = vpack.c.bf16 %v7001_v53, %v7000_v61 }
 0xdad   : > { %10079 = vmatprep.subr.bf16.mxu1 %v11203_v55 }
 0xdaf   : > { %8998 = vmatmul.mubr.msk.f32.vlgmr.msra.gmra.mrb[126].mxu1 %vm3948_vm10, %v6581_v58 }
 0xdb0   : > { %10081 = vmatpush3.bf16.msra.mxu1 %v10080_v57  ;;  %9008 = vmatprep.mubr.msk.f32.mxu1 %vm11204_vm3, %v10478_v34  ;;  %v6996_v34 = vld [vmem:[%s13919_s0 + $0x50] sm:$0xff] }
 0xdb1   : > { %10082 = vmatprep.subr.bf16.mxu1 %v11203_v55  ;;  %v7004_v55 = vld [vmem:[%s13919_s0 + $0x90] sm:$0xff]  ;;  %v10107_v44 = vpack.c.bf16 %v6997_v20, %v6996_v34 }
 0xdb2   : > { %v10089_v10 = vpack.c.bf16 %v7005_v5, %v7004_v55 }
 0xdb4   : > { %10084 = vmatpush3.bf16.msra.mxu1 %v10083_v63 }
 0xdb5   : > { %10086 = vmatprep.subr.bf16.mxu1 %v10085_v0 }
 0xdcc   : > { %v8320_v13 = vpop.f32.mrb[120].mxu1 }
 0xdcd   : > { %v8321_v47 = vpop.f32.mrb[121].mxu1 }
 0xdce   : > { %v8322_v48 = vadd.f32 %v8321_v47, %v8320_v13 }
 0xdd0   : > { %v6555_v7 = vadd.f32 %v8322_v48, %v13618_v41  ;;  %v10087_v41 = vpack.c.bf16 %v6987_v38, %v6986_v50 }
 0xdd2   : > { %v6567_v60 = vadd.f32 %v13620_v29, %v6555_v7  ;;  %v7789_v7 = vld [vmem:[#allocation36] ss:$0 sm:$0xff] }
 0xdd4   : > { %v6577_v39 = vmul.f32 0.01, %v6567_v60  ;;  %vm6572_vm3 = vcmp.ge.f32.partialorder %v6567_v60, 0.0 }
 0xdd6   : > { %v6582_v29 = vsel %vm6572_vm3, %v6567_v60, %v6577_v39  ;;  %v7790_v39 = vld [vmem:[#allocation38] ss:$0 sm:$0xff] }
 0xdd7   : > { %9009 = vmatmul.mubr.msk.f32.vlgmr.msra.gmra.mrb[128].mxu1 %vm3948_vm10, %v6582_v29 }
 0xdd8   : > { %10088 = vmatpush3.bf16.msra.mxu1 %v10087_v41  ;;  %7082 = vmatprep.mubr.f32.mxu1 %v13609_v9  ;;  %v10095_v9 = vpack.c.bf16 %v6991_v37, %v6990_v43 }
 0xdd9   : > { %10090 = vmatprep.subr.bf16.mxu1 %v10089_v10 }
 0xddc   : > { %10092 = vmatpush3.bf16.msra.mxu1 %v10091_v51 }
 0xddd   : > { %10094 = vmatprep.subr.bf16.mxu1 %v10093_v1 }
 0xde0   : > { %10096 = vmatpush3.bf16.msra.mxu1 %v10095_v9 }
 0xde1   : > { %10098 = vmatprep.subr.bf16.mxu1 %v10097_v28 }
 0xde4   : > { %10100 = vmatpush3.bf16.msra.mxu1 %v10099_v32 }
 0xde5   : > { %10102 = vmatprep.subr.bf16.mxu1 %v10101_v27 }
 0xde8   : > { %10104 = vmatpush3.bf16.msra.mxu1 %v10103_v26 }
 0xde9   : > { %10106 = vmatprep.subr.bf16.mxu1 %v10105_v40 }
 0xdec   : > { %10108 = vmatpush3.bf16.msra.mxu1 %v10107_v44 }
 0xded   : > { %10110 = vmatprep.subr.bf16.mxu1 %v10109_v46 }
 0xdf0   : > { %10112 = vmatpush3.bf16.msra.mxu1 %v10111_v19 }
 0xdf1   : > { %10114 = vmatprep.subr.bf16.mxu1 %v10113_v36 }
 0xdf4   : > { %10116 = vmatpush3.bf16.msra.mxu1 %v10115_v4 }
 0xdf7   : > { %7083 = vmatmul.mubr.f32.vlgmr.msra.gmra.mrb[130].mxu1 %v13607_v8 }
 0xe72   : > { %v6734_v33 = vpop.f32.mrb[122].mxu1 }
 0xe73   : > { %v8977_v56 = vpop.f32.mrb[123].mxu1 }
 0xe76   : > { %v6661_v2 = vpop.f32.mrb[26].mxu0 }
 0xe77   : > { %v6735_v57 = vadd.f32 %v6734_v33, %v6661_v2  ;;  %v8966_v30 = vpop.f32.mrb[27].mxu0 }
 0xe7a   : > { %v6812_v35 = vpop.f32.mrb[124].mxu1 }
 0xe7b   : > { %v6816_v58 = vadd.f32 %v6812_v35, %v6735_v57  ;;  %v8988_v62 = vpop.f32.mrb[125].mxu1 }
 0xe82   : > { %v6891_v49 = vpop.f32.mrb[126].mxu1 }
 0xe83   : > { %v6895_v63 = vadd.f32 %v6891_v49, %v6816_v58  ;;  %v8999_v0 = vpop.f32.mrb[127].mxu1 }
 0xeaa   : > { %v6970_v13 = vpop.f32.mrb[128].mxu1 }
 0xeab   : > { %v6974_v47 = vadd.f32 %v6970_v13, %v6895_v63  ;;  %v9010_v48 = vpop.f32.mrb[129].mxu1 }
 0xead   : > { %v6982_v50 = vadd.f32 %v7789_v7, %v6974_v47 }
 0xeaf   : > { %v6984_v38 = vmul.f32 0.01, %v6982_v50  ;;  %vm6983_vm1 = vcmp.ge.f32.partialorder %v6982_v50, 0.0 }
 0xeb1   : > { %v6985_v5 = vsel %vm6983_vm1, %v6982_v50, %v6984_v38 }
 0xeca   : > { %v8380_v8 = vpop.f32.mrb[130].mxu1 }
 0xecb   : > { %v8381_v60 = vpop.f32.mrb[131].mxu1 }
 0xecc   : > { %v8382_v55 = vadd.f32 %v8381_v60, %v8380_v8 }
 0xece   : > { %v7088_v41 = vadd.f32 %v8382_v55, %v6985_v5 }
 0xed0   : > { %v7096_v10 = vadd.f32 %v7790_v39, %v7088_v41 }
 0xed2   : > { %v7097_v25 = vsel %vm3948_vm10, %v7096_v10, -inf }
 0xed3   : > { %v7098_v11 = vrot.slane %v7097_v25, 4 }
 0xed5   : > { %v7099_v29 = vmax.f32 %v7097_v25, %v7098_v11 }
 0xed7   : > { %v7100_v14 = vrot.slane %v7099_v29, 2 }
 0xed9   : > { %v7101_v42 = vmax.f32 %v7099_v29, %v7100_v14 }
 0xedb   : > { %v7102_v51 = vrot.slane %v7101_v42, 1 }
 0xedd   : > { %v7103_v1 = vmax.f32 %v7101_v42, %v7102_v51 }
 0xedf   : > { %7105 = vst.msk [vmem:[%s1035_s29] sm:$0x1] %vm7104_vm4, %v7103_v1 }
 0xee0   : > { %11080 = shalt.err (!%p11077_p6)
}
 0xee1   : > { %s11081_s9 = scalar_lea.hbm %s13745_s30, 16  ;;  %s11085_s6 = scalar_lea.hbm %s13922_s15, 32 }
 0xee2   : > { %p11082_p5 = scmp.ne.s32.totalorder %s13745_s30, %s11081_s9  ;;  %p11086_p10 = scmp.lt.u32.totalorder %s13745_s30, %s13922_s15 }
 0xee3   : > { %p11087_p2 = scmp.lt.u32.totalorder %s11085_s6, %s11081_s9  ;;  %p11089_p4 = scmp.lt.u32.totalorder %s11081_s9, %s13745_s30 }
 0xee4   : > { %p11083_p9 = pnand %p11082_p5, %p13923_p7 }
 0xee5   : > { %p11088_p3 = por %p11087_p2, %p11086_p10 }
 0xee6   : > { %p11084_p12 = pneg %p11083_p9 }
 0xee7   : > { %p11090_p8 = por %p11089_p4, %p11088_p3 }
 0xee9   : > { %p11091_p11 = pnand %p11090_p8, %p11084_p12 }
 0xeeb   : > { %11094 = shalt.err (!%p11091_p11)
}
 0xeec   : > { %10297 = dma.vmem_to_hbm [thread:$0]  (%p13923_p7), %s13747_s27, 16, %s13745_s30, %s7107_s10  }
 0xeed PF: > { %s13924_s19 = sld [smem:[#allocation55_spill]]  ;;  %s13925_s12 = sld [smem:[#allocation52_spill]] }
 0xeee   : > { %s13926_s5 = sld [smem:[#allocation59_spill]] }
 0xef3   : > { %p10409_p13 = scmp.ge.s32.totalorder %s13924_s19, 2  ;;  %s7131_s7 = sand.u32 1, %s13925_s12  }
 0xef4   : > { %p13927_p1 = scmp.ne.s32.totalorder %s13926_s5, 0  ;;  %s7132_s1 = scalar_lea.sflag [#allocation8], %s7131_s7 }
 0xef6   : > { %p10364_p0 = pnand %p10409_p13, %p13927_p1 }
 0xef8   : > { %11156 = dma.done.wait (!%p10364_p0), %s7132_s1, 16  }
 0xef9   : > { %11158 = vsyncadd (!%p10364_p0), %s7132_s1, 4294967280  ;;  %s13928_s30 = sld [smem:[#allocation56_spill]]  ;;  %s13929_s29 = sld [smem:[#allocation53_spill]] }
 0xefa   : > { %s13930_s2 = sld [smem:[#allocation54_spill]]  ;;  %s13931_s6 = sld [smem:[#allocation57_spill]] }
 0xeff   : > { %p46_p6 = scmp.ge.s32.totalorder %s13928_s30, 4  }
 0xf01   :  { %48 = sbr.rel (!%p46_p6) target bundleno = 34 (0x22), region = 272 }
 0xf08   :  { %7136 = vsyncpa [#allocation7], 1 }
 0xf09   :  { %7138 = vsyncpa [#allocation7 + $0x1], 1 }
 0xf0a   :  { %7139 = vsyncpa [#allocation10], 1 }
 0xf0b   :  { %7140 = vsyncpa [#allocation13], 1 }
 0xf0c   :  { %7141 = vsyncpa [#allocation16], 1 }
 0xf0d   :  { %7142 = vsyncpa [#allocation19], 1 }
 0xf0e   :  { %7143 = vsyncpa [#allocation22], 1 }
 0xf0f   :  { %7144 = vsyncpa [#allocation25], 1 }
 0xf10   :  { %7145 = vsyncpa [#allocation28], 1 }
 0xf11   :  { %7146 = vsyncpa [#allocation31], 1 }
 0xf12   :  { %7147 = vsyncpa [#allocation34], 1 }
 0xf13   :  { %7148 = vsyncpa [#allocation37], 1 }
 0xf14   :  { %7149 = vsyncpa [#allocation8], 1 }
 0xf15   :  { %7151 = vsyncpa [#allocation8 + $0x1], 1 }

</bundles_post_ra>
